<compile_context>
chip_gen: v7x
topology: tpu7x:2x2x1
jax: 0.10.0
libtpu: 0.0.40
codegen_flags: <defaults>
</compile_context>

<pallas_src>
import jax
import jax.numpy as jnp
import numpy as np
from jax import lax
from jax.experimental import pallas as pl
from jax.experimental.pallas import tpu as pltpu


def _round_up(x, m):
    return ((x + m - 1) // m) * m


# --------------------------------- kernel ------------------------------------
def make_bilstm_kernel(T, H, padding_token):
    """Bidirectional masked-LSTM recurrence over one BN tile.

    gx_f_ref : (T, 4H, TB)  fwd gate pre-activations (x@W_ih_f + b_f), gathered
    gx_b_ref : (T, 4H, TB)  bwd gate pre-activations
    tok_ref  : (T, TB)      int32 tokens (mask derived in-kernel)
    whh_ref  : (8H, 2H)     block-diag [W_hh_f^T | 0 ; 0 | W_hh_b^T]
    out_ref  : (2H, TB)     rows 0:H = final c_fwd, H:2H = final c_bwd
    Layout: batch on lanes, hidden/gate features on sublanes (H=16 -> aligned).
    """
    G = 4 * H

    def kernel(gx_f_ref, gx_b_ref, tok_ref, whh_ref, out_ref):
        TB = out_ref.shape[1]
        whh = whh_ref[...]                            # (2G, 2H), VMEM-resident
        keep = tok_ref[...] != padding_token          # (T, TB) hoisted compare

        h_f = jnp.zeros((H, TB), jnp.float32)
        c_f = jnp.zeros((H, TB), jnp.float32)
        h_b = jnp.zeros((H, TB), jnp.float32)
        c_b = jnp.zeros((H, TB), jnp.float32)

        def lstm_cell(gates, c_prev):
            # gate rows: [i | f | g | o], each H sublanes (H % 8 == 0 here).
            i = jax.nn.sigmoid(gates[0 * H:1 * H])
            f = jax.nn.sigmoid(gates[1 * H:2 * H])
            g = jnp.tanh(gates[2 * H:3 * H])
            o = jax.nn.sigmoid(gates[3 * H:4 * H])
            c_new = f * c_prev + i * g
            return o * jnp.tanh(c_new), c_new

        # Fused fwd+bwd recurrence, fully unrolled (T is small and static).
        # TODO(synk): switch to lax.fori_loop(..., unroll=2) if T grows past ~16.
        for t in range(T):
            tr = T - 1 - t
            h_cat = jnp.concatenate([h_f, h_b], axis=0)            # (2H, TB)
            rec = jnp.dot(whh, h_cat,
                          preferred_element_type=jnp.float32)      # (2G, TB)
            gates_f = gx_f_ref[t] + rec[0:G]
            gates_b = gx_b_ref[tr] + rec[G:2 * G]
            hf_n, cf_n = lstm_cell(gates_f, c_f)
            hb_n, cb_n = lstm_cell(gates_b, c_b)
            # packed-sequence semantics: padded timesteps are no-ops.
            kf = keep[t][None, :]
            kb = keep[tr][None, :]
            h_f = jnp.where(kf, hf_n, h_f)
            c_f = jnp.where(kf, cf_n, c_f)
            h_b = jnp.where(kb, hb_n, h_b)
            c_b = jnp.where(kb, cb_n, c_b)

        # Two aligned sublane-slab stores into a lane-dense output block.
        out_ref[0:H, :] = c_f
        out_ref[H:2 * H, :] = c_b

    return kernel


# -------------------------------- wrapper -------------------------------------
def rnn_hid_forward(x_tokens, params, padding_token):
    """x_tokens: (B, NK, T) int32 -> (B, NK, rnn_hid_dim) f32."""
    B, NK, T = x_tokens.shape
    BN = B * NK
    H = params["w_hh_f"].shape[0]                # hidden per direction
    G = 4 * H

    # ---- fold embedding lookup + input projection + biases into one table ---
    emb = params["embed"].astype(jnp.float32)                       # (V, E)
    g_f = jnp.dot(emb, params["w_ih_f"]) + params["b_f"]            # (V, 4H)
    g_b = jnp.dot(emb, params["w_ih_b"]) + params["b_b"]            # (V, 4H)

    # Block-diagonal recurrent weights -> one fused per-step matmul, both dirs.
    whh_blk = jnp.zeros((2 * G, 2 * H), jnp.float32)
    whh_blk = whh_blk.at[0:G, 0:H].set(params["w_hh_f"].T)
    whh_blk = whh_blk.at[G:2 * G, H:2 * H].set(params["w_hh_b"].T)

    TILE_BN = 128                     # keeps live recurrent state vreg-resident
    BN_pad = _round_up(BN, TILE_BN)   # padded columns are all-PAD -> stay zero
    tok = x_tokens.reshape(BN, T).astype(jnp.int32).T               # (T, BN)
    tok = jnp.pad(tok, ((0, 0), (0, BN_pad - BN)),
                  constant_values=padding_token)                    # (T, BN_pad)

    # Per-token gate pre-activations, lane-dense & time-major:
    # batch on lanes, gate features on sublanes.
    gx_f = jnp.transpose(jnp.take(g_f, tok, axis=0), (0, 2, 1))     # (T, 4H, BNp)
    gx_b = jnp.transpose(jnp.take(g_b, tok, axis=0), (0, 2, 1))     # (T, 4H, BNp)

    ntiles = BN_pad // TILE_BN        # v7x note: >=2 tiles enables megacore split

    cost = pl.CostEstimate(
        flops=2 * T * BN_pad * (2 * G) * (2 * H) + 10 * T * BN_pad * 2 * H,
        transcendentals=10 * T * BN_pad * H,
        bytes_accessed=4 * (2 * T * G * BN_pad + T * BN_pad
                            + 2 * G * 2 * H + 2 * H * BN_pad),
    )

    out = pl.pallas_call(
        make_bilstm_kernel(T, H, padding_token),
        out_shape=jax.ShapeDtypeStruct((2 * H, BN_pad), jnp.float32),
        grid_spec=pltpu.PrefetchScalarGridSpec(
            num_scalar_prefetch=0,
            grid=(ntiles,),
            in_specs=[
                pl.BlockSpec((T, G, TILE_BN), lambda i: (0, 0, i)),   # gx fwd
                pl.BlockSpec((T, G, TILE_BN), lambda i: (0, 0, i)),   # gx bwd
                pl.BlockSpec((T, TILE_BN), lambda i: (0, i)),         # tokens
                pl.BlockSpec((2 * G, 2 * H), lambda i: (0, 0)),       # resident
            ],
            out_specs=pl.BlockSpec((2 * H, TILE_BN), lambda i: (0, i)),
        ),
        compiler_params=pltpu.CompilerParams(
            dimension_semantics=("parallel",),     # BN tiles split across TCs
        ),
        cost_estimate=cost,
    )(gx_f, gx_b, tok, whh_blk)

    # (2H, BN_pad) -> (BN, 2H) = [c_fwd | c_bwd]; drop batch padding.
    seq_embed = out[:, :BN].T
    return seq_embed.reshape(B, NK, 2 * H)


# ------------------------- pure-JAX reference (check) -------------------------
def _ref_direction(emb_tm, mask_tm, wih, whh, b, reverse):
    T, BN, _ = emb_tm.shape
    H = whh.shape[0]
    h0 = jnp.zeros((BN, H), jnp.float32)
    c0 = jnp.zeros((BN, H), jnp.float32)

    def step(carry, xm):
        x_t, m_t = xm
        h, c = carry
        gates = (jnp.dot(x_t, wih, preferred_element_type=jnp.float32) + b
                 ) + jnp.dot(h, whh, preferred_element_type=jnp.float32)
        i = jax.nn.sigmoid(gates[:, 0 * H:1 * H])
        f = jax.nn.sigmoid(gates[:, 1 * H:2 * H])
        g = jnp.tanh(gates[:, 2 * H:3 * H])
        o = jax.nn.sigmoid(gates[:, 3 * H:4 * H])
        c_new = f * c + i * g
        h_new = o * jnp.tanh(c_new)
        keep = m_t > 0.5
        return (jnp.where(keep, h_new, h), jnp.where(keep, c_new, c)), None

    (_, c_final), _ = lax.scan(step, (h0, c0), (emb_tm, mask_tm), reverse=reverse)
    return c_final


def rnn_hid_reference(x_tokens, params, padding_token):
    B, NK, T = x_tokens.shape
    BN = B * NK
    x_flat = x_tokens.reshape(BN, T)
    mask = (x_flat != padding_token).astype(jnp.float32)
    emb_tm = jnp.take(params["embed"], x_flat.T, axis=0).astype(jnp.float32)
    mask_tm = jnp.transpose(mask, (1, 0))[:, :, None]
    c_fwd = _ref_direction(emb_tm, mask_tm, params["w_ih_f"], params["w_hh_f"],
                           params["b_f"], reverse=False)
    c_bwd = _ref_direction(emb_tm, mask_tm, params["w_ih_b"], params["w_hh_b"],
                           params["b_b"], reverse=True)
    return jnp.concatenate([c_fwd, c_bwd], axis=-1).reshape(B, NK, -1)


# ----------------------------- parameter init ---------------------------------
def init_params(key, vocab_size, rnn_hid_dim):
    """Deterministic synthetic init matching the module's __init__ shapes.

    embedding_type='rand': Embedding(V, rnn_hid_dim) ~ N(0,1);
    LSTM(input=rnn_hid_dim, hidden=rnn_hid_dim//2, bidirectional)
      ~ U(-1/sqrt(H), 1/sqrt(H)).  Weights stored transposed (E,4H)/(H,4H) for
    right-multiplication; the two LSTM biases (b_ih + b_hh) are pre-summed into
    one (1, 4H) bias per direction.  Gate order: i, f, g, o.
    """
    E = rnn_hid_dim
    H = rnn_hid_dim // 2
    ks = jax.random.split(key, 9)
    s = 1.0 / float(np.sqrt(H))

    def u(k, shape):
        return jax.random.uniform(k, shape, jnp.float32, -s, s)

    return dict(
        embed=jax.random.normal(ks[0], (vocab_size, E), jnp.float32),
        w_ih_f=u(ks[1], (E, 4 * H)),
        w_hh_f=u(ks[2], (H, 4 * H)),
        b_f=u(ks[3], (1, 4 * H)) + u(ks[4], (1, 4 * H)),
        w_ih_b=u(ks[5], (E, 4 * H)),
        w_hh_b=u(ks[6], (H, 4 * H)),
        b_b=u(ks[7], (1, 4 * H)) + u(ks[8], (1, 4 * H)),
    )


# TODO(synk): pretrained glove/w2v embedding loading (get_embedding_weights) has
# no in-script equivalent; the 'rand' embedding path is used instead.

if __name__ == "__main__":
    B, NK, T = 2, 4, 8          # b x N*K x max_seq_len
    rnn_hid_dim = 32            # emb dim = 32, hidden per direction = 16
    VOCAB = 50
    PAD_TOKEN = 0               # dictionary['PAD']

    key = jax.random.PRNGKey(0)
    k_tok, k_len, k_par = jax.random.split(key, 3)

    tokens = jax.random.randint(k_tok, (B, NK, T), 1, VOCAB, dtype=jnp.int32)
    seq_lens = jax.random.randint(k_len, (B, NK), 1, T + 1, dtype=jnp.int32)
    valid = jnp.arange(T)[None, None, :] < seq_lens[..., None]
    tokens = jnp.where(valid, tokens, PAD_TOKEN)   # every sequence has >= 1 token

    params = init_params(k_par, VOCAB, rnn_hid_dim)

    out = rnn_hid_forward(tokens, params, PAD_TOKEN)
    out = jax.block_until_ready(out)

    ref = jax.block_until_ready(rnn_hid_reference(tokens, params, PAD_TOKEN))
    assert out.shape == (B, NK, rnn_hid_dim), out.shape
    np.testing.assert_allclose(np.asarray(out), np.asarray(ref), atol=5e-5, rtol=5e-5)

    print("KERNEL_OK")
</pallas_src>

<mosaic_0001>
module attributes {stable_mosaic.version = 11 : i64} {
  func.func @kernel(%arg0: i32, %arg1: memref<8x64x128xf32, #tpu.memory_space<vmem>>, %arg2: memref<8x64x128xf32, #tpu.memory_space<vmem>>, %arg3: memref<8x128xi32, #tpu.memory_space<vmem>>, %arg4: memref<128x32xf32, #tpu.memory_space<vmem>>, %arg5: memref<32x128xf32, #tpu.memory_space<vmem>>) attributes {dimension_semantics = [#tpu.dimension_semantics<parallel>], iteration_bounds = array<i64: 1>, scalar_prefetch = 0 : i64, scratch_operands = 0 : i64, tpu.core_type = #tpu.core_type<tc>, window_params = [{transform_indices = @transform_0, window_bounds = array<i64: 8, 64, 128>}, {transform_indices = @transform_1, window_bounds = array<i64: 8, 64, 128>}, {transform_indices = @transform_2, window_bounds = array<i64: 8, 128>}, {pipeline_mode = #tpu.pipeline_mode<synchronous>, transform_indices = @transform_3, window_bounds = array<i64: 128, 32>}, {transform_indices = @transform_4, window_bounds = array<i64: 32, 128>}]} {
    %c0 = arith.constant 0 : index
    %c0_0 = arith.constant 0 : index
    %0 = vector.load %arg4[%c0, %c0_0] : memref<128x32xf32, #tpu.memory_space<vmem>>, vector<128x32xf32>
    %c0_1 = arith.constant 0 : index
    %c0_2 = arith.constant 0 : index
    %1 = vector.load %arg3[%c0_1, %c0_2] : memref<8x128xi32, #tpu.memory_space<vmem>>, vector<8x128xi32>
    %c0_i32 = arith.constant 0 : i32
    %2 = vector.broadcast %c0_i32 : i32 to vector<8x128xi32>
    %3 = arith.cmpi ne, %1, %2 : vector<8x128xi32>
    %cst = arith.constant 0.000000e+00 : f32
    %4 = vector.broadcast %cst : f32 to vector<16x128xf32>
    %cst_3 = arith.constant 0.000000e+00 : f32
    %5 = vector.broadcast %cst_3 : f32 to vector<16x128xf32>
    %cst_4 = arith.constant 0.000000e+00 : f32
    %6 = vector.broadcast %cst_4 : f32 to vector<16x128xf32>
    %cst_5 = arith.constant 0.000000e+00 : f32
    %7 = vector.broadcast %cst_5 : f32 to vector<16x128xf32>
    %8 = tpu.concatenate %4, %6 in 0 : vector<16x128xf32>, vector<16x128xf32> -> vector<32x128xf32>
    %cst_6 = arith.constant dense<0.000000e+00> : vector<128x128xf32>
    %9 = tpu.matmul %0, %8, %cst_6 {dimension_numbers = #tpu.dot_dimension_numbers<[1], [0], [0], [1], [0, 0, 1, 1], [], []>} : vector<128x32xf32>, vector<32x128xf32>, vector<128x128xf32> -> vector<128x128xf32>
    %c0_7 = arith.constant 0 : index
    %c0_8 = arith.constant 0 : index
    %c0_9 = arith.constant 0 : index
    %10 = vector.load %arg1[%c0_7, %c0_8, %c0_9] : memref<8x64x128xf32, #tpu.memory_space<vmem>>, vector<1x64x128xf32>
    %11 = vector.shape_cast %10 : vector<1x64x128xf32> to vector<64x128xf32>
    %12 = vector.extract_strided_slice %9 {offsets = [0, 0], sizes = [64, 128], strides = [1, 1]} : vector<128x128xf32> to vector<64x128xf32>
    %13 = arith.addf %11, %12 : vector<64x128xf32>
    %c7 = arith.constant 7 : index
    %c0_10 = arith.constant 0 : index
    %c0_11 = arith.constant 0 : index
    %14 = vector.load %arg2[%c7, %c0_10, %c0_11] : memref<8x64x128xf32, #tpu.memory_space<vmem>>, vector<1x64x128xf32>
    %15 = vector.shape_cast %14 : vector<1x64x128xf32> to vector<64x128xf32>
    %16 = vector.extract_strided_slice %9 {offsets = [64, 0], sizes = [64, 128], strides = [1, 1]} : vector<128x128xf32> to vector<64x128xf32>
    %17 = arith.addf %15, %16 : vector<64x128xf32>
    %18 = vector.extract_strided_slice %13 {offsets = [0, 0], sizes = [16, 128], strides = [1, 1]} : vector<64x128xf32> to vector<16x128xf32>
    %19 = arith.negf %18 : vector<16x128xf32>
    %20 = math.exp %19 : vector<16x128xf32>
    %cst_12 = arith.constant 1.000000e+00 : f32
    %21 = vector.broadcast %cst_12 : f32 to vector<16x128xf32>
    %22 = arith.addf %21, %20 : vector<16x128xf32>
    %23 = arith.divf %21, %22 : vector<16x128xf32>
    %24 = vector.extract_strided_slice %13 {offsets = [16, 0], sizes = [16, 128], strides = [1, 1]} : vector<64x128xf32> to vector<16x128xf32>
    %25 = arith.negf %24 : vector<16x128xf32>
    %26 = math.exp %25 : vector<16x128xf32>
    %cst_13 = arith.constant 1.000000e+00 : f32
    %27 = vector.broadcast %cst_13 : f32 to vector<16x128xf32>
    %28 = arith.addf %27, %26 : vector<16x128xf32>
    %29 = arith.divf %27, %28 : vector<16x128xf32>
    %30 = vector.extract_strided_slice %13 {offsets = [32, 0], sizes = [16, 128], strides = [1, 1]} : vector<64x128xf32> to vector<16x128xf32>
    %31 = math.tanh %30 : vector<16x128xf32>
    %32 = vector.extract_strided_slice %13 {offsets = [48, 0], sizes = [16, 128], strides = [1, 1]} : vector<64x128xf32> to vector<16x128xf32>
    %33 = arith.negf %32 : vector<16x128xf32>
    %34 = math.exp %33 : vector<16x128xf32>
    %cst_14 = arith.constant 1.000000e+00 : f32
    %35 = vector.broadcast %cst_14 : f32 to vector<16x128xf32>
    %36 = arith.addf %35, %34 : vector<16x128xf32>
    %37 = arith.divf %35, %36 : vector<16x128xf32>
    %38 = arith.mulf %29, %5 : vector<16x128xf32>
    %39 = arith.mulf %23, %31 : vector<16x128xf32>
    %40 = arith.addf %38, %39 : vector<16x128xf32>
    %41 = math.tanh %40 : vector<16x128xf32>
    %42 = arith.mulf %37, %41 : vector<16x128xf32>
    %43 = vector.extract_strided_slice %17 {offsets = [0, 0], sizes = [16, 128], strides = [1, 1]} : vector<64x128xf32> to vector<16x128xf32>
    %44 = arith.negf %43 : vector<16x128xf32>
    %45 = math.exp %44 : vector<16x128xf32>
    %cst_15 = arith.constant 1.000000e+00 : f32
    %46 = vector.broadcast %cst_15 : f32 to vector<16x128xf32>
    %47 = arith.addf %46, %45 : vector<16x128xf32>
    %48 = arith.divf %46, %47 : vector<16x128xf32>
    %49 = vector.extract_strided_slice %17 {offsets = [16, 0], sizes = [16, 128], strides = [1, 1]} : vector<64x128xf32> to vector<16x128xf32>
    %50 = arith.negf %49 : vector<16x128xf32>
    %51 = math.exp %50 : vector<16x128xf32>
    %cst_16 = arith.constant 1.000000e+00 : f32
    %52 = vector.broadcast %cst_16 : f32 to vector<16x128xf32>
    %53 = arith.addf %52, %51 : vector<16x128xf32>
    %54 = arith.divf %52, %53 : vector<16x128xf32>
    %55 = vector.extract_strided_slice %17 {offsets = [32, 0], sizes = [16, 128], strides = [1, 1]} : vector<64x128xf32> to vector<16x128xf32>
    %56 = math.tanh %55 : vector<16x128xf32>
    %57 = vector.extract_strided_slice %17 {offsets = [48, 0], sizes = [16, 128], strides = [1, 1]} : vector<64x128xf32> to vector<16x128xf32>
    %58 = arith.negf %57 : vector<16x128xf32>
    %59 = math.exp %58 : vector<16x128xf32>
    %cst_17 = arith.constant 1.000000e+00 : f32
    %60 = vector.broadcast %cst_17 : f32 to vector<16x128xf32>
    %61 = arith.addf %60, %59 : vector<16x128xf32>
    %62 = arith.divf %60, %61 : vector<16x128xf32>
    %63 = arith.mulf %54, %7 : vector<16x128xf32>
    %64 = arith.mulf %48, %56 : vector<16x128xf32>
    %65 = arith.addf %63, %64 : vector<16x128xf32>
    %66 = math.tanh %65 : vector<16x128xf32>
    %67 = arith.mulf %62, %66 : vector<16x128xf32>
    %68 = vector.extract_strided_slice %3 {offsets = [0, 0], sizes = [1, 128], strides = [1, 1]} : vector<8x128xi1> to vector<1x128xi1>
    %69 = vector.shape_cast %68 : vector<1x128xi1> to vector<128xi1>
    %70 = vector.shape_cast %69 : vector<128xi1> to vector<1x128xi1>
    %71 = vector.extract_strided_slice %3 {offsets = [7, 0], sizes = [1, 128], strides = [1, 1]} : vector<8x128xi1> to vector<1x128xi1>
    %72 = vector.shape_cast %71 : vector<1x128xi1> to vector<128xi1>
    %73 = vector.shape_cast %72 : vector<128xi1> to vector<1x128xi1>
    %74 = vector.shape_cast %70 : vector<1x128xi1> to vector<1x128xi1>
    %75 = vector.broadcast %74 : vector<1x128xi1> to vector<16x128xi1>
    %76 = arith.select %75, %42, %4 : vector<16x128xi1>, vector<16x128xf32>
    %77 = vector.shape_cast %70 : vector<1x128xi1> to vector<1x128xi1>
    %78 = vector.broadcast %77 : vector<1x128xi1> to vector<16x128xi1>
    %79 = arith.select %78, %40, %5 : vector<16x128xi1>, vector<16x128xf32>
    %80 = vector.shape_cast %73 : vector<1x128xi1> to vector<1x128xi1>
    %81 = vector.broadcast %80 : vector<1x128xi1> to vector<16x128xi1>
    %82 = arith.select %81, %67, %6 : vector<16x128xi1>, vector<16x128xf32>
    %83 = vector.shape_cast %73 : vector<1x128xi1> to vector<1x128xi1>
    %84 = vector.broadcast %83 : vector<1x128xi1> to vector<16x128xi1>
    %85 = arith.select %84, %65, %7 : vector<16x128xi1>, vector<16x128xf32>
    %86 = tpu.concatenate %76, %82 in 0 : vector<16x128xf32>, vector<16x128xf32> -> vector<32x128xf32>
    %cst_18 = arith.constant dense<0.000000e+00> : vector<128x128xf32>
    %87 = tpu.matmul %0, %86, %cst_18 {dimension_numbers = #tpu.dot_dimension_numbers<[1], [0], [0], [1], [0, 0, 1, 1], [], []>} : vector<128x32xf32>, vector<32x128xf32>, vector<128x128xf32> -> vector<128x128xf32>
    %c1 = arith.constant 1 : index
    %c0_19 = arith.constant 0 : index
    %c0_20 = arith.constant 0 : index
    %88 = vector.load %arg1[%c1, %c0_19, %c0_20] : memref<8x64x128xf32, #tpu.memory_space<vmem>>, vector<1x64x128xf32>
    %89 = vector.shape_cast %88 : vector<1x64x128xf32> to vector<64x128xf32>
    %90 = vector.extract_strided_slice %87 {offsets = [0, 0], sizes = [64, 128], strides = [1, 1]} : vector<128x128xf32> to vector<64x128xf32>
    %91 = arith.addf %89, %90 : vector<64x128xf32>
    %c6 = arith.constant 6 : index
    %c0_21 = arith.constant 0 : index
    %c0_22 = arith.constant 0 : index
    %92 = vector.load %arg2[%c6, %c0_21, %c0_22] : memref<8x64x128xf32, #tpu.memory_space<vmem>>, vector<1x64x128xf32>
    %93 = vector.shape_cast %92 : vector<1x64x128xf32> to vector<64x128xf32>
    %94 = vector.extract_strided_slice %87 {offsets = [64, 0], sizes = [64, 128], strides = [1, 1]} : vector<128x128xf32> to vector<64x128xf32>
    %95 = arith.addf %93, %94 : vector<64x128xf32>
    %96 = vector.extract_strided_slice %91 {offsets = [0, 0], sizes = [16, 128], strides = [1, 1]} : vector<64x128xf32> to vector<16x128xf32>
    %97 = arith.negf %96 : vector<16x128xf32>
    %98 = math.exp %97 : vector<16x128xf32>
    %cst_23 = arith.constant 1.000000e+00 : f32
    %99 = vector.broadcast %cst_23 : f32 to vector<16x128xf32>
    %100 = arith.addf %99, %98 : vector<16x128xf32>
    %101 = arith.divf %99, %100 : vector<16x128xf32>
    %102 = vector.extract_strided_slice %91 {offsets = [16, 0], sizes = [16, 128], strides = [1, 1]} : vector<64x128xf32> to vector<16x128xf32>
    %103 = arith.negf %102 : vector<16x128xf32>
    %104 = math.exp %103 : vector<16x128xf32>
    %cst_24 = arith.constant 1.000000e+00 : f32
    %105 = vector.broadcast %cst_24 : f32 to vector<16x128xf32>
    %106 = arith.addf %105, %104 : vector<16x128xf32>
    %107 = arith.divf %105, %106 : vector<16x128xf32>
    %108 = vector.extract_strided_slice %91 {offsets = [32, 0], sizes = [16, 128], strides = [1, 1]} : vector<64x128xf32> to vector<16x128xf32>
    %109 = math.tanh %108 : vector<16x128xf32>
    %110 = vector.extract_strided_slice %91 {offsets = [48, 0], sizes = [16, 128], strides = [1, 1]} : vector<64x128xf32> to vector<16x128xf32>
    %111 = arith.negf %110 : vector<16x128xf32>
    %112 = math.exp %111 : vector<16x128xf32>
    %cst_25 = arith.constant 1.000000e+00 : f32
    %113 = vector.broadcast %cst_25 : f32 to vector<16x128xf32>
    %114 = arith.addf %113, %112 : vector<16x128xf32>
    %115 = arith.divf %113, %114 : vector<16x128xf32>
    %116 = arith.mulf %107, %79 : vector<16x128xf32>
    %117 = arith.mulf %101, %109 : vector<16x128xf32>
    %118 = arith.addf %116, %117 : vector<16x128xf32>
    %119 = math.tanh %118 : vector<16x128xf32>
    %120 = arith.mulf %115, %119 : vector<16x128xf32>
    %121 = vector.extract_strided_slice %95 {offsets = [0, 0], sizes = [16, 128], strides = [1, 1]} : vector<64x128xf32> to vector<16x128xf32>
    %122 = arith.negf %121 : vector<16x128xf32>
    %123 = math.exp %122 : vector<16x128xf32>
    %cst_26 = arith.constant 1.000000e+00 : f32
    %124 = vector.broadcast %cst_26 : f32 to vector<16x128xf32>
    %125 = arith.addf %124, %123 : vector<16x128xf32>
    %126 = arith.divf %124, %125 : vector<16x128xf32>
    %127 = vector.extract_strided_slice %95 {offsets = [16, 0], sizes = [16, 128], strides = [1, 1]} : vector<64x128xf32> to vector<16x128xf32>
    %128 = arith.negf %127 : vector<16x128xf32>
    %129 = math.exp %128 : vector<16x128xf32>
    %cst_27 = arith.constant 1.000000e+00 : f32
    %130 = vector.broadcast %cst_27 : f32 to vector<16x128xf32>
    %131 = arith.addf %130, %129 : vector<16x128xf32>
    %132 = arith.divf %130, %131 : vector<16x128xf32>
    %133 = vector.extract_strided_slice %95 {offsets = [32, 0], sizes = [16, 128], strides = [1, 1]} : vector<64x128xf32> to vector<16x128xf32>
    %134 = math.tanh %133 : vector<16x128xf32>
    %135 = vector.extract_strided_slice %95 {offsets = [48, 0], sizes = [16, 128], strides = [1, 1]} : vector<64x128xf32> to vector<16x128xf32>
    %136 = arith.negf %135 : vector<16x128xf32>
    %137 = math.exp %136 : vector<16x128xf32>
    %cst_28 = arith.constant 1.000000e+00 : f32
    %138 = vector.broadcast %cst_28 : f32 to vector<16x128xf32>
    %139 = arith.addf %138, %137 : vector<16x128xf32>
    %140 = arith.divf %138, %139 : vector<16x128xf32>
    %141 = arith.mulf %132, %85 : vector<16x128xf32>
    %142 = arith.mulf %126, %134 : vector<16x128xf32>
    %143 = arith.addf %141, %142 : vector<16x128xf32>
    %144 = math.tanh %143 : vector<16x128xf32>
    %145 = arith.mulf %140, %144 : vector<16x128xf32>
    %146 = vector.extract_strided_slice %3 {offsets = [1, 0], sizes = [1, 128], strides = [1, 1]} : vector<8x128xi1> to vector<1x128xi1>
    %147 = vector.shape_cast %146 : vector<1x128xi1> to vector<128xi1>
    %148 = vector.shape_cast %147 : vector<128xi1> to vector<1x128xi1>
    %149 = vector.extract_strided_slice %3 {offsets = [6, 0], sizes = [1, 128], strides = [1, 1]} : vector<8x128xi1> to vector<1x128xi1>
    %150 = vector.shape_cast %149 : vector<1x128xi1> to vector<128xi1>
    %151 = vector.shape_cast %150 : vector<128xi1> to vector<1x128xi1>
    %152 = vector.shape_cast %148 : vector<1x128xi1> to vector<1x128xi1>
    %153 = vector.broadcast %152 : vector<1x128xi1> to vector<16x128xi1>
    %154 = arith.select %153, %120, %76 : vector<16x128xi1>, vector<16x128xf32>
    %155 = vector.shape_cast %148 : vector<1x128xi1> to vector<1x128xi1>
    %156 = vector.broadcast %155 : vector<1x128xi1> to vector<16x128xi1>
    %157 = arith.select %156, %118, %79 : vector<16x128xi1>, vector<16x128xf32>
    %158 = vector.shape_cast %151 : vector<1x128xi1> to vector<1x128xi1>
    %159 = vector.broadcast %158 : vector<1x128xi1> to vector<16x128xi1>
    %160 = arith.select %159, %145, %82 : vector<16x128xi1>, vector<16x128xf32>
    %161 = vector.shape_cast %151 : vector<1x128xi1> to vector<1x128xi1>
    %162 = vector.broadcast %161 : vector<1x128xi1> to vector<16x128xi1>
    %163 = arith.select %162, %143, %85 : vector<16x128xi1>, vector<16x128xf32>
    %164 = tpu.concatenate %154, %160 in 0 : vector<16x128xf32>, vector<16x128xf32> -> vector<32x128xf32>
    %cst_29 = arith.constant dense<0.000000e+00> : vector<128x128xf32>
    %165 = tpu.matmul %0, %164, %cst_29 {dimension_numbers = #tpu.dot_dimension_numbers<[1], [0], [0], [1], [0, 0, 1, 1], [], []>} : vector<128x32xf32>, vector<32x128xf32>, vector<128x128xf32> -> vector<128x128xf32>
    %c2 = arith.constant 2 : index
    %c0_30 = arith.constant 0 : index
    %c0_31 = arith.constant 0 : index
    %166 = vector.load %arg1[%c2, %c0_30, %c0_31] : memref<8x64x128xf32, #tpu.memory_space<vmem>>, vector<1x64x128xf32>
    %167 = vector.shape_cast %166 : vector<1x64x128xf32> to vector<64x128xf32>
    %168 = vector.extract_strided_slice %165 {offsets = [0, 0], sizes = [64, 128], strides = [1, 1]} : vector<128x128xf32> to vector<64x128xf32>
    %169 = arith.addf %167, %168 : vector<64x128xf32>
    %c5 = arith.constant 5 : index
    %c0_32 = arith.constant 0 : index
    %c0_33 = arith.constant 0 : index
    %170 = vector.load %arg2[%c5, %c0_32, %c0_33] : memref<8x64x128xf32, #tpu.memory_space<vmem>>, vector<1x64x128xf32>
    %171 = vector.shape_cast %170 : vector<1x64x128xf32> to vector<64x128xf32>
    %172 = vector.extract_strided_slice %165 {offsets = [64, 0], sizes = [64, 128], strides = [1, 1]} : vector<128x128xf32> to vector<64x128xf32>
    %173 = arith.addf %171, %172 : vector<64x128xf32>
    %174 = vector.extract_strided_slice %169 {offsets = [0, 0], sizes = [16, 128], strides = [1, 1]} : vector<64x128xf32> to vector<16x128xf32>
    %175 = arith.negf %174 : vector<16x128xf32>
    %176 = math.exp %175 : vector<16x128xf32>
    %cst_34 = arith.constant 1.000000e+00 : f32
    %177 = vector.broadcast %cst_34 : f32 to vector<16x128xf32>
    %178 = arith.addf %177, %176 : vector<16x128xf32>
    %179 = arith.divf %177, %178 : vector<16x128xf32>
    %180 = vector.extract_strided_slice %169 {offsets = [16, 0], sizes = [16, 128], strides = [1, 1]} : vector<64x128xf32> to vector<16x128xf32>
    %181 = arith.negf %180 : vector<16x128xf32>
    %182 = math.exp %181 : vector<16x128xf32>
    %cst_35 = arith.constant 1.000000e+00 : f32
    %183 = vector.broadcast %cst_35 : f32 to vector<16x128xf32>
    %184 = arith.addf %183, %182 : vector<16x128xf32>
    %185 = arith.divf %183, %184 : vector<16x128xf32>
    %186 = vector.extract_strided_slice %169 {offsets = [32, 0], sizes = [16, 128], strides = [1, 1]} : vector<64x128xf32> to vector<16x128xf32>
    %187 = math.tanh %186 : vector<16x128xf32>
    %188 = vector.extract_strided_slice %169 {offsets = [48, 0], sizes = [16, 128], strides = [1, 1]} : vector<64x128xf32> to vector<16x128xf32>
    %189 = arith.negf %188 : vector<16x128xf32>
    %190 = math.exp %189 : vector<16x128xf32>
    %cst_36 = arith.constant 1.000000e+00 : f32
    %191 = vector.broadcast %cst_36 : f32 to vector<16x128xf32>
    %192 = arith.addf %191, %190 : vector<16x128xf32>
    %193 = arith.divf %191, %192 : vector<16x128xf32>
    %194 = arith.mulf %185, %157 : vector<16x128xf32>
    %195 = arith.mulf %179, %187 : vector<16x128xf32>
    %196 = arith.addf %194, %195 : vector<16x128xf32>
    %197 = math.tanh %196 : vector<16x128xf32>
    %198 = arith.mulf %193, %197 : vector<16x128xf32>
    %199 = vector.extract_strided_slice %173 {offsets = [0, 0], sizes = [16, 128], strides = [1, 1]} : vector<64x128xf32> to vector<16x128xf32>
    %200 = arith.negf %199 : vector<16x128xf32>
    %201 = math.exp %200 : vector<16x128xf32>
    %cst_37 = arith.constant 1.000000e+00 : f32
    %202 = vector.broadcast %cst_37 : f32 to vector<16x128xf32>
    %203 = arith.addf %202, %201 : vector<16x128xf32>
    %204 = arith.divf %202, %203 : vector<16x128xf32>
    %205 = vector.extract_strided_slice %173 {offsets = [16, 0], sizes = [16, 128], strides = [1, 1]} : vector<64x128xf32> to vector<16x128xf32>
    %206 = arith.negf %205 : vector<16x128xf32>
    %207 = math.exp %206 : vector<16x128xf32>
    %cst_38 = arith.constant 1.000000e+00 : f32
    %208 = vector.broadcast %cst_38 : f32 to vector<16x128xf32>
    %209 = arith.addf %208, %207 : vector<16x128xf32>
    %210 = arith.divf %208, %209 : vector<16x128xf32>
    %211 = vector.extract_strided_slice %173 {offsets = [32, 0], sizes = [16, 128], strides = [1, 1]} : vector<64x128xf32> to vector<16x128xf32>
    %212 = math.tanh %211 : vector<16x128xf32>
    %213 = vector.extract_strided_slice %173 {offsets = [48, 0], sizes = [16, 128], strides = [1, 1]} : vector<64x128xf32> to vector<16x128xf32>
    %214 = arith.negf %213 : vector<16x128xf32>
    %215 = math.exp %214 : vector<16x128xf32>
    %cst_39 = arith.constant 1.000000e+00 : f32
    %216 = vector.broadcast %cst_39 : f32 to vector<16x128xf32>
    %217 = arith.addf %216, %215 : vector<16x128xf32>
    %218 = arith.divf %216, %217 : vector<16x128xf32>
    %219 = arith.mulf %210, %163 : vector<16x128xf32>
    %220 = arith.mulf %204, %212 : vector<16x128xf32>
    %221 = arith.addf %219, %220 : vector<16x128xf32>
    %222 = math.tanh %221 : vector<16x128xf32>
    %223 = arith.mulf %218, %222 : vector<16x128xf32>
    %224 = vector.extract_strided_slice %3 {offsets = [2, 0], sizes = [1, 128], strides = [1, 1]} : vector<8x128xi1> to vector<1x128xi1>
    %225 = vector.shape_cast %224 : vector<1x128xi1> to vector<128xi1>
    %226 = vector.shape_cast %225 : vector<128xi1> to vector<1x128xi1>
    %227 = vector.extract_strided_slice %3 {offsets = [5, 0], sizes = [1, 128], strides = [1, 1]} : vector<8x128xi1> to vector<1x128xi1>
    %228 = vector.shape_cast %227 : vector<1x128xi1> to vector<128xi1>
    %229 = vector.shape_cast %228 : vector<128xi1> to vector<1x128xi1>
    %230 = vector.shape_cast %226 : vector<1x128xi1> to vector<1x128xi1>
    %231 = vector.broadcast %230 : vector<1x128xi1> to vector<16x128xi1>
    %232 = arith.select %231, %198, %154 : vector<16x128xi1>, vector<16x128xf32>
    %233 = vector.shape_cast %226 : vector<1x128xi1> to vector<1x128xi1>
    %234 = vector.broadcast %233 : vector<1x128xi1> to vector<16x128xi1>
    %235 = arith.select %234, %196, %157 : vector<16x128xi1>, vector<16x128xf32>
    %236 = vector.shape_cast %229 : vector<1x128xi1> to vector<1x128xi1>
    %237 = vector.broadcast %236 : vector<1x128xi1> to vector<16x128xi1>
    %238 = arith.select %237, %223, %160 : vector<16x128xi1>, vector<16x128xf32>
    %239 = vector.shape_cast %229 : vector<1x128xi1> to vector<1x128xi1>
    %240 = vector.broadcast %239 : vector<1x128xi1> to vector<16x128xi1>
    %241 = arith.select %240, %221, %163 : vector<16x128xi1>, vector<16x128xf32>
    %242 = tpu.concatenate %232, %238 in 0 : vector<16x128xf32>, vector<16x128xf32> -> vector<32x128xf32>
    %cst_40 = arith.constant dense<0.000000e+00> : vector<128x128xf32>
    %243 = tpu.matmul %0, %242, %cst_40 {dimension_numbers = #tpu.dot_dimension_numbers<[1], [0], [0], [1], [0, 0, 1, 1], [], []>} : vector<128x32xf32>, vector<32x128xf32>, vector<128x128xf32> -> vector<128x128xf32>
    %c3 = arith.constant 3 : index
    %c0_41 = arith.constant 0 : index
    %c0_42 = arith.constant 0 : index
    %244 = vector.load %arg1[%c3, %c0_41, %c0_42] : memref<8x64x128xf32, #tpu.memory_space<vmem>>, vector<1x64x128xf32>
    %245 = vector.shape_cast %244 : vector<1x64x128xf32> to vector<64x128xf32>
    %246 = vector.extract_strided_slice %243 {offsets = [0, 0], sizes = [64, 128], strides = [1, 1]} : vector<128x128xf32> to vector<64x128xf32>
    %247 = arith.addf %245, %246 : vector<64x128xf32>
    %c4 = arith.constant 4 : index
    %c0_43 = arith.constant 0 : index
    %c0_44 = arith.constant 0 : index
    %248 = vector.load %arg2[%c4, %c0_43, %c0_44] : memref<8x64x128xf32, #tpu.memory_space<vmem>>, vector<1x64x128xf32>
    %249 = vector.shape_cast %248 : vector<1x64x128xf32> to vector<64x128xf32>
    %250 = vector.extract_strided_slice %243 {offsets = [64, 0], sizes = [64, 128], strides = [1, 1]} : vector<128x128xf32> to vector<64x128xf32>
    %251 = arith.addf %249, %250 : vector<64x128xf32>
    %252 = vector.extract_strided_slice %247 {offsets = [0, 0], sizes = [16, 128], strides = [1, 1]} : vector<64x128xf32> to vector<16x128xf32>
    %253 = arith.negf %252 : vector<16x128xf32>
    %254 = math.exp %253 : vector<16x128xf32>
    %cst_45 = arith.constant 1.000000e+00 : f32
    %255 = vector.broadcast %cst_45 : f32 to vector<16x128xf32>
    %256 = arith.addf %255, %254 : vector<16x128xf32>
    %257 = arith.divf %255, %256 : vector<16x128xf32>
    %258 = vector.extract_strided_slice %247 {offsets = [16, 0], sizes = [16, 128], strides = [1, 1]} : vector<64x128xf32> to vector<16x128xf32>
    %259 = arith.negf %258 : vector<16x128xf32>
    %260 = math.exp %259 : vector<16x128xf32>
    %cst_46 = arith.constant 1.000000e+00 : f32
    %261 = vector.broadcast %cst_46 : f32 to vector<16x128xf32>
    %262 = arith.addf %261, %260 : vector<16x128xf32>
    %263 = arith.divf %261, %262 : vector<16x128xf32>
    %264 = vector.extract_strided_slice %247 {offsets = [32, 0], sizes = [16, 128], strides = [1, 1]} : vector<64x128xf32> to vector<16x128xf32>
    %265 = math.tanh %264 : vector<16x128xf32>
    %266 = vector.extract_strided_slice %247 {offsets = [48, 0], sizes = [16, 128], strides = [1, 1]} : vector<64x128xf32> to vector<16x128xf32>
    %267 = arith.negf %266 : vector<16x128xf32>
    %268 = math.exp %267 : vector<16x128xf32>
    %cst_47 = arith.constant 1.000000e+00 : f32
    %269 = vector.broadcast %cst_47 : f32 to vector<16x128xf32>
    %270 = arith.addf %269, %268 : vector<16x128xf32>
    %271 = arith.divf %269, %270 : vector<16x128xf32>
    %272 = arith.mulf %263, %235 : vector<16x128xf32>
    %273 = arith.mulf %257, %265 : vector<16x128xf32>
    %274 = arith.addf %272, %273 : vector<16x128xf32>
    %275 = math.tanh %274 : vector<16x128xf32>
    %276 = arith.mulf %271, %275 : vector<16x128xf32>
    %277 = vector.extract_strided_slice %251 {offsets = [0, 0], sizes = [16, 128], strides = [1, 1]} : vector<64x128xf32> to vector<16x128xf32>
    %278 = arith.negf %277 : vector<16x128xf32>
    %279 = math.exp %278 : vector<16x128xf32>
    %cst_48 = arith.constant 1.000000e+00 : f32
    %280 = vector.broadcast %cst_48 : f32 to vector<16x128xf32>
    %281 = arith.addf %280, %279 : vector<16x128xf32>
    %282 = arith.divf %280, %281 : vector<16x128xf32>
    %283 = vector.extract_strided_slice %251 {offsets = [16, 0], sizes = [16, 128], strides = [1, 1]} : vector<64x128xf32> to vector<16x128xf32>
    %284 = arith.negf %283 : vector<16x128xf32>
    %285 = math.exp %284 : vector<16x128xf32>
    %cst_49 = arith.constant 1.000000e+00 : f32
    %286 = vector.broadcast %cst_49 : f32 to vector<16x128xf32>
    %287 = arith.addf %286, %285 : vector<16x128xf32>
    %288 = arith.divf %286, %287 : vector<16x128xf32>
    %289 = vector.extract_strided_slice %251 {offsets = [32, 0], sizes = [16, 128], strides = [1, 1]} : vector<64x128xf32> to vector<16x128xf32>
    %290 = math.tanh %289 : vector<16x128xf32>
    %291 = vector.extract_strided_slice %251 {offsets = [48, 0], sizes = [16, 128], strides = [1, 1]} : vector<64x128xf32> to vector<16x128xf32>
    %292 = arith.negf %291 : vector<16x128xf32>
    %293 = math.exp %292 : vector<16x128xf32>
    %cst_50 = arith.constant 1.000000e+00 : f32
    %294 = vector.broadcast %cst_50 : f32 to vector<16x128xf32>
    %295 = arith.addf %294, %293 : vector<16x128xf32>
    %296 = arith.divf %294, %295 : vector<16x128xf32>
    %297 = arith.mulf %288, %241 : vector<16x128xf32>
    %298 = arith.mulf %282, %290 : vector<16x128xf32>
    %299 = arith.addf %297, %298 : vector<16x128xf32>
    %300 = math.tanh %299 : vector<16x128xf32>
    %301 = arith.mulf %296, %300 : vector<16x128xf32>
    %302 = vector.extract_strided_slice %3 {offsets = [3, 0], sizes = [1, 128], strides = [1, 1]} : vector<8x128xi1> to vector<1x128xi1>
    %303 = vector.shape_cast %302 : vector<1x128xi1> to vector<128xi1>
    %304 = vector.shape_cast %303 : vector<128xi1> to vector<1x128xi1>
    %305 = vector.extract_strided_slice %3 {offsets = [4, 0], sizes = [1, 128], strides = [1, 1]} : vector<8x128xi1> to vector<1x128xi1>
    %306 = vector.shape_cast %305 : vector<1x128xi1> to vector<128xi1>
    %307 = vector.shape_cast %306 : vector<128xi1> to vector<1x128xi1>
    %308 = vector.shape_cast %304 : vector<1x128xi1> to vector<1x128xi1>
    %309 = vector.broadcast %308 : vector<1x128xi1> to vector<16x128xi1>
    %310 = arith.select %309, %276, %232 : vector<16x128xi1>, vector<16x128xf32>
    %311 = vector.shape_cast %304 : vector<1x128xi1> to vector<1x128xi1>
    %312 = vector.broadcast %311 : vector<1x128xi1> to vector<16x128xi1>
    %313 = arith.select %312, %274, %235 : vector<16x128xi1>, vector<16x128xf32>
    %314 = vector.shape_cast %307 : vector<1x128xi1> to vector<1x128xi1>
    %315 = vector.broadcast %314 : vector<1x128xi1> to vector<16x128xi1>
    %316 = arith.select %315, %301, %238 : vector<16x128xi1>, vector<16x128xf32>
    %317 = vector.shape_cast %307 : vector<1x128xi1> to vector<1x128xi1>
    %318 = vector.broadcast %317 : vector<1x128xi1> to vector<16x128xi1>
    %319 = arith.select %318, %299, %241 : vector<16x128xi1>, vector<16x128xf32>
    %320 = tpu.concatenate %310, %316 in 0 : vector<16x128xf32>, vector<16x128xf32> -> vector<32x128xf32>
    %cst_51 = arith.constant dense<0.000000e+00> : vector<128x128xf32>
    %321 = tpu.matmul %0, %320, %cst_51 {dimension_numbers = #tpu.dot_dimension_numbers<[1], [0], [0], [1], [0, 0, 1, 1], [], []>} : vector<128x32xf32>, vector<32x128xf32>, vector<128x128xf32> -> vector<128x128xf32>
    %c4_52 = arith.constant 4 : index
    %c0_53 = arith.constant 0 : index
    %c0_54 = arith.constant 0 : index
    %322 = vector.load %arg1[%c4_52, %c0_53, %c0_54] : memref<8x64x128xf32, #tpu.memory_space<vmem>>, vector<1x64x128xf32>
    %323 = vector.shape_cast %322 : vector<1x64x128xf32> to vector<64x128xf32>
    %324 = vector.extract_strided_slice %321 {offsets = [0, 0], sizes = [64, 128], strides = [1, 1]} : vector<128x128xf32> to vector<64x128xf32>
    %325 = arith.addf %323, %324 : vector<64x128xf32>
    %c3_55 = arith.constant 3 : index
    %c0_56 = arith.constant 0 : index
    %c0_57 = arith.constant 0 : index
    %326 = vector.load %arg2[%c3_55, %c0_56, %c0_57] : memref<8x64x128xf32, #tpu.memory_space<vmem>>, vector<1x64x128xf32>
    %327 = vector.shape_cast %326 : vector<1x64x128xf32> to vector<64x128xf32>
    %328 = vector.extract_strided_slice %321 {offsets = [64, 0], sizes = [64, 128], strides = [1, 1]} : vector<128x128xf32> to vector<64x128xf32>
    %329 = arith.addf %327, %328 : vector<64x128xf32>
    %330 = vector.extract_strided_slice %325 {offsets = [0, 0], sizes = [16, 128], strides = [1, 1]} : vector<64x128xf32> to vector<16x128xf32>
    %331 = arith.negf %330 : vector<16x128xf32>
    %332 = math.exp %331 : vector<16x128xf32>
    %cst_58 = arith.constant 1.000000e+00 : f32
    %333 = vector.broadcast %cst_58 : f32 to vector<16x128xf32>
    %334 = arith.addf %333, %332 : vector<16x128xf32>
    %335 = arith.divf %333, %334 : vector<16x128xf32>
    %336 = vector.extract_strided_slice %325 {offsets = [16, 0], sizes = [16, 128], strides = [1, 1]} : vector<64x128xf32> to vector<16x128xf32>
    %337 = arith.negf %336 : vector<16x128xf32>
    %338 = math.exp %337 : vector<16x128xf32>
    %cst_59 = arith.constant 1.000000e+00 : f32
    %339 = vector.broadcast %cst_59 : f32 to vector<16x128xf32>
    %340 = arith.addf %339, %338 : vector<16x128xf32>
    %341 = arith.divf %339, %340 : vector<16x128xf32>
    %342 = vector.extract_strided_slice %325 {offsets = [32, 0], sizes = [16, 128], strides = [1, 1]} : vector<64x128xf32> to vector<16x128xf32>
    %343 = math.tanh %342 : vector<16x128xf32>
    %344 = vector.extract_strided_slice %325 {offsets = [48, 0], sizes = [16, 128], strides = [1, 1]} : vector<64x128xf32> to vector<16x128xf32>
    %345 = arith.negf %344 : vector<16x128xf32>
    %346 = math.exp %345 : vector<16x128xf32>
    %cst_60 = arith.constant 1.000000e+00 : f32
    %347 = vector.broadcast %cst_60 : f32 to vector<16x128xf32>
    %348 = arith.addf %347, %346 : vector<16x128xf32>
    %349 = arith.divf %347, %348 : vector<16x128xf32>
    %350 = arith.mulf %341, %313 : vector<16x128xf32>
    %351 = arith.mulf %335, %343 : vector<16x128xf32>
    %352 = arith.addf %350, %351 : vector<16x128xf32>
    %353 = math.tanh %352 : vector<16x128xf32>
    %354 = arith.mulf %349, %353 : vector<16x128xf32>
    %355 = vector.extract_strided_slice %329 {offsets = [0, 0], sizes = [16, 128], strides = [1, 1]} : vector<64x128xf32> to vector<16x128xf32>
    %356 = arith.negf %355 : vector<16x128xf32>
    %357 = math.exp %356 : vector<16x128xf32>
    %cst_61 = arith.constant 1.000000e+00 : f32
    %358 = vector.broadcast %cst_61 : f32 to vector<16x128xf32>
    %359 = arith.addf %358, %357 : vector<16x128xf32>
    %360 = arith.divf %358, %359 : vector<16x128xf32>
    %361 = vector.extract_strided_slice %329 {offsets = [16, 0], sizes = [16, 128], strides = [1, 1]} : vector<64x128xf32> to vector<16x128xf32>
    %362 = arith.negf %361 : vector<16x128xf32>
    %363 = math.exp %362 : vector<16x128xf32>
    %cst_62 = arith.constant 1.000000e+00 : f32
    %364 = vector.broadcast %cst_62 : f32 to vector<16x128xf32>
    %365 = arith.addf %364, %363 : vector<16x128xf32>
    %366 = arith.divf %364, %365 : vector<16x128xf32>
    %367 = vector.extract_strided_slice %329 {offsets = [32, 0], sizes = [16, 128], strides = [1, 1]} : vector<64x128xf32> to vector<16x128xf32>
    %368 = math.tanh %367 : vector<16x128xf32>
    %369 = vector.extract_strided_slice %329 {offsets = [48, 0], sizes = [16, 128], strides = [1, 1]} : vector<64x128xf32> to vector<16x128xf32>
    %370 = arith.negf %369 : vector<16x128xf32>
    %371 = math.exp %370 : vector<16x128xf32>
    %cst_63 = arith.constant 1.000000e+00 : f32
    %372 = vector.broadcast %cst_63 : f32 to vector<16x128xf32>
    %373 = arith.addf %372, %371 : vector<16x128xf32>
    %374 = arith.divf %372, %373 : vector<16x128xf32>
    %375 = arith.mulf %366, %319 : vector<16x128xf32>
    %376 = arith.mulf %360, %368 : vector<16x128xf32>
    %377 = arith.addf %375, %376 : vector<16x128xf32>
    %378 = math.tanh %377 : vector<16x128xf32>
    %379 = arith.mulf %374, %378 : vector<16x128xf32>
    %380 = vector.extract_strided_slice %3 {offsets = [4, 0], sizes = [1, 128], strides = [1, 1]} : vector<8x128xi1> to vector<1x128xi1>
    %381 = vector.shape_cast %380 : vector<1x128xi1> to vector<128xi1>
    %382 = vector.shape_cast %381 : vector<128xi1> to vector<1x128xi1>
    %383 = vector.extract_strided_slice %3 {offsets = [3, 0], sizes = [1, 128], strides = [1, 1]} : vector<8x128xi1> to vector<1x128xi1>
    %384 = vector.shape_cast %383 : vector<1x128xi1> to vector<128xi1>
    %385 = vector.shape_cast %384 : vector<128xi1> to vector<1x128xi1>
    %386 = vector.shape_cast %382 : vector<1x128xi1> to vector<1x128xi1>
    %387 = vector.broadcast %386 : vector<1x128xi1> to vector<16x128xi1>
    %388 = arith.select %387, %354, %310 : vector<16x128xi1>, vector<16x128xf32>
    %389 = vector.shape_cast %382 : vector<1x128xi1> to vector<1x128xi1>
    %390 = vector.broadcast %389 : vector<1x128xi1> to vector<16x128xi1>
    %391 = arith.select %390, %352, %313 : vector<16x128xi1>, vector<16x128xf32>
    %392 = vector.shape_cast %385 : vector<1x128xi1> to vector<1x128xi1>
    %393 = vector.broadcast %392 : vector<1x128xi1> to vector<16x128xi1>
    %394 = arith.select %393, %379, %316 : vector<16x128xi1>, vector<16x128xf32>
    %395 = vector.shape_cast %385 : vector<1x128xi1> to vector<1x128xi1>
    %396 = vector.broadcast %395 : vector<1x128xi1> to vector<16x128xi1>
    %397 = arith.select %396, %377, %319 : vector<16x128xi1>, vector<16x128xf32>
    %398 = tpu.concatenate %388, %394 in 0 : vector<16x128xf32>, vector<16x128xf32> -> vector<32x128xf32>
    %cst_64 = arith.constant dense<0.000000e+00> : vector<128x128xf32>
    %399 = tpu.matmul %0, %398, %cst_64 {dimension_numbers = #tpu.dot_dimension_numbers<[1], [0], [0], [1], [0, 0, 1, 1], [], []>} : vector<128x32xf32>, vector<32x128xf32>, vector<128x128xf32> -> vector<128x128xf32>
    %c5_65 = arith.constant 5 : index
    %c0_66 = arith.constant 0 : index
    %c0_67 = arith.constant 0 : index
    %400 = vector.load %arg1[%c5_65, %c0_66, %c0_67] : memref<8x64x128xf32, #tpu.memory_space<vmem>>, vector<1x64x128xf32>
    %401 = vector.shape_cast %400 : vector<1x64x128xf32> to vector<64x128xf32>
    %402 = vector.extract_strided_slice %399 {offsets = [0, 0], sizes = [64, 128], strides = [1, 1]} : vector<128x128xf32> to vector<64x128xf32>
    %403 = arith.addf %401, %402 : vector<64x128xf32>
    %c2_68 = arith.constant 2 : index
    %c0_69 = arith.constant 0 : index
    %c0_70 = arith.constant 0 : index
    %404 = vector.load %arg2[%c2_68, %c0_69, %c0_70] : memref<8x64x128xf32, #tpu.memory_space<vmem>>, vector<1x64x128xf32>
    %405 = vector.shape_cast %404 : vector<1x64x128xf32> to vector<64x128xf32>
    %406 = vector.extract_strided_slice %399 {offsets = [64, 0], sizes = [64, 128], strides = [1, 1]} : vector<128x128xf32> to vector<64x128xf32>
    %407 = arith.addf %405, %406 : vector<64x128xf32>
    %408 = vector.extract_strided_slice %403 {offsets = [0, 0], sizes = [16, 128], strides = [1, 1]} : vector<64x128xf32> to vector<16x128xf32>
    %409 = arith.negf %408 : vector<16x128xf32>
    %410 = math.exp %409 : vector<16x128xf32>
    %cst_71 = arith.constant 1.000000e+00 : f32
    %411 = vector.broadcast %cst_71 : f32 to vector<16x128xf32>
    %412 = arith.addf %411, %410 : vector<16x128xf32>
    %413 = arith.divf %411, %412 : vector<16x128xf32>
    %414 = vector.extract_strided_slice %403 {offsets = [16, 0], sizes = [16, 128], strides = [1, 1]} : vector<64x128xf32> to vector<16x128xf32>
    %415 = arith.negf %414 : vector<16x128xf32>
    %416 = math.exp %415 : vector<16x128xf32>
    %cst_72 = arith.constant 1.000000e+00 : f32
    %417 = vector.broadcast %cst_72 : f32 to vector<16x128xf32>
    %418 = arith.addf %417, %416 : vector<16x128xf32>
    %419 = arith.divf %417, %418 : vector<16x128xf32>
    %420 = vector.extract_strided_slice %403 {offsets = [32, 0], sizes = [16, 128], strides = [1, 1]} : vector<64x128xf32> to vector<16x128xf32>
    %421 = math.tanh %420 : vector<16x128xf32>
    %422 = vector.extract_strided_slice %403 {offsets = [48, 0], sizes = [16, 128], strides = [1, 1]} : vector<64x128xf32> to vector<16x128xf32>
    %423 = arith.negf %422 : vector<16x128xf32>
    %424 = math.exp %423 : vector<16x128xf32>
    %cst_73 = arith.constant 1.000000e+00 : f32
    %425 = vector.broadcast %cst_73 : f32 to vector<16x128xf32>
    %426 = arith.addf %425, %424 : vector<16x128xf32>
    %427 = arith.divf %425, %426 : vector<16x128xf32>
    %428 = arith.mulf %419, %391 : vector<16x128xf32>
    %429 = arith.mulf %413, %421 : vector<16x128xf32>
    %430 = arith.addf %428, %429 : vector<16x128xf32>
    %431 = math.tanh %430 : vector<16x128xf32>
    %432 = arith.mulf %427, %431 : vector<16x128xf32>
    %433 = vector.extract_strided_slice %407 {offsets = [0, 0], sizes = [16, 128], strides = [1, 1]} : vector<64x128xf32> to vector<16x128xf32>
    %434 = arith.negf %433 : vector<16x128xf32>
    %435 = math.exp %434 : vector<16x128xf32>
    %cst_74 = arith.constant 1.000000e+00 : f32
    %436 = vector.broadcast %cst_74 : f32 to vector<16x128xf32>
    %437 = arith.addf %436, %435 : vector<16x128xf32>
    %438 = arith.divf %436, %437 : vector<16x128xf32>
    %439 = vector.extract_strided_slice %407 {offsets = [16, 0], sizes = [16, 128], strides = [1, 1]} : vector<64x128xf32> to vector<16x128xf32>
    %440 = arith.negf %439 : vector<16x128xf32>
    %441 = math.exp %440 : vector<16x128xf32>
    %cst_75 = arith.constant 1.000000e+00 : f32
    %442 = vector.broadcast %cst_75 : f32 to vector<16x128xf32>
    %443 = arith.addf %442, %441 : vector<16x128xf32>
    %444 = arith.divf %442, %443 : vector<16x128xf32>
    %445 = vector.extract_strided_slice %407 {offsets = [32, 0], sizes = [16, 128], strides = [1, 1]} : vector<64x128xf32> to vector<16x128xf32>
    %446 = math.tanh %445 : vector<16x128xf32>
    %447 = vector.extract_strided_slice %407 {offsets = [48, 0], sizes = [16, 128], strides = [1, 1]} : vector<64x128xf32> to vector<16x128xf32>
    %448 = arith.negf %447 : vector<16x128xf32>
    %449 = math.exp %448 : vector<16x128xf32>
    %cst_76 = arith.constant 1.000000e+00 : f32
    %450 = vector.broadcast %cst_76 : f32 to vector<16x128xf32>
    %451 = arith.addf %450, %449 : vector<16x128xf32>
    %452 = arith.divf %450, %451 : vector<16x128xf32>
    %453 = arith.mulf %444, %397 : vector<16x128xf32>
    %454 = arith.mulf %438, %446 : vector<16x128xf32>
    %455 = arith.addf %453, %454 : vector<16x128xf32>
    %456 = math.tanh %455 : vector<16x128xf32>
    %457 = arith.mulf %452, %456 : vector<16x128xf32>
    %458 = vector.extract_strided_slice %3 {offsets = [5, 0], sizes = [1, 128], strides = [1, 1]} : vector<8x128xi1> to vector<1x128xi1>
    %459 = vector.shape_cast %458 : vector<1x128xi1> to vector<128xi1>
    %460 = vector.shape_cast %459 : vector<128xi1> to vector<1x128xi1>
    %461 = vector.extract_strided_slice %3 {offsets = [2, 0], sizes = [1, 128], strides = [1, 1]} : vector<8x128xi1> to vector<1x128xi1>
    %462 = vector.shape_cast %461 : vector<1x128xi1> to vector<128xi1>
    %463 = vector.shape_cast %462 : vector<128xi1> to vector<1x128xi1>
    %464 = vector.shape_cast %460 : vector<1x128xi1> to vector<1x128xi1>
    %465 = vector.broadcast %464 : vector<1x128xi1> to vector<16x128xi1>
    %466 = arith.select %465, %432, %388 : vector<16x128xi1>, vector<16x128xf32>
    %467 = vector.shape_cast %460 : vector<1x128xi1> to vector<1x128xi1>
    %468 = vector.broadcast %467 : vector<1x128xi1> to vector<16x128xi1>
    %469 = arith.select %468, %430, %391 : vector<16x128xi1>, vector<16x128xf32>
    %470 = vector.shape_cast %463 : vector<1x128xi1> to vector<1x128xi1>
    %471 = vector.broadcast %470 : vector<1x128xi1> to vector<16x128xi1>
    %472 = arith.select %471, %457, %394 : vector<16x128xi1>, vector<16x128xf32>
    %473 = vector.shape_cast %463 : vector<1x128xi1> to vector<1x128xi1>
    %474 = vector.broadcast %473 : vector<1x128xi1> to vector<16x128xi1>
    %475 = arith.select %474, %455, %397 : vector<16x128xi1>, vector<16x128xf32>
    %476 = tpu.concatenate %466, %472 in 0 : vector<16x128xf32>, vector<16x128xf32> -> vector<32x128xf32>
    %cst_77 = arith.constant dense<0.000000e+00> : vector<128x128xf32>
    %477 = tpu.matmul %0, %476, %cst_77 {dimension_numbers = #tpu.dot_dimension_numbers<[1], [0], [0], [1], [0, 0, 1, 1], [], []>} : vector<128x32xf32>, vector<32x128xf32>, vector<128x128xf32> -> vector<128x128xf32>
    %c6_78 = arith.constant 6 : index
    %c0_79 = arith.constant 0 : index
    %c0_80 = arith.constant 0 : index
    %478 = vector.load %arg1[%c6_78, %c0_79, %c0_80] : memref<8x64x128xf32, #tpu.memory_space<vmem>>, vector<1x64x128xf32>
    %479 = vector.shape_cast %478 : vector<1x64x128xf32> to vector<64x128xf32>
    %480 = vector.extract_strided_slice %477 {offsets = [0, 0], sizes = [64, 128], strides = [1, 1]} : vector<128x128xf32> to vector<64x128xf32>
    %481 = arith.addf %479, %480 : vector<64x128xf32>
    %c1_81 = arith.constant 1 : index
    %c0_82 = arith.constant 0 : index
    %c0_83 = arith.constant 0 : index
    %482 = vector.load %arg2[%c1_81, %c0_82, %c0_83] : memref<8x64x128xf32, #tpu.memory_space<vmem>>, vector<1x64x128xf32>
    %483 = vector.shape_cast %482 : vector<1x64x128xf32> to vector<64x128xf32>
    %484 = vector.extract_strided_slice %477 {offsets = [64, 0], sizes = [64, 128], strides = [1, 1]} : vector<128x128xf32> to vector<64x128xf32>
    %485 = arith.addf %483, %484 : vector<64x128xf32>
    %486 = vector.extract_strided_slice %481 {offsets = [0, 0], sizes = [16, 128], strides = [1, 1]} : vector<64x128xf32> to vector<16x128xf32>
    %487 = arith.negf %486 : vector<16x128xf32>
    %488 = math.exp %487 : vector<16x128xf32>
    %cst_84 = arith.constant 1.000000e+00 : f32
    %489 = vector.broadcast %cst_84 : f32 to vector<16x128xf32>
    %490 = arith.addf %489, %488 : vector<16x128xf32>
    %491 = arith.divf %489, %490 : vector<16x128xf32>
    %492 = vector.extract_strided_slice %481 {offsets = [16, 0], sizes = [16, 128], strides = [1, 1]} : vector<64x128xf32> to vector<16x128xf32>
    %493 = arith.negf %492 : vector<16x128xf32>
    %494 = math.exp %493 : vector<16x128xf32>
    %cst_85 = arith.constant 1.000000e+00 : f32
    %495 = vector.broadcast %cst_85 : f32 to vector<16x128xf32>
    %496 = arith.addf %495, %494 : vector<16x128xf32>
    %497 = arith.divf %495, %496 : vector<16x128xf32>
    %498 = vector.extract_strided_slice %481 {offsets = [32, 0], sizes = [16, 128], strides = [1, 1]} : vector<64x128xf32> to vector<16x128xf32>
    %499 = math.tanh %498 : vector<16x128xf32>
    %500 = vector.extract_strided_slice %481 {offsets = [48, 0], sizes = [16, 128], strides = [1, 1]} : vector<64x128xf32> to vector<16x128xf32>
    %501 = arith.negf %500 : vector<16x128xf32>
    %502 = math.exp %501 : vector<16x128xf32>
    %cst_86 = arith.constant 1.000000e+00 : f32
    %503 = vector.broadcast %cst_86 : f32 to vector<16x128xf32>
    %504 = arith.addf %503, %502 : vector<16x128xf32>
    %505 = arith.divf %503, %504 : vector<16x128xf32>
    %506 = arith.mulf %497, %469 : vector<16x128xf32>
    %507 = arith.mulf %491, %499 : vector<16x128xf32>
    %508 = arith.addf %506, %507 : vector<16x128xf32>
    %509 = math.tanh %508 : vector<16x128xf32>
    %510 = arith.mulf %505, %509 : vector<16x128xf32>
    %511 = vector.extract_strided_slice %485 {offsets = [0, 0], sizes = [16, 128], strides = [1, 1]} : vector<64x128xf32> to vector<16x128xf32>
    %512 = arith.negf %511 : vector<16x128xf32>
    %513 = math.exp %512 : vector<16x128xf32>
    %cst_87 = arith.constant 1.000000e+00 : f32
    %514 = vector.broadcast %cst_87 : f32 to vector<16x128xf32>
    %515 = arith.addf %514, %513 : vector<16x128xf32>
    %516 = arith.divf %514, %515 : vector<16x128xf32>
    %517 = vector.extract_strided_slice %485 {offsets = [16, 0], sizes = [16, 128], strides = [1, 1]} : vector<64x128xf32> to vector<16x128xf32>
    %518 = arith.negf %517 : vector<16x128xf32>
    %519 = math.exp %518 : vector<16x128xf32>
    %cst_88 = arith.constant 1.000000e+00 : f32
    %520 = vector.broadcast %cst_88 : f32 to vector<16x128xf32>
    %521 = arith.addf %520, %519 : vector<16x128xf32>
    %522 = arith.divf %520, %521 : vector<16x128xf32>
    %523 = vector.extract_strided_slice %485 {offsets = [32, 0], sizes = [16, 128], strides = [1, 1]} : vector<64x128xf32> to vector<16x128xf32>
    %524 = math.tanh %523 : vector<16x128xf32>
    %525 = vector.extract_strided_slice %485 {offsets = [48, 0], sizes = [16, 128], strides = [1, 1]} : vector<64x128xf32> to vector<16x128xf32>
    %526 = arith.negf %525 : vector<16x128xf32>
    %527 = math.exp %526 : vector<16x128xf32>
    %cst_89 = arith.constant 1.000000e+00 : f32
    %528 = vector.broadcast %cst_89 : f32 to vector<16x128xf32>
    %529 = arith.addf %528, %527 : vector<16x128xf32>
    %530 = arith.divf %528, %529 : vector<16x128xf32>
    %531 = arith.mulf %522, %475 : vector<16x128xf32>
    %532 = arith.mulf %516, %524 : vector<16x128xf32>
    %533 = arith.addf %531, %532 : vector<16x128xf32>
    %534 = math.tanh %533 : vector<16x128xf32>
    %535 = arith.mulf %530, %534 : vector<16x128xf32>
    %536 = vector.extract_strided_slice %3 {offsets = [6, 0], sizes = [1, 128], strides = [1, 1]} : vector<8x128xi1> to vector<1x128xi1>
    %537 = vector.shape_cast %536 : vector<1x128xi1> to vector<128xi1>
    %538 = vector.shape_cast %537 : vector<128xi1> to vector<1x128xi1>
    %539 = vector.extract_strided_slice %3 {offsets = [1, 0], sizes = [1, 128], strides = [1, 1]} : vector<8x128xi1> to vector<1x128xi1>
    %540 = vector.shape_cast %539 : vector<1x128xi1> to vector<128xi1>
    %541 = vector.shape_cast %540 : vector<128xi1> to vector<1x128xi1>
    %542 = vector.shape_cast %538 : vector<1x128xi1> to vector<1x128xi1>
    %543 = vector.broadcast %542 : vector<1x128xi1> to vector<16x128xi1>
    %544 = arith.select %543, %510, %466 : vector<16x128xi1>, vector<16x128xf32>
    %545 = vector.shape_cast %538 : vector<1x128xi1> to vector<1x128xi1>
    %546 = vector.broadcast %545 : vector<1x128xi1> to vector<16x128xi1>
    %547 = arith.select %546, %508, %469 : vector<16x128xi1>, vector<16x128xf32>
    %548 = vector.shape_cast %541 : vector<1x128xi1> to vector<1x128xi1>
    %549 = vector.broadcast %548 : vector<1x128xi1> to vector<16x128xi1>
    %550 = arith.select %549, %535, %472 : vector<16x128xi1>, vector<16x128xf32>
    %551 = vector.shape_cast %541 : vector<1x128xi1> to vector<1x128xi1>
    %552 = vector.broadcast %551 : vector<1x128xi1> to vector<16x128xi1>
    %553 = arith.select %552, %533, %475 : vector<16x128xi1>, vector<16x128xf32>
    %554 = tpu.concatenate %544, %550 in 0 : vector<16x128xf32>, vector<16x128xf32> -> vector<32x128xf32>
    %cst_90 = arith.constant dense<0.000000e+00> : vector<128x128xf32>
    %555 = tpu.matmul %0, %554, %cst_90 {dimension_numbers = #tpu.dot_dimension_numbers<[1], [0], [0], [1], [0, 0, 1, 1], [], []>} : vector<128x32xf32>, vector<32x128xf32>, vector<128x128xf32> -> vector<128x128xf32>
    %c7_91 = arith.constant 7 : index
    %c0_92 = arith.constant 0 : index
    %c0_93 = arith.constant 0 : index
    %556 = vector.load %arg1[%c7_91, %c0_92, %c0_93] : memref<8x64x128xf32, #tpu.memory_space<vmem>>, vector<1x64x128xf32>
    %557 = vector.shape_cast %556 : vector<1x64x128xf32> to vector<64x128xf32>
    %558 = vector.extract_strided_slice %555 {offsets = [0, 0], sizes = [64, 128], strides = [1, 1]} : vector<128x128xf32> to vector<64x128xf32>
    %559 = arith.addf %557, %558 : vector<64x128xf32>
    %c0_94 = arith.constant 0 : index
    %c0_95 = arith.constant 0 : index
    %c0_96 = arith.constant 0 : index
    %560 = vector.load %arg2[%c0_94, %c0_95, %c0_96] : memref<8x64x128xf32, #tpu.memory_space<vmem>>, vector<1x64x128xf32>
    %561 = vector.shape_cast %560 : vector<1x64x128xf32> to vector<64x128xf32>
    %562 = vector.extract_strided_slice %555 {offsets = [64, 0], sizes = [64, 128], strides = [1, 1]} : vector<128x128xf32> to vector<64x128xf32>
    %563 = arith.addf %561, %562 : vector<64x128xf32>
    %564 = vector.extract_strided_slice %559 {offsets = [0, 0], sizes = [16, 128], strides = [1, 1]} : vector<64x128xf32> to vector<16x128xf32>
    %565 = arith.negf %564 : vector<16x128xf32>
    %566 = math.exp %565 : vector<16x128xf32>
    %cst_97 = arith.constant 1.000000e+00 : f32
    %567 = vector.broadcast %cst_97 : f32 to vector<16x128xf32>
    %568 = arith.addf %567, %566 : vector<16x128xf32>
    %569 = arith.divf %567, %568 : vector<16x128xf32>
    %570 = vector.extract_strided_slice %559 {offsets = [16, 0], sizes = [16, 128], strides = [1, 1]} : vector<64x128xf32> to vector<16x128xf32>
    %571 = arith.negf %570 : vector<16x128xf32>
    %572 = math.exp %571 : vector<16x128xf32>
    %cst_98 = arith.constant 1.000000e+00 : f32
    %573 = vector.broadcast %cst_98 : f32 to vector<16x128xf32>
    %574 = arith.addf %573, %572 : vector<16x128xf32>
    %575 = arith.divf %573, %574 : vector<16x128xf32>
    %576 = vector.extract_strided_slice %559 {offsets = [32, 0], sizes = [16, 128], strides = [1, 1]} : vector<64x128xf32> to vector<16x128xf32>
    %577 = math.tanh %576 : vector<16x128xf32>
    %578 = arith.mulf %575, %547 : vector<16x128xf32>
    %579 = arith.mulf %569, %577 : vector<16x128xf32>
    %580 = arith.addf %578, %579 : vector<16x128xf32>
    %581 = vector.extract_strided_slice %563 {offsets = [0, 0], sizes = [16, 128], strides = [1, 1]} : vector<64x128xf32> to vector<16x128xf32>
    %582 = arith.negf %581 : vector<16x128xf32>
    %583 = math.exp %582 : vector<16x128xf32>
    %cst_99 = arith.constant 1.000000e+00 : f32
    %584 = vector.broadcast %cst_99 : f32 to vector<16x128xf32>
    %585 = arith.addf %584, %583 : vector<16x128xf32>
    %586 = arith.divf %584, %585 : vector<16x128xf32>
    %587 = vector.extract_strided_slice %563 {offsets = [16, 0], sizes = [16, 128], strides = [1, 1]} : vector<64x128xf32> to vector<16x128xf32>
    %588 = arith.negf %587 : vector<16x128xf32>
    %589 = math.exp %588 : vector<16x128xf32>
    %cst_100 = arith.constant 1.000000e+00 : f32
    %590 = vector.broadcast %cst_100 : f32 to vector<16x128xf32>
    %591 = arith.addf %590, %589 : vector<16x128xf32>
    %592 = arith.divf %590, %591 : vector<16x128xf32>
    %593 = vector.extract_strided_slice %563 {offsets = [32, 0], sizes = [16, 128], strides = [1, 1]} : vector<64x128xf32> to vector<16x128xf32>
    %594 = math.tanh %593 : vector<16x128xf32>
    %595 = arith.mulf %592, %553 : vector<16x128xf32>
    %596 = arith.mulf %586, %594 : vector<16x128xf32>
    %597 = arith.addf %595, %596 : vector<16x128xf32>
    %598 = vector.extract_strided_slice %3 {offsets = [7, 0], sizes = [1, 128], strides = [1, 1]} : vector<8x128xi1> to vector<1x128xi1>
    %599 = vector.shape_cast %598 : vector<1x128xi1> to vector<128xi1>
    %600 = vector.shape_cast %599 : vector<128xi1> to vector<1x128xi1>
    %601 = vector.extract_strided_slice %3 {offsets = [0, 0], sizes = [1, 128], strides = [1, 1]} : vector<8x128xi1> to vector<1x128xi1>
    %602 = vector.shape_cast %601 : vector<1x128xi1> to vector<128xi1>
    %603 = vector.shape_cast %602 : vector<128xi1> to vector<1x128xi1>
    %604 = vector.shape_cast %600 : vector<1x128xi1> to vector<1x128xi1>
    %605 = vector.broadcast %604 : vector<1x128xi1> to vector<16x128xi1>
    %606 = arith.select %605, %580, %547 : vector<16x128xi1>, vector<16x128xf32>
    %607 = vector.shape_cast %603 : vector<1x128xi1> to vector<1x128xi1>
    %608 = vector.broadcast %607 : vector<1x128xi1> to vector<16x128xi1>
    %609 = arith.select %608, %597, %553 : vector<16x128xi1>, vector<16x128xf32>
    %c0_101 = arith.constant 0 : index
    %c0_102 = arith.constant 0 : index
    %610 = vector.load %arg5[%c0_101, %c0_102] : memref<32x128xf32, #tpu.memory_space<vmem>>, vector<16x128xf32>
    tpu.vector_store %arg5[%c0_101, %c0_102], %606 {strides = array<i32>} : memref<32x128xf32, #tpu.memory_space<vmem>>, vector<16x128xf32>,
    %c16 = arith.constant 16 : index
    %c0_103 = arith.constant 0 : index
    %611 = vector.load %arg5[%c16, %c0_103] : memref<32x128xf32, #tpu.memory_space<vmem>>, vector<16x128xf32>
    tpu.vector_store %arg5[%c16, %c0_103], %609 {strides = array<i32>} : memref<32x128xf32, #tpu.memory_space<vmem>>, vector<16x128xf32>,
    return
  }
  func.func @transform_0(%arg0: i32) -> (i32, i32, i32) {
    %c0_i32 = arith.constant 0 : i32
    %c0_i32_0 = arith.constant 0 : i32
    %c0_i32_1 = arith.constant 0 : i32
    return %c0_i32, %c0_i32_0, %arg0 : i32, i32, i32
  }
  func.func @transform_1(%arg0: i32) -> (i32, i32, i32) {
    %c0_i32 = arith.constant 0 : i32
    %c0_i32_0 = arith.constant 0 : i32
    %c0_i32_1 = arith.constant 0 : i32
    return %c0_i32, %c0_i32_0, %arg0 : i32, i32, i32
  }
  func.func @transform_2(%arg0: i32) -> (i32, i32) {
    %c0_i32 = arith.constant 0 : i32
    %c0_i32_0 = arith.constant 0 : i32
    return %c0_i32, %arg0 : i32, i32
  }
  func.func @transform_3(%arg0: i32) -> (i32, i32) {
    %c0_i32 = arith.constant 0 : i32
    %c0_i32_0 = arith.constant 0 : i32
    %c0_i32_1 = arith.constant 0 : i32
    return %c0_i32, %c0_i32_0 : i32, i32
  }
  func.func @transform_4(%arg0: i32) -> (i32, i32) {
    %c0_i32 = arith.constant 0 : i32
    %c0_i32_0 = arith.constant 0 : i32
    return %c0_i32, %arg0 : i32, i32
  }
}

</mosaic_0001>

<bundles_post_ra>
// kernel: tpu_custom_call.1
= control target key start
LH: loop header
LB: loop body
LE: loop exit
PB: predicated region body
PF: predicated region fallthrough
CT: control target
= control target key end

     0   :  { %9 = vsyncpa [#allocation3], 0  ;;  %s11771_s0 = inlined_call_operand.hbm [shape: f32[8,64,128], index: 0, kind: input, shape index: {}]   ;;  %s11772_s1 = inlined_call_operand.hbm [shape: f32[8,64,128], index: 1, kind: input, shape index: {}]   ;;  %s11773_s2 = inlined_call_operand.vmem [shape: s32[8,128], index: 2, kind: input, shape index: {}]   ;;  %s11774_s3 = inlined_call_operand.vmem [shape: f32[128,32], index: 3, kind: input, shape index: {}]   ;;  %s11775_s4 = inlined_call_operand.hbm [shape: f32[32,128], index: 4, kind: output, shape index: {}]  }
   0x1   :  { %10 = vsyncpa [#allocation6], 0 }
   0x2   :  { %11 = vsyncpa [#allocation4], 0  ;;  %s7195_s15 = smov [#allocation2]   ;;  %s7123_s19 = scalar_lea.hbm %s11771_s0, 8192 }
   0x3   :  { %s17_s16 = sshll.u32 %s7195_s15, 4  ;;  %p7124_p0 = scmp.ne.s32.totalorder %s11771_s0, %s7123_s19  ;;  %s18_s16 = int_to_ptr.vmem [resolvable:$true] %s17_s16 }
   0x4   :  { %p7127_p1 = scmp.lt.u32.totalorder %s7123_s19, %s11771_s0 }
   0x6   :  { %p7129_p2 = pnand %p7127_p1, %p7124_p0 }
   0x8   :  { %7132 = shalt.err (!%p7129_p2)
}
   0x9   :  { %s7133_s24 = scalar_lea.vmem %s18_s16, 8192  ;;  %p7138_p4 = scmp.lt.s32.totalorder %s18_s16, %s18_s16 }
   0xa   :  { %p7134_p3 = scmp.ne.s32.totalorder %s18_s16, %s7133_s24  ;;  %p7139_p5 = scmp.lt.s32.totalorder %s7133_s24, %s7133_s24 }
   0xc   :  { %p7140_p6 = por %p7139_p5, %p7138_p4 }
   0xe   :  { %p7141_p7 = pnand %p7140_p6, %p7134_p3 }
  0x10   :  { %7144 = shalt.err (!%p7141_p7)
}
  0x11   :  { %s7196_s25 = smov 128   ;;  %s7197_s26 = smov 8  }
  0x12   :  { %23 = dma.hbm_to_vmem [thread:$0]  %s11771_s0, 8192, %s18_s16, [#allocation3], %s7196_s25, %s7196_s25, %s7197_s26  }
  0x13   :  { %s7198_s29 = smov [#allocation5]   ;;  %s7145_s7 = scalar_lea.hbm %s11772_s1, 8192 }
  0x14   :  { %s29_s30 = sshll.u32 %s7198_s29, 4  ;;  %p7146_p8 = scmp.ne.s32.totalorder %s11772_s1, %s7145_s7  ;;  %s30_s30 = int_to_ptr.vmem [resolvable:$true] %s29_s30 }
  0x15   :  { %p7149_p9 = scmp.lt.u32.totalorder %s7145_s7, %s11772_s1 }
  0x17   :  { %p7151_p10 = pnand %p7149_p9, %p7146_p8 }
  0x19   :  { %7154 = shalt.err (!%p7151_p10)
}
  0x1a   :  { %s7155_s12 = scalar_lea.vmem %s30_s30, 8192  ;;  %p7160_p12 = scmp.lt.s32.totalorder %s30_s30, %s30_s30 }
  0x1b   :  { %p7156_p11 = scmp.ne.s32.totalorder %s30_s30, %s7155_s12  ;;  %p7161_p13 = scmp.lt.s32.totalorder %s7155_s12, %s7155_s12 }
  0x1d   :  { %p7162_p0 = por %p7161_p13, %p7160_p12 }
  0x1f   :  { %p7163_p1 = pnand %p7162_p0, %p7156_p11 }
  0x21   :  { %7166 = shalt.err (!%p7163_p1)
}
  0x22   :  { %35 = dma.hbm_to_vmem [thread:$0]  %s11772_s1, 8192, %s30_s30, [#allocation6], %s7196_s25, %s7196_s25, %s7197_s26  }
  0x23   :  { %7189 = dma.done.wait [#allocation3], 8192  }
  0x24   :  { %7190 = vsyncadd [#allocation3], 4294959104 }
  0x25   :  { %7191 = dma.done.wait [#allocation6], 8192  }
  0x26   :  { %7192 = vsyncadd [#allocation6], 4294959104  ;;  %v7199_v0 = vmov 0.0   ;;  %vm64_vm0 = vcmask 261120   ;;  %v7259_v1 = vld [vmem:[%s11774_s3] sm:$0xff]  ;;  %v7264_v2 = vld [vmem:[%s11774_s3 + $0x8] sm:$0xff] }
  0x27   :  { %6276 = vmatprep.subr.mxu0 %v7199_v0  ;;  %6278 = vmatprep.mubr.msk.f32.mxu0 %vm64_vm0, %v7259_v1  ;;  %v7271_v3 = vld [vmem:[%s11774_s3 + $0x10] sm:$0xff]  ;;  %v7282_v4 = vld [vmem:[%s11774_s3 + $0x18] sm:$0xff]  ;;  %v7287_v5 = vld [vmem:[%s11774_s3 + $0x20] sm:$0xff]  ;;  %vm598_vm2 = vcmask 1041409   ;;  %vm601_vm3 = vcmask 1042434   ;;  %vm604_vm4 = vcmask 1043459  }
  0x28   :  { %6277 = vmatpush3.msra.mxu0 %v7199_v0  ;;  %6310 = vmatprep.mubr.msk.f32.mxu1 %vm64_vm0, %v7259_v1  ;;  %v7296_v6 = vld [vmem:[%s11774_s3 + $0x28] sm:$0xff]  ;;  %v7301_v7 = vld [vmem:[%s11774_s3 + $0x30] sm:$0xff]  ;;  %v7310_v8 = vld [vmem:[%s11774_s3 + $0x38] sm:$0xff]  ;;  %vm607_vm5 = vcmask 1044484   ;;  %vm610_vm6 = vcmask 1045509   ;;  %vm613_vm7 = vcmask 1046534  }
  0x29   :  { %6279 = vmatmul.mubr.msk.f32.vlgmr.msra.gmra.mrb[0].mxu0 %vm64_vm0, %v7264_v2  ;;  %v7315_v9 = vld [vmem:[%s11774_s3 + $0x40] sm:$0xff]  ;;  %v7324_v10 = vld [vmem:[%s11774_s3 + $0x48] sm:$0xff]  ;;  %v7329_v11 = vld [vmem:[%s11774_s3 + $0x50] sm:$0xff]  ;;  %vm616_vm8 = vcmask 1047559  }
  0x2a   :  { %6281 = vmatprep.mubr.msk.f32.mxu0 %vm64_vm0, %v7271_v3  ;;  %v7338_v12 = vld [vmem:[%s11774_s3 + $0x58] sm:$0xff]  ;;  %v7343_v13 = vld [vmem:[%s11774_s3 + $0x60] sm:$0xff]  ;;  %v7352_v14 = vld [vmem:[%s11774_s3 + $0x68] sm:$0xff] }
  0x2b   :  { %v7357_v15 = vld [vmem:[%s11774_s3 + $0x70] sm:$0xff]  ;;  %v7366_v16 = vld [vmem:[%s11774_s3 + $0x78] sm:$0xff]  ;;  %v259_v17 = vld [vmem:[#allocation2 + $0x8] sm:$0xff] }
  0x2c   :  { %v258_v18 = vld [vmem:[#allocation2] sm:$0xff]  ;;  %v261_v23 = vld [vmem:[#allocation2 + $0x18] sm:$0xff]  ;;  %v260_v25 = vld [vmem:[#allocation2 + $0x10] sm:$0xff] }
  0x2d   :  { %6282 = vmatmul.mubr.msk.f32.gmra.mrb[2].mxu0 %vm64_vm0, %v7282_v4  ;;  %v263_v34 = vld [vmem:[#allocation2 + $0x28] sm:$0xff]  ;;  %v262_v36 = vld [vmem:[#allocation2 + $0x20] sm:$0xff]  ;;  %v265_v37 = vld [vmem:[#allocation2 + $0x38] sm:$0xff] }
  0x2e   :  { %6284 = vmatprep.mubr.msk.f32.mxu0 %vm64_vm0, %v7287_v5  ;;  %v264_v39 = vld [vmem:[#allocation2 + $0x30] sm:$0xff]  ;;  %v276_v45 = vld [vmem:[#allocation5 + $0x1c8] sm:$0xff]  ;;  %v275_v48 = vld [vmem:[#allocation5 + $0x1c0] sm:$0xff] }
  0x2f   :  { %v278_v57 = vld [vmem:[#allocation5 + $0x1d8] sm:$0xff]  ;;  %v277_v60 = vld [vmem:[#allocation5 + $0x1d0] sm:$0xff] }
  0x31   :  { %6285 = vmatmul.mubr.msk.f32.gmra.mrb[4].mxu0 %vm64_vm0, %v7296_v6 }
  0x32   :  { %6287 = vmatprep.mubr.msk.f32.mxu0 %vm64_vm0, %v7301_v7 }
  0x35   :  { %6288 = vmatmul.mubr.msk.f32.gmra.mrb[6].mxu0 %vm64_vm0, %v7310_v8 }
  0x36   :  { %6290 = vmatprep.mubr.msk.f32.mxu0 %vm64_vm0, %v7315_v9 }
  0x39   :  { %6291 = vmatmul.mubr.msk.f32.gmra.mrb[8].mxu0 %vm64_vm0, %v7324_v10 }
  0x3a   :  { %6293 = vmatprep.mubr.msk.f32.mxu0 %vm64_vm0, %v7329_v11 }
  0x3d   :  { %6294 = vmatmul.mubr.msk.f32.gmra.mrb[10].mxu0 %vm64_vm0, %v7338_v12 }
  0x3e   :  { %6296 = vmatprep.mubr.msk.f32.mxu0 %vm64_vm0, %v7343_v13 }
  0x41   :  { %6297 = vmatmul.mubr.msk.f32.gmra.mrb[12].mxu0 %vm64_vm0, %v7352_v14 }
  0x42   :  { %6299 = vmatprep.mubr.msk.f32.mxu0 %vm64_vm0, %v7357_v15 }
  0x45   :  { %6300 = vmatmul.mubr.msk.f32.gmra.mrb[14].mxu0 %vm64_vm0, %v7366_v16 }
  0x46   :  { %6342 = vmatprep.mubr.msk.f32.mxu0 %vm64_vm0, %v7259_v1 }
  0xfc   :  { %v6280_v19 = vpop.f32.mrb[0].mxu0 }
  0xfd   :  { %v267_v20 = vadd.f32 %v6280_v19, %v259_v17  ;;  %v179_v21 = vpop.f32.mrb[1].mxu0 }
  0xfe   :  { %v266_v22 = vadd.f32 %v258_v18, %v179_v21 }
  0xff   :  { %v5916_v24 = vmul.f32 -1.442695, %v267_v20 }
 0x100   :  { %v5915_v26 = vmul.f32 -1.442695, %v266_v22  ;;  %v6283_v27 = vpop.f32.mrb[2].mxu0  ;;  %v280_v22 = vld [vmem:[#allocation5 + $0x1e8] sm:$0xff] }
 0x101   :  { %6588 = vpow2.f32 %v5916_v24  ;;  %v269_v28 = vadd.f32 %v6283_v27, %v261_v23  ;;  %v189_v29 = vpop.f32.mrb[3].mxu0 }
 0x102   :  { %6590 = vpow2.f32 %v5915_v26  ;;  %v268_v30 = vadd.f32 %v260_v25, %v189_v29  ;;  %v279_v25 = vld [vmem:[#allocation5 + $0x1e0] sm:$0xff] }
 0x103   :  { %v5918_v31 = vmul.f32 -1.442695, %v269_v28 }
 0x104   :  { %v5917_v32 = vmul.f32 -1.442695, %v268_v30  ;;  %v6286_v33 = vpop.f32.mrb[4].mxu0  ;;  %v282_v30 = vld [vmem:[#allocation5 + $0x1f8] sm:$0xff] }
 0x105   :  { %6592 = vpow2.f32 %v5918_v31  ;;  %v199_v35 = vpop.f32.mrb[5].mxu0  ;;  %v271_v38 = vadd.f32 %v6286_v33, %v263_v34  ;;  %v281_v33 = vld [vmem:[#allocation5 + $0x1f0] sm:$0xff] }
 0x106   :  { %6594 = vpow2.f32 %v5917_v32  ;;  %v270_v40 = vadd.f32 %v262_v36, %v199_v35 }
 0x107   :  { %6596 = vtanh.f32 %v271_v38 }
 0x108   :  { %v6289_v41 = vpop.f32.mrb[6].mxu0  ;;  %6598 = vtanh.f32 %v270_v40 }
 0x109   :  { %v273_v42 = vadd.f32 %v6289_v41, %v265_v37  ;;  %v209_v43 = vpop.f32.mrb[7].mxu0 }
 0x10a   :  { %v272_v44 = vadd.f32 %v264_v39, %v209_v43 }
 0x10b   :  { %v6589_v46 = vpop.eup %6588  ;;  %v5920_v47 = vmul.f32 -1.442695, %v273_v42 }
 0x10c   :  { %v6591_v49 = vpop.eup %6590  ;;  %v298_v50 = vadd.f32 1.0, %v6589_v46  ;;  %v5919_v51 = vmul.f32 -1.442695, %v272_v44  ;;  %v6292_v52 = vpop.f32.mrb[8].mxu0 }
 0x10d   :  { %v297_v53 = vadd.f32 1.0, %v6591_v49  ;;  %6600 = vpow2.f32 %v5920_v47  ;;  %v284_v54 = vadd.f32 %v6292_v52, %v276_v45  ;;  %v219_v55 = vpop.f32.mrb[9].mxu0 }
 0x10e   :  { %6602 = vrcp.f32 %v298_v50  ;;  %v283_v56 = vadd.f32 %v275_v48, %v219_v55 }
 0x10f   :  { %v6593_v58 = vpop.eup %6592  ;;  %6604 = vrcp.f32 %v297_v53  ;;  %v5922_v59 = vmul.f32 -1.442695, %v284_v54 }
 0x110   :  { %v6595_v61 = vpop.eup %6594  ;;  %v310_v62 = vadd.f32 1.0, %v6593_v58  ;;  %6606 = vpow2.f32 %v5919_v51  ;;  %v5921_v63 = vmul.f32 -1.442695, %v283_v56  ;;  %v6295_v0 = vpop.f32.mrb[10].mxu0 }
 0x111   :  { %v309_v17 = vadd.f32 1.0, %v6595_v61  ;;  %6608 = vpow2.f32 %v5922_v59  ;;  %v286_v18 = vadd.f32 %v6295_v0, %v278_v57  ;;  %v229_v19 = vpop.f32.mrb[11].mxu0  ;;  %v6597_v26 = vpop.eup %6596 }
 0x112   :  { %6610 = vrcp.f32 %v310_v62  ;;  %v285_v20 = vadd.f32 %v277_v60, %v229_v19  ;;  %v6599_v28 = vpop.eup %6598 }
 0x113   :  { %6612 = vrcp.f32 %v309_v17  ;;  %v5924_v21 = vmul.f32 -1.442695, %v286_v18 }
 0x114   :  { %6614 = vpow2.f32 %v5921_v63  ;;  %v5923_v23 = vmul.f32 -1.442695, %v285_v20  ;;  %v6298_v24 = vpop.f32.mrb[12].mxu0 }
 0x115   :  { %6616 = vpow2.f32 %v5924_v21  ;;  %v239_v27 = vpop.f32.mrb[13].mxu0  ;;  %v288_v29 = vadd.f32 %v6298_v24, %v280_v22  ;;  %v7381_v24 = vld [vmem:[%s11773_s2] sm:$0xff] }
 0x116   :  { %6618 = vpow2.f32 %v5923_v23  ;;  %v287_v32 = vadd.f32 %v279_v25, %v239_v27  ;;  %vm63_vm1 = vcmp.ne.s32.totalorder %v7381_v24, 0 }
 0x117   :  { %v6601_v31 = vpop.eup %6600  ;;  %6620 = vtanh.f32 %v288_v29 }
 0x118   :  { %v6603_v34 = vpop.eup %6602  ;;  %v324_v35 = vadd.f32 1.0, %v6601_v31  ;;  %v6301_v36 = vpop.f32.mrb[14].mxu0  ;;  %6622 = vtanh.f32 %v287_v32 }
 0x119   :  { %v6605_v37 = vpop.eup %6604  ;;  %v332_v38 = vmul.f32 %v6603_v34, %v6597_v26  ;;  %v290_v39 = vadd.f32 %v6301_v36, %v282_v30  ;;  %v249_v40 = vpop.f32.mrb[15].mxu0 }
 0x11a   :  { %v6607_v41 = vpop.eup %6606  ;;  %v331_v42 = vmul.f32 %v6605_v37, %v6599_v28  ;;  %v289_v43 = vadd.f32 %v281_v33, %v249_v40  ;;  %6624 = vrcp.f32 %v324_v35 }
 0x11b   :  { %v6609_v44 = vpop.eup %6608  ;;  %v323_v45 = vadd.f32 1.0, %v6607_v41  ;;  %v5926_v46 = vmul.f32 -1.442695, %v290_v39 }
 0x11c   :  { %v6611_v47 = vpop.eup %6610  ;;  %v346_v48 = vadd.f32 1.0, %v6609_v44  ;;  %v5925_v49 = vmul.f32 -1.442695, %v289_v43 }
 0x11d   :  { %v6613_v50 = vpop.eup %6612  ;;  %v330_v51 = vmul.f32 0.0, %v6611_v47  ;;  %6626 = vrcp.f32 %v323_v45 }
 0x11e   :  { %v6615_v52 = vpop.eup %6614  ;;  %v329_v53 = vmul.f32 0.0, %v6613_v50  ;;  %6628 = vrcp.f32 %v346_v48 }
 0x11f   :  { %v6617_v54 = vpop.eup %6616  ;;  %v7372_v55 = vadd.f32 %v332_v38, %v330_v51  ;;  %v345_v56 = vadd.f32 1.0, %v6615_v52  ;;  %6630 = vpow2.f32 %v5926_v46 }
 0x120   :  { %v6619_v57 = vpop.eup %6618  ;;  %v7374_v58 = vadd.f32 %v331_v42, %v329_v53  ;;  %v358_v59 = vadd.f32 1.0, %v6617_v54  ;;  %6632 = vpow2.f32 %v5925_v49 }
 0x121   :  { %6634 = vtanh.f32 %v7372_v55  ;;  %v357_v60 = vadd.f32 1.0, %v6619_v57  ;;  %v6621_v61 = vpop.eup %6620 }
 0x122   :  { %6636 = vtanh.f32 %v7374_v58  ;;  %v6623_v62 = vpop.eup %6622 }
 0x123   :  { %6638 = vrcp.f32 %v345_v56 }
 0x124   :  { %6640 = vrcp.f32 %v358_v59  ;;  %v6625_v63 = vpop.eup %6624 }
 0x125   :  { %6642 = vrcp.f32 %v357_v60 }
 0x127   :  { %v6627_v0 = vpop.eup %6626 }
 0x128   :  { %v6629_v17 = vpop.eup %6628 }
 0x129   :  { %v6631_v18 = vpop.eup %6630  ;;  %v380_v19 = vmul.f32 %v6629_v17, %v6621_v61 }
 0x12a   :  { %v6633_v20 = vpop.eup %6632  ;;  %v372_v22 = vadd.f32 1.0, %v6631_v18 }
 0x12b   :  { %v6635_v21 = vpop.eup %6634  ;;  %v371_v26 = vadd.f32 1.0, %v6633_v20 }
 0x12c   :  { %v6637_v23 = vpop.eup %6636  ;;  %v338_v25 = vmul.f32 %v6635_v21, %v6625_v63  ;;  %6644 = vrcp.f32 %v372_v22 }
 0x12d   :  { %v6639_v27 = vpop.eup %6638  ;;  %v337_v28 = vmul.f32 %v6637_v23, %v6627_v0  ;;  %6646 = vrcp.f32 %v371_v26 }
 0x12e   :  { %v6641_v29 = vpop.eup %6640  ;;  %v379_v30 = vmul.f32 %v6639_v27, %v6623_v62  ;;  %v398_v38 = vrot.slane %v338_v25, 1  ;;  %v399_v39 = vrot.slane %v338_v25, 2  ;;  %v400_v43 = vrot.slane %v338_v25, 3 }
 0x12f   :  { %v6643_v31 = vpop.eup %6642  ;;  %v378_v32 = vmul.f32 0.0, %v6641_v29  ;;  %v391_v34 = vrot.slane %v337_v28, 1  ;;  %v392_v35 = vrot.slane %v337_v28, 2  ;;  %v393_v37 = vrot.slane %v337_v28, 3 }
 0x130   :  { %v377_v33 = vmul.f32 0.0, %v6643_v31  ;;  %v394_v41 = vrot.slane %v337_v28, 4  ;;  %v395_v42 = vrot.slane %v337_v28, 5  ;;  %v396_v44 = vrot.slane %v337_v28, 6 }
 0x131   :  { %v7384_v36 = vadd.f32 %v380_v19, %v378_v32  ;;  %v397_v45 = vrot.slane %v337_v28, 7  ;;  %v401_v46 = vrot.slane %v338_v25, 4  ;;  %v402_v47 = vrot.slane %v338_v25, 5 }
 0x132   :  { %v7386_v40 = vadd.f32 %v379_v30, %v377_v33  ;;  %v7392_v48 = vsel %vm63_vm1, %v391_v34, 0.0  ;;  %v7396_v49 = vsel %vm63_vm1, %v392_v35, 0.0  ;;  %v403_v50 = vrot.slane %v338_v25, 6 }
 0x133   :  { %6648 = vtanh.f32 %v7384_v36  ;;  %12071 = vst [vmem:[#allocation11_spill] sm:$0xff] %v7392_v48  ;;  %v404_v51 = vrot.slane %v338_v25, 7  ;;  %v7400_v52 = vsel %vm63_vm1, %v337_v28, 0.0  ;;  %v7404_v53 = vsel %vm63_vm1, %v393_v37, 0.0 }
 0x134   :  { %6650 = vtanh.f32 %v7386_v40  ;;  %v7408_v54 = vsel %vm63_vm1, %v394_v41, 0.0  ;;  %v7412_v56 = vsel %vm63_vm1, %v395_v42, 0.0  ;;  %v7416_v57 = vsel %vm63_vm1, %v398_v38, 0.0 }
 0x135   :  { %12072 = vst [vmem:[#allocation12_spill] sm:$0xff] %v7416_v57  ;;  %v7420_v59 = vsel %vm63_vm1, %v399_v39, 0.0  ;;  %v7424_v60 = vsel %vm63_vm1, %v396_v44, 0.0  ;;  %v7428_v61 = vsel %vm63_vm1, %v397_v45, 0.0  ;;  %v11777_v62 = vrot.slane %v7392_v48, 7 }
 0x136   :  { %v600_v63 = vrot.slane %v7396_v49, 6  ;;  %v7434_v0 = vsel %vm63_vm1, %v338_v25, 0.0  ;;  %v7438_v17 = vsel %vm63_vm1, %v400_v43, 0.0  ;;  %v7442_v18 = vsel %vm63_vm1, %v401_v46, 0.0  ;;  %v6645_v20 = vpop.eup %6644 }
 0x137   :  { %v7446_v19 = vsel %vm63_vm1, %v402_v47, 0.0  ;;  %v599_v21 = vsel %vm598_vm2, %v11777_v62, %v7400_v52  ;;  %v603_v22 = vrot.slane %v7404_v53, 5  ;;  %v11776_v23 = vrot.slane %v7416_v57, 7  ;;  %v6647_v26 = vpop.eup %6646 }
 0x138   :  { %v620_v25 = vrot.slane %v7420_v59, 6  ;;  %v7457_v27 = vsel %vm63_vm1, %v403_v50, 0.0  ;;  %v7461_v28 = vsel %vm63_vm1, %v404_v51, 0.0  ;;  %v602_v29 = vsel %vm601_vm3, %v600_v63, %v599_v21 }
 0x139   :  { %v606_v30 = vrot.slane %v7408_v54, 4  ;;  %v605_v31 = vsel %vm604_vm4, %v603_v22, %v602_v29  ;;  %v609_v32 = vrot.slane %v7412_v56, 3  ;;  %v619_v33 = vsel %vm598_vm2, %v11776_v23, %v7434_v0 }
 0x13a   :  { %v622_v34 = vrot.slane %v7438_v17, 5  ;;  %v612_v37 = vrot.slane %v7424_v60, 2  ;;  %v621_v38 = vsel %vm601_vm3, %v620_v25, %v619_v33  ;;  %v624_v39 = vrot.slane %v7442_v18, 4 }
 0x13b   :  { %v608_v35 = vsel %vm607_vm5, %v606_v30, %v605_v31  ;;  %v615_v43 = vrot.slane %v7428_v61, 1  ;;  %v626_v45 = vrot.slane %v7446_v19, 3  ;;  %v628_v63 = vrot.slane %v7457_v27, 2 }
 0x13c   :  { %v611_v42 = vsel %vm610_vm6, %v609_v32, %v608_v35  ;;  %v623_v44 = vsel %vm604_vm4, %v622_v34, %v621_v38  ;;  %v630_v29 = vrot.slane %v7461_v28, 1 }
 0x13d   :  { %v6649_v41 = vpop.eup %6648  ;;  %v614_v50 = vsel %vm613_vm7, %v612_v37, %v611_v42  ;;  %v625_v51 = vsel %vm607_vm5, %v624_v39, %v623_v44 }
 0x13e   :  { %v6651_v46 = vpop.eup %6650  ;;  %v7480_v47 = vmul.f32 %v6649_v41, %v6645_v20  ;;  %v617_v22 = vsel %vm616_vm8, %v615_v43, %v614_v50  ;;  %v627_v25 = vsel %vm610_vm6, %v626_v45, %v625_v51 }
 0x13f   :  { %v385_v21 = vmul.f32 %v6651_v46, %v6647_v26  ;;  %v629_v30 = vsel %vm613_vm7, %v628_v63, %v627_v25 }
 0x140   :  { %v631_v31 = vsel %vm616_vm8, %v630_v29, %v629_v30  ;;  %v494_v35 = vrot.slane %v7480_v47, 1  ;;  %v495_v38 = vrot.slane %v7480_v47, 2  ;;  %v496_v39 = vrot.slane %v7480_v47, 3 }
 0x141   :  { %v6526_v32 = vpack.c.bf16 %v631_v31, %v617_v22  ;;  %v487_v20 = vrot.slane %v385_v21, 1  ;;  %v488_v33 = vrot.slane %v385_v21, 2  ;;  %v489_v34 = vrot.slane %v385_v21, 3 }
 0x142   :  { %v490_v37 = vrot.slane %v385_v21, 4  ;;  %v491_v26 = vrot.slane %v385_v21, 5  ;;  %v492_v41 = vrot.slane %v385_v21, 6  ;;  %v493_v42 = vrot.slane %v385_v21, 7 }
 0x143   :  { %6527 = vmatprep.subr.bf16.mxu1 %v6526_v32  ;;  %v497_v43 = vrot.slane %v7480_v47, 4  ;;  %v498_v44 = vrot.slane %v7480_v47, 5  ;;  %v7497_v45 = vsel %vm63_vm1, %v487_v20, 0.0  ;;  %v7501_v46 = vsel %vm63_vm1, %v488_v33, 0.0 }
 0x144   :  { %6529 = vmatpush3.bf16.msra.mxu1 %v6526_v32  ;;  %v7505_v50 = vsel %vm63_vm1, %v489_v34, 0.0  ;;  %v499_v51 = vrot.slane %v7480_v47, 6  ;;  %v500_v63 = vrot.slane %v7480_v47, 7  ;;  %v7511_v22 = vsel %vm63_vm1, %v494_v35, 0.0 }
 0x145   :  { %12073 = vst [vmem:[#allocation13_spill] sm:$0xff] %v7511_v22  ;;  %v7515_v25 = vsel %vm63_vm1, %v490_v37, 0.0  ;;  %v7519_v29 = vsel %vm63_vm1, %v491_v26, 0.0  ;;  %v7523_v30 = vsel %vm63_vm1, %v495_v38, 0.0  ;;  %v7527_v31 = vsel %vm63_vm1, %v496_v39, 0.0 }
 0x146   :  { %12074 = vst [vmem:[#allocation14_spill] sm:$0xff] %v7523_v30  ;;  %12075 = vst [vmem:[#allocation15_spill] sm:$0xff] %v7527_v31  ;;  %v7531_v32 = vsel %vm63_vm1, %v492_v41, 0.0  ;;  %v650_v20 = vrot.slane %v7497_v45, 7  ;;  %v651_v33 = vrot.slane %v7501_v46, 6  ;;  %v653_v34 = vrot.slane %v7505_v50, 5 }
 0x147   :  { %12076 = vst [vmem:[#allocation16_spill] sm:$0xff] %v7531_v32  ;;  %v7538_v35 = vsel %vm63_vm1, %v493_v42, 0.0  ;;  %v7542_v37 = vsel %vm63_vm1, %v497_v43, 0.0  ;;  %v7546_v26 = vsel %vm63_vm1, %v498_v44, 0.0  ;;  %v664_v38 = vrot.slane %v7511_v22, 7 }
 0x148   :  { %12077 = vst [vmem:[#allocation17_spill] sm:$0xff] %v7538_v35  ;;  %12078 = vst [vmem:[#allocation18_spill] sm:$0xff] %v7542_v37  ;;  %v652_v39 = vsel %vm598_vm2, %v651_v33, %v650_v20  ;;  %v655_v41 = vrot.slane %v7515_v25, 4  ;;  %v665_v23 = vrot.slane %v7523_v30, 6  ;;  %v667_v62 = vrot.slane %v7527_v31, 5 }
 0x149   :  { %12079 = vst [vmem:[#allocation19_spill] sm:$0xff] %v7546_v26  ;;  %v7555_v42 = vsel %vm63_vm1, %v499_v51, 0.0  ;;  %v7559_v43 = vsel %vm63_vm1, %v500_v63, 0.0  ;;  %v654_v44 = vsel %vm601_vm3, %v653_v34, %v652_v39  ;;  %v657_v22 = vrot.slane %v7519_v29, 3 }
 0x14a   :  { %12080 = vst [vmem:[#allocation20_spill] sm:$0xff] %v7555_v42  ;;  %12081 = vst [vmem:[#allocation21_spill] sm:$0xff] %v7559_v43  ;;  %v656_v20 = vsel %vm604_vm4, %v655_v41, %v654_v44  ;;  %v659_v33 = vrot.slane %v7531_v32, 2  ;;  %v666_v30 = vsel %vm598_vm2, %v665_v23, %v664_v38  ;;  %v669_v31 = vrot.slane %v7542_v37, 4 }
 0x14b   :  { %v658_v57 = vsel %vm607_vm5, %v657_v22, %v656_v20  ;;  %v11784_v51 = vrot.slane %v7538_v35, 1  ;;  %v668_v48 = vsel %vm601_vm3, %v667_v62, %v666_v30  ;;  %v671_v63 = vrot.slane %v7546_v26, 3  ;;  %v844_v35 = vld [vmem:[#allocation5 + $0x188] sm:$0xff] }
 0x14c   :  { %v660_v34 = vsel %vm610_vm6, %v659_v33, %v658_v57  ;;  %v670_v39 = vsel %vm604_vm4, %v669_v31, %v668_v48  ;;  %v673_v41 = vrot.slane %v7555_v42, 2  ;;  %v7576_v44 = vsel %vm63_vm1, %v385_v21, 0.0 }
 0x14d   :  { %12082 = vst [vmem:[#allocation22_spill] sm:$0xff] %v7576_v44  ;;  %v662_v23 = vsel %vm613_vm7, %v11784_v51, %v660_v34  ;;  %v672_v22 = vsel %vm607_vm5, %v671_v63, %v670_v39  ;;  %v11783_v62 = vrot.slane %v7559_v43, 1  ;;  %v7589_v48 = vsel %vm63_vm1, %v7480_v47, 0.0 }
 0x14e   :  { %v663_v30 = vsel %vm616_vm8, %v7576_v44, %v662_v23  ;;  %v674_v57 = vsel %vm610_vm6, %v673_v41, %v672_v22  ;;  %12083 = vst [vmem:[#allocation23_spill] sm:$0xff] %v7589_v48 }
 0x14f   :  { %v676_v21 = vsel %vm613_vm7, %v11783_v62, %v674_v57  ;;  %v441_v57 = vrot.slane %v7374_v58, 3 }
 0x150   :  { %v677_v31 = vsel %vm616_vm8, %v7589_v48, %v676_v21 }
 0x151   :  { %v6530_v38 = vpack.c.bf16 %v677_v31, %v663_v30 }
 0x153   :  { %6531 = vmatprep.subr.bf16.mxu1 %v6530_v38 }
 0x154   :  { %6533 = vmatpush3.bf16.msra.mxu1 %v6530_v38 }
 0x157   :  { %6311 = vmatmul.mubr.msk.f32.vlgmr.msra.gmra.mrb[0].mxu1 %vm64_vm0, %v7264_v2  ;;  %v446_v2 = vrot.slane %v7372_v55, 1 }
 0x158   :  { %6313 = vmatprep.mubr.msk.f32.mxu1 %vm64_vm0, %v7271_v3  ;;  %v447_v3 = vrot.slane %v7372_v55, 2 }
 0x15b   :  { %6314 = vmatmul.mubr.msk.f32.gmra.mrb[2].mxu1 %vm64_vm0, %v7282_v4  ;;  %v7632_v4 = vsel %vm63_vm1, %v446_v2, 0.0  ;;  %v444_v2 = vrot.slane %v7374_v58, 6 }
 0x15c   :  { %6316 = vmatprep.mubr.msk.f32.mxu1 %vm64_vm0, %v7287_v5  ;;  %v7636_v5 = vsel %vm63_vm1, %v447_v3, 0.0  ;;  %v7697_v3 = vsel %vm63_vm1, %v7374_v58, 0.0 }
 0x15d   :  { %12086 = vst [vmem:[#allocation26_spill] sm:$0xff] %v7697_v3 }
 0x15f   :  { %6317 = vmatmul.mubr.msk.f32.gmra.mrb[4].mxu1 %vm64_vm0, %v7296_v6  ;;  %v11786_v6 = vrot.slane %v7632_v4, 7 }
 0x160   :  { %6319 = vmatprep.mubr.msk.f32.mxu1 %vm64_vm0, %v7301_v7  ;;  %v448_v7 = vrot.slane %v7372_v55, 3 }
 0x163   :  { %6320 = vmatmul.mubr.msk.f32.gmra.mrb[6].mxu1 %vm64_vm0, %v7310_v8  ;;  %v929_v8 = vrot.slane %v7636_v5, 6 }
 0x164   :  { %6322 = vmatprep.mubr.msk.f32.mxu1 %vm64_vm0, %v7315_v9  ;;  %v439_v9 = vrot.slane %v7374_v58, 1 }
 0x166   :  { %v7663_v20 = vsel %vm63_vm1, %v439_v9, 0.0 }
 0x167   :  { %6323 = vmatmul.mubr.msk.f32.gmra.mrb[8].mxu1 %vm64_vm0, %v7324_v10  ;;  %v449_v10 = vrot.slane %v7372_v55, 4  ;;  %12084 = vst [vmem:[#allocation24_spill] sm:$0xff] %v7663_v20  ;;  %v11785_v22 = vrot.slane %v7663_v20, 7 }
 0x168   :  { %6325 = vmatprep.mubr.msk.f32.mxu1 %vm64_vm0, %v7329_v11 }
 0x169   :  { %v7667_v33 = vsel %vm63_vm1, %v449_v10, 0.0 }
 0x16a   :  { %v933_v30 = vrot.slane %v7667_v33, 4 }
 0x16b   :  { %6326 = vmatmul.mubr.msk.f32.gmra.mrb[10].mxu1 %vm64_vm0, %v7338_v12  ;;  %v450_v12 = vrot.slane %v7372_v55, 5 }
 0x16c   :  { %6328 = vmatprep.mubr.msk.f32.mxu1 %vm64_vm0, %v7343_v13  ;;  %v451_v13 = vrot.slane %v7372_v55, 6 }
 0x16d   :  { %v7672_v34 = vsel %vm63_vm1, %v450_v12, 0.0  ;;  %v914_v12 = vsel %vm598_vm2, %v11785_v22, %v7697_v3  ;;  %v828_v22 = vld [vmem:[#allocation2 + $0x50] sm:$0xff] }
 0x16e   :  { %v935_v21 = vrot.slane %v7672_v34, 3 }
 0x16f   :  { %6329 = vmatmul.mubr.msk.f32.gmra.mrb[12].mxu1 %vm64_vm0, %v7352_v14  ;;  %v7656_v14 = vsel %vm63_vm1, %v448_v7, 0.0 }
 0x170   :  { %6331 = vmatprep.mubr.msk.f32.mxu1 %vm64_vm0, %v7357_v15  ;;  %v452_v15 = vrot.slane %v7372_v55, 7  ;;  %v931_v63 = vrot.slane %v7656_v14, 5 }
 0x172   :  { %v7680_v39 = vsel %vm63_vm1, %v452_v15, 0.0 }
 0x173   :  { %6332 = vmatmul.mubr.msk.f32.gmra.mrb[14].mxu1 %vm64_vm0, %v7366_v16  ;;  %v440_v16 = vrot.slane %v7374_v58, 2 }
 0x174   :  { %6374 = vmatprep.mubr.msk.f32.mxu1 %vm64_vm0, %v7259_v1  ;;  %v7643_v1 = vsel %vm63_vm1, %v7372_v55, 0.0  ;;  %v7676_v55 = vsel %vm63_vm1, %v451_v13, 0.0  ;;  %v826_v13 = vld [vmem:[#allocation2 + $0x40] sm:$0xff] }
 0x175   :  { %v928_v11 = vsel %vm598_vm2, %v11786_v6, %v7643_v1  ;;  %v7685_v23 = vsel %vm63_vm1, %v440_v16, 0.0  ;;  %v937_v31 = vrot.slane %v7676_v55, 2  ;;  %v443_v16 = vrot.slane %v7374_v58, 5 }
 0x176   :  { %v930_v47 = vsel %vm601_vm3, %v929_v8, %v928_v11  ;;  %12085 = vst [vmem:[#allocation25_spill] sm:$0xff] %v7685_v23  ;;  %v915_v7 = vrot.slane %v7685_v23, 6  ;;  %v827_v8 = vld [vmem:[#allocation2 + $0x48] sm:$0xff]  ;;  %v442_v11 = vrot.slane %v7374_v58, 4 }
 0x177   :  { %v932_v41 = vsel %vm604_vm4, %v931_v63, %v930_v47  ;;  %v7712_v63 = vsel %vm63_vm1, %v441_v57, 0.0  ;;  %v829_v57 = vld [vmem:[#allocation2 + $0x58] sm:$0xff]  ;;  %v7735_v20 = vsel %vm63_vm1, %v443_v16, 0.0 }
 0x178   :  { %v934_v38 = vsel %vm607_vm5, %v933_v30, %v932_v41  ;;  %12087 = vst [vmem:[#allocation27_spill] sm:$0xff] %v7712_v63  ;;  %v916_v47 = vsel %vm601_vm3, %v915_v7, %v914_v12  ;;  %v7724_v41 = vsel %vm63_vm1, %v442_v11, 0.0  ;;  %12089 = vst [vmem:[#allocation29_spill] sm:$0xff] %v7735_v20 }
 0x179   :  { %v936_v62 = vsel %vm610_vm6, %v935_v21, %v934_v38  ;;  %12088 = vst [vmem:[#allocation28_spill] sm:$0xff] %v7724_v41  ;;  %v917_v21 = vrot.slane %v7712_v63, 5  ;;  %v919_v6 = vrot.slane %v7724_v41, 4  ;;  %v545_v41 = vrot.slane %v7384_v36, 4 }
 0x17b   :  { %v918_v51 = vsel %vm604_vm4, %v917_v21, %v916_v47  ;;  %v543_v21 = vrot.slane %v7384_v36, 2 }
 0x17c   :  { %v920_v47 = vsel %vm607_vm5, %v919_v6, %v918_v51 }
 0x22a   :  { %v6312_v30 = vpop.f32.mrb[0].mxu1 }
 0x22b   :  { %v835_v15 = vadd.f32 %v6312_v30, %v827_v8  ;;  %v746_v10 = vpop.f32.mrb[1].mxu1  ;;  %v831_v8 = vld [vmem:[#allocation2 + $0x68] sm:$0xff] }
 0x22c   :  { %v834_v9 = vadd.f32 %v826_v13, %v746_v10  ;;  %v445_v13 = vrot.slane %v7374_v58, 7 }
 0x22d   :  { %v5944_v30 = vmul.f32 -1.442695, %v835_v15  ;;  %v921_v15 = vrot.slane %v7735_v20, 3  ;;  %v832_v20 = vld [vmem:[#allocation2 + $0x70] sm:$0xff] }
 0x22e   :  { %v5943_v10 = vmul.f32 -1.442695, %v834_v9  ;;  %v6315_v12 = vpop.f32.mrb[2].mxu1  ;;  %v7741_v9 = vsel %vm63_vm1, %v444_v2, 0.0  ;;  %v7753_v51 = vsel %vm63_vm1, %v445_v13, 0.0  ;;  %v544_v2 = vrot.slane %v7384_v36, 3 }
 0x22f   :  { %6652 = vpow2.f32 %v5944_v30  ;;  %v837_v11 = vadd.f32 %v6315_v12, %v829_v57  ;;  %v756_v38 = vpop.f32.mrb[3].mxu1  ;;  %12090 = vst [vmem:[#allocation30_spill] sm:$0xff] %v7741_v9  ;;  %v542_v57 = vrot.slane %v7384_v36, 1  ;;  %v938_v30 = vsel %vm613_vm7, %v937_v31, %v936_v62  ;;  %12091 = vst [vmem:[#allocation31_spill] sm:$0xff] %v7753_v51 }
 0x230   :  { %6654 = vpow2.f32 %v5943_v10  ;;  %v836_v7 = vadd.f32 %v828_v22, %v756_v38  ;;  %v830_v38 = vld [vmem:[#allocation2 + $0x60] sm:$0xff]  ;;  %v922_v62 = vsel %vm610_vm6, %v921_v15, %v920_v47  ;;  %v923_v31 = vrot.slane %v7741_v9, 2 }
 0x231   :  { %v5946_v58 = vmul.f32 -1.442695, %v837_v11  ;;  %v7765_v13 = vsel %vm63_vm1, %v543_v21, 0.0  ;;  %v546_v21 = vrot.slane %v7384_v36, 5  ;;  %v547_v11 = vrot.slane %v7384_v36, 6 }
 0x232   :  { %v5945_v12 = vmul.f32 -1.442695, %v836_v7  ;;  %v6318_v10 = vpop.f32.mrb[4].mxu1  ;;  %v833_v7 = vld [vmem:[#allocation2 + $0x78] sm:$0xff]  ;;  %12093 = vst [vmem:[#allocation33_spill] sm:$0xff] %v7765_v13  ;;  %v924_v22 = vsel %vm613_vm7, %v923_v31, %v922_v62  ;;  %v7783_v31 = vsel %vm63_vm1, %v544_v2, 0.0 }
 0x233   :  { %6656 = vpow2.f32 %v5946_v58  ;;  %v766_v6 = vpop.f32.mrb[5].mxu1  ;;  %v839_v16 = vadd.f32 %v6318_v10, %v831_v8  ;;  %v7761_v58 = vsel %vm63_vm1, %v542_v57, 0.0  ;;  %v925_v8 = vrot.slane %v7753_v51, 1  ;;  %12095 = vst [vmem:[#allocation34_spill] sm:$0xff] %v7783_v31  ;;  %v846_v2 = vld [vmem:[#allocation5 + $0x198] sm:$0xff] }
 0x234   :  { %6658 = vpow2.f32 %v5945_v12  ;;  %12092 = vst [vmem:[#allocation32_spill] sm:$0xff] %v7761_v58  ;;  %v12094_v12 = vrot.slane %v7680_v39, 1  ;;  %v838_v47 = vadd.f32 %v830_v38, %v766_v6  ;;  %v1021_v63 = vrot.slane %v7761_v58, 7  ;;  %v843_v38 = vld [vmem:[#allocation5 + $0x180] sm:$0xff] }
 0x235   :  { %6660 = vtanh.f32 %v839_v16 }
 0x236   :  { %v7771_v15 = vsel %vm616_vm8, %v12094_v12, %v938_v30  ;;  %v6321_v10 = vpop.f32.mrb[6].mxu1  ;;  %v1022_v30 = vrot.slane %v7765_v13, 6  ;;  %6662 = vtanh.f32 %v838_v47  ;;  %v536_v47 = vrot.slane %v7386_v40, 2 }
 0x237   :  { %v841_v9 = vadd.f32 %v6321_v10, %v833_v7  ;;  %v776_v57 = vpop.f32.mrb[7].mxu1 }
 0x238   :  { %v840_v43 = vadd.f32 %v832_v20, %v776_v57  ;;  %v7786_v20 = vsel %vm616_vm8, %v925_v8, %v924_v22  ;;  %v1023_v23 = vsel %vm598_vm2, %v1022_v30, %v1021_v63 }
 0x239   :  { %v6653_v12 = vpop.eup %6652  ;;  %v5948_v6 = vmul.f32 -1.442695, %v841_v9  ;;  %v7790_v9 = vsel %vm63_vm1, %v545_v41, 0.0 }
 0x23a   :  { %v6655_v7 = vpop.eup %6654  ;;  %v866_v10 = vadd.f32 1.0, %v6653_v12  ;;  %v5947_v57 = vmul.f32 -1.442695, %v840_v43  ;;  %v6324_v58 = vpop.f32.mrb[8].mxu1  ;;  %12096 = vst [vmem:[#allocation35_spill] sm:$0xff] %v7790_v9  ;;  %v1024_v12 = vrot.slane %v7783_v31, 5 }
 0x23b   :  { %v865_v51 = vadd.f32 1.0, %v6655_v7  ;;  %6664 = vpow2.f32 %v5948_v6  ;;  %v852_v13 = vadd.f32 %v6324_v58, %v844_v35  ;;  %v786_v16 = vpop.f32.mrb[9].mxu1  ;;  %v535_v43 = vrot.slane %v7386_v40, 1  ;;  %v845_v35 = vld [vmem:[#allocation5 + $0x190] sm:$0xff] }
 0x23c   :  { %6666 = vrcp.f32 %v866_v10  ;;  %v851_v62 = vadd.f32 %v843_v38, %v786_v16  ;;  %v7798_v38 = vsel %vm63_vm1, %v546_v21, 0.0  ;;  %v1025_v10 = vsel %vm601_vm3, %v1024_v12, %v1023_v23 }
 0x23d   :  { %v6657_v22 = vpop.eup %6656  ;;  %6668 = vrcp.f32 %v865_v51  ;;  %v5950_v8 = vmul.f32 -1.442695, %v852_v13  ;;  %12097 = vst [vmem:[#allocation36_spill] sm:$0xff] %v7798_v38  ;;  %v537_v51 = vrot.slane %v7386_v40, 3  ;;  %v1026_v16 = vrot.slane %v7790_v9, 4  ;;  %v849_v9 = vld [vmem:[#allocation5 + $0x1b0] sm:$0xff] }
 0x23e   :  { %v6659_v58 = vpop.eup %6658  ;;  %v878_v6 = vadd.f32 1.0, %v6657_v22  ;;  %6670 = vpow2.f32 %v5947_v57  ;;  %v5949_v41 = vmul.f32 -1.442695, %v851_v62  ;;  %v6327_v7 = vpop.f32.mrb[10].mxu1  ;;  %v7805_v62 = vsel %vm63_vm1, %v535_v43, 0.0 }
 0x23f   :  { %v877_v63 = vadd.f32 1.0, %v6659_v58  ;;  %6672 = vpow2.f32 %v5950_v8  ;;  %v854_v30 = vadd.f32 %v6327_v7, %v846_v2  ;;  %v796_v13 = vpop.f32.mrb[11].mxu1  ;;  %12098 = vst [vmem:[#allocation37_spill] sm:$0xff] %v7805_v62  ;;  %v7809_v21 = vsel %vm63_vm1, %v536_v47, 0.0  ;;  %v848_v2 = vld [vmem:[#allocation5 + $0x1a8] sm:$0xff]  ;;  %v6661_v58 = vpop.eup %6660 }
 0x240   :  { %6674 = vrcp.f32 %v878_v6  ;;  %v853_v31 = vadd.f32 %v845_v35, %v796_v13  ;;  %12099 = vst [vmem:[#allocation38_spill] sm:$0xff] %v7809_v21  ;;  %v7813_v22 = vsel %vm63_vm1, %v547_v11, 0.0  ;;  %v1028_v23 = vrot.slane %v7798_v38, 3  ;;  %v847_v35 = vld [vmem:[#allocation5 + $0x1a0] sm:$0xff]  ;;  %v6663_v7 = vpop.eup %6662 }
 0x241   :  { %6676 = vrcp.f32 %v877_v63  ;;  %v5952_v57 = vmul.f32 -1.442695, %v854_v30  ;;  %v1027_v43 = vsel %vm604_vm4, %v1026_v16, %v1025_v10  ;;  %v538_v6 = vrot.slane %v7386_v40, 4  ;;  %v850_v30 = vld [vmem:[#allocation5 + $0x1b8] sm:$0xff] }
 0x242   :  { %6678 = vpow2.f32 %v5949_v41  ;;  %v5951_v12 = vmul.f32 -1.442695, %v853_v31  ;;  %v6330_v8 = vpop.f32.mrb[12].mxu1  ;;  %v7820_v47 = vsel %vm63_vm1, %v537_v51, 0.0  ;;  %v1007_v11 = vrot.slane %v7805_v62, 7 }
 0x243   :  { %6680 = vpow2.f32 %v5952_v57  ;;  %v806_v41 = vpop.f32.mrb[13].mxu1  ;;  %v1008_v63 = vrot.slane %v7809_v21, 6  ;;  %v856_v31 = vadd.f32 %v6330_v8, %v848_v2  ;;  %v12100_v57 = vrot.slane %v7384_v36, 7 }
 0x244   :  { %6682 = vpow2.f32 %v5951_v12  ;;  %v539_v51 = vrot.slane %v7386_v40, 5  ;;  %v855_v38 = vadd.f32 %v847_v35, %v806_v41  ;;  %v7833_v62 = vsel %vm607_vm5, %v1028_v23, %v1027_v43 }
 0x245   :  { %v6665_v13 = vpop.eup %6664  ;;  %v7828_v10 = vsel %vm63_vm1, %v12100_v57, 0.0  ;;  %v540_v2 = vrot.slane %v7386_v40, 6  ;;  %v541_v8 = vrot.slane %v7386_v40, 7  ;;  %v7839_v57 = vsel %vm63_vm1, %v538_v6, 0.0 }
 0x246   :  { %v6667_v12 = vpop.eup %6666  ;;  %v892_v3 = vadd.f32 1.0, %v6665_v13  ;;  %v6333_v21 = vpop.f32.mrb[14].mxu1  ;;  %v1010_v16 = vrot.slane %v7820_v47, 5  ;;  %v1009_v23 = vsel %vm598_vm2, %v1008_v63, %v1007_v11  ;;  %6684 = vtanh.f32 %v856_v31 }
 0x247   :  { %v6669_v48 = vpop.eup %6668  ;;  %v946_v42 = vmul.f32 %v6667_v12, %v6661_v58  ;;  %v858_v35 = vadd.f32 %v6333_v21, %v850_v30  ;;  %v816_v41 = vpop.f32.mrb[15].mxu1  ;;  %v7845_v32 = vsel %vm63_vm1, %v539_v51, 0.0  ;;  %6686 = vtanh.f32 %v855_v38 }
 0x248   :  { %v6671_v26 = vpop.eup %6670  ;;  %v945_v13 = vmul.f32 %v6669_v48, %v6663_v7  ;;  %v857_v43 = vadd.f32 %v849_v9, %v816_v41  ;;  %6688 = vrcp.f32 %v892_v3  ;;  %v7849_v21 = vsel %vm63_vm1, %v540_v2, 0.0 }
 0x249   :  { %v6673_v37 = vpop.eup %6672  ;;  %v891_v44 = vadd.f32 1.0, %v6671_v26  ;;  %v5954_v58 = vmul.f32 -1.442695, %v858_v35  ;;  %v7854_v26 = vsel %vm63_vm1, %v541_v8, 0.0  ;;  %v1011_v9 = vsel %vm601_vm3, %v1010_v16, %v1009_v23 }
 0x24a   :  { %v6675_v6 = vpop.eup %6674  ;;  %v960_v12 = vadd.f32 1.0, %v6673_v37  ;;  %v5953_v48 = vmul.f32 -1.442695, %v857_v43  ;;  %v1012_v37 = vrot.slane %v7839_v57, 4  ;;  %v1014_v3 = vrot.slane %v7845_v32, 3 }
 0x24b   :  { %v6677_v7 = vpop.eup %6676  ;;  %v944_v11 = vmul.f32 %v6675_v6, %v7771_v15  ;;  %6690 = vrcp.f32 %v891_v44  ;;  %v1016_v15 = vrot.slane %v7849_v21, 2 }
 0x24c   :  { %v6679_v38 = vpop.eup %6678  ;;  %v943_v63 = vmul.f32 %v6677_v7, %v7786_v20  ;;  %6692 = vrcp.f32 %v960_v12  ;;  %v1013_v16 = vsel %vm604_vm4, %v1012_v37, %v1011_v9  ;;  %v12105_v37 = vrot.slane %v7667_v33, 7 }
 0x24d   :  { %v6681_v31 = vpop.eup %6680  ;;  %v948_v30 = vadd.f32 %v946_v42, %v944_v11  ;;  %v959_v51 = vadd.f32 1.0, %v6679_v38  ;;  %6694 = vpow2.f32 %v5954_v58  ;;  %v12101_v58 = vrot.slane %v7643_v1, 7 }
 0x24e   :  { %v6683_v44 = vpop.eup %6682  ;;  %v7861_v2 = vadd.f32 %v945_v13, %v943_v63  ;;  %v972_v8 = vadd.f32 1.0, %v6681_v31  ;;  %6696 = vpow2.f32 %v5953_v48  ;;  %v1015_v48 = vsel %vm607_vm5, %v1014_v3, %v1013_v16 }
 0x24f   :  { %6698 = vtanh.f32 %v948_v30  ;;  %v971_v20 = vadd.f32 1.0, %v6683_v44  ;;  %v1134_v35 = vrot.slane %v948_v30, 7  ;;  %v1135_v41 = vrot.slane %v948_v30, 1 }
 0x250   :  { %6700 = vtanh.f32 %v7861_v2  ;;  %v1136_v23 = vrot.slane %v948_v30, 2  ;;  %v1137_v43 = vrot.slane %v948_v30, 3  ;;  %v1138_v42 = vrot.slane %v948_v30, 4  ;;  %v6685_v7 = vpop.eup %6684 }
 0x251   :  { %6702 = vrcp.f32 %v959_v51  ;;  %v1139_v6 = vrot.slane %v948_v30, 5  ;;  %v1140_v12 = vrot.slane %v948_v30, 6  ;;  %v7869_v13 = vsel %vm63_vm1, %v1134_v35, %v12101_v58  ;;  %v6687_v1 = vpop.eup %6686 }
 0x252   :  { %6704 = vrcp.f32 %v972_v8  ;;  %v12102_v11 = vrot.slane %v7636_v5, 7  ;;  %v12104_v38 = vrot.slane %v7656_v14, 7  ;;  %v7888_v31 = vsel %vm63_vm1, %v1137_v43, %v12105_v37  ;;  %v6689_v44 = vpop.eup %6688 }
 0x253   :  { %6706 = vrcp.f32 %v971_v20  ;;  %v12106_v5 = vrot.slane %v7672_v34, 7  ;;  %v12107_v14 = vrot.slane %v7676_v55, 7  ;;  %v12108_v33 = vrot.slane %v7813_v22, 2 }
 0x254   :  { %v7876_v9 = vsel %vm63_vm1, %v1135_v41, %v12102_v11  ;;  %v7882_v63 = vsel %vm63_vm1, %v1136_v23, %v12104_v38  ;;  %v12109_v16 = vrot.slane %v7680_v39, 7  ;;  %v1698_v20 = vrot.slane %v7869_v13, 1 }
 0x255   :  { %12103 = vst [vmem:[#allocation39_spill] sm:$0xff] %v7876_v9  ;;  %v7894_v3 = vsel %vm63_vm1, %v1138_v42, %v12106_v5  ;;  %v7900_v51 = vsel %vm63_vm1, %v1139_v6, %v12107_v14  ;;  %v1031_v8 = vsel %vm610_vm6, %v12108_v33, %v7833_v62  ;;  %v11810_v55 = vrot.slane %v7876_v9, 7  ;;  %v6691_v35 = vpop.eup %6690 }
 0x256   :  { %v7910_v34 = vsel %vm63_vm1, %v1140_v12, %v12109_v16  ;;  %v1091_v41 = vrot.slane %v7457_v27, 7  ;;  %v11812_v23 = vrot.slane %v7828_v10, 1  ;;  %v1017_v43 = vsel %vm610_vm6, %v1016_v15, %v1015_v48  ;;  %v6693_v62 = vpop.eup %6692 }
 0x257   :  { %v12110_v42 = vrot.slane %v7632_v4, 7  ;;  %v11811_v12 = vrot.slane %v7854_v26, 1  ;;  %v1702_v11 = vrot.slane %v7882_v63, 6  ;;  %v6695_v38 = vpop.eup %6694  ;;  %v1040_v4 = vmul.f32 %v6693_v62, %v6685_v7 }
 0x258   :  { %v1033_v15 = vsel %vm613_vm7, %v11812_v23, %v1031_v8  ;;  %v1704_v48 = vrot.slane %v7888_v31, 5  ;;  %v6697_v37 = vpop.eup %6696  ;;  %v986_v14 = vadd.f32 1.0, %v6695_v38  ;;  %v1706_v16 = vrot.slane %v7894_v3, 4 }
 0x259   :  { %v7921_v39 = vsel %vm63_vm1, %v948_v30, %v12110_v42  ;;  %v1019_v5 = vsel %vm613_vm7, %v11811_v12, %v1017_v43  ;;  %v7943_v7 = vsel %vm63_vm1, %v7384_v36, 0.0  ;;  %v985_v8 = vadd.f32 1.0, %v6697_v37 }
 0x25a   :  { %v1699_v58 = vsel %vm598_vm2, %v7921_v39, %v1698_v20  ;;  %v6699_v20 = vpop.eup %6698  ;;  %v1708_v62 = vrot.slane %v7900_v51, 3  ;;  %v1034_v43 = vsel %vm616_vm8, %v7943_v7, %v1033_v15  ;;  %6708 = vrcp.f32 %v986_v14 }
 0x25b   :  { %v1701_v30 = vsel %vm601_vm3, %v11810_v55, %v1699_v58  ;;  %v6701_v58 = vpop.eup %6700  ;;  %v7947_v55 = vmul.f32 %v6699_v20, %v6689_v44  ;;  %6710 = vrcp.f32 %v985_v8 }
 0x25c   :  { %v1703_v33 = vsel %vm604_vm4, %v1702_v11, %v1701_v30  ;;  %v7954_v11 = vsel %vm63_vm1, %v7386_v40, 0.0  ;;  %v6703_v36 = vpop.eup %6702  ;;  %v951_v30 = vmul.f32 %v6701_v58, %v6691_v35 }
 0x25d   :  { %v1705_v42 = vsel %vm607_vm5, %v1704_v48, %v1703_v33  ;;  %v1020_v48 = vsel %vm616_vm8, %v7954_v11, %v1019_v5  ;;  %v6705_v44 = vpop.eup %6704  ;;  %v1039_v33 = vmul.f32 %v6703_v36, %v6687_v1  ;;  %v1056_v15 = vrot.slane %v7947_v55, 7 }
 0x25e   :  { %v1707_v38 = vsel %vm610_vm6, %v1706_v16, %v1705_v42  ;;  %v1057_v20 = vrot.slane %v7947_v55, 1  ;;  %v6707_v40 = vpop.eup %6706  ;;  %v1038_v12 = vmul.f32 %v6705_v44, %v1034_v43  ;;  %v1049_v23 = vrot.slane %v951_v30, 7 }
 0x25f   :  { %v7960_v37 = vsel %vm613_vm7, %v1708_v62, %v1707_v38  ;;  %v1050_v16 = vrot.slane %v951_v30, 1  ;;  %v1051_v42 = vrot.slane %v951_v30, 2  ;;  %v1037_v35 = vmul.f32 %v6707_v40, %v1020_v48 }
 0x260   :  { %v1052_v58 = vrot.slane %v951_v30, 3  ;;  %v1053_v6 = vrot.slane %v951_v30, 4  ;;  %v1054_v5 = vrot.slane %v951_v30, 5  ;;  %v7964_v14 = vadd.f32 %v1040_v4, %v1038_v12 }
 0x261   :  { %v1055_v62 = vrot.slane %v951_v30, 6  ;;  %v1058_v38 = vrot.slane %v7947_v55, 2  ;;  %v1059_v1 = vrot.slane %v7947_v55, 3  ;;  %v7968_v8 = vadd.f32 %v1039_v33, %v1037_v35 }
 0x262   :  { %v1060_v36 = vrot.slane %v7947_v55, 4  ;;  %v1061_v43 = vrot.slane %v7947_v55, 5  ;;  %v12111_v44 = vrot.slane %v7400_v52, 7  ;;  %6712 = vtanh.f32 %v7964_v14 }
 0x263   :  { %v1062_v12 = vrot.slane %v7947_v55, 6  ;;  %v12112_v4 = vrot.slane %v7396_v49, 7  ;;  %v12114_v40 = vrot.slane %v7404_v53, 7  ;;  %6714 = vtanh.f32 %v7968_v8 }
 0x264   :  { %v7976_v48 = vsel %vm63_vm1, %v1049_v23, %v12111_v44  ;;  %v12115_v52 = vrot.slane %v7408_v54, 7  ;;  %v12116_v49 = vrot.slane %v7412_v56, 7  ;;  %v12117_v53 = vrot.slane %v7424_v60, 7 }
 0x265   :  { %v7984_v33 = vsel %vm63_vm1, %v1050_v16, %v12112_v4  ;;  %v7990_v35 = vsel %vm63_vm1, %v1051_v42, %v12114_v40  ;;  %v12118_v54 = vrot.slane %v7428_v61, 7  ;;  %v12119_v56 = vrot.slane %v7434_v0, 7 }
 0x266   :  { %12113 = vst [vmem:[#allocation40_spill] sm:$0xff] %v7984_v33  ;;  %v7997_v23 = vsel %vm63_vm1, %v1052_v58, %v12115_v52  ;;  %v8003_v16 = vsel %vm63_vm1, %v1053_v6, %v12116_v49  ;;  %v8009_v42 = vsel %vm63_vm1, %v1054_v5, %v12117_v53  ;;  %v12121_v60 = vrot.slane %v7420_v59, 7 }
 0x267   :  { %v8016_v58 = vsel %vm63_vm1, %v1055_v62, %v12118_v54  ;;  %v8022_v6 = vsel %vm63_vm1, %v1056_v15, %v12119_v56  ;;  %v12123_v4 = vrot.slane %v7438_v17, 7  ;;  %v12125_v62 = vrot.slane %v7442_v18, 7 }
 0x268   :  { %12120 = vst [vmem:[#allocation41_spill] sm:$0xff] %v8022_v6  ;;  %v8028_v5 = vsel %vm63_vm1, %v1057_v20, %v12121_v60  ;;  %v12127_v15 = vrot.slane %v7446_v19, 7  ;;  %v8052_v17 = vsel %vm63_vm1, %v1061_v43, %v1091_v41  ;;  %v6709_v20 = vpop.eup %6708  ;;  %v12130_v18 = vrot.slane %v7461_v28, 7  ;;  %v12132_v43 = vld [vmem:[#allocation11_spill] sm:$0xff]  ;;  %v12134_v60 = vld [vmem:[#allocation16_spill] sm:$0xff] }
 0x269   :  { %12122 = vst [vmem:[#allocation42_spill] sm:$0xff] %v8028_v5  ;;  %v8034_v61 = vsel %vm63_vm1, %v1058_v38, %v12123_v4  ;;  %v8040_v0 = vsel %vm63_vm1, %v1059_v1, %v12125_v62  ;;  %12129 = vst [vmem:[#allocation46_spill] sm:$0xff] %v8052_v17  ;;  %v1375_v19 = vrot.slane %v7976_v48, 1  ;;  %v6711_v40 = vpop.eup %6710  ;;  %v12133_v49 = vrot.slane %v12132_v43, 7  ;;  %v12135_v62 = vld [vmem:[#allocation12_spill] sm:$0xff] }
 0x26a   :  { %12124 = vst [vmem:[#allocation43_spill] sm:$0xff] %v8034_v61  ;;  %12126 = vst [vmem:[#allocation44_spill] sm:$0xff] %v8040_v0  ;;  %v8046_v59 = vsel %vm63_vm1, %v1060_v36, %v12127_v15  ;;  %v8059_v1 = vsel %vm63_vm1, %v1062_v12, %v12130_v18  ;;  %v11813_v36 = vrot.slane %v7984_v33, 7  ;;  %v1379_v53 = vrot.slane %v7990_v35, 6 }
 0x26b   :  { %12128 = vst [vmem:[#allocation45_spill] sm:$0xff] %v8046_v59  ;;  %12131 = vst [vmem:[#allocation47_spill] sm:$0xff] %v8059_v1  ;;  %v8070_v28 = vsel %vm63_vm1, %v951_v30, %v12133_v49  ;;  %v1389_v54 = vrot.slane %v8022_v6, 1  ;;  %v11814_v56 = vrot.slane %v8028_v5, 7  ;;  %v1240_v4 = vrot.slane %v12134_v60, 1  ;;  %v12139_v5 = vld [vmem:[#allocation13_spill] sm:$0xff] }
 0x26c   :  { %v1376_v12 = vsel %vm598_vm2, %v8070_v28, %v1375_v19  ;;  %v12136_v15 = vrot.slane %v12135_v62, 7  ;;  %v1381_v19 = vrot.slane %v7997_v23, 5  ;;  %v1383_v49 = vrot.slane %v8003_v16, 4 }
 0x26d   :  { %v1378_v30 = vsel %vm601_vm3, %v11813_v36, %v1376_v12  ;;  %v1393_v62 = vrot.slane %v8034_v61, 6  ;;  %v1395_v12 = vrot.slane %v8040_v0, 5  ;;  %v6713_v36 = vpop.eup %6712  ;;  %v1242_v33 = vrot.slane %v12139_v5, 1 }
 0x26e   :  { %v8083_v18 = vsel %vm63_vm1, %v7947_v55, %v12136_v15  ;;  %v1380_v43 = vsel %vm604_vm4, %v1379_v53, %v1378_v30  ;;  %v1385_v55 = vrot.slane %v8009_v42, 3  ;;  %v1387_v30 = vrot.slane %v8016_v58, 2  ;;  %v6715_v27 = vpop.eup %6714 }
 0x26f   :  { %12137 = vst [vmem:[#allocation11_spill] sm:$0xff] %v8083_v18  ;;  %v1390_v60 = vsel %vm598_vm2, %v8083_v18, %v1389_v54  ;;  %v1382_v41 = vsel %vm607_vm5, %v1381_v19, %v1380_v43  ;;  %v1397_v54 = vrot.slane %v8046_v59, 4  ;;  %v8104_v38 = vmul.f32 %v6713_v36, %v6709_v20  ;;  %v12140_v20 = vld [vmem:[#allocation14_spill] sm:$0xff] }
 0x270   :  { %v1392_v15 = vsel %vm601_vm3, %v11814_v56, %v1390_v60  ;;  %v1384_v53 = vsel %vm610_vm6, %v1383_v49, %v1382_v41  ;;  %v1399_v60 = vrot.slane %v8052_v17, 3  ;;  %v8109_v56 = vmul.f32 %v6715_v27, %v6711_v40  ;;  %v12143_v40 = vld [vmem:[#allocation19_spill] sm:$0xff] }
 0x271   :  { %v1394_v52 = vsel %vm604_vm4, %v1393_v62, %v1392_v15  ;;  %v1386_v19 = vsel %vm613_vm7, %v1385_v55, %v1384_v53  ;;  %v1401_v49 = vrot.slane %v8059_v1, 2  ;;  %v12138_v62 = vld [vmem:[#allocation22_spill] sm:$0xff]  ;;  %v1243_v36 = vrot.slane %v12140_v20, 1  ;;  %v12141_v53 = vld [vmem:[#allocation15_spill] sm:$0xff] }
 0x272   :  { %v1396_v43 = vsel %vm607_vm5, %v1395_v12, %v1394_v52  ;;  %v1388_v44 = vsel %vm616_vm8, %v1387_v30, %v1386_v19  ;;  %v1241_v15 = vrot.slane %v12138_v62, 1  ;;  %v1244_v52 = vrot.slane %v12141_v53, 1  ;;  %v12142_v12 = vld [vmem:[#allocation18_spill] sm:$0xff]  ;;  %v12144_v19 = vld [vmem:[#allocation20_spill] sm:$0xff] }
 0x273   :  { %v1398_v41 = vsel %vm610_vm6, %v1397_v54, %v1396_v43  ;;  %v1245_v17 = vrot.slane %v12142_v12, 1  ;;  %v1246_v27 = vrot.slane %v12143_v40, 1  ;;  %v1247_v54 = vrot.slane %v12144_v19, 1 }
 0x274   :  { %v1400_v55 = vsel %vm613_vm7, %v1399_v60, %v1398_v41  ;;  %v1205_v1 = vrot.slane %v8109_v56, 2  ;;  %v1206_v62 = vrot.slane %v8109_v56, 3  ;;  %v1207_v5 = vrot.slane %v8109_v56, 4 }
 0x275   :  { %v1402_v30 = vsel %vm616_vm8, %v1401_v49, %v1400_v55  ;;  %v1208_v20 = vrot.slane %v8109_v56, 5  ;;  %v1209_v60 = vrot.slane %v8109_v56, 6  ;;  %v1210_v41 = vrot.slane %v8109_v56, 7 }
 0x276   :  { %v6534_v43 = vpack.c.bf16 %v1402_v30, %v1388_v44  ;;  %v1211_v53 = vrot.slane %v8109_v56, 1  ;;  %v1212_v49 = vrot.slane %v8104_v38, 2  ;;  %v1213_v55 = vrot.slane %v8104_v38, 3 }
 0x277   :  { %v1214_v44 = vrot.slane %v8104_v38, 4  ;;  %v1215_v12 = vrot.slane %v8104_v38, 5  ;;  %v1216_v40 = vrot.slane %v8104_v38, 6  ;;  %v1217_v30 = vrot.slane %v8104_v38, 7 }
 0x278   :  { %6535 = vmatprep.subr.bf16.mxu0 %v6534_v43  ;;  %v1218_v19 = vrot.slane %v8104_v38, 1  ;;  %v12145_v59 = vrot.slane %v7497_v45, 1  ;;  %v12146_v61 = vrot.slane %v7501_v46, 1  ;;  %v12148_v6 = vrot.slane %v7515_v25, 1 }
 0x279   :  { %6537 = vmatpush3.bf16.msra.mxu0 %v6534_v43  ;;  %v12147_v43 = vrot.slane %v7505_v50, 1  ;;  %v12150_v46 = vrot.slane %v7519_v29, 1  ;;  %v8170_v50 = vsel %vm63_vm1, %v1210_v41, %v1240_v4  ;;  %v8178_v25 = vsel %vm63_vm1, %v1212_v49, %v1242_v33  ;;  %v12157_v41 = vld [vmem:[#allocation25_spill] sm:$0xff] }
 0x27a   :  { %v8141_v0 = vsel %vm63_vm1, %v1205_v1, %v12145_v59  ;;  %v8147_v18 = vsel %vm63_vm1, %v1206_v62, %v12146_v61  ;;  %v8159_v45 = vsel %vm63_vm1, %v1208_v20, %v12148_v6  ;;  %v12149_v59 = vld [vmem:[#allocation23_spill] sm:$0xff]  ;;  %12151 = vst [vmem:[#allocation16_spill] sm:$0xff] %v8170_v50  ;;  %v8174_v62 = vsel %vm63_vm1, %v1211_v53, %v1241_v15 }
 0x27b   :  { %v8153_v9 = vsel %vm63_vm1, %v1207_v5, %v12147_v43  ;;  %v1248_v1 = vrot.slane %v12149_v59, 1  ;;  %v8166_v61 = vsel %vm63_vm1, %v1209_v60, %v12150_v46  ;;  %v8182_v6 = vsel %vm63_vm1, %v1213_v55, %v1243_v36  ;;  %v12156_v5 = vld [vmem:[#allocation26_spill] sm:$0xff] }
 0x27c   :  { %12152 = vst [vmem:[#allocation12_spill] sm:$0xff] %v8182_v6  ;;  %v8186_v29 = vsel %vm63_vm1, %v1214_v44, %v1244_v52  ;;  %v8190_v4 = vsel %vm63_vm1, %v1215_v12, %v1245_v17  ;;  %v8194_v15 = vsel %vm63_vm1, %v1216_v40, %v1246_v27  ;;  %v8198_v33 = vsel %vm63_vm1, %v1217_v30, %v1247_v54  ;;  %v12158_v27 = vld [vmem:[#allocation27_spill] sm:$0xff] }
 0x27d   :  { %12153 = vst [vmem:[#allocation22_spill] sm:$0xff] %v8186_v29  ;;  %12154 = vst [vmem:[#allocation13_spill] sm:$0xff] %v8190_v4  ;;  %v8202_v36 = vsel %vm63_vm1, %v1218_v19, %v1248_v1  ;;  %v1157_v20 = vrot.slane %v12156_v5, 7  ;;  %v1421_v52 = vrot.slane %v8141_v0, 6  ;;  %v1422_v60 = vrot.slane %v8147_v18, 5 }
 0x27e   :  { %12155 = vst [vmem:[#allocation14_spill] sm:$0xff] %v8194_v15  ;;  %v1424_v17 = vrot.slane %v8153_v9, 4  ;;  %v1158_v53 = vrot.slane %v12157_v41, 7  ;;  %v1159_v49 = vrot.slane %v12158_v27, 7  ;;  %v1435_v55 = vrot.slane %v8178_v25, 6  ;;  %v12159_v41 = vld [vmem:[#allocation17_spill] sm:$0xff] }
 0x27f   :  { %v1710_v54 = vrot.slane %v7910_v34, 2  ;;  %v1423_v44 = vsel %vm598_vm2, %v1422_v60, %v1421_v52  ;;  %v1426_v12 = vrot.slane %v8159_v45, 3  ;;  %v1436_v40 = vrot.slane %v8182_v6, 5 }
 0x280   :  { %v1438_v30 = vrot.slane %v8186_v29, 4  ;;  %v1425_v19 = vsel %vm601_vm3, %v1424_v17, %v1423_v44  ;;  %v1428_v43 = vrot.slane %v8166_v61, 2  ;;  %v1127_v59 = vrot.slane %v7861_v2, 7 }
 0x281   :  { %v1128_v1 = vrot.slane %v7861_v2, 1  ;;  %v1427_v46 = vsel %vm604_vm4, %v1426_v12, %v1425_v19  ;;  %v11827_v5 = vrot.slane %v8170_v50, 1  ;;  %v1437_v52 = vsel %vm598_vm2, %v1436_v40, %v1435_v55  ;;  %v12165_v50 = vld [vmem:[#allocation30_spill] sm:$0xff] }
 0x282   :  { %v1440_v60 = vrot.slane %v8190_v4, 3  ;;  %v12160_v27 = vrot.slane %v12159_v41, 1  ;;  %v1429_v44 = vsel %vm607_vm5, %v1428_v43, %v1427_v46  ;;  %v1439_v29 = vsel %vm601_vm3, %v1438_v30, %v1437_v52  ;;  %v12161_v46 = vld [vmem:[#allocation21_spill] sm:$0xff]  ;;  %v12166_v4 = vld [vmem:[#allocation31_spill] sm:$0xff] }
 0x283   :  { %v1442_v6 = vrot.slane %v8194_v15, 2  ;;  %v1431_v12 = vsel %vm610_vm6, %v11827_v5, %v1429_v44  ;;  %v1433_v55 = vrot.slane %v8174_v62, 7  ;;  %v11831_v19 = vrot.slane %v8198_v33, 1 }
 0x284   :  { %v8229_v17 = vsel %vm63_vm1, %v8109_v56, %v12160_v27  ;;  %v1441_v40 = vsel %vm604_vm4, %v1440_v60, %v1439_v29  ;;  %v1129_v43 = vrot.slane %v7861_v2, 2  ;;  %v1130_v30 = vrot.slane %v7861_v2, 3 }
 0x285   :  { %v1432_v56 = vsel %vm613_vm7, %v8229_v17, %v1431_v12  ;;  %v1443_v41 = vsel %vm607_vm5, %v1442_v6, %v1441_v40  ;;  %v12162_v52 = vrot.slane %v12161_v46, 1  ;;  %v1447_v44 = vrot.slane %v8202_v36, 7  ;;  %v12163_v6 = vld [vmem:[#allocation28_spill] sm:$0xff]  ;;  %v12164_v40 = vld [vmem:[#allocation29_spill] sm:$0xff] }
 0x286   :  { %v1434_v29 = vsel %vm616_vm8, %v1433_v55, %v1432_v56  ;;  %v1445_v60 = vsel %vm610_vm6, %v11831_v19, %v1443_v41  ;;  %v1160_v12 = vrot.slane %v12163_v6, 7  ;;  %v1161_v5 = vrot.slane %v12164_v40, 7 }
 0x287   :  { %v8250_v27 = vsel %vm63_vm1, %v8104_v38, %v12162_v52  ;;  %v1162_v15 = vrot.slane %v12165_v50, 7  ;;  %v1163_v38 = vrot.slane %v12166_v4, 7  ;;  %v8266_v55 = vsel %vm616_vm8, %v1710_v54, %v7960_v37 }
 0x288   :  { %v1446_v46 = vsel %vm613_vm7, %v8250_v27, %v1445_v60  ;;  %v1131_v56 = vrot.slane %v7861_v2, 4  ;;  %v1132_v6 = vrot.slane %v7861_v2, 5  ;;  %v1133_v40 = vrot.slane %v7861_v2, 6  ;;  %v12167_v60 = vld [vmem:[#allocation32_spill] sm:$0xff] }
 0x289   :  { %v1448_v52 = vsel %vm616_vm8, %v1447_v44, %v1446_v46  ;;  %v8273_v50 = vsel %vm63_vm1, %v1127_v59, %v1157_v20  ;;  %v1320_v19 = vrot.slane %v12167_v60, 1  ;;  %v8278_v4 = vsel %vm63_vm1, %v1128_v1, %v1158_v53  ;;  %v12170_v59 = vld [vmem:[#allocation33_spill] sm:$0xff]  ;;  %v12172_v44 = vld [vmem:[#allocation24_spill] sm:$0xff]  ;;  %v12174_v46 = vld [vmem:[#allocation35_spill] sm:$0xff] }
 0x28a   :  { %v6538_v41 = vpack.c.bf16 %v1448_v52, %v1434_v29  ;;  %12168 = vst [vmem:[#allocation15_spill] sm:$0xff] %v8278_v4  ;;  %v8282_v37 = vsel %vm63_vm1, %v1129_v43, %v1159_v49  ;;  %v8286_v54 = vsel %vm63_vm1, %v1130_v30, %v1160_v12  ;;  %v8290_v29 = vsel %vm63_vm1, %v1131_v56, %v1161_v5  ;;  %v12171_v43 = vld [vmem:[#allocation34_spill] sm:$0xff] }
 0x28b   :  { %v8294_v20 = vsel %vm63_vm1, %v1132_v6, %v1162_v15  ;;  %v8298_v53 = vsel %vm63_vm1, %v1133_v40, %v1163_v38  ;;  %v1684_v49 = vrot.slane %v8273_v50, 1  ;;  %v1321_v1 = vrot.slane %v12170_v59, 1  ;;  %v12175_v38 = vld [vmem:[#allocation36_spill] sm:$0xff] }
 0x28c   :  { %6539 = vmatprep.subr.bf16.mxu0 %v6538_v41  ;;  %12169 = vst [vmem:[#allocation18_spill] sm:$0xff] %v8298_v53  ;;  %v1322_v30 = vrot.slane %v12171_v43, 1  ;;  %v12173_v12 = vrot.slane %v12172_v44, 7  ;;  %v11832_v15 = vrot.slane %v8278_v4, 7  ;;  %v1323_v52 = vrot.slane %v12174_v46, 1  ;;  %v8325_v43 = vld [vmem:[%s11774_s3 + $0x8] sm:$0xff] }
 0x28d   :  { %6541 = vmatpush3.bf16.msra.mxu0 %v6538_v41  ;;  %v1324_v56 = vrot.slane %v12175_v38, 1  ;;  %v1688_v40 = vrot.slane %v8282_v37, 6  ;;  %v1325_v41 = vrot.slane %v7813_v22, 1  ;;  %v1326_v60 = vrot.slane %v7943_v7, 1  ;;  %12176 = vst [vmem:[#allocation19_spill] sm:$0xff] %v8325_v43 }
 0x28e   :  { %v8308_v5 = vsel %vm63_vm1, %v7861_v2, %v12173_v12  ;;  %v1690_v59 = vrot.slane %v8286_v54, 5  ;;  %v1692_v22 = vrot.slane %v8290_v29, 4  ;;  %v1694_v7 = vrot.slane %v8294_v20, 3  ;;  %v8336_v12 = vld [vmem:[%s11774_s3 + $0x10] sm:$0xff] }
 0x28f   :  { %v1685_v6 = vsel %vm598_vm2, %v8308_v5, %v1684_v49  ;;  %v1696_v44 = vrot.slane %v8298_v53, 2  ;;  %12177 = vst [vmem:[#allocation20_spill] sm:$0xff] %v8336_v12  ;;  %v1290_v38 = vrot.slane %v7964_v14, 2  ;;  %v1295_v4 = vrot.slane %v7964_v14, 7 }
 0x290   :  { %v1687_v2 = vsel %vm601_vm3, %v11832_v15, %v1685_v6  ;;  %6343 = vmatmul.mubr.msk.f32.vlgmr.msra.gmra.mrb[16].mxu0 %vm64_vm0, %v8325_v43  ;;  %v1291_v6 = vrot.slane %v7964_v14, 3  ;;  %v1293_v15 = vrot.slane %v7964_v14, 5  ;;  %v1294_v43 = vrot.slane %v7964_v14, 6 }
 0x291   :  { %v1689_v49 = vsel %vm604_vm4, %v1688_v40, %v1687_v2  ;;  %6345 = vmatprep.mubr.msk.f32.mxu0 %vm64_vm0, %v8336_v12  ;;  %v1292_v40 = vrot.slane %v7964_v14, 4  ;;  %v1296_v12 = vrot.slane %v7964_v14, 1 }
 0x292   :  { %v1691_v46 = vsel %vm607_vm5, %v1690_v59, %v1689_v49  ;;  %v8352_v59 = vsel %vm63_vm1, %v1290_v38, %v1320_v19  ;;  %v8356_v49 = vsel %vm63_vm1, %v1291_v6, %v1321_v1  ;;  %v8374_v19 = vsel %vm63_vm1, %v1293_v15, %v1323_v52  ;;  %v12181_v38 = vld [vmem:[#allocation37_spill] sm:$0xff]  ;;  %v12185_v52 = vld [vmem:[#allocation38_spill] sm:$0xff] }
 0x293   :  { %v1693_v2 = vsel %vm610_vm6, %v1692_v22, %v1691_v46  ;;  %v8361_v22 = vld [vmem:[%s11774_s3 + $0x18] sm:$0xff]  ;;  %v8370_v46 = vsel %vm63_vm1, %v1292_v40, %v1322_v30  ;;  %12179 = vst [vmem:[#allocation26_spill] sm:$0xff] %v8374_v19  ;;  %v8378_v1 = vsel %vm63_vm1, %v1294_v43, %v1324_v56  ;;  %v1313_v6 = vrot.slane %v12181_v38, 1 }
 0x294   :  { %v1695_v53 = vsel %vm613_vm7, %v1694_v7, %v1693_v2  ;;  %12178 = vst [vmem:[#allocation23_spill] sm:$0xff] %v8361_v22  ;;  %6346 = vmatmul.mubr.msk.f32.gmra.mrb[18].mxu0 %vm64_vm0, %v8361_v22  ;;  %12180 = vst [vmem:[#allocation25_spill] sm:$0xff] %v8378_v1  ;;  %v8384_v2 = vld [vmem:[%s11774_s3 + $0x20] sm:$0xff]  ;;  %v8394_v30 = vsel %vm63_vm1, %v1296_v12, %v1326_v60  ;;  %v1792_v15 = vrot.slane %v8352_v59, 6  ;;  %v1314_v56 = vrot.slane %v12185_v52, 1  ;;  %v8408_v60 = vld [vmem:[%s11774_s3 + $0x28] sm:$0xff] }
 0x295   :  { %v8366_v7 = vsel %vm616_vm8, %v1696_v44, %v1695_v53  ;;  %12182 = vst [vmem:[#allocation27_spill] sm:$0xff] %v8384_v2  ;;  %6348 = vmatprep.mubr.msk.f32.mxu0 %vm64_vm0, %v8384_v2  ;;  %v8390_v53 = vsel %vm63_vm1, %v1295_v4, %v1325_v41  ;;  %12184 = vst [vmem:[#allocation21_spill] sm:$0xff] %v8394_v30  ;;  %v1315_v43 = vrot.slane %v7820_v47, 1  ;;  %v1793_v44 = vrot.slane %v8356_v49, 5  ;;  %v8425_v12 = vld [vmem:[%s11774_s3 + $0x30] sm:$0xff]  ;;  %v8444_v52 = vld [vmem:[%s11774_s3 + $0x38] sm:$0xff] }
 0x296   :  { %12183 = vst [vmem:[#allocation17_spill] sm:$0xff] %v8390_v53  ;;  %v1795_v40 = vrot.slane %v8370_v46, 4  ;;  %v1316_v38 = vrot.slane %v7839_v57, 1  ;;  %v1317_v2 = vrot.slane %v7845_v32, 1  ;;  %v1318_v4 = vrot.slane %v7849_v21, 1  ;;  %12186 = vst [vmem:[#allocation28_spill] sm:$0xff] %v8408_v60 }
 0x297   :  { %v1319_v41 = vrot.slane %v7954_v11, 1  ;;  %v12187_v47 = vrot.slane %v7828_v10, 1  ;;  %v1794_v32 = vsel %vm598_vm2, %v1793_v44, %v1792_v15  ;;  %v1797_v21 = vrot.slane %v8374_v19, 3  ;;  %12189 = vst [vmem:[#allocation30_spill] sm:$0xff] %v8425_v12  ;;  %12190 = vst [vmem:[#allocation31_spill] sm:$0xff] %v8444_v52 }
 0x298   :  { %6349 = vmatmul.mubr.msk.f32.gmra.mrb[20].mxu0 %vm64_vm0, %v8408_v60  ;;  %v1799_v11 = vrot.slane %v8378_v1, 2  ;;  %v1796_v10 = vsel %vm601_vm3, %v1795_v40, %v1794_v32  ;;  %v1283_v15 = vrot.slane %v7968_v8, 2  ;;  %v1285_v60 = vrot.slane %v7968_v8, 4 }
 0x299   :  { %v8417_v57 = vsel %vm63_vm1, %v7964_v14, %v12187_v47  ;;  %6351 = vmatprep.mubr.msk.f32.mxu0 %vm64_vm0, %v8425_v12  ;;  %v1804_v14 = vrot.slane %v8394_v30, 7  ;;  %v1798_v44 = vsel %vm604_vm4, %v1797_v21, %v1796_v10  ;;  %v1284_v47 = vrot.slane %v7968_v8, 3 }
 0x29a   :  { %12188 = vst [vmem:[#allocation29_spill] sm:$0xff] %v8417_v57  ;;  %v1286_v22 = vrot.slane %v7968_v8, 5  ;;  %v1800_v1 = vsel %vm607_vm5, %v1799_v11, %v1798_v44  ;;  %v1287_v12 = vrot.slane %v7968_v8, 6  ;;  %v1288_v40 = vrot.slane %v7968_v8, 7 }
 0x29b   :  { %v1289_v32 = vrot.slane %v7968_v8, 1  ;;  %v12191_v21 = vrot.slane %v8390_v53, 1  ;;  %v8453_v11 = vsel %vm63_vm1, %v1283_v15, %v1313_v6  ;;  %v8457_v44 = vsel %vm63_vm1, %v1284_v47, %v1314_v56 }
 0x29c   :  { %6352 = vmatmul.mubr.msk.f32.gmra.mrb[22].mxu0 %vm64_vm0, %v8444_v52  ;;  %12192 = vst [vmem:[#allocation32_spill] sm:$0xff] %v8453_v11  ;;  %12193 = vst [vmem:[#allocation33_spill] sm:$0xff] %v8457_v44  ;;  %v8461_v30 = vsel %vm63_vm1, %v1285_v60, %v1315_v43  ;;  %v8466_v52 = vld [vmem:[%s11774_s3 + $0x40] sm:$0xff]  ;;  %v8474_v6 = vsel %vm63_vm1, %v1286_v22, %v1316_v38  ;;  %v8478_v56 = vsel %vm63_vm1, %v1287_v12, %v1317_v2  ;;  %v8497_v2 = vld [vmem:[%s11774_s3 + $0x48] sm:$0xff] }
 0x29d   :  { %v1802_v10 = vsel %vm610_vm6, %v12191_v21, %v1800_v1  ;;  %12194 = vst [vmem:[#allocation34_spill] sm:$0xff] %v8461_v30  ;;  %12195 = vst [vmem:[#allocation24_spill] sm:$0xff] %v8466_v52  ;;  %6354 = vmatprep.mubr.msk.f32.mxu0 %vm64_vm0, %v8466_v52  ;;  %v8482_v43 = vsel %vm63_vm1, %v1288_v40, %v1318_v4  ;;  %v8489_v15 = vsel %vm63_vm1, %v1289_v32, %v1319_v41  ;;  %v8504_v4 = vld [vmem:[%s11774_s3 + $0x50] sm:$0xff] }
 0x29e   :  { %v1803_v1 = vsel %vm613_vm7, %v8417_v57, %v1802_v10  ;;  %12196 = vst [vmem:[#allocation35_spill] sm:$0xff] %v8474_v6  ;;  %12197 = vst [vmem:[#allocation36_spill] sm:$0xff] %v8478_v56  ;;  %v1778_v47 = vrot.slane %v8453_v11, 6  ;;  %v1779_v22 = vrot.slane %v8457_v44, 5  ;;  %v1781_v38 = vrot.slane %v8461_v30, 4  ;;  %v8517_v10 = vld [vmem:[%s11774_s3 + $0x58] sm:$0xff] }
 0x29f   :  { %12198 = vst [vmem:[#allocation37_spill] sm:$0xff] %v8482_v43  ;;  %v8485_v60 = vsel %vm616_vm8, %v1804_v14, %v1803_v1  ;;  %12199 = vst [vmem:[#allocation38_spill] sm:$0xff] %v8489_v15  ;;  %v1783_v12 = vrot.slane %v8474_v6, 3  ;;  %v1785_v40 = vrot.slane %v8478_v56, 2  ;;  %v11844_v21 = vrot.slane %v8482_v43, 1  ;;  %v1599_v43 = vld [vmem:[#allocation2 + $0x90] sm:$0xff] }
 0x2a0   :  { %12200 = vst [vmem:[#allocation48_spill] sm:$0xff] %v8497_v2  ;;  %6355 = vmatmul.mubr.msk.f32.gmra.mrb[24].mxu0 %vm64_vm0, %v8497_v2  ;;  %12201 = vst [vmem:[#allocation49_spill] sm:$0xff] %v8504_v4  ;;  %v1780_v41 = vsel %vm598_vm2, %v1779_v22, %v1778_v47  ;;  %v8525_v47 = vld [vmem:[%s11774_s3 + $0x60] sm:$0xff]  ;;  %v12204_v22 = vrot.slane %v7854_v26, 1  ;;  %v8548_v26 = vld [vmem:[%s11774_s3 + $0x68] sm:$0xff]  ;;  %v1935_v57 = vrot.slane %v7869_v13, 7 }
 0x2a1   :  { %6357 = vmatprep.mubr.msk.f32.mxu0 %vm64_vm0, %v8504_v4  ;;  %v1782_v14 = vsel %vm601_vm3, %v1781_v38, %v1780_v41  ;;  %12202 = vst [vmem:[#allocation50_spill] sm:$0xff] %v8517_v10  ;;  %12203 = vst [vmem:[#allocation51_spill] sm:$0xff] %v8525_v47  ;;  %v1601_v6 = vld [vmem:[#allocation2 + $0xa0] sm:$0xff]  ;;  %v1939_v13 = vrot.slane %v7894_v3, 7 }
 0x2a2   :  { %v1784_v32 = vsel %vm604_vm4, %v1783_v12, %v1782_v14  ;;  %v8534_v38 = vsel %vm63_vm1, %v7968_v8, %v12204_v22  ;;  %v1790_v12 = vrot.slane %v8489_v15, 7  ;;  %12206 = vst [vmem:[#allocation53_spill] sm:$0xff] %v8548_v26  ;;  %v8555_v8 = vld [vmem:[%s11774_s3 + $0x70] sm:$0xff]  ;;  %v1598_v22 = vld [vmem:[#allocation2 + $0x88] sm:$0xff] }
 0x2a3   :  { %v1786_v1 = vsel %vm607_vm5, %v1785_v40, %v1784_v32  ;;  %12205 = vst [vmem:[#allocation52_spill] sm:$0xff] %v8534_v38  ;;  %12207 = vst [vmem:[#allocation54_spill] sm:$0xff] %v8555_v8  ;;  %v8562_v32 = vld [vmem:[%s11774_s3 + $0x78] sm:$0xff] }
 0x2a4   :  { %6358 = vmatmul.mubr.msk.f32.gmra.mrb[26].mxu0 %vm64_vm0, %v8517_v10  ;;  %v1788_v41 = vsel %vm610_vm6, %v11844_v21, %v1786_v1  ;;  %12208 = vst [vmem:[#allocation55_spill] sm:$0xff] %v8562_v32  ;;  %v8569_v1 = vld [vmem:[%s11774_s3] sm:$0xff] }
 0x2a5   :  { %6360 = vmatprep.mubr.msk.f32.mxu0 %vm64_vm0, %v8525_v47  ;;  %v1789_v14 = vsel %vm613_vm7, %v8534_v38, %v1788_v41  ;;  %12209 = vst [vmem:[#allocation56_spill] sm:$0xff] %v8569_v1  ;;  %v1597_v41 = vld [vmem:[#allocation2 + $0x80] sm:$0xff] }
 0x2a6   :  { %v8543_v40 = vsel %vm616_vm8, %v1790_v12, %v1789_v14 }
 0x2a8   :  { %6361 = vmatmul.mubr.msk.f32.gmra.mrb[28].mxu0 %vm64_vm0, %v8548_v26  ;;  %v1600_v26 = vld [vmem:[#allocation2 + $0x98] sm:$0xff] }
 0x2a9   :  { %6363 = vmatprep.mubr.msk.f32.mxu0 %vm64_vm0, %v8555_v8 }
 0x2ac   :  { %6364 = vmatmul.mubr.msk.f32.gmra.mrb[30].mxu0 %vm64_vm0, %v8562_v32 }
 0x2ad   :  { %6406 = vmatprep.mubr.msk.f32.mxu0 %vm64_vm0, %v8569_v1  ;;  %v1602_v1 = vld [vmem:[#allocation2 + $0xa8] sm:$0xff] }
 0x363   :  { %v6344_v12 = vpop.f32.mrb[16].mxu0 }
 0x364   :  { %v1606_v14 = vadd.f32 %v6344_v12, %v1598_v22  ;;  %v1517_v21 = vpop.f32.mrb[17].mxu0  ;;  %v1604_v22 = vld [vmem:[#allocation2 + $0xb8] sm:$0xff] }
 0x365   :  { %v1605_v8 = vadd.f32 %v1597_v41, %v1517_v21  ;;  %v1603_v41 = vld [vmem:[#allocation2 + $0xb0] sm:$0xff] }
 0x366   :  { %v5972_v47 = vmul.f32 -1.442695, %v1606_v14 }
 0x367   :  { %v5971_v10 = vmul.f32 -1.442695, %v1605_v8  ;;  %v6347_v4 = vpop.f32.mrb[18].mxu0 }
 0x368   :  { %6716 = vpow2.f32 %v5972_v47  ;;  %v1608_v32 = vadd.f32 %v6347_v4, %v1600_v26  ;;  %v1527_v2 = vpop.f32.mrb[19].mxu0  ;;  %v1615_v4 = vld [vmem:[#allocation5 + $0x148] sm:$0xff] }
 0x369   :  { %6718 = vpow2.f32 %v5971_v10  ;;  %v1607_v52 = vadd.f32 %v1599_v43, %v1527_v2  ;;  %v1614_v2 = vld [vmem:[#allocation5 + $0x140] sm:$0xff] }
 0x36a   :  { %v5974_v53 = vmul.f32 -1.442695, %v1608_v32 }
 0x36b   :  { %v5973_v15 = vmul.f32 -1.442695, %v1607_v52  ;;  %v6350_v38 = vpop.f32.mrb[20].mxu0 }
 0x36c   :  { %6720 = vpow2.f32 %v5974_v53  ;;  %v1537_v56 = vpop.f32.mrb[21].mxu0  ;;  %v1610_v21 = vadd.f32 %v6350_v38, %v1602_v1 }
 0x36d   :  { %6722 = vpow2.f32 %v5973_v15  ;;  %v1609_v12 = vadd.f32 %v1601_v6, %v1537_v56  ;;  %v1617_v56 = vld [vmem:[#allocation5 + $0x158] sm:$0xff] }
 0x36e   :  { %6724 = vtanh.f32 %v1610_v21 }
 0x36f   :  { %v6353_v14 = vpop.f32.mrb[22].mxu0  ;;  %6726 = vtanh.f32 %v1609_v12 }
 0x370   :  { %v1612_v8 = vadd.f32 %v6353_v14, %v1604_v22  ;;  %v1547_v30 = vpop.f32.mrb[23].mxu0  ;;  %v1616_v22 = vld [vmem:[#allocation5 + $0x150] sm:$0xff] }
 0x371   :  { %v1611_v47 = vadd.f32 %v1603_v41, %v1547_v30 }
 0x372   :  { %v6717_v26 = vpop.eup %6716  ;;  %v5976_v43 = vmul.f32 -1.442695, %v1612_v8 }
 0x373   :  { %v6719_v52 = vpop.eup %6718  ;;  %v1637_v10 = vadd.f32 1.0, %v6717_v26  ;;  %v5975_v53 = vmul.f32 -1.442695, %v1611_v47  ;;  %v6356_v32 = vpop.f32.mrb[24].mxu0 }
 0x374   :  { %v1636_v44 = vadd.f32 1.0, %v6719_v52  ;;  %6728 = vpow2.f32 %v5976_v43  ;;  %v1623_v15 = vadd.f32 %v6356_v32, %v1615_v4  ;;  %v1557_v38 = vpop.f32.mrb[25].mxu0  ;;  %v1619_v52 = vld [vmem:[#allocation5 + $0x168] sm:$0xff] }
 0x375   :  { %6730 = vrcp.f32 %v1637_v10  ;;  %v1622_v6 = vadd.f32 %v1614_v2, %v1557_v38 }
 0x376   :  { %v6721_v1 = vpop.eup %6720  ;;  %6732 = vrcp.f32 %v1636_v44  ;;  %v5978_v30 = vmul.f32 -1.442695, %v1623_v15  ;;  %v1618_v44 = vld [vmem:[#allocation5 + $0x160] sm:$0xff] }
 0x377   :  { %v6723_v41 = vpop.eup %6722  ;;  %v1649_v21 = vadd.f32 1.0, %v6721_v1  ;;  %6734 = vpow2.f32 %v5975_v53  ;;  %v5977_v14 = vmul.f32 -1.442695, %v1622_v6  ;;  %v6359_v8 = vpop.f32.mrb[26].mxu0  ;;  %v1621_v6 = vld [vmem:[#allocation5 + $0x178] sm:$0xff] }
 0x378   :  { %v1648_v26 = vadd.f32 1.0, %v6723_v41  ;;  %6736 = vpow2.f32 %v5978_v30  ;;  %v1625_v12 = vadd.f32 %v6359_v8, %v1617_v56  ;;  %v1567_v47 = vpop.f32.mrb[27].mxu0  ;;  %v6725_v32 = vpop.eup %6724  ;;  %v1620_v56 = vld [vmem:[#allocation5 + $0x170] sm:$0xff] }
 0x379   :  { %6738 = vrcp.f32 %v1649_v21  ;;  %v1624_v43 = vadd.f32 %v1616_v22, %v1567_v47  ;;  %v6727_v38 = vpop.eup %6726 }
 0x37a   :  { %6740 = vrcp.f32 %v1648_v26  ;;  %v5980_v4 = vmul.f32 -1.442695, %v1625_v12 }
 0x37b   :  { %6742 = vpow2.f32 %v5977_v14  ;;  %v5979_v2 = vmul.f32 -1.442695, %v1624_v43  ;;  %v6362_v10 = vpop.f32.mrb[28].mxu0 }
 0x37c   :  { %6744 = vpow2.f32 %v5980_v4  ;;  %v1577_v15 = vpop.f32.mrb[29].mxu0  ;;  %v1627_v53 = vadd.f32 %v6362_v10, %v1619_v52 }
 0x37d   :  { %6746 = vpow2.f32 %v5979_v2  ;;  %v1626_v30 = vadd.f32 %v1618_v44, %v1577_v15  ;;  %v1936_v44 = vrot.slane %v7921_v39, 7 }
 0x37e   :  { %v6729_v1 = vpop.eup %6728  ;;  %6748 = vtanh.f32 %v1627_v53 }
 0x37f   :  { %v6731_v41 = vpop.eup %6730  ;;  %v1663_v21 = vadd.f32 1.0, %v6729_v1  ;;  %v6365_v22 = vpop.f32.mrb[30].mxu0  ;;  %6750 = vtanh.f32 %v1626_v30  ;;  %v1940_v30 = vrot.slane %v7900_v51, 7 }
 0x380   :  { %v6733_v8 = vpop.eup %6732  ;;  %v1717_v26 = vmul.f32 %v6731_v41, %v6725_v32  ;;  %v1629_v12 = vadd.f32 %v6365_v22, %v1621_v6  ;;  %v1587_v14 = vpop.f32.mrb[31].mxu0  ;;  %v1937_v6 = vrot.slane %v7882_v63, 7  ;;  %v1941_v41 = vrot.slane %v7910_v34, 7 }
 0x381   :  { %v6735_v47 = vpop.eup %6734  ;;  %v1716_v43 = vmul.f32 %v6733_v8, %v6727_v38  ;;  %v1628_v11 = vadd.f32 %v1620_v56, %v1587_v14  ;;  %6752 = vrcp.f32 %v1663_v21  ;;  %v1938_v38 = vrot.slane %v7888_v31, 7 }
 0x382   :  { %v6737_v4 = vpop.eup %6736  ;;  %v1662_v2 = vadd.f32 1.0, %v6735_v47  ;;  %v5982_v52 = vmul.f32 -1.442695, %v1629_v12 }
 0x383   :  { %v6739_v10 = vpop.eup %6738  ;;  %v1731_v15 = vadd.f32 1.0, %v6737_v4  ;;  %v5981_v1 = vmul.f32 -1.442695, %v1628_v11 }
 0x384   :  { %v6741_v19 = vpop.eup %6740  ;;  %v1715_v32 = vmul.f32 %v6739_v10, %v8266_v55  ;;  %6754 = vrcp.f32 %v1662_v2 }
 0x385   :  { %v6743_v53 = vpop.eup %6742  ;;  %v1714_v56 = vmul.f32 %v6741_v19, %v8366_v7  ;;  %6756 = vrcp.f32 %v1731_v15 }
 0x386   :  { %v6745_v39 = vpop.eup %6744  ;;  %v1719_v11 = vadd.f32 %v1717_v26, %v1715_v32  ;;  %v1730_v21 = vadd.f32 1.0, %v6743_v53  ;;  %6758 = vpow2.f32 %v5982_v52 }
 0x387   :  { %v6747_v55 = vpop.eup %6746  ;;  %v8583_v22 = vadd.f32 %v1716_v43, %v1714_v56  ;;  %v1743_v31 = vadd.f32 1.0, %v6745_v39  ;;  %6760 = vpow2.f32 %v5981_v1  ;;  %v1853_v56 = vrot.slane %v7997_v23, 7  ;;  %v12223_v43 = vld [vmem:[#allocation45_spill] sm:$0xff] }
 0x388   :  { %6762 = vtanh.f32 %v1719_v11  ;;  %v1742_v3 = vadd.f32 1.0, %v6747_v55  ;;  %v1905_v8 = vrot.slane %v1719_v11, 6  ;;  %v1906_v51 = vrot.slane %v1719_v11, 7  ;;  %v6749_v47 = vpop.eup %6748  ;;  %v12216_v55 = vld [vmem:[#allocation41_spill] sm:$0xff] }
 0x389   :  { %6764 = vtanh.f32 %v8583_v22  ;;  %v1907_v7 = vrot.slane %v1719_v11, 1  ;;  %v1908_v19 = vrot.slane %v1719_v11, 2  ;;  %v1909_v12 = vrot.slane %v1719_v11, 3  ;;  %v6751_v52 = vpop.eup %6750 }
 0x38a   :  { %6766 = vrcp.f32 %v1730_v21  ;;  %v1910_v34 = vrot.slane %v1719_v11, 4  ;;  %v1911_v26 = vrot.slane %v1719_v11, 5  ;;  %v8588_v14 = vsel %vm63_vm1, %v1905_v8, %v1935_v57 }
 0x38b   :  { %12210 = vst [vmem:[#allocation57_spill] sm:$0xff] %v8588_v14  ;;  %6768 = vrcp.f32 %v1743_v31  ;;  %v8593_v4 = vsel %vm63_vm1, %v1906_v51, %v1936_v44  ;;  %v8597_v2 = vsel %vm63_vm1, %v1907_v7, %v1937_v6  ;;  %v8601_v10 = vsel %vm63_vm1, %v1908_v19, %v1938_v38  ;;  %v6753_v44 = vpop.eup %6752  ;;  %v12220_v19 = vld [vmem:[#allocation11_spill] sm:$0xff] }
 0x38c   :  { %12211 = vst [vmem:[#allocation58_spill] sm:$0xff] %v8593_v4  ;;  %12212 = vst [vmem:[#allocation59_spill] sm:$0xff] %v8597_v2  ;;  %6770 = vrcp.f32 %v1742_v3  ;;  %v8605_v57 = vsel %vm63_vm1, %v1909_v12, %v1939_v13  ;;  %v8609_v15 = vsel %vm63_vm1, %v1910_v34, %v1940_v30  ;;  %v8614_v32 = vsel %vm63_vm1, %v1911_v26, %v1941_v41  ;;  %v12217_v3 = vld [vmem:[#allocation39_spill] sm:$0xff] }
 0x38d   :  { %12213 = vst [vmem:[#allocation60_spill] sm:$0xff] %v8601_v10  ;;  %12214 = vst [vmem:[#allocation61_spill] sm:$0xff] %v8605_v57  ;;  %v2469_v6 = vrot.slane %v8588_v14, 2  ;;  %v2470_v38 = vrot.slane %v8593_v4, 1  ;;  %v1854_v13 = vrot.slane %v8003_v16, 7  ;;  %v1855_v39 = vrot.slane %v8009_v42, 7 }
 0x38e   :  { %12215 = vst [vmem:[#allocation62_spill] sm:$0xff] %v8609_v15  ;;  %v6755_v53 = vpop.eup %6754  ;;  %v1857_v31 = vrot.slane %v12216_v55, 7  ;;  %v12218_v8 = vrot.slane %v12217_v3, 7  ;;  %v11868_v7 = vrot.slane %v8597_v2, 7  ;;  %v1858_v16 = vrot.slane %v12220_v19, 7  ;;  %v12221_v55 = vld [vmem:[#allocation43_spill] sm:$0xff] }
 0x38f   :  { %v6757_v21 = vpop.eup %6756  ;;  %v2471_v51 = vsel %vm598_vm2, %v2470_v38, %v2469_v6  ;;  %v2475_v34 = vrot.slane %v8601_v10, 6  ;;  %v1859_v3 = vrot.slane %v12221_v55, 7  ;;  %v2477_v6 = vrot.slane %v8605_v57, 5  ;;  %v12224_v10 = vld [vmem:[#allocation46_spill] sm:$0xff] }
 0x390   :  { %v8627_v41 = vsel %vm63_vm1, %v1719_v11, %v12218_v8  ;;  %v6759_v23 = vpop.eup %6758  ;;  %v1811_v12 = vmul.f32 %v6757_v21, %v6749_v47  ;;  %v12222_v8 = vld [vmem:[#allocation44_spill] sm:$0xff]  ;;  %v2479_v21 = vrot.slane %v8609_v15, 4  ;;  %v1861_v63 = vrot.slane %v12223_v43, 7 }
 0x391   :  { %12219 = vst [vmem:[#allocation41_spill] sm:$0xff] %v8627_v41  ;;  %v2472_v42 = vsel %vm601_vm3, %v8627_v41, %v2471_v51  ;;  %v6761_v26 = vpop.eup %6760  ;;  %v1757_v30 = vadd.f32 1.0, %v6759_v23  ;;  %v1860_v1 = vrot.slane %v12222_v8, 7  ;;  %v1862_v55 = vrot.slane %v12224_v10, 7 }
 0x392   :  { %v2474_v11 = vsel %vm604_vm4, %v11868_v7, %v2472_v42  ;;  %v6763_v38 = vpop.eup %6762  ;;  %v1756_v19 = vadd.f32 1.0, %v6761_v26  ;;  %v12225_v42 = vld [vmem:[#allocation47_spill] sm:$0xff]  ;;  %v12226_v14 = vrot.slane %v7976_v48, 7 }
 0x393   :  { %v2476_v47 = vsel %vm607_vm5, %v2475_v34, %v2474_v11  ;;  %v6765_v51 = vpop.eup %6764  ;;  %v1723_v23 = vmul.f32 %v6763_v38, %v6753_v44  ;;  %v1863_v7 = vrot.slane %v12225_v42, 7  ;;  %6772 = vrcp.f32 %v1757_v30 }
 0x394   :  { %v2478_v2 = vsel %vm610_vm6, %v2477_v6, %v2476_v47  ;;  %v6767_v41 = vpop.eup %6766  ;;  %v1722_v57 = vmul.f32 %v6765_v51, %v6755_v53  ;;  %6774 = vrcp.f32 %v1756_v19 }
 0x395   :  { %v8648_v8 = vsel %vm613_vm7, %v2479_v21, %v2478_v2  ;;  %v6769_v26 = vpop.eup %6768  ;;  %v1810_v34 = vmul.f32 %v6767_v41, %v6751_v52  ;;  %v1827_v11 = vrot.slane %v1723_v23, 6  ;;  %v1828_v15 = vrot.slane %v1723_v23, 7 }
 0x396   :  { %v6771_v4 = vpop.eup %6770  ;;  %v1809_v43 = vmul.f32 %v6769_v26, %v8485_v60  ;;  %v1820_v10 = vrot.slane %v1722_v57, 6  ;;  %v1821_v44 = vrot.slane %v1722_v57, 7  ;;  %v1822_v38 = vrot.slane %v1722_v57, 1 }
 0x397   :  { %v1808_v6 = vmul.f32 %v6771_v4, %v8543_v40  ;;  %v1823_v47 = vrot.slane %v1722_v57, 2  ;;  %v1824_v42 = vrot.slane %v1722_v57, 3  ;;  %v1825_v53 = vrot.slane %v1722_v57, 4 }
 0x398   :  { %v8652_v30 = vadd.f32 %v1811_v12, %v1809_v43  ;;  %v1826_v2 = vrot.slane %v1722_v57, 5  ;;  %v1829_v21 = vrot.slane %v1723_v23, 1  ;;  %v1830_v51 = vrot.slane %v1723_v23, 2 }
 0x399   :  { %v8654_v52 = vadd.f32 %v1810_v34, %v1808_v6  ;;  %v1831_v41 = vrot.slane %v1723_v23, 3  ;;  %v1832_v19 = vrot.slane %v1723_v23, 4  ;;  %v8660_v60 = vsel %vm63_vm1, %v1820_v10, %v12226_v14 }
 0x39a   :  { %6776 = vtanh.f32 %v8652_v30  ;;  %v1833_v40 = vrot.slane %v1723_v23, 5  ;;  %v12227_v4 = vrot.slane %v8070_v28, 7  ;;  %v12228_v26 = vrot.slane %v7990_v35, 7  ;;  %v12242_v35 = vld [vmem:[#allocation14_spill] sm:$0xff] }
 0x39b   :  { %6778 = vtanh.f32 %v8654_v52  ;;  %v8678_v48 = vsel %vm63_vm1, %v1823_v47, %v1853_v56  ;;  %v8682_v14 = vsel %vm63_vm1, %v1824_v42, %v1854_v13  ;;  %v8686_v28 = vsel %vm63_vm1, %v1825_v53, %v1855_v39 }
 0x39c   :  { %v8667_v12 = vsel %vm63_vm1, %v1821_v44, %v12227_v4  ;;  %v8673_v34 = vsel %vm63_vm1, %v1822_v38, %v12228_v26  ;;  %v12230_v43 = vrot.slane %v8016_v58, 7  ;;  %v8697_v56 = vsel %vm63_vm1, %v1827_v11, %v1857_v31 }
 0x39d   :  { %12229 = vst [vmem:[#allocation39_spill] sm:$0xff] %v8673_v34  ;;  %v8701_v13 = vsel %vm63_vm1, %v1828_v15, %v1858_v16  ;;  %v8705_v39 = vsel %vm63_vm1, %v1829_v21, %v1859_v3  ;;  %v8709_v44 = vsel %vm63_vm1, %v1830_v51, %v1860_v1  ;;  %v8713_v58 = vsel %vm63_vm1, %v1831_v41, %v1861_v63  ;;  %v6773_v11 = vpop.eup %6772  ;;  %v12239_v15 = vld [vmem:[#allocation12_spill] sm:$0xff] }
 0x39e   :  { %v8693_v10 = vsel %vm63_vm1, %v1826_v2, %v12230_v43  ;;  %12231 = vst [vmem:[#allocation11_spill] sm:$0xff] %v8705_v39  ;;  %12232 = vst [vmem:[#allocation43_spill] sm:$0xff] %v8713_v58  ;;  %v8717_v31 = vsel %vm63_vm1, %v1832_v19, %v1862_v55  ;;  %v8722_v16 = vsel %vm63_vm1, %v1833_v40, %v1863_v7  ;;  %v2146_v3 = vrot.slane %v8660_v60, 2  ;;  %v6775_v38 = vpop.eup %6774  ;;  %v12235_v55 = vld [vmem:[#allocation40_spill] sm:$0xff]  ;;  %v12237_v19 = vld [vmem:[#allocation42_spill] sm:$0xff] }
 0x39f   :  { %12233 = vst [vmem:[#allocation44_spill] sm:$0xff] %v8717_v31  ;;  %12234 = vst [vmem:[#allocation45_spill] sm:$0xff] %v8722_v16  ;;  %v2147_v1 = vrot.slane %v8667_v12, 1  ;;  %v12236_v42 = vrot.slane %v12235_v55, 7  ;;  %v11873_v2 = vrot.slane %v8673_v34, 7  ;;  %v2160_v21 = vrot.slane %v8697_v56, 2 }
 0x3a0   :  { %v2161_v51 = vrot.slane %v8701_v13, 1  ;;  %v2011_v41 = vrot.slane %v8229_v17, 1  ;;  %v12238_v40 = vrot.slane %v12237_v19, 7  ;;  %v2152_v26 = vrot.slane %v8678_v48, 6 }
 0x3a1   :  { %v8733_v53 = vsel %vm63_vm1, %v1722_v57, %v12236_v42  ;;  %v2148_v7 = vsel %vm598_vm2, %v2147_v1, %v2146_v3  ;;  %v2154_v3 = vrot.slane %v8682_v14, 5  ;;  %v11874_v17 = vrot.slane %v8705_v39, 7 }
 0x3a2   :  { %v8744_v4 = vsel %vm63_vm1, %v1723_v23, %v12238_v40  ;;  %v2149_v57 = vsel %vm601_vm3, %v8733_v53, %v2148_v7  ;;  %v2162_v1 = vsel %vm598_vm2, %v2161_v51, %v2160_v21  ;;  %v2156_v23 = vrot.slane %v8686_v28, 4 }
 0x3a3   :  { %v2151_v43 = vsel %vm604_vm4, %v11873_v2, %v2149_v57  ;;  %v2163_v42 = vsel %vm601_vm3, %v8744_v4, %v2162_v1  ;;  %v2166_v7 = vrot.slane %v8709_v44, 6  ;;  %v2158_v57 = vrot.slane %v8693_v10, 3 }
 0x3a4   :  { %v2153_v55 = vsel %vm607_vm5, %v2152_v26, %v2151_v43  ;;  %v6777_v19 = vpop.eup %6776  ;;  %v2165_v21 = vsel %vm604_vm4, %v11874_v17, %v2163_v42  ;;  %v2168_v51 = vrot.slane %v8713_v58, 5  ;;  %v2170_v47 = vrot.slane %v8717_v31, 4 }
 0x3a5   :  { %v2155_v40 = vsel %vm610_vm6, %v2154_v3, %v2153_v55  ;;  %v6779_v2 = vpop.eup %6778  ;;  %v8766_v26 = vmul.f32 %v6777_v19, %v6773_v11  ;;  %v2167_v1 = vsel %vm607_vm5, %v2166_v7, %v2165_v21  ;;  %v2172_v6 = vrot.slane %v8722_v16, 3  ;;  %v12241_v7 = vld [vmem:[#allocation13_spill] sm:$0xff] }
 0x3a6   :  { %v2157_v43 = vsel %vm613_vm7, %v2156_v23, %v2155_v40  ;;  %v1816_v63 = vmul.f32 %v6779_v2, %v6775_v38  ;;  %v2169_v55 = vsel %vm610_vm6, %v2168_v51, %v2167_v1  ;;  %v2012_v42 = vrot.slane %v8174_v62, 1  ;;  %v12240_v23 = vld [vmem:[#allocation22_spill] sm:$0xff] }
 0x3a7   :  { %v2159_v3 = vsel %vm616_vm8, %v2158_v57, %v2157_v43  ;;  %v2013_v17 = vrot.slane %v8178_v25, 1  ;;  %v2014_v11 = vrot.slane %v12239_v15, 1  ;;  %v2171_v19 = vsel %vm613_vm7, %v2170_v47, %v2169_v55 }
 0x3a8   :  { %v2015_v40 = vrot.slane %v12240_v23, 1  ;;  %v2016_v21 = vrot.slane %v12241_v7, 1  ;;  %v2017_v38 = vrot.slane %v12242_v35, 1  ;;  %v2173_v2 = vsel %vm616_vm8, %v2172_v6, %v2171_v19 }
 0x3a9   :  { %v2018_v57 = vrot.slane %v8250_v27, 1  ;;  %v6542_v51 = vpack.c.bf16 %v2173_v2, %v2159_v3  ;;  %v1976_v43 = vrot.slane %v1816_v63, 3  ;;  %v1977_v1 = vrot.slane %v1816_v63, 4 }
 0x3aa   :  { %v1978_v62 = vrot.slane %v1816_v63, 5  ;;  %v1979_v39 = vrot.slane %v1816_v63, 6  ;;  %v1980_v25 = vrot.slane %v1816_v63, 7  ;;  %v1981_v34 = vrot.slane %v1816_v63, 1 }
 0x3ab   :  { %6543 = vmatprep.subr.bf16.mxu1 %v6542_v51  ;;  %v1982_v15 = vrot.slane %v1816_v63, 2  ;;  %v1983_v47 = vrot.slane %v8766_v26, 3  ;;  %v1984_v55 = vrot.slane %v8766_v26, 4  ;;  %v1985_v23 = vrot.slane %v8766_v26, 5 }
 0x3ac   :  { %6545 = vmatpush3.bf16.msra.mxu1 %v6542_v51  ;;  %v1986_v35 = vrot.slane %v8766_v26, 6  ;;  %v1987_v27 = vrot.slane %v8766_v26, 7  ;;  %v1988_v6 = vrot.slane %v8766_v26, 1  ;;  %v1989_v3 = vrot.slane %v8766_v26, 2 }
 0x3ad   :  { %v12243_v19 = vrot.slane %v8141_v0, 1  ;;  %v12244_v2 = vrot.slane %v8147_v18, 1  ;;  %v12245_v51 = vrot.slane %v8153_v9, 1  ;;  %v12246_v58 = vrot.slane %v8159_v45, 1 }
 0x3ae   :  { %v12247_v18 = vrot.slane %v8166_v61, 1  ;;  %v8823_v9 = vsel %vm63_vm1, %v1981_v34, %v2011_v41  ;;  %v8831_v45 = vsel %vm63_vm1, %v1983_v47, %v2013_v17  ;;  %v8839_v61 = vsel %vm63_vm1, %v1985_v23, %v2015_v40 }
 0x3af   :  { %v8794_v7 = vsel %vm63_vm1, %v1976_v43, %v12243_v19  ;;  %v8800_v16 = vsel %vm63_vm1, %v1977_v1, %v12244_v2  ;;  %v8806_v31 = vsel %vm63_vm1, %v1978_v62, %v12245_v51  ;;  %v8812_v0 = vsel %vm63_vm1, %v1979_v39, %v12246_v58 }
 0x3b0   :  { %v2019_v43 = vrot.slane %v8202_v36, 1  ;;  %v8819_v1 = vsel %vm63_vm1, %v1980_v25, %v12247_v18  ;;  %v8827_v62 = vsel %vm63_vm1, %v1982_v15, %v2012_v42  ;;  %v8835_v36 = vsel %vm63_vm1, %v1984_v55, %v2014_v11 }
 0x3b1   :  { %v8843_v34 = vsel %vm63_vm1, %v1986_v35, %v2016_v21  ;;  %v8847_v39 = vsel %vm63_vm1, %v1987_v27, %v2017_v38  ;;  %v8851_v58 = vsel %vm63_vm1, %v1988_v6, %v2018_v57  ;;  %v1928_v17 = vrot.slane %v8273_v50, 7  ;;  %v12248_v27 = vld [vmem:[#allocation16_spill] sm:$0xff] }
 0x3b2   :  { %v8855_v41 = vsel %vm63_vm1, %v1989_v3, %v2019_v43  ;;  %v2192_v42 = vrot.slane %v8794_v7, 5  ;;  %v2193_v11 = vrot.slane %v8800_v16, 4  ;;  %v2195_v40 = vrot.slane %v8806_v31, 3 }
 0x3b3   :  { %v1929_v21 = vrot.slane %v8308_v5, 7  ;;  %v1930_v38 = vrot.slane %v8282_v37, 7  ;;  %v2206_v25 = vrot.slane %v8831_v45, 5  ;;  %v2481_v57 = vrot.slane %v8614_v32, 3 }
 0x3b4   :  { %v2194_v15 = vsel %vm598_vm2, %v2193_v11, %v2192_v42  ;;  %v2197_v47 = vrot.slane %v8812_v0, 2  ;;  %v2207_v50 = vrot.slane %v8835_v36, 4  ;;  %v2209_v55 = vrot.slane %v8839_v61, 3 }
 0x3b5   :  { %v2196_v23 = vsel %vm601_vm3, %v2195_v40, %v2194_v15  ;;  %v11881_v35 = vrot.slane %v8819_v1, 1  ;;  %v1898_v5 = vrot.slane %v8583_v22, 6  ;;  %v1899_v37 = vrot.slane %v8583_v22, 7 }
 0x3b6   :  { %v12249_v6 = vrot.slane %v12248_v27, 1  ;;  %v2198_v19 = vsel %vm604_vm4, %v2197_v47, %v2196_v23  ;;  %v2208_v2 = vsel %vm598_vm2, %v2207_v50, %v2206_v25  ;;  %v2211_v51 = vrot.slane %v8843_v34, 2 }
 0x3b7   :  { %v2200_v43 = vsel %vm607_vm5, %v11881_v35, %v2198_v19  ;;  %v2202_v18 = vrot.slane %v8823_v9, 7  ;;  %v2210_v42 = vsel %vm601_vm3, %v2209_v55, %v2208_v2  ;;  %v11880_v11 = vrot.slane %v8847_v39, 1 }
 0x3b8   :  { %v8877_v3 = vsel %vm63_vm1, %v1816_v63, %v12249_v6  ;;  %v2204_v40 = vrot.slane %v8827_v62, 6  ;;  %v2212_v15 = vsel %vm604_vm4, %v2211_v51, %v2210_v42  ;;  %v1900_v25 = vrot.slane %v8583_v22, 1  ;;  %v12251_v42 = vld [vmem:[#allocation18_spill] sm:$0xff] }
 0x3b9   :  { %v2201_v63 = vsel %vm610_vm6, %v8877_v3, %v2200_v43  ;;  %v12250_v47 = vrot.slane %v8198_v33, 1  ;;  %v2214_v23 = vsel %vm607_vm5, %v11880_v11, %v2212_v15  ;;  %v2216_v27 = vrot.slane %v8851_v58, 7 }
 0x3ba   :  { %v2203_v55 = vsel %vm613_vm7, %v2202_v18, %v2201_v63  ;;  %v2218_v33 = vrot.slane %v8855_v41, 6  ;;  %v1901_v2 = vrot.slane %v8583_v22, 2  ;;  %v1932_v51 = vrot.slane %v8290_v29, 7 }
 0x3bb   :  { %v8898_v50 = vsel %vm63_vm1, %v8766_v26, %v12250_v47  ;;  %v2205_v6 = vsel %vm616_vm8, %v2204_v40, %v2203_v55  ;;  %v1931_v26 = vrot.slane %v8286_v54, 7  ;;  %v1933_v43 = vrot.slane %v8294_v20, 7 }
 0x3bc   :  { %v2215_v19 = vsel %vm610_vm6, %v8898_v50, %v2214_v23  ;;  %v1934_v63 = vrot.slane %v12251_v42, 7  ;;  %v8918_v40 = vsel %vm616_vm8, %v2481_v57, %v8648_v8  ;;  %v1902_v47 = vrot.slane %v8583_v22, 3  ;;  %v12260_v42 = vld [vmem:[#allocation15_spill] sm:$0xff] }
 0x3bd   :  { %v2217_v18 = vsel %vm613_vm7, %v2216_v27, %v2215_v19  ;;  %v1903_v23 = vrot.slane %v8583_v22, 4  ;;  %v1904_v54 = vrot.slane %v8583_v22, 5  ;;  %v8925_v29 = vsel %vm63_vm1, %v1898_v5, %v1928_v17 }
 0x3be   :  { %v2219_v15 = vsel %vm616_vm8, %v2218_v33, %v2217_v18  ;;  %v2091_v20 = vrot.slane %v8352_v59, 1  ;;  %v8930_v27 = vsel %vm63_vm1, %v1899_v37, %v1929_v21  ;;  %v8934_v8 = vsel %vm63_vm1, %v1900_v25, %v1930_v38  ;;  %v12256_v37 = vld [vmem:[#allocation26_spill] sm:$0xff]  ;;  %v12257_v33 = vld [vmem:[#allocation25_spill] sm:$0xff] }
 0x3bf   :  { %v6546_v55 = vpack.c.bf16 %v2219_v15, %v2205_v6  ;;  %12252 = vst [vmem:[#allocation46_spill] sm:$0xff] %v8934_v8  ;;  %v8938_v57 = vsel %vm63_vm1, %v1901_v2, %v1931_v26  ;;  %v8942_v6 = vsel %vm63_vm1, %v1902_v47, %v1932_v51  ;;  %v8946_v59 = vsel %vm63_vm1, %v1903_v23, %v1933_v43  ;;  %v12258_v26 = vld [vmem:[#allocation29_spill] sm:$0xff]  ;;  %v12262_v23 = vld [vmem:[#allocation19_spill] sm:$0xff] }
 0x3c0   :  { %12253 = vst [vmem:[#allocation47_spill] sm:$0xff] %v8942_v6  ;;  %12254 = vst [vmem:[#allocation40_spill] sm:$0xff] %v8946_v59  ;;  %v8950_v17 = vsel %vm63_vm1, %v1904_v54, %v1934_v63  ;;  %v2455_v21 = vrot.slane %v8925_v29, 2  ;;  %v2092_v38 = vrot.slane %v8356_v49, 1  ;;  %v2093_v5 = vrot.slane %v8370_v46, 1  ;;  %v12259_v43 = vld [vmem:[#allocation21_spill] sm:$0xff] }
 0x3c1   :  { %6547 = vmatprep.subr.bf16.mxu1 %v6546_v55  ;;  %12255 = vst [vmem:[#allocation42_spill] sm:$0xff] %v8950_v17  ;;  %v2094_v25 = vrot.slane %v12256_v37, 1  ;;  %v2456_v19 = vrot.slane %v8930_v27, 1  ;;  %v2095_v2 = vrot.slane %v12257_v33, 1  ;;  %v2096_v51 = vrot.slane %v12258_v26, 1  ;;  %v12263_v26 = vld [vmem:[#allocation20_spill] sm:$0xff] }
 0x3c2   :  { %6549 = vmatpush3.bf16.msra.mxu1 %v6546_v55  ;;  %v2097_v18 = vrot.slane %v12259_v43, 1  ;;  %v12261_v63 = vrot.slane %v12260_v42, 7  ;;  %v11882_v46 = vrot.slane %v8934_v8, 7  ;;  %v2461_v47 = vrot.slane %v8938_v57, 6  ;;  %v12268_v8 = vld [vmem:[#allocation23_spill] sm:$0xff] }
 0x3c3   :  { %v2457_v49 = vsel %vm598_vm2, %v2456_v19, %v2455_v21  ;;  %v2463_v55 = vrot.slane %v8942_v6, 5  ;;  %v2465_v37 = vrot.slane %v8946_v59, 4  ;;  %v2467_v33 = vrot.slane %v8950_v17, 3 }
 0x3c4   :  { %v8965_v15 = vsel %vm63_vm1, %v8583_v22, %v12261_v63  ;;  %v2061_v22 = vrot.slane %v8652_v30, 3  ;;  %v2062_v19 = vrot.slane %v8652_v30, 4  ;;  %v2063_v43 = vrot.slane %v8652_v30, 5 }
 0x3c5   :  { %6375 = vmatmul.mubr.msk.f32.vlgmr.msra.gmra.mrb[16].mxu1 %vm64_vm0, %v12262_v23  ;;  %v2458_v54 = vsel %vm601_vm3, %v8965_v15, %v2457_v49  ;;  %v2064_v42 = vrot.slane %v8652_v30, 6  ;;  %v2065_v49 = vrot.slane %v8652_v30, 7  ;;  %v2066_v23 = vrot.slane %v8652_v30, 1 }
 0x3c6   :  { %6377 = vmatprep.mubr.msk.f32.mxu1 %vm64_vm0, %v12263_v26  ;;  %v2460_v21 = vsel %vm604_vm4, %v11882_v46, %v2458_v54  ;;  %v2067_v11 = vrot.slane %v8652_v30, 2  ;;  %v8993_v35 = vsel %vm63_vm1, %v2061_v22, %v2091_v20  ;;  %v8997_v54 = vsel %vm63_vm1, %v2062_v19, %v2092_v38  ;;  %v12271_v38 = vld [vmem:[#allocation27_spill] sm:$0xff] }
 0x3c7   :  { %v2462_v63 = vsel %vm607_vm5, %v2461_v47, %v2460_v21  ;;  %12264 = vst [vmem:[#allocation12_spill] sm:$0xff] %v8993_v35  ;;  %12265 = vst [vmem:[#allocation22_spill] sm:$0xff] %v8997_v54  ;;  %v9001_v46 = vsel %vm63_vm1, %v2063_v43, %v2093_v5  ;;  %v12267_v47 = vld [vmem:[#allocation32_spill] sm:$0xff]  ;;  %v9013_v20 = vsel %vm63_vm1, %v2065_v49, %v2095_v2  ;;  %v12275_v2 = vld [vmem:[#allocation34_spill] sm:$0xff] }
 0x3c8   :  { %v2464_v26 = vsel %vm610_vm6, %v2463_v55, %v2462_v63  ;;  %12266 = vst [vmem:[#allocation13_spill] sm:$0xff] %v9001_v46  ;;  %v2084_v21 = vrot.slane %v12267_v47, 1  ;;  %v9009_v55 = vsel %vm63_vm1, %v2064_v42, %v2094_v25  ;;  %12270 = vst [vmem:[#allocation16_spill] sm:$0xff] %v9013_v20  ;;  %v9022_v22 = vsel %vm63_vm1, %v2066_v23, %v2096_v51  ;;  %v12277_v49 = vld [vmem:[#allocation36_spill] sm:$0xff]  ;;  %v12279_v47 = vld [vmem:[#allocation38_spill] sm:$0xff] }
 0x3c9   :  { %6378 = vmatmul.mubr.msk.f32.gmra.mrb[18].mxu1 %vm64_vm0, %v12268_v8  ;;  %v2466_v17 = vsel %vm613_vm7, %v2465_v37, %v2464_v26  ;;  %12269 = vst [vmem:[#allocation14_spill] sm:$0xff] %v9009_v55  ;;  %12272 = vst [vmem:[#allocation18_spill] sm:$0xff] %v9022_v22  ;;  %v9026_v8 = vsel %vm63_vm1, %v2067_v11, %v2097_v18  ;;  %v2563_v25 = vrot.slane %v8993_v35, 5  ;;  %v12274_v37 = vld [vmem:[#allocation33_spill] sm:$0xff]  ;;  %v2086_v43 = vrot.slane %v12275_v2, 1  ;;  %v12278_v51 = vld [vmem:[#allocation52_spill] sm:$0xff] }
 0x3ca   :  { %6380 = vmatprep.mubr.msk.f32.mxu1 %vm64_vm0, %v12271_v38  ;;  %v9018_v5 = vsel %vm616_vm8, %v2467_v33, %v2466_v17  ;;  %12273 = vst [vmem:[#allocation26_spill] sm:$0xff] %v9026_v8  ;;  %v2085_v19 = vrot.slane %v12274_v37, 1  ;;  %v2564_v42 = vrot.slane %v8997_v54, 4  ;;  %v2566_v63 = vrot.slane %v9001_v46, 3  ;;  %v12276_v17 = vld [vmem:[#allocation35_spill] sm:$0xff]  ;;  %v12280_v11 = vld [vmem:[#allocation28_spill] sm:$0xff] }
 0x3cb   :  { %v2087_v33 = vrot.slane %v12276_v17, 1  ;;  %v2088_v26 = vrot.slane %v12277_v49, 1  ;;  %v2089_v23 = vrot.slane %v12278_v51, 1  ;;  %v2090_v38 = vrot.slane %v12279_v47, 1  ;;  %v12281_v18 = vld [vmem:[#allocation17_spill] sm:$0xff]  ;;  %v12284_v46 = vld [vmem:[#allocation30_spill] sm:$0xff] }
 0x3cc   :  { %v12282_v35 = vrot.slane %v12281_v18, 1  ;;  %v2565_v2 = vsel %vm598_vm2, %v2564_v42, %v2563_v25  ;;  %v2568_v17 = vrot.slane %v9009_v55, 2  ;;  %v11890_v49 = vrot.slane %v9013_v20, 1  ;;  %v12305_v55 = vld [vmem:[#allocation57_spill] sm:$0xff] }
 0x3cd   :  { %6381 = vmatmul.mubr.msk.f32.gmra.mrb[20].mxu1 %vm64_vm0, %v12280_v11  ;;  %v2567_v51 = vsel %vm601_vm3, %v2566_v63, %v2565_v2  ;;  %v2573_v47 = vrot.slane %v9022_v22, 7  ;;  %v2575_v11 = vrot.slane %v9026_v8, 6  ;;  %v2054_v18 = vrot.slane %v8654_v52, 3  ;;  %v12285_v22 = vld [vmem:[#allocation31_spill] sm:$0xff] }
 0x3ce   :  { %v9044_v37 = vsel %vm63_vm1, %v8652_v30, %v12282_v35  ;;  %6383 = vmatprep.mubr.msk.f32.mxu1 %vm64_vm0, %v12284_v46  ;;  %v2569_v30 = vsel %vm604_vm4, %v2568_v17, %v2567_v51  ;;  %v2055_v35 = vrot.slane %v8654_v52, 4  ;;  %v2056_v25 = vrot.slane %v8654_v52, 5 }
 0x3cf   :  { %12283 = vst [vmem:[#allocation25_spill] sm:$0xff] %v9044_v37  ;;  %v2057_v42 = vrot.slane %v8654_v52, 6  ;;  %v2571_v46 = vsel %vm607_vm5, %v11890_v49, %v2569_v30  ;;  %v2058_v63 = vrot.slane %v8654_v52, 7  ;;  %v2059_v2 = vrot.slane %v8654_v52, 1  ;;  %v12289_v49 = vld [vmem:[#allocation24_spill] sm:$0xff] }
 0x3d0   :  { %v2060_v8 = vrot.slane %v8654_v52, 2  ;;  %v2572_v17 = vsel %vm610_vm6, %v9044_v37, %v2571_v46  ;;  %v9071_v51 = vsel %vm63_vm1, %v2054_v18, %v2084_v21  ;;  %v9075_v20 = vsel %vm63_vm1, %v2055_v35, %v2085_v19  ;;  %v12294_v35 = vld [vmem:[#allocation48_spill] sm:$0xff] }
 0x3d1   :  { %6384 = vmatmul.mubr.msk.f32.gmra.mrb[22].mxu1 %vm64_vm0, %v12285_v22  ;;  %12286 = vst [vmem:[#allocation29_spill] sm:$0xff] %v9071_v51  ;;  %12287 = vst [vmem:[#allocation21_spill] sm:$0xff] %v9075_v20  ;;  %v9079_v30 = vsel %vm63_vm1, %v2056_v25, %v2086_v43  ;;  %v2574_v22 = vsel %vm613_vm7, %v2573_v47, %v2572_v17  ;;  %v9086_v46 = vsel %vm63_vm1, %v2057_v42, %v2087_v33  ;;  %v12296_v42 = vld [vmem:[#allocation50_spill] sm:$0xff] }
 0x3d2   :  { %12288 = vst [vmem:[#allocation15_spill] sm:$0xff] %v9079_v30  ;;  %6386 = vmatprep.mubr.msk.f32.mxu1 %vm64_vm0, %v12289_v49  ;;  %12290 = vst [vmem:[#allocation19_spill] sm:$0xff] %v9086_v46  ;;  %v9090_v21 = vsel %vm63_vm1, %v2058_v63, %v2088_v26  ;;  %v9093_v19 = vsel %vm616_vm8, %v2575_v11, %v2574_v22  ;;  %v9097_v43 = vsel %vm63_vm1, %v2059_v2, %v2089_v23  ;;  %v12295_v26 = vld [vmem:[#allocation49_spill] sm:$0xff] }
 0x3d3   :  { %12291 = vst [vmem:[#allocation20_spill] sm:$0xff] %v9090_v21  ;;  %12292 = vst [vmem:[#allocation32_spill] sm:$0xff] %v9097_v43  ;;  %v9101_v49 = vsel %vm63_vm1, %v2060_v8, %v2090_v38  ;;  %v2549_v47 = vrot.slane %v9071_v51, 5  ;;  %v2550_v33 = vrot.slane %v9075_v20, 4  ;;  %v2552_v18 = vrot.slane %v9079_v30, 3  ;;  %v12297_v63 = vld [vmem:[#allocation37_spill] sm:$0xff] }
 0x3d4   :  { %12293 = vst [vmem:[#allocation23_spill] sm:$0xff] %v9101_v49  ;;  %v2554_v23 = vrot.slane %v9086_v46, 2  ;;  %v11891_v8 = vrot.slane %v9090_v21, 1  ;;  %v12298_v2 = vrot.slane %v12297_v63, 1  ;;  %v2368_v63 = vld [vmem:[#allocation2 + $0xc0] sm:$0xff]  ;;  %v2706_v54 = vrot.slane %v12305_v55, 7 }
 0x3d5   :  { %6387 = vmatmul.mubr.msk.f32.gmra.mrb[24].mxu1 %vm64_vm0, %v12294_v35  ;;  %v2551_v11 = vsel %vm598_vm2, %v2550_v33, %v2549_v47  ;;  %v2559_v47 = vrot.slane %v9097_v43, 7  ;;  %v12300_v33 = vld [vmem:[#allocation51_spill] sm:$0xff]  ;;  %v2561_v35 = vrot.slane %v9101_v49, 6 }
 0x3d6   :  { %6389 = vmatprep.mubr.msk.f32.mxu1 %vm64_vm0, %v12295_v26  ;;  %v2553_v25 = vsel %vm601_vm3, %v2552_v18, %v2551_v11  ;;  %v9122_v17 = vsel %vm63_vm1, %v8654_v52, %v12298_v2  ;;  %v12301_v52 = vld [vmem:[#allocation53_spill] sm:$0xff]  ;;  %v2372_v30 = vld [vmem:[#allocation2 + $0xe0] sm:$0xff] }
 0x3d7   :  { %v2555_v38 = vsel %vm604_vm4, %v2554_v23, %v2553_v25  ;;  %12299 = vst [vmem:[#allocation27_spill] sm:$0xff] %v9122_v17  ;;  %v12302_v23 = vld [vmem:[#allocation54_spill] sm:$0xff]  ;;  %v12303_v25 = vld [vmem:[#allocation55_spill] sm:$0xff] }
 0x3d8   :  { %v2557_v22 = vsel %vm607_vm5, %v11891_v8, %v2555_v38  ;;  %v12304_v38 = vld [vmem:[#allocation56_spill] sm:$0xff] }
 0x3d9   :  { %6390 = vmatmul.mubr.msk.f32.gmra.mrb[26].mxu1 %vm64_vm0, %v12296_v42  ;;  %v2558_v18 = vsel %vm610_vm6, %v9122_v17, %v2557_v22  ;;  %v2369_v42 = vld [vmem:[#allocation2 + $0xc8] sm:$0xff] }
 0x3da   :  { %6392 = vmatprep.mubr.msk.f32.mxu1 %vm64_vm0, %v12300_v33  ;;  %v2560_v26 = vsel %vm613_vm7, %v2559_v47, %v2558_v18  ;;  %v2371_v18 = vld [vmem:[#allocation2 + $0xd8] sm:$0xff] }
 0x3db   :  { %v9135_v11 = vsel %vm616_vm8, %v2561_v35, %v2560_v26  ;;  %v2370_v26 = vld [vmem:[#allocation2 + $0xd0] sm:$0xff] }
 0x3dd   :  { %6393 = vmatmul.mubr.msk.f32.gmra.mrb[28].mxu1 %vm64_vm0, %v12301_v52 }
 0x3de   :  { %6395 = vmatprep.mubr.msk.f32.mxu1 %vm64_vm0, %v12302_v23 }
 0x3e1   :  { %6396 = vmatmul.mubr.msk.f32.gmra.mrb[30].mxu1 %vm64_vm0, %v12303_v25 }
 0x3e2   :  { %6438 = vmatprep.mubr.msk.f32.mxu1 %vm64_vm0, %v12304_v38  ;;  %v2373_v38 = vld [vmem:[#allocation2 + $0xe8] sm:$0xff] }
 0x498   :  { %v6376_v2 = vpop.f32.mrb[16].mxu1 }
 0x499   :  { %v2377_v22 = vadd.f32 %v6376_v2, %v2369_v42  ;;  %v2288_v47 = vpop.f32.mrb[17].mxu1  ;;  %v2375_v42 = vld [vmem:[#allocation2 + $0xf8] sm:$0xff]  ;;  %v2374_v2 = vld [vmem:[#allocation2 + $0xf0] sm:$0xff] }
 0x49a   :  { %v2376_v33 = vadd.f32 %v2368_v63, %v2288_v47 }
 0x49b   :  { %v6000_v35 = vmul.f32 -1.442695, %v2377_v22 }
 0x49c   :  { %v5999_v8 = vmul.f32 -1.442695, %v2376_v33  ;;  %v6379_v52 = vpop.f32.mrb[18].mxu1 }
 0x49d   :  { %6780 = vpow2.f32 %v6000_v35  ;;  %v2379_v21 = vadd.f32 %v6379_v52, %v2371_v18  ;;  %v2298_v23 = vpop.f32.mrb[19].mxu1  ;;  %v2386_v18 = vld [vmem:[#allocation5 + $0x108] sm:$0xff] }
 0x49e   :  { %6782 = vpow2.f32 %v5999_v8  ;;  %v2378_v49 = vadd.f32 %v2370_v26, %v2298_v23 }
 0x49f   :  { %v6002_v25 = vmul.f32 -1.442695, %v2379_v21  ;;  %v2385_v21 = vld [vmem:[#allocation5 + $0x100] sm:$0xff] }
 0x4a0   :  { %v6001_v43 = vmul.f32 -1.442695, %v2378_v49  ;;  %v6382_v17 = vpop.f32.mrb[20].mxu1 }
 0x4a1   :  { %6784 = vpow2.f32 %v6002_v25  ;;  %v2308_v46 = vpop.f32.mrb[21].mxu1  ;;  %v2381_v63 = vadd.f32 %v6382_v17, %v2373_v38 }
 0x4a2   :  { %6786 = vpow2.f32 %v6001_v43  ;;  %v2380_v22 = vadd.f32 %v2372_v30, %v2308_v46  ;;  %v2388_v46 = vld [vmem:[#allocation5 + $0x118] sm:$0xff] }
 0x4a3   :  { %6788 = vtanh.f32 %v2381_v63 }
 0x4a4   :  { %v6385_v47 = vpop.f32.mrb[22].mxu1  ;;  %6790 = vtanh.f32 %v2380_v22 }
 0x4a5   :  { %v2383_v33 = vadd.f32 %v6385_v47, %v2375_v42  ;;  %v2318_v20 = vpop.f32.mrb[23].mxu1  ;;  %v2387_v42 = vld [vmem:[#allocation5 + $0x110] sm:$0xff] }
 0x4a6   :  { %v2382_v35 = vadd.f32 %v2374_v2, %v2318_v20 }
 0x4a7   :  { %v6781_v52 = vpop.eup %6780  ;;  %v6004_v8 = vmul.f32 -1.442695, %v2383_v33 }
 0x4a8   :  { %v6783_v49 = vpop.eup %6782  ;;  %v2408_v26 = vadd.f32 1.0, %v6781_v52  ;;  %v6003_v23 = vmul.f32 -1.442695, %v2382_v35  ;;  %v6388_v25 = vpop.f32.mrb[24].mxu1 }
 0x4a9   :  { %v2407_v51 = vadd.f32 1.0, %v6783_v49  ;;  %6792 = vpow2.f32 %v6004_v8  ;;  %v2394_v43 = vadd.f32 %v6388_v25, %v2386_v18  ;;  %v2328_v17 = vpop.f32.mrb[25].mxu1  ;;  %v2390_v49 = vld [vmem:[#allocation5 + $0x128] sm:$0xff] }
 0x4aa   :  { %6794 = vrcp.f32 %v2408_v26  ;;  %v2393_v30 = vadd.f32 %v2385_v21, %v2328_v17 }
 0x4ab   :  { %v6785_v38 = vpop.eup %6784  ;;  %6796 = vrcp.f32 %v2407_v51  ;;  %v6006_v20 = vmul.f32 -1.442695, %v2394_v43  ;;  %v2389_v51 = vld [vmem:[#allocation5 + $0x120] sm:$0xff] }
 0x4ac   :  { %v6787_v2 = vpop.eup %6786  ;;  %v2420_v63 = vadd.f32 1.0, %v6785_v38  ;;  %6798 = vpow2.f32 %v6003_v23  ;;  %v6005_v47 = vmul.f32 -1.442695, %v2393_v30  ;;  %v6391_v33 = vpop.f32.mrb[26].mxu1  ;;  %v2392_v30 = vld [vmem:[#allocation5 + $0x138] sm:$0xff] }
 0x4ad   :  { %v2419_v52 = vadd.f32 1.0, %v6787_v2  ;;  %6800 = vpow2.f32 %v6006_v20  ;;  %v2396_v22 = vadd.f32 %v6391_v33, %v2388_v46  ;;  %v2338_v35 = vpop.f32.mrb[27].mxu1  ;;  %v6789_v25 = vpop.eup %6788  ;;  %v2391_v46 = vld [vmem:[#allocation5 + $0x130] sm:$0xff] }
 0x4ae   :  { %6802 = vrcp.f32 %v2420_v63  ;;  %v2395_v8 = vadd.f32 %v2387_v42, %v2338_v35  ;;  %v6791_v17 = vpop.eup %6790 }
 0x4af   :  { %6804 = vrcp.f32 %v2419_v52  ;;  %v6008_v18 = vmul.f32 -1.442695, %v2396_v22 }
 0x4b0   :  { %6806 = vpow2.f32 %v6005_v47  ;;  %v6007_v21 = vmul.f32 -1.442695, %v2395_v8  ;;  %v6394_v26 = vpop.f32.mrb[28].mxu1 }
 0x4b1   :  { %6808 = vpow2.f32 %v6008_v18  ;;  %v2348_v43 = vpop.f32.mrb[29].mxu1  ;;  %v2398_v23 = vadd.f32 %v6394_v26, %v2390_v49 }
 0x4b2   :  { %6810 = vpow2.f32 %v6007_v21  ;;  %v2397_v20 = vadd.f32 %v2389_v51, %v2348_v43  ;;  %v12306_v51 = vld [vmem:[#allocation58_spill] sm:$0xff] }
 0x4b3   :  { %v6793_v38 = vpop.eup %6792  ;;  %6812 = vtanh.f32 %v2398_v23  ;;  %v2707_v43 = vrot.slane %v12306_v51, 7 }
 0x4b4   :  { %v6795_v2 = vpop.eup %6794  ;;  %v2434_v63 = vadd.f32 1.0, %v6793_v38  ;;  %v6397_v42 = vpop.f32.mrb[30].mxu1  ;;  %6814 = vtanh.f32 %v2397_v20 }
 0x4b5   :  { %v6797_v33 = vpop.eup %6796  ;;  %v2488_v52 = vmul.f32 %v6795_v2, %v6789_v25  ;;  %v2400_v22 = vadd.f32 %v6397_v42, %v2392_v30  ;;  %v2358_v47 = vpop.f32.mrb[31].mxu1  ;;  %v12307_v30 = vld [vmem:[#allocation41_spill] sm:$0xff] }
 0x4b6   :  { %v6799_v35 = vpop.eup %6798  ;;  %v2487_v8 = vmul.f32 %v6797_v33, %v6791_v17  ;;  %v2399_v37 = vadd.f32 %v2391_v46, %v2358_v47  ;;  %6816 = vrcp.f32 %v2434_v63  ;;  %v2708_v2 = vrot.slane %v12307_v30, 7  ;;  %v12308_v17 = vld [vmem:[#allocation60_spill] sm:$0xff]  ;;  %v12309_v42 = vld [vmem:[#allocation61_spill] sm:$0xff]  ;;  %v12310_v33 = vld [vmem:[#allocation62_spill] sm:$0xff] }
 0x4b7   :  { %v6801_v18 = vpop.eup %6800  ;;  %v2433_v21 = vadd.f32 1.0, %v6799_v35  ;;  %v6010_v49 = vmul.f32 -1.442695, %v2400_v22  ;;  %v2709_v23 = vrot.slane %v12308_v17, 7  ;;  %v2710_v55 = vrot.slane %v12309_v42, 7 }
 0x4b8   :  { %v6803_v26 = vpop.eup %6802  ;;  %v2502_v38 = vadd.f32 1.0, %v6801_v18  ;;  %v6009_v59 = vmul.f32 -1.442695, %v2399_v37  ;;  %v2711_v20 = vrot.slane %v12310_v33, 7  ;;  %v2712_v63 = vrot.slane %v8614_v32, 7 }
 0x4b9   :  { %v6805_v6 = vpop.eup %6804  ;;  %v2486_v25 = vmul.f32 %v6803_v26, %v8918_v40  ;;  %6818 = vrcp.f32 %v2433_v21 }
 0x4ba   :  { %v6807_v46 = vpop.eup %6806  ;;  %v2485_v22 = vmul.f32 %v6805_v6, %v9018_v5  ;;  %6820 = vrcp.f32 %v2502_v38 }
 0x4bb   :  { %v6809_v47 = vpop.eup %6808  ;;  %v2490_v37 = vadd.f32 %v2488_v52, %v2486_v25  ;;  %v2501_v35 = vadd.f32 1.0, %v6807_v46  ;;  %6822 = vpow2.f32 %v6010_v49 }
 0x4bc   :  { %v6811_v40 = vpop.eup %6810  ;;  %v9155_v26 = vadd.f32 %v2487_v8, %v2485_v22  ;;  %v2514_v21 = vadd.f32 1.0, %v6809_v47  ;;  %6824 = vpow2.f32 %v6009_v59 }
 0x4bd   :  { %6826 = vtanh.f32 %v2490_v37  ;;  %v2513_v51 = vadd.f32 1.0, %v6811_v40  ;;  %v2676_v30 = vrot.slane %v2490_v37, 5  ;;  %v2677_v17 = vrot.slane %v2490_v37, 6  ;;  %v6813_v8 = vpop.eup %6812 }
 0x4be   :  { %6828 = vtanh.f32 %v9155_v26  ;;  %v2678_v6 = vrot.slane %v2490_v37, 7  ;;  %v2679_v5 = vrot.slane %v2490_v37, 1  ;;  %v2680_v38 = vrot.slane %v2490_v37, 2  ;;  %v6815_v42 = vpop.eup %6814 }
 0x4bf   :  { %6830 = vrcp.f32 %v2501_v35  ;;  %v2681_v32 = vrot.slane %v2490_v37, 3  ;;  %v2682_v52 = vrot.slane %v2490_v37, 4  ;;  %v9160_v49 = vsel %vm63_vm1, %v2676_v30, %v2706_v54 }
 0x4c0   :  { %6832 = vrcp.f32 %v2514_v21  ;;  %v9165_v59 = vsel %vm63_vm1, %v2677_v17, %v2707_v43  ;;  %v9169_v46 = vsel %vm63_vm1, %v2678_v6, %v2708_v2  ;;  %v9173_v33 = vsel %vm63_vm1, %v2679_v5, %v2709_v23  ;;  %v6817_v43 = vpop.eup %6816 }
 0x4c1   :  { %12311 = vst [vmem:[#allocation33_spill] sm:$0xff] %v9169_v46  ;;  %6834 = vrcp.f32 %v2513_v51  ;;  %12312 = vst [vmem:[#allocation34_spill] sm:$0xff] %v9173_v33  ;;  %v9177_v54 = vsel %vm63_vm1, %v2680_v38, %v2710_v55  ;;  %v9181_v22 = vsel %vm63_vm1, %v2681_v32, %v2711_v20  ;;  %v9185_v47 = vsel %vm63_vm1, %v2682_v52, %v2712_v63  ;;  %v12315_v52 = vld [vmem:[#allocation59_spill] sm:$0xff] }
 0x4c2   :  { %12313 = vst [vmem:[#allocation35_spill] sm:$0xff] %v9177_v54  ;;  %12314 = vst [vmem:[#allocation36_spill] sm:$0xff] %v9181_v22  ;;  %v3240_v2 = vrot.slane %v9160_v49, 3  ;;  %v3241_v35 = vrot.slane %v9165_v59, 2  ;;  %v3243_v23 = vrot.slane %v9169_v46, 1  ;;  %v2623_v21 = vrot.slane %v8733_v53, 7 }
 0x4c3   :  { %v6819_v40 = vpop.eup %6818  ;;  %v2624_v55 = vrot.slane %v8678_v48, 7  ;;  %v2625_v51 = vrot.slane %v8682_v14, 7  ;;  %v2626_v20 = vrot.slane %v8686_v28, 7  ;;  %v2627_v17 = vrot.slane %v8693_v10, 7 }
 0x4c4   :  { %v6821_v30 = vpop.eup %6820  ;;  %v2628_v63 = vrot.slane %v8697_v56, 7  ;;  %v2629_v6 = vrot.slane %v8701_v13, 7  ;;  %v3242_v5 = vsel %vm598_vm2, %v3241_v35, %v3240_v2  ;;  %v12316_v25 = vrot.slane %v12315_v52, 7 }
 0x4c5   :  { %v6823_v38 = vpop.eup %6822  ;;  %v2582_v32 = vmul.f32 %v6821_v30, %v6813_v8  ;;  %v3244_v14 = vsel %vm601_vm3, %v3243_v23, %v3242_v5  ;;  %v11908_v28 = vrot.slane %v9173_v33, 7  ;;  %v2630_v10 = vrot.slane %v8744_v4, 7  ;;  %v12318_v5 = vld [vmem:[#allocation43_spill] sm:$0xff]  ;;  %v12319_v4 = vld [vmem:[#allocation44_spill] sm:$0xff] }
 0x4c6   :  { %v9202_v48 = vsel %vm63_vm1, %v2490_v37, %v12316_v25  ;;  %v6825_v53 = vpop.eup %6824  ;;  %v2528_v56 = vadd.f32 1.0, %v6823_v38  ;;  %v3248_v2 = vrot.slane %v9177_v54, 6  ;;  %v2631_v35 = vrot.slane %v8709_v44, 7 }
 0x4c7   :  { %12317 = vst [vmem:[#allocation52_spill] sm:$0xff] %v9202_v48  ;;  %v3245_v13 = vsel %vm604_vm4, %v9202_v48, %v3244_v14  ;;  %v6827_v8 = vpop.eup %6826  ;;  %v2527_v30 = vadd.f32 1.0, %v6825_v53  ;;  %v3250_v25 = vrot.slane %v9181_v22, 5  ;;  %v2632_v52 = vrot.slane %v12318_v5, 7  ;;  %v12320_v48 = vld [vmem:[#allocation45_spill] sm:$0xff] }
 0x4c8   :  { %v3247_v37 = vsel %vm607_vm5, %v11908_v28, %v3245_v13  ;;  %v6829_v23 = vpop.eup %6828  ;;  %v2633_v38 = vrot.slane %v12319_v4, 7  ;;  %v9217_v18 = vmul.f32 %v6827_v8, %v6817_v43  ;;  %v2634_v46 = vrot.slane %v12320_v48, 7 }
 0x4c9   :  { %v3249_v14 = vsel %vm610_vm6, %v3248_v2, %v3247_v37  ;;  %v6831_v54 = vpop.eup %6830  ;;  %v2493_v44 = vmul.f32 %v6829_v23, %v6819_v40  ;;  %6836 = vrcp.f32 %v2528_v56 }
 0x4ca   :  { %v9222_v53 = vsel %vm613_vm7, %v3250_v25, %v3249_v14  ;;  %v6833_v13 = vpop.eup %6832  ;;  %v2581_v28 = vmul.f32 %v6831_v54, %v6815_v42  ;;  %6838 = vrcp.f32 %v2527_v30  ;;  %v2598_v33 = vrot.slane %v9217_v18, 5 }
 0x4cb   :  { %v2599_v5 = vrot.slane %v9217_v18, 6  ;;  %v6835_v4 = vpop.eup %6834  ;;  %v2580_v43 = vmul.f32 %v6833_v13, %v9093_v19  ;;  %v2591_v8 = vrot.slane %v2493_v44, 5  ;;  %v2592_v2 = vrot.slane %v2493_v44, 6 }
 0x4cc   :  { %v2593_v37 = vrot.slane %v2493_v44, 7  ;;  %v2579_v48 = vmul.f32 %v6835_v4, %v9135_v11  ;;  %v2594_v40 = vrot.slane %v2493_v44, 1  ;;  %v2595_v56 = vrot.slane %v2493_v44, 2 }
 0x4cd   :  { %v2596_v23 = vrot.slane %v2493_v44, 3  ;;  %v9228_v25 = vadd.f32 %v2582_v32, %v2580_v43  ;;  %v2597_v14 = vrot.slane %v2493_v44, 4  ;;  %v2600_v42 = vrot.slane %v9217_v18, 7 }
 0x4ce   :  { %v2601_v54 = vrot.slane %v9217_v18, 1  ;;  %v9232_v30 = vadd.f32 %v2581_v28, %v2579_v48  ;;  %v2602_v22 = vrot.slane %v9217_v18, 2  ;;  %v2603_v19 = vrot.slane %v9217_v18, 3 }
 0x4cf   :  { %v12321_v13 = vrot.slane %v8660_v60, 7  ;;  %6840 = vtanh.f32 %v9228_v25  ;;  %v2604_v32 = vrot.slane %v9217_v18, 4  ;;  %v12322_v4 = vrot.slane %v8667_v12, 7 }
 0x4d0   :  { %v9252_v43 = vsel %vm63_vm1, %v2593_v37, %v2623_v21  ;;  %6842 = vtanh.f32 %v9232_v30  ;;  %v9257_v60 = vsel %vm63_vm1, %v2594_v40, %v2624_v55  ;;  %v9265_v12 = vsel %vm63_vm1, %v2596_v23, %v2626_v20 }
 0x4d1   :  { %v9240_v11 = vsel %vm63_vm1, %v2591_v8, %v12321_v13  ;;  %v9248_v28 = vsel %vm63_vm1, %v2592_v2, %v12322_v4  ;;  %12323 = vst [vmem:[#allocation38_spill] sm:$0xff] %v9257_v60  ;;  %v9261_v8 = vsel %vm63_vm1, %v2595_v56, %v2625_v51  ;;  %v9269_v2 = vsel %vm63_vm1, %v2597_v14, %v2627_v17  ;;  %v12327_v13 = vld [vmem:[#allocation11_spill] sm:$0xff] }
 0x4d2   :  { %v9273_v21 = vsel %vm63_vm1, %v2598_v33, %v2628_v63  ;;  %v9277_v55 = vsel %vm63_vm1, %v2599_v5, %v2629_v6  ;;  %v9281_v51 = vsel %vm63_vm1, %v2600_v42, %v2630_v10  ;;  %v9286_v20 = vsel %vm63_vm1, %v2601_v54, %v2631_v35  ;;  %v12325_v54 = vld [vmem:[#allocation39_spill] sm:$0xff] }
 0x4d3   :  { %12324 = vst [vmem:[#allocation28_spill] sm:$0xff] %v9286_v20  ;;  %v9290_v17 = vsel %vm63_vm1, %v2602_v22, %v2632_v52  ;;  %v9294_v33 = vsel %vm63_vm1, %v2603_v19, %v2633_v38  ;;  %v6837_v63 = vpop.eup %6836  ;;  %v9298_v6 = vsel %vm63_vm1, %v2604_v32, %v2634_v46  ;;  %v2917_v10 = vrot.slane %v9240_v11, 3 }
 0x4d4   :  { %v2918_v5 = vrot.slane %v9248_v28, 2  ;;  %v2920_v35 = vrot.slane %v9252_v43, 1  ;;  %v6839_v48 = vpop.eup %6838  ;;  %v2778_v40 = vrot.slane %v8800_v16, 1  ;;  %v2779_v22 = vrot.slane %v8806_v31, 1 }
 0x4d5   :  { %v2780_v52 = vrot.slane %v8812_v0, 1  ;;  %v2931_v46 = vrot.slane %v9273_v21, 3  ;;  %v2932_v23 = vrot.slane %v9277_v55, 2  ;;  %v2934_v14 = vrot.slane %v9281_v51, 1 }
 0x4d6   :  { %v2919_v56 = vsel %vm598_vm2, %v2918_v5, %v2917_v10  ;;  %v2782_v42 = vrot.slane %v8823_v9, 1  ;;  %v12326_v19 = vrot.slane %v12325_v54, 7  ;;  %v11911_v0 = vrot.slane %v9257_v60, 7 }
 0x4d7   :  { %v2921_v31 = vsel %vm601_vm3, %v2920_v35, %v2919_v56  ;;  %v12328_v32 = vrot.slane %v12327_v13, 7  ;;  %v2925_v10 = vrot.slane %v9261_v8, 6  ;;  %v2933_v5 = vsel %vm598_vm2, %v2932_v23, %v2931_v46 }
 0x4d8   :  { %v9316_v16 = vsel %vm63_vm1, %v2493_v44, %v12326_v19  ;;  %v2927_v35 = vrot.slane %v9265_v12, 5  ;;  %v2935_v56 = vsel %vm601_vm3, %v2934_v14, %v2933_v5  ;;  %v11912_v54 = vrot.slane %v9286_v20, 7 }
 0x4d9   :  { %v9325_v4 = vsel %vm63_vm1, %v9217_v18, %v12328_v32  ;;  %v2922_v9 = vsel %vm604_vm4, %v9316_v16, %v2921_v31  ;;  %v6841_v19 = vpop.eup %6840  ;;  %v2929_v13 = vrot.slane %v9269_v2, 4  ;;  %v2939_v46 = vrot.slane %v9290_v17, 6 }
 0x4da   :  { %v2924_v44 = vsel %vm607_vm5, %v11911_v0, %v2922_v9  ;;  %v2936_v31 = vsel %vm604_vm4, %v9325_v4, %v2935_v56  ;;  %v6843_v23 = vpop.eup %6842  ;;  %v9342_v32 = vmul.f32 %v6841_v19, %v6837_v63  ;;  %v2941_v5 = vrot.slane %v9294_v33, 5 }
 0x4db   :  { %v2926_v18 = vsel %vm610_vm6, %v2925_v10, %v2924_v44  ;;  %v2938_v14 = vsel %vm607_vm5, %v11912_v54, %v2936_v31  ;;  %v2587_v0 = vmul.f32 %v6843_v23, %v6839_v48  ;;  %v2943_v56 = vrot.slane %v9298_v6, 4 }
 0x4dc   :  { %v2928_v9 = vsel %vm613_vm7, %v2927_v35, %v2926_v18  ;;  %v2940_v44 = vsel %vm610_vm6, %v2939_v46, %v2938_v14  ;;  %v2783_v38 = vrot.slane %v8827_v62, 1  ;;  %v2784_v63 = vrot.slane %v8831_v45, 1 }
 0x4dd   :  { %v2930_v10 = vsel %vm616_vm8, %v2929_v13, %v2928_v9  ;;  %v2785_v19 = vrot.slane %v8835_v36, 1  ;;  %v2942_v35 = vsel %vm613_vm7, %v2941_v5, %v2940_v44  ;;  %v2786_v18 = vrot.slane %v8839_v61, 1 }
 0x4de   :  { %v2787_v31 = vrot.slane %v8843_v34, 1  ;;  %v2788_v48 = vrot.slane %v8898_v50, 1  ;;  %v2944_v13 = vsel %vm616_vm8, %v2943_v56, %v2942_v35  ;;  %v2789_v46 = vrot.slane %v8851_v58, 1 }
 0x4df   :  { %v6550_v23 = vpack.c.bf16 %v2944_v13, %v2930_v10  ;;  %v2747_v9 = vrot.slane %v2587_v0, 4  ;;  %v2748_v14 = vrot.slane %v2587_v0, 5  ;;  %v2749_v62 = vrot.slane %v2587_v0, 6 }
 0x4e0   :  { %v2750_v54 = vrot.slane %v2587_v0, 7  ;;  %v2751_v45 = vrot.slane %v2587_v0, 1  ;;  %v2752_v37 = vrot.slane %v2587_v0, 2  ;;  %v2753_v36 = vrot.slane %v2587_v0, 3 }
 0x4e1   :  { %6551 = vmatprep.subr.bf16.mxu0 %v6550_v23  ;;  %v2754_v5 = vrot.slane %v9342_v32, 4  ;;  %v2755_v61 = vrot.slane %v9342_v32, 5  ;;  %v2756_v34 = vrot.slane %v9342_v32, 6  ;;  %v2757_v50 = vrot.slane %v9342_v32, 7 }
 0x4e2   :  { %6553 = vmatpush3.bf16.msra.mxu0 %v6550_v23  ;;  %v2758_v58 = vrot.slane %v9342_v32, 1  ;;  %v2759_v10 = vrot.slane %v9342_v32, 2  ;;  %v2760_v44 = vrot.slane %v9342_v32, 3  ;;  %v12329_v56 = vrot.slane %v8794_v7, 1 }
 0x4e3   :  { %v9376_v13 = vsel %vm63_vm1, %v2748_v14, %v2778_v40  ;;  %v9380_v23 = vsel %vm63_vm1, %v2749_v62, %v2779_v22  ;;  %v9384_v20 = vsel %vm63_vm1, %v2750_v54, %v2780_v52  ;;  %v2790_v60 = vrot.slane %v8855_v41, 1 }
 0x4e4   :  { %v9372_v35 = vsel %vm63_vm1, %v2747_v9, %v12329_v56  ;;  %12330 = vst [vmem:[#allocation17_spill] sm:$0xff] %v9384_v20  ;;  %v12331_v7 = vrot.slane %v8877_v3, 1  ;;  %v9395_v40 = vsel %vm63_vm1, %v2752_v37, %v2782_v42  ;;  %v9399_v22 = vsel %vm63_vm1, %v2753_v36, %v2783_v38 }
 0x4e5   :  { %v9403_v52 = vsel %vm63_vm1, %v2754_v5, %v2784_v63  ;;  %v9407_v41 = vsel %vm63_vm1, %v2755_v61, %v2785_v19  ;;  %v9411_v3 = vsel %vm63_vm1, %v2756_v34, %v2786_v18  ;;  %v9415_v37 = vsel %vm63_vm1, %v2757_v50, %v2787_v31 }
 0x4e6   :  { %v9391_v9 = vsel %vm63_vm1, %v2751_v45, %v12331_v7  ;;  %12332 = vst [vmem:[#allocation30_spill] sm:$0xff] %v9415_v37  ;;  %v9419_v38 = vsel %vm63_vm1, %v2758_v58, %v2788_v48  ;;  %v9423_v42 = vsel %vm63_vm1, %v2759_v10, %v2789_v46  ;;  %v9427_v54 = vsel %vm63_vm1, %v2760_v44, %v2790_v60 }
 0x4e7   :  { %v2699_v63 = vrot.slane %v8925_v29, 7  ;;  %v2963_v19 = vrot.slane %v9372_v35, 4  ;;  %v2964_v18 = vrot.slane %v9376_v13, 3  ;;  %v2966_v31 = vrot.slane %v9380_v23, 2 }
 0x4e8   :  { %v2700_v14 = vrot.slane %v8930_v27, 7  ;;  %v2701_v48 = vrot.slane %v8965_v15, 7  ;;  %v2977_v62 = vrot.slane %v9403_v52, 4  ;;  %v3252_v46 = vrot.slane %v9185_v47, 4 }
 0x4e9   :  { %v2965_v45 = vsel %vm598_vm2, %v2964_v18, %v2963_v19  ;;  %v11916_v60 = vrot.slane %v9384_v20, 1  ;;  %v2978_v29 = vrot.slane %v9407_v41, 3  ;;  %v2980_v36 = vrot.slane %v9411_v3, 2 }
 0x4ea   :  { %v12333_v5 = vrot.slane %v8819_v1, 1  ;;  %v2967_v27 = vsel %vm601_vm3, %v2966_v31, %v2965_v45  ;;  %v2669_v15 = vrot.slane %v9155_v26, 5  ;;  %v2670_v34 = vrot.slane %v9155_v26, 6 }
 0x4eb   :  { %v2969_v50 = vsel %vm604_vm4, %v11916_v60, %v2967_v27  ;;  %v2971_v58 = vrot.slane %v9391_v9, 7  ;;  %v2979_v10 = vsel %vm598_vm2, %v2978_v29, %v2977_v62  ;;  %v11915_v1 = vrot.slane %v9415_v37, 1 }
 0x4ec   :  { %v9445_v61 = vsel %vm63_vm1, %v2587_v0, %v12333_v5  ;;  %v12334_v44 = vrot.slane %v8847_v39, 1  ;;  %v2973_v7 = vrot.slane %v9395_v40, 6  ;;  %v2981_v19 = vsel %vm601_vm3, %v2980_v36, %v2979_v10 }
 0x4ed   :  { %v2970_v56 = vsel %vm607_vm5, %v9445_v61, %v2969_v50  ;;  %v2975_v31 = vrot.slane %v9399_v22, 5  ;;  %v2983_v39 = vsel %vm604_vm4, %v11915_v1, %v2981_v19  ;;  %v2985_v62 = vrot.slane %v9419_v38, 7 }
 0x4ee   :  { %v9461_v0 = vsel %vm63_vm1, %v9342_v32, %v12334_v44  ;;  %v2972_v18 = vsel %vm610_vm6, %v2971_v58, %v2970_v56  ;;  %v2987_v29 = vrot.slane %v9423_v42, 6  ;;  %v2671_v5 = vrot.slane %v9155_v26, 7  ;;  %v12335_v44 = vld [vmem:[#allocation47_spill] sm:$0xff] }
 0x4ef   :  { %v2974_v32 = vsel %vm613_vm7, %v2973_v7, %v2972_v18  ;;  %v2984_v45 = vsel %vm607_vm5, %v9461_v0, %v2983_v39  ;;  %v2989_v50 = vrot.slane %v9427_v54, 5  ;;  %v2672_v58 = vrot.slane %v9155_v26, 1  ;;  %v12336_v7 = vld [vmem:[#allocation40_spill] sm:$0xff]  ;;  %v12337_v39 = vld [vmem:[#allocation42_spill] sm:$0xff] }
 0x4f0   :  { %v2976_v36 = vsel %vm616_vm8, %v2975_v31, %v2974_v32  ;;  %v2986_v27 = vsel %vm610_vm6, %v2985_v62, %v2984_v45  ;;  %v2702_v10 = vrot.slane %v8938_v57, 7  ;;  %v2703_v56 = vrot.slane %v12335_v44, 7 }
 0x4f1   :  { %v2704_v19 = vrot.slane %v12336_v7, 7  ;;  %v2988_v18 = vsel %vm613_vm7, %v2987_v29, %v2986_v27  ;;  %v2705_v1 = vrot.slane %v12337_v39, 7  ;;  %v9490_v31 = vsel %vm616_vm8, %v3252_v46, %v9222_v53  ;;  %v12338_v29 = vld [vmem:[#allocation12_spill] sm:$0xff]  ;;  %v12347_v39 = vld [vmem:[#allocation18_spill] sm:$0xff] }
 0x4f2   :  { %v2990_v60 = vsel %vm616_vm8, %v2989_v50, %v2988_v18  ;;  %v2673_v62 = vrot.slane %v9155_v26, 2  ;;  %v2674_v45 = vrot.slane %v9155_v26, 3  ;;  %v2675_v57 = vrot.slane %v9155_v26, 4  ;;  %v12346_v18 = vld [vmem:[#allocation25_spill] sm:$0xff] }
 0x4f3   :  { %v6554_v32 = vpack.c.bf16 %v2990_v60, %v2976_v36  ;;  %v9497_v44 = vsel %vm63_vm1, %v2669_v15, %v2699_v63  ;;  %v2862_v27 = vrot.slane %v12338_v29, 1  ;;  %v9502_v50 = vsel %vm63_vm1, %v2670_v34, %v2700_v14  ;;  %v12343_v15 = vld [vmem:[#allocation22_spill] sm:$0xff] }
 0x4f4   :  { %v9506_v53 = vsel %vm63_vm1, %v2671_v5, %v2701_v48  ;;  %v9510_v46 = vsel %vm63_vm1, %v2672_v58, %v2702_v10  ;;  %v9514_v60 = vsel %vm63_vm1, %v2673_v62, %v2703_v56  ;;  %v9518_v63 = vsel %vm63_vm1, %v2674_v45, %v2704_v19  ;;  %v12344_v5 = vld [vmem:[#allocation13_spill] sm:$0xff]  ;;  %v12345_v56 = vld [vmem:[#allocation14_spill] sm:$0xff] }
 0x4f5   :  { %12339 = vst [vmem:[#allocation31_spill] sm:$0xff] %v9510_v46  ;;  %6555 = vmatprep.subr.bf16.mxu0 %v6554_v32  ;;  %12340 = vst [vmem:[#allocation24_spill] sm:$0xff] %v9514_v60  ;;  %v9522_v14 = vsel %vm63_vm1, %v2675_v57, %v2705_v1  ;;  %v3226_v48 = vrot.slane %v9497_v44, 3  ;;  %v2863_v34 = vrot.slane %v12343_v15, 1  ;;  %v2864_v36 = vrot.slane %v12344_v5, 1  ;;  %v12348_v45 = vld [vmem:[#allocation26_spill] sm:$0xff] }
 0x4f6   :  { %12341 = vst [vmem:[#allocation48_spill] sm:$0xff] %v9518_v63  ;;  %12342 = vst [vmem:[#allocation49_spill] sm:$0xff] %v9522_v14  ;;  %6557 = vmatpush3.bf16.msra.mxu0 %v6554_v32  ;;  %v3227_v58 = vrot.slane %v9502_v50, 2  ;;  %v3229_v10 = vrot.slane %v9506_v53, 1  ;;  %v2865_v7 = vrot.slane %v12345_v56, 1  ;;  %v2866_v19 = vrot.slane %v12346_v18, 1 }
 0x4f7   :  { %v2867_v62 = vrot.slane %v12347_v39, 1  ;;  %v2868_v1 = vrot.slane %v12348_v45, 1  ;;  %v12349_v57 = vld [vmem:[#allocation46_spill] sm:$0xff]  ;;  %v11924_v5 = vrot.slane %v9510_v46, 7  ;;  %v3234_v37 = vrot.slane %v9514_v60, 6  ;;  %v9546_v56 = vld [vmem:[%s11774_s3 + $0x8] sm:$0xff] }
 0x4f8   :  { %v12350_v29 = vrot.slane %v12349_v57, 7  ;;  %v3228_v32 = vsel %vm598_vm2, %v3227_v58, %v3226_v48  ;;  %12352 = vst [vmem:[#allocation37_spill] sm:$0xff] %v9546_v56  ;;  %v3236_v39 = vrot.slane %v9518_v63, 5  ;;  %v2832_v48 = vrot.slane %v9228_v25, 4  ;;  %v9557_v58 = vld [vmem:[%s11774_s3 + $0x10] sm:$0xff] }
 0x4f9   :  { %6407 = vmatmul.mubr.msk.f32.vlgmr.msra.gmra.mrb[32].mxu0 %vm64_vm0, %v9546_v56  ;;  %v3230_v18 = vsel %vm601_vm3, %v3229_v10, %v3228_v32  ;;  %12353 = vst [vmem:[#allocation51_spill] sm:$0xff] %v9557_v58  ;;  %v2833_v57 = vrot.slane %v9228_v25, 5  ;;  %v2834_v10 = vrot.slane %v9228_v25, 6  ;;  %v2836_v56 = vrot.slane %v9228_v25, 1 }
 0x4fa   :  { %v9538_v15 = vsel %vm63_vm1, %v9155_v26, %v12350_v29  ;;  %v3238_v26 = vrot.slane %v9522_v14, 4  ;;  %6409 = vmatprep.mubr.msk.f32.mxu0 %vm64_vm0, %v9557_v58  ;;  %v2835_v29 = vrot.slane %v9228_v25, 7  ;;  %v2837_v14 = vrot.slane %v9228_v25, 2 }
 0x4fb   :  { %12351 = vst [vmem:[#allocation50_spill] sm:$0xff] %v9538_v15  ;;  %v3231_v45 = vsel %vm604_vm4, %v9538_v15, %v3230_v18  ;;  %v2838_v63 = vrot.slane %v9228_v25, 3  ;;  %v9575_v18 = vsel %vm63_vm1, %v2832_v48, %v2862_v27  ;;  %v9579_v60 = vsel %vm63_vm1, %v2833_v57, %v2863_v34  ;;  %v9589_v15 = vld [vmem:[%s11774_s3 + $0x18] sm:$0xff]  ;;  %v12365_v57 = vld [vmem:[#allocation15_spill] sm:$0xff] }
 0x4fc   :  { %v3233_v32 = vsel %vm607_vm5, %v11924_v5, %v3231_v45  ;;  %12354 = vst [vmem:[#allocation53_spill] sm:$0xff] %v9575_v18  ;;  %12355 = vst [vmem:[#allocation54_spill] sm:$0xff] %v9579_v60  ;;  %v9583_v46 = vsel %vm63_vm1, %v2834_v10, %v2864_v36  ;;  %v12357_v45 = vld [vmem:[#allocation29_spill] sm:$0xff]  ;;  %v9596_v27 = vsel %vm63_vm1, %v2835_v29, %v2865_v7  ;;  %v9605_v36 = vld [vmem:[%s11774_s3 + $0x20] sm:$0xff]  ;;  %v2857_v10 = vrot.slane %v12365_v57, 1 }
 0x4fd   :  { %v3235_v58 = vsel %vm610_vm6, %v3234_v37, %v3233_v32  ;;  %12356 = vst [vmem:[#allocation55_spill] sm:$0xff] %v9583_v46  ;;  %v2855_v5 = vrot.slane %v12357_v45, 1  ;;  %12358 = vst [vmem:[#allocation56_spill] sm:$0xff] %v9589_v15  ;;  %6410 = vmatmul.mubr.msk.f32.gmra.mrb[34].mxu0 %vm64_vm0, %v9589_v15  ;;  %v9600_v34 = vsel %vm63_vm1, %v2836_v56, %v2866_v19  ;;  %v3334_v19 = vrot.slane %v9575_v18, 4  ;;  %v12364_v56 = vld [vmem:[#allocation21_spill] sm:$0xff]  ;;  %v12369_v15 = vld [vmem:[#allocation23_spill] sm:$0xff] }
 0x4fe   :  { %v3237_v37 = vsel %vm613_vm7, %v3236_v39, %v3235_v58  ;;  %12359 = vst [vmem:[#allocation57_spill] sm:$0xff] %v9596_v27  ;;  %12360 = vst [vmem:[#allocation58_spill] sm:$0xff] %v9600_v34  ;;  %6412 = vmatprep.mubr.msk.f32.mxu0 %vm64_vm0, %v9605_v36  ;;  %v9614_v39 = vsel %vm63_vm1, %v2837_v14, %v2867_v62  ;;  %v9618_v7 = vsel %vm63_vm1, %v2838_v63, %v2868_v1  ;;  %v12368_v14 = vld [vmem:[#allocation32_spill] sm:$0xff] }
 0x4ff   :  { %12361 = vst [vmem:[#allocation41_spill] sm:$0xff] %v9605_v36  ;;  %v9610_v48 = vsel %vm616_vm8, %v3238_v26, %v3237_v37  ;;  %12362 = vst [vmem:[#allocation60_spill] sm:$0xff] %v9614_v39  ;;  %v2856_v58 = vrot.slane %v12364_v56, 1  ;;  %v3335_v29 = vrot.slane %v9579_v60, 3  ;;  %v3337_v32 = vrot.slane %v9583_v46, 2  ;;  %v12366_v26 = vld [vmem:[#allocation19_spill] sm:$0xff] }
 0x500   :  { %12363 = vst [vmem:[#allocation61_spill] sm:$0xff] %v9618_v7  ;;  %v2858_v45 = vrot.slane %v12366_v26, 1  ;;  %v12367_v37 = vld [vmem:[#allocation27_spill] sm:$0xff]  ;;  %v2860_v62 = vrot.slane %v12368_v14, 1  ;;  %v2861_v20 = vrot.slane %v12369_v15, 1  ;;  %v9632_v63 = vld [vmem:[%s11774_s3 + $0x28] sm:$0xff] }
 0x501   :  { %v2859_v36 = vrot.slane %v12367_v37, 1  ;;  %12370 = vst [vmem:[#allocation62_spill] sm:$0xff] %v9632_v63  ;;  %6413 = vmatmul.mubr.msk.f32.gmra.mrb[36].mxu0 %vm64_vm0, %v9632_v63  ;;  %v12371_v1 = vld [vmem:[#allocation16_spill] sm:$0xff]  ;;  %v3336_v26 = vsel %vm598_vm2, %v3335_v29, %v3334_v19  ;;  %v11935_v37 = vrot.slane %v9596_v27, 1  ;;  %v3342_v15 = vrot.slane %v9600_v34, 7  ;;  %v9649_v14 = vld [vmem:[%s11774_s3 + $0x30] sm:$0xff] }
 0x502   :  { %v12372_v56 = vrot.slane %v12371_v1, 1  ;;  %12374 = vst [vmem:[#allocation43_spill] sm:$0xff] %v9649_v14  ;;  %6415 = vmatprep.mubr.msk.f32.mxu0 %vm64_vm0, %v9649_v14  ;;  %v3338_v1 = vsel %vm601_vm3, %v3337_v32, %v3336_v26  ;;  %v3344_v63 = vrot.slane %v9614_v39, 6  ;;  %v2825_v19 = vrot.slane %v9232_v30, 4  ;;  %v9671_v27 = vld [vmem:[%s11774_s3 + $0x38] sm:$0xff] }
 0x503   :  { %v3340_v29 = vsel %vm604_vm4, %v11935_v37, %v3338_v1  ;;  %v2827_v34 = vrot.slane %v9232_v30, 6  ;;  %v2828_v46 = vrot.slane %v9232_v30, 7  ;;  %v2829_v32 = vrot.slane %v9232_v30, 1  ;;  %12375 = vst [vmem:[#allocation44_spill] sm:$0xff] %v9671_v27 }
 0x504   :  { %v9641_v57 = vsel %vm63_vm1, %v9228_v25, %v12372_v56  ;;  %v3346_v25 = vrot.slane %v9618_v7, 5  ;;  %v2826_v56 = vrot.slane %v9232_v30, 5  ;;  %v2830_v26 = vrot.slane %v9232_v30, 2 }
 0x505   :  { %12373 = vst [vmem:[#allocation59_spill] sm:$0xff] %v9641_v57  ;;  %v3341_v14 = vsel %vm607_vm5, %v9641_v57, %v3340_v29  ;;  %v2831_v7 = vrot.slane %v9232_v30, 3  ;;  %6416 = vmatmul.mubr.msk.f32.gmra.mrb[38].mxu0 %vm64_vm0, %v9671_v27  ;;  %v9678_v37 = vsel %vm63_vm1, %v2825_v19, %v2855_v5  ;;  %v9686_v39 = vsel %vm63_vm1, %v2827_v34, %v2857_v10  ;;  %v9691_v57 = vld [vmem:[%s11774_s3 + $0x40] sm:$0xff]  ;;  %v12386_v19 = vld [vmem:[#allocation20_spill] sm:$0xff] }
 0x506   :  { %v3343_v1 = vsel %vm610_vm6, %v3342_v15, %v3341_v14  ;;  %12376 = vst [vmem:[#allocation45_spill] sm:$0xff] %v9678_v37  ;;  %v9682_v29 = vsel %vm63_vm1, %v2826_v56, %v2856_v58  ;;  %12378 = vst [vmem:[#allocation11_spill] sm:$0xff] %v9686_v39  ;;  %6418 = vmatprep.mubr.msk.f32.mxu0 %vm64_vm0, %v9691_v57  ;;  %v9698_v5 = vsel %vm63_vm1, %v2828_v46, %v2858_v45 }
 0x507   :  { %12377 = vst [vmem:[#allocation39_spill] sm:$0xff] %v9682_v29  ;;  %12379 = vst [vmem:[#allocation47_spill] sm:$0xff] %v9691_v57  ;;  %v3345_v15 = vsel %vm613_vm7, %v3344_v63, %v3343_v1  ;;  %v9702_v58 = vsel %vm63_vm1, %v2829_v32, %v2859_v36  ;;  %v9709_v10 = vsel %vm63_vm1, %v2830_v26, %v2860_v62  ;;  %v3320_v63 = vrot.slane %v9678_v37, 4  ;;  %v9721_v36 = vld [vmem:[%s11774_s3 + $0x48] sm:$0xff]  ;;  %v9728_v62 = vld [vmem:[%s11774_s3 + $0x50] sm:$0xff] }
 0x508   :  { %12380 = vst [vmem:[#allocation40_spill] sm:$0xff] %v9698_v5  ;;  %12381 = vst [vmem:[#allocation42_spill] sm:$0xff] %v9702_v58  ;;  %v9705_v34 = vsel %vm616_vm8, %v3346_v25, %v3345_v15  ;;  %v9713_v14 = vsel %vm63_vm1, %v2831_v7, %v2861_v20  ;;  %v3321_v46 = vrot.slane %v9682_v29, 3  ;;  %v3323_v45 = vrot.slane %v9686_v39, 2  ;;  %v9749_v15 = vld [vmem:[%s11774_s3 + $0x58] sm:$0xff] }
 0x509   :  { %12382 = vst [vmem:[#allocation12_spill] sm:$0xff] %v9709_v10  ;;  %12383 = vst [vmem:[#allocation22_spill] sm:$0xff] %v9713_v14  ;;  %6419 = vmatmul.mubr.msk.f32.gmra.mrb[40].mxu0 %vm64_vm0, %v9721_v36  ;;  %v11938_v7 = vrot.slane %v9698_v5, 1  ;;  %v12387_v56 = vrot.slane %v12386_v19, 1  ;;  %v3328_v1 = vrot.slane %v9702_v58, 7  ;;  %v3477_v60 = vrot.slane %v9160_v49, 7 }
 0x50a   :  { %12384 = vst [vmem:[#allocation13_spill] sm:$0xff] %v9721_v36  ;;  %12385 = vst [vmem:[#allocation14_spill] sm:$0xff] %v9728_v62  ;;  %6421 = vmatprep.mubr.msk.f32.mxu0 %vm64_vm0, %v9728_v62  ;;  %v3322_v20 = vsel %vm598_vm2, %v3321_v46, %v3320_v63  ;;  %v9759_v46 = vld [vmem:[%s11774_s3 + $0x60] sm:$0xff] }
 0x50b   :  { %v3324_v25 = vsel %vm601_vm3, %v3323_v45, %v3322_v20  ;;  %v9740_v32 = vsel %vm63_vm1, %v9232_v30, %v12387_v56  ;;  %12389 = vst [vmem:[#allocation18_spill] sm:$0xff] %v9749_v15  ;;  %v3330_v30 = vrot.slane %v9709_v10, 6  ;;  %12390 = vst [vmem:[#allocation26_spill] sm:$0xff] %v9759_v46  ;;  %v3332_v20 = vrot.slane %v9713_v14, 5  ;;  %v9772_v56 = vld [vmem:[%s11774_s3 + $0x68] sm:$0xff] }
 0x50c   :  { %12388 = vst [vmem:[#allocation25_spill] sm:$0xff] %v9740_v32  ;;  %v3326_v26 = vsel %vm604_vm4, %v11938_v7, %v3324_v25  ;;  %12391 = vst [vmem:[#allocation46_spill] sm:$0xff] %v9772_v56 }
 0x50d   :  { %6422 = vmatmul.mubr.msk.f32.gmra.mrb[42].mxu0 %vm64_vm0, %v9749_v15  ;;  %v3327_v63 = vsel %vm607_vm5, %v9740_v32, %v3326_v26  ;;  %v9779_v26 = vld [vmem:[%s11774_s3 + $0x70] sm:$0xff]  ;;  %v3143_v32 = vld [vmem:[#allocation2 + $0x120] sm:$0xff] }
 0x50e   :  { %6424 = vmatprep.mubr.msk.f32.mxu0 %vm64_vm0, %v9759_v46  ;;  %v3329_v45 = vsel %vm610_vm6, %v3328_v1, %v3327_v63  ;;  %12392 = vst [vmem:[#allocation29_spill] sm:$0xff] %v9779_v26  ;;  %v9786_v1 = vld [vmem:[%s11774_s3 + $0x78] sm:$0xff]  ;;  %v9793_v63 = vld [vmem:[%s11774_s3] sm:$0xff]  ;;  %v3141_v15 = vld [vmem:[#allocation2 + $0x110] sm:$0xff] }
 0x50f   :  { %v3331_v25 = vsel %vm613_vm7, %v3330_v30, %v3329_v45  ;;  %12393 = vst [vmem:[#allocation21_spill] sm:$0xff] %v9786_v1  ;;  %12394 = vst [vmem:[#allocation15_spill] sm:$0xff] %v9793_v63  ;;  %v3140_v30 = vld [vmem:[#allocation2 + $0x108] sm:$0xff]  ;;  %v3139_v45 = vld [vmem:[#allocation2 + $0x100] sm:$0xff] }
 0x510   :  { %v9767_v19 = vsel %vm616_vm8, %v3332_v20, %v3331_v25 }
 0x511   :  { %6425 = vmatmul.mubr.msk.f32.gmra.mrb[44].mxu0 %vm64_vm0, %v9772_v56  ;;  %v3142_v56 = vld [vmem:[#allocation2 + $0x118] sm:$0xff] }
 0x512   :  { %6427 = vmatprep.mubr.msk.f32.mxu0 %vm64_vm0, %v9779_v26 }
 0x515   :  { %6428 = vmatmul.mubr.msk.f32.gmra.mrb[46].mxu0 %vm64_vm0, %v9786_v1 }
 0x516   :  { %6470 = vmatprep.mubr.msk.f32.mxu0 %vm64_vm0, %v9793_v63  ;;  %v3144_v63 = vld [vmem:[#allocation2 + $0x128] sm:$0xff] }
 0x5cc   :  { %v6408_v20 = vpop.f32.mrb[32].mxu0 }
 0x5cd   :  { %v3148_v25 = vadd.f32 %v6408_v20, %v3140_v30  ;;  %v3059_v7 = vpop.f32.mrb[33].mxu0  ;;  %v3146_v30 = vld [vmem:[#allocation2 + $0x138] sm:$0xff] }
 0x5ce   :  { %v3147_v26 = vadd.f32 %v3139_v45, %v3059_v7  ;;  %v3145_v45 = vld [vmem:[#allocation2 + $0x130] sm:$0xff] }
 0x5cf   :  { %v6028_v46 = vmul.f32 -1.442695, %v3148_v25 }
 0x5d0   :  { %v6027_v5 = vmul.f32 -1.442695, %v3147_v26  ;;  %v6411_v62 = vpop.f32.mrb[34].mxu0 }
 0x5d1   :  { %6844 = vpow2.f32 %v6028_v46  ;;  %v3150_v1 = vadd.f32 %v6411_v62, %v3142_v56  ;;  %v3069_v36 = vpop.f32.mrb[35].mxu0  ;;  %v3157_v62 = vld [vmem:[#allocation5 + $0xc8] sm:$0xff] }
 0x5d2   :  { %6846 = vpow2.f32 %v6027_v5  ;;  %v3149_v57 = vadd.f32 %v3141_v15, %v3069_v36  ;;  %v3156_v36 = vld [vmem:[#allocation5 + $0xc0] sm:$0xff] }
 0x5d3   :  { %v6030_v27 = vmul.f32 -1.442695, %v3150_v1 }
 0x5d4   :  { %v6029_v14 = vmul.f32 -1.442695, %v3149_v57  ;;  %v6414_v10 = vpop.f32.mrb[36].mxu0 }
 0x5d5   :  { %6848 = vpow2.f32 %v6030_v27  ;;  %v3079_v58 = vpop.f32.mrb[37].mxu0  ;;  %v3152_v7 = vadd.f32 %v6414_v10, %v3144_v63 }
 0x5d6   :  { %6850 = vpow2.f32 %v6029_v14  ;;  %v3151_v20 = vadd.f32 %v3143_v32, %v3079_v58  ;;  %v3159_v32 = vld [vmem:[#allocation5 + $0xd8] sm:$0xff] }
 0x5d7   :  { %6852 = vtanh.f32 %v3152_v7 }
 0x5d8   :  { %v6417_v25 = vpop.f32.mrb[38].mxu0  ;;  %6854 = vtanh.f32 %v3151_v20 }
 0x5d9   :  { %v3154_v26 = vadd.f32 %v6417_v25, %v3146_v30  ;;  %v3089_v39 = vpop.f32.mrb[39].mxu0  ;;  %v3158_v30 = vld [vmem:[#allocation5 + $0xd0] sm:$0xff] }
 0x5da   :  { %v3153_v46 = vadd.f32 %v3145_v45, %v3089_v39 }
 0x5db   :  { %v6845_v56 = vpop.eup %6844  ;;  %v6032_v5 = vmul.f32 -1.442695, %v3154_v26 }
 0x5dc   :  { %v6847_v57 = vpop.eup %6846  ;;  %v3179_v15 = vadd.f32 1.0, %v6845_v56  ;;  %v6031_v27 = vmul.f32 -1.442695, %v3153_v46  ;;  %v6420_v1 = vpop.f32.mrb[40].mxu0 }
 0x5dd   :  { %v3178_v29 = vadd.f32 1.0, %v6847_v57  ;;  %6856 = vpow2.f32 %v6032_v5  ;;  %v3165_v14 = vadd.f32 %v6420_v1, %v3157_v62  ;;  %v3099_v10 = vpop.f32.mrb[41].mxu0  ;;  %v3161_v57 = vld [vmem:[#allocation5 + $0xe8] sm:$0xff] }
 0x5de   :  { %6858 = vrcp.f32 %v3179_v15  ;;  %v3164_v58 = vadd.f32 %v3156_v36, %v3099_v10 }
 0x5df   :  { %v6849_v63 = vpop.eup %6848  ;;  %6860 = vrcp.f32 %v3178_v29  ;;  %v6034_v39 = vmul.f32 -1.442695, %v3165_v14  ;;  %v3160_v29 = vld [vmem:[#allocation5 + $0xe0] sm:$0xff] }
 0x5e0   :  { %v6851_v45 = vpop.eup %6850  ;;  %v3191_v7 = vadd.f32 1.0, %v6849_v63  ;;  %6862 = vpow2.f32 %v6031_v27  ;;  %v6033_v25 = vmul.f32 -1.442695, %v3164_v58  ;;  %v6423_v26 = vpop.f32.mrb[42].mxu0  ;;  %v3163_v58 = vld [vmem:[#allocation5 + $0xf8] sm:$0xff] }
 0x5e1   :  { %v3190_v56 = vadd.f32 1.0, %v6851_v45  ;;  %6864 = vpow2.f32 %v6034_v39  ;;  %v3167_v20 = vadd.f32 %v6423_v26, %v3159_v32  ;;  %v3109_v46 = vpop.f32.mrb[43].mxu0  ;;  %v6853_v1 = vpop.eup %6852  ;;  %v3162_v32 = vld [vmem:[#allocation5 + $0xf0] sm:$0xff] }
 0x5e2   :  { %6866 = vrcp.f32 %v3191_v7  ;;  %v3166_v5 = vadd.f32 %v3158_v30, %v3109_v46  ;;  %v6855_v10 = vpop.eup %6854 }
 0x5e3   :  { %6868 = vrcp.f32 %v3190_v56  ;;  %v6036_v62 = vmul.f32 -1.442695, %v3167_v20 }
 0x5e4   :  { %6870 = vpow2.f32 %v6033_v25  ;;  %v6035_v36 = vmul.f32 -1.442695, %v3166_v5  ;;  %v6426_v15 = vpop.f32.mrb[44].mxu0 }
 0x5e5   :  { %6872 = vpow2.f32 %v6036_v62  ;;  %v3119_v14 = vpop.f32.mrb[45].mxu0  ;;  %v3169_v27 = vadd.f32 %v6426_v15, %v3161_v57 }
 0x5e6   :  { %6874 = vpow2.f32 %v6035_v36  ;;  %v3168_v39 = vadd.f32 %v3160_v29, %v3119_v14  ;;  %v3478_v29 = vrot.slane %v9165_v59, 7 }
 0x5e7   :  { %v6857_v63 = vpop.eup %6856  ;;  %6876 = vtanh.f32 %v3169_v27 }
 0x5e8   :  { %v6859_v45 = vpop.eup %6858  ;;  %v3205_v7 = vadd.f32 1.0, %v6857_v63  ;;  %v6429_v30 = vpop.f32.mrb[46].mxu0  ;;  %6878 = vtanh.f32 %v3168_v39 }
 0x5e9   :  { %v6861_v26 = vpop.eup %6860  ;;  %v3259_v56 = vmul.f32 %v6859_v45, %v6853_v1  ;;  %v3171_v20 = vadd.f32 %v6429_v30, %v3163_v58  ;;  %v3129_v25 = vpop.f32.mrb[47].mxu0  ;;  %v12395_v58 = vld [vmem:[#allocation33_spill] sm:$0xff]  ;;  %v12397_v30 = vld [vmem:[#allocation35_spill] sm:$0xff] }
 0x5ea   :  { %v6863_v46 = vpop.eup %6862  ;;  %v3258_v5 = vmul.f32 %v6861_v26, %v6855_v10  ;;  %v3170_v37 = vadd.f32 %v3162_v32, %v3129_v25  ;;  %6880 = vrcp.f32 %v3205_v7  ;;  %v3479_v45 = vrot.slane %v12395_v58, 7  ;;  %v12396_v10 = vld [vmem:[#allocation52_spill] sm:$0xff] }
 0x5eb   :  { %v6865_v62 = vpop.eup %6864  ;;  %v3204_v36 = vadd.f32 1.0, %v6863_v46  ;;  %v6038_v57 = vmul.f32 -1.442695, %v3171_v20  ;;  %v3480_v27 = vrot.slane %v12396_v10, 7  ;;  %v3481_v49 = vrot.slane %v12397_v30, 7  ;;  %v12398_v26 = vld [vmem:[#allocation36_spill] sm:$0xff] }
 0x5ec   :  { %v6867_v15 = vpop.eup %6866  ;;  %v3273_v14 = vadd.f32 1.0, %v6865_v62  ;;  %v6037_v63 = vmul.f32 -1.442695, %v3170_v37  ;;  %v3482_v39 = vrot.slane %v12398_v26, 7  ;;  %v3483_v7 = vrot.slane %v9185_v47, 7 }
 0x5ed   :  { %v6869_v18 = vpop.eup %6868  ;;  %v3257_v1 = vmul.f32 %v6867_v15, %v9490_v31  ;;  %6882 = vrcp.f32 %v3204_v36 }
 0x5ee   :  { %v6871_v32 = vpop.eup %6870  ;;  %v3256_v20 = vmul.f32 %v6869_v18, %v9610_v48  ;;  %6884 = vrcp.f32 %v3273_v14 }
 0x5ef   :  { %v6873_v59 = vpop.eup %6872  ;;  %v3261_v37 = vadd.f32 %v3259_v56, %v3257_v1  ;;  %v3272_v25 = vadd.f32 1.0, %v6871_v32  ;;  %6886 = vpow2.f32 %v6038_v57 }
 0x5f0   :  { %v6875_v31 = vpop.eup %6874  ;;  %v9807_v62 = vadd.f32 %v3258_v5, %v3256_v20  ;;  %v3285_v36 = vadd.f32 1.0, %v6873_v59  ;;  %6888 = vpow2.f32 %v6037_v63 }
 0x5f1   :  { %6890 = vtanh.f32 %v3261_v37  ;;  %v3284_v15 = vadd.f32 1.0, %v6875_v31  ;;  %v3447_v58 = vrot.slane %v3261_v37, 4  ;;  %v3448_v10 = vrot.slane %v3261_v37, 5  ;;  %v6877_v5 = vpop.eup %6876 }
 0x5f2   :  { %6892 = vtanh.f32 %v9807_v62  ;;  %v3449_v18 = vrot.slane %v3261_v37, 6  ;;  %v3450_v48 = vrot.slane %v3261_v37, 7  ;;  %v3451_v14 = vrot.slane %v3261_v37, 1  ;;  %v6879_v30 = vpop.eup %6878 }
 0x5f3   :  { %6894 = vrcp.f32 %v3272_v25  ;;  %v3452_v47 = vrot.slane %v3261_v37, 2  ;;  %v3453_v56 = vrot.slane %v3261_v37, 3  ;;  %v9812_v57 = vsel %vm63_vm1, %v3447_v58, %v3477_v60 }
 0x5f4   :  { %6896 = vrcp.f32 %v3285_v36  ;;  %v9816_v63 = vsel %vm63_vm1, %v3448_v10, %v3478_v29  ;;  %v9820_v1 = vsel %vm63_vm1, %v3449_v18, %v3479_v45  ;;  %v9824_v32 = vsel %vm63_vm1, %v3450_v48, %v3480_v27  ;;  %v6881_v20 = vpop.eup %6880 }
 0x5f5   :  { %12399 = vst [vmem:[#allocation19_spill] sm:$0xff] %v9824_v32  ;;  %6898 = vrcp.f32 %v3284_v15  ;;  %v9829_v60 = vsel %vm63_vm1, %v3451_v14, %v3481_v49  ;;  %v9833_v29 = vsel %vm63_vm1, %v3452_v47, %v3482_v39  ;;  %v9837_v45 = vsel %vm63_vm1, %v3453_v56, %v3483_v7 }
 0x5f6   :  { %12400 = vst [vmem:[#allocation27_spill] sm:$0xff] %v9829_v60  ;;  %12401 = vst [vmem:[#allocation32_spill] sm:$0xff] %v9833_v29  ;;  %v4011_v27 = vrot.slane %v9812_v57, 4  ;;  %v4012_v59 = vrot.slane %v9816_v63, 3  ;;  %v4014_v25 = vrot.slane %v9820_v1, 2  ;;  %v3394_v36 = vrot.slane %v9252_v43, 7 }
 0x5f7   :  { %v6883_v31 = vpop.eup %6882  ;;  %v3395_v49 = vrot.slane %v9316_v16, 7  ;;  %v3396_v15 = vrot.slane %v9261_v8, 7  ;;  %v3397_v39 = vrot.slane %v9265_v12, 7  ;;  %v3398_v10 = vrot.slane %v9269_v2, 7  ;;  %v12402_v12 = vld [vmem:[#allocation34_spill] sm:$0xff] }
 0x5f8   :  { %v6885_v58 = vpop.eup %6884  ;;  %v3399_v7 = vrot.slane %v9273_v21, 7  ;;  %v4013_v18 = vsel %vm598_vm2, %v4012_v59, %v4011_v27  ;;  %v4016_v48 = vrot.slane %v9824_v32, 1  ;;  %v3400_v47 = vrot.slane %v9277_v55, 7 }
 0x5f9   :  { %v6887_v14 = vpop.eup %6886  ;;  %v3401_v43 = vrot.slane %v9281_v51, 7  ;;  %v3353_v56 = vmul.f32 %v6885_v58, %v6877_v5  ;;  %v4015_v16 = vsel %vm601_vm3, %v4014_v25, %v4013_v18  ;;  %v12403_v46 = vrot.slane %v12402_v12, 7 }
 0x5fa   :  { %v6889_v8 = vpop.eup %6888  ;;  %v3299_v26 = vadd.f32 1.0, %v6887_v14  ;;  %v4017_v21 = vsel %vm604_vm4, %v4016_v48, %v4015_v16  ;;  %v11960_v27 = vrot.slane %v9829_v60, 7  ;;  %v3402_v55 = vrot.slane %v9325_v4, 7 }
 0x5fb   :  { %v9857_v2 = vsel %vm63_vm1, %v3261_v37, %v12403_v46  ;;  %v6891_v59 = vpop.eup %6890  ;;  %v3298_v32 = vadd.f32 1.0, %v6889_v8  ;;  %v4021_v5 = vrot.slane %v9833_v29, 6  ;;  %v3403_v58 = vrot.slane %v9290_v17, 7 }
 0x5fc   :  { %v4018_v51 = vsel %vm607_vm5, %v9857_v2, %v4017_v21  ;;  %v6893_v25 = vpop.eup %6892  ;;  %v9866_v18 = vmul.f32 %v6891_v59, %v6881_v20  ;;  %6900 = vrcp.f32 %v3299_v26  ;;  %v3404_v48 = vrot.slane %v9294_v33, 7 }
 0x5fd   :  { %v4020_v37 = vsel %vm610_vm6, %v11960_v27, %v4018_v51  ;;  %v6895_v46 = vpop.eup %6894  ;;  %v3264_v4 = vmul.f32 %v6893_v25, %v6883_v31  ;;  %6902 = vrcp.f32 %v3298_v32 }
 0x5fe   :  { %v9873_v14 = vsel %vm613_vm7, %v4021_v5, %v4020_v37  ;;  %v6897_v16 = vpop.eup %6896  ;;  %v3352_v8 = vmul.f32 %v6895_v46, %v6879_v30  ;;  %v3369_v12 = vrot.slane %v9866_v18, 4  ;;  %v3370_v17 = vrot.slane %v9866_v18, 5 }
 0x5ff   :  { %v3371_v26 = vrot.slane %v9866_v18, 6  ;;  %v6899_v20 = vpop.eup %6898  ;;  %v3351_v21 = vmul.f32 %v6897_v16, %v9705_v34  ;;  %v3362_v59 = vrot.slane %v3264_v4, 4  ;;  %v3363_v51 = vrot.slane %v3264_v4, 5 }
 0x600   :  { %v3364_v27 = vrot.slane %v3264_v4, 6  ;;  %v3350_v33 = vmul.f32 %v6899_v20, %v9767_v19  ;;  %v3365_v32 = vrot.slane %v3264_v4, 7  ;;  %v3366_v31 = vrot.slane %v3264_v4, 1 }
 0x601   :  { %v3367_v5 = vrot.slane %v3264_v4, 2  ;;  %v9880_v25 = vadd.f32 %v3353_v56, %v3351_v21  ;;  %v3368_v30 = vrot.slane %v3264_v4, 3  ;;  %v3372_v37 = vrot.slane %v9866_v18, 7 }
 0x602   :  { %v3373_v46 = vrot.slane %v9866_v18, 1  ;;  %v9884_v60 = vadd.f32 %v3352_v8, %v3350_v33  ;;  %v3374_v29 = vrot.slane %v9866_v18, 2  ;;  %v3375_v34 = vrot.slane %v9866_v18, 3 }
 0x603   :  { %v12404_v16 = vrot.slane %v9240_v11, 7  ;;  %6904 = vtanh.f32 %v9880_v25  ;;  %v12405_v56 = vrot.slane %v9248_v28, 7  ;;  %v9903_v8 = vsel %vm63_vm1, %v3364_v27, %v3394_v36 }
 0x604   :  { %v9907_v21 = vsel %vm63_vm1, %v3365_v32, %v3395_v49  ;;  %v3405_v11 = vrot.slane %v9298_v6, 7  ;;  %6906 = vtanh.f32 %v9884_v60  ;;  %v9917_v28 = vsel %vm63_vm1, %v3367_v5, %v3397_v39 }
 0x605   :  { %v9892_v19 = vsel %vm63_vm1, %v3362_v59, %v12404_v16  ;;  %v9899_v20 = vsel %vm63_vm1, %v3363_v51, %v12405_v56  ;;  %v9913_v59 = vsel %vm63_vm1, %v3366_v31, %v3396_v15  ;;  %v9921_v36 = vsel %vm63_vm1, %v3368_v30, %v3398_v10 }
 0x606   :  { %12406 = vst [vmem:[#allocation23_spill] sm:$0xff] %v9913_v59  ;;  %v9925_v49 = vsel %vm63_vm1, %v3369_v12, %v3399_v7  ;;  %v9929_v6 = vsel %vm63_vm1, %v3370_v17, %v3400_v47  ;;  %v9933_v15 = vsel %vm63_vm1, %v3371_v26, %v3401_v43  ;;  %v6901_v27 = vpop.eup %6900  ;;  %v3548_v39 = vrot.slane %v9372_v35, 1 }
 0x607   :  { %v9938_v51 = vsel %vm63_vm1, %v3372_v37, %v3402_v55  ;;  %v9942_v10 = vsel %vm63_vm1, %v3373_v46, %v3403_v58  ;;  %v9946_v7 = vsel %vm63_vm1, %v3374_v29, %v3404_v48  ;;  %v6903_v47 = vpop.eup %6902  ;;  %v9950_v43 = vsel %vm63_vm1, %v3375_v34, %v3405_v11  ;;  %v12408_v46 = vld [vmem:[#allocation38_spill] sm:$0xff]  ;;  %v12410_v58 = vld [vmem:[#allocation28_spill] sm:$0xff] }
 0x608   :  { %12407 = vst [vmem:[#allocation16_spill] sm:$0xff] %v9942_v10  ;;  %v3688_v12 = vrot.slane %v9892_v19, 4  ;;  %v3689_v17 = vrot.slane %v9899_v20, 3  ;;  %v3691_v55 = vrot.slane %v9903_v8, 2  ;;  %v3693_v29 = vrot.slane %v9907_v21, 1 }
 0x609   :  { %v3702_v32 = vrot.slane %v9925_v49, 4  ;;  %v3703_v31 = vrot.slane %v9929_v6, 3  ;;  %v3705_v5 = vrot.slane %v9933_v15, 2  ;;  %v3552_v30 = vrot.slane %v9391_v9, 1 }
 0x60a   :  { %v3690_v48 = vsel %vm598_vm2, %v3689_v17, %v3688_v12  ;;  %v3553_v37 = vrot.slane %v9395_v40, 1  ;;  %v12409_v34 = vrot.slane %v12408_v46, 7  ;;  %v11964_v12 = vrot.slane %v9913_v59, 7 }
 0x60b   :  { %v3692_v56 = vsel %vm601_vm3, %v3691_v55, %v3690_v48  ;;  %v3704_v17 = vsel %vm598_vm2, %v3703_v31, %v3702_v32  ;;  %v3707_v33 = vrot.slane %v9938_v51, 1  ;;  %v12411_v9 = vrot.slane %v12410_v58, 7 }
 0x60c   :  { %v9969_v16 = vsel %vm63_vm1, %v3264_v4, %v12409_v34  ;;  %v3694_v11 = vsel %vm604_vm4, %v3693_v29, %v3692_v56  ;;  %v3698_v55 = vrot.slane %v9917_v28, 6  ;;  %v3706_v29 = vsel %vm601_vm3, %v3705_v5, %v3704_v17 }
 0x60d   :  { %v9981_v40 = vsel %vm63_vm1, %v9866_v18, %v12411_v9  ;;  %v3695_v4 = vsel %vm607_vm5, %v9969_v16, %v3694_v11  ;;  %v6905_v48 = vpop.eup %6904  ;;  %v3700_v31 = vrot.slane %v9921_v36, 5  ;;  %v3708_v58 = vsel %vm604_vm4, %v3707_v33, %v3706_v29 }
 0x60e   :  { %v3697_v32 = vsel %vm610_vm6, %v11964_v12, %v3695_v4  ;;  %v11963_v46 = vrot.slane %v9942_v10, 7  ;;  %v6907_v18 = vpop.eup %6906  ;;  %v9993_v34 = vmul.f32 %v6905_v48, %v6901_v27  ;;  %v3709_v11 = vsel %vm607_vm5, %v9981_v40, %v3708_v58 }
 0x60f   :  { %v3699_v56 = vsel %vm613_vm7, %v3698_v55, %v3697_v32  ;;  %v3712_v5 = vrot.slane %v9946_v7, 6  ;;  %v3358_v17 = vmul.f32 %v6907_v18, %v6903_v47  ;;  %v3714_v33 = vrot.slane %v9950_v43, 5 }
 0x610   :  { %v3701_v9 = vsel %vm616_vm8, %v3700_v31, %v3699_v56  ;;  %v3711_v4 = vsel %vm610_vm6, %v11963_v46, %v3709_v11  ;;  %v3554_v29 = vrot.slane %v9399_v22, 1  ;;  %v3555_v27 = vrot.slane %v9403_v52, 1 }
 0x611   :  { %v3556_v55 = vrot.slane %v9407_v41, 1  ;;  %v3713_v48 = vsel %vm613_vm7, %v3712_v5, %v3711_v4  ;;  %v3557_v32 = vrot.slane %v9411_v3, 1  ;;  %v3558_v47 = vrot.slane %v9461_v0, 1 }
 0x612   :  { %v3559_v31 = vrot.slane %v9419_v38, 1  ;;  %v3715_v58 = vsel %vm616_vm8, %v3714_v33, %v3713_v48  ;;  %v3560_v18 = vrot.slane %v9423_v42, 1  ;;  %v3518_v11 = vrot.slane %v3358_v17, 5 }
 0x613   :  { %v6558_v56 = vpack.c.bf16 %v3715_v58, %v3701_v9  ;;  %v3519_v46 = vrot.slane %v3358_v17, 6  ;;  %v3520_v22 = vrot.slane %v3358_v17, 7  ;;  %v3521_v12 = vrot.slane %v3358_v17, 1 }
 0x614   :  { %v3522_v52 = vrot.slane %v3358_v17, 2  ;;  %v3523_v26 = vrot.slane %v3358_v17, 3  ;;  %v3524_v41 = vrot.slane %v3358_v17, 4  ;;  %v3525_v5 = vrot.slane %v9993_v34, 5 }
 0x615   :  { %6559 = vmatprep.subr.bf16.mxu1 %v6558_v56  ;;  %v3526_v3 = vrot.slane %v9993_v34, 6  ;;  %v3527_v0 = vrot.slane %v9993_v34, 7  ;;  %v3528_v38 = vrot.slane %v9993_v34, 1  ;;  %v3529_v42 = vrot.slane %v9993_v34, 2 }
 0x616   :  { %6561 = vmatpush3.bf16.msra.mxu1 %v6558_v56  ;;  %v3530_v9 = vrot.slane %v9993_v34, 3  ;;  %v3531_v4 = vrot.slane %v9993_v34, 4  ;;  %v3561_v33 = vrot.slane %v9427_v54, 1  ;;  %v10025_v48 = vsel %vm63_vm1, %v3518_v11, %v3548_v39 }
 0x617   :  { %v12412_v58 = vrot.slane %v9376_v13, 1  ;;  %v12413_v10 = vrot.slane %v9380_v23, 1  ;;  %v12415_v54 = vrot.slane %v9445_v61, 1  ;;  %v10047_v39 = vsel %vm63_vm1, %v3522_v52, %v3552_v30 }
 0x618   :  { %v10051_v13 = vsel %vm63_vm1, %v3523_v26, %v3553_v37  ;;  %v10055_v23 = vsel %vm63_vm1, %v3524_v41, %v3554_v29  ;;  %v10063_v61 = vsel %vm63_vm1, %v3526_v3, %v3556_v55  ;;  %v10067_v30 = vsel %vm63_vm1, %v3527_v0, %v3557_v32 }
 0x619   :  { %v10031_v56 = vsel %vm63_vm1, %v3519_v46, %v12412_v58  ;;  %v10037_v59 = vsel %vm63_vm1, %v3520_v22, %v12413_v10  ;;  %v10043_v35 = vsel %vm63_vm1, %v3521_v12, %v12415_v54  ;;  %v10059_v10 = vsel %vm63_vm1, %v3525_v5, %v3555_v27  ;;  %12416 = vst [vmem:[#allocation33_spill] sm:$0xff] %v10067_v30  ;;  %v12417_v5 = vld [vmem:[#allocation17_spill] sm:$0xff] }
 0x61a   :  { %12414 = vst [vmem:[#allocation20_spill] sm:$0xff] %v10037_v59  ;;  %v10071_v26 = vsel %vm63_vm1, %v3528_v38, %v3558_v47  ;;  %v10075_v37 = vsel %vm63_vm1, %v3529_v42, %v3559_v31  ;;  %v10079_v12 = vsel %vm63_vm1, %v3530_v9, %v3560_v18  ;;  %v10083_v46 = vsel %vm63_vm1, %v3531_v4, %v3561_v33  ;;  %v12419_v42 = vld [vmem:[#allocation30_spill] sm:$0xff] }
 0x61b   :  { %v3470_v29 = vrot.slane %v9497_v44, 7  ;;  %v3734_v27 = vrot.slane %v10025_v48, 3  ;;  %v3735_v55 = vrot.slane %v10031_v56, 2  ;;  %v11968_v32 = vrot.slane %v10037_v59, 1 }
 0x61c   :  { %v3471_v47 = vrot.slane %v9502_v50, 7  ;;  %v3472_v31 = vrot.slane %v9506_v53, 7  ;;  %v3748_v11 = vrot.slane %v10059_v10, 3  ;;  %v4023_v18 = vrot.slane %v9837_v45, 5 }
 0x61d   :  { %v3736_v22 = vsel %vm598_vm2, %v3735_v55, %v3734_v27  ;;  %v3749_v52 = vrot.slane %v10063_v61, 2  ;;  %v11967_v44 = vrot.slane %v10067_v30, 1  ;;  %v3440_v41 = vrot.slane %v9807_v62, 4  ;;  %v12423_v30 = vld [vmem:[#allocation48_spill] sm:$0xff] }
 0x61e   :  { %v12418_v3 = vrot.slane %v12417_v5, 1  ;;  %v3738_v50 = vsel %vm601_vm3, %v11968_v32, %v3736_v22  ;;  %v3740_v53 = vrot.slane %v10043_v35, 7  ;;  %v3441_v38 = vrot.slane %v9807_v62, 5 }
 0x61f   :  { %v12420_v9 = vrot.slane %v12419_v42, 1  ;;  %v3750_v58 = vsel %vm598_vm2, %v3749_v52, %v3748_v11  ;;  %v3744_v27 = vrot.slane %v10051_v13, 5  ;;  %v3754_v22 = vrot.slane %v10071_v26, 7 }
 0x620   :  { %v10101_v0 = vsel %vm63_vm1, %v3358_v17, %v12418_v3  ;;  %v3742_v17 = vrot.slane %v10047_v39, 6  ;;  %v3752_v55 = vsel %vm601_vm3, %v11967_v44, %v3750_v58  ;;  %v3746_v5 = vrot.slane %v10055_v23, 4  ;;  %v12422_v44 = vld [vmem:[#allocation24_spill] sm:$0xff] }
 0x621   :  { %v10113_v4 = vsel %vm63_vm1, %v9993_v34, %v12420_v9  ;;  %v3739_v33 = vsel %vm604_vm4, %v10101_v0, %v3738_v50  ;;  %v3756_v50 = vrot.slane %v10075_v37, 6  ;;  %v3442_v42 = vrot.slane %v9807_v62, 6 }
 0x622   :  { %v3741_v54 = vsel %vm607_vm5, %v3740_v53, %v3739_v33  ;;  %v3753_v3 = vsel %vm604_vm4, %v10113_v4, %v3752_v55  ;;  %v3758_v53 = vrot.slane %v10079_v12, 5  ;;  %v3443_v58 = vrot.slane %v9807_v62, 7 }
 0x623   :  { %v3743_v34 = vsel %vm610_vm6, %v3742_v17, %v3741_v54  ;;  %v3755_v52 = vsel %vm607_vm5, %v3754_v22, %v3753_v3  ;;  %v3760_v17 = vrot.slane %v10083_v46, 4  ;;  %v12421_v54 = vld [vmem:[#allocation50_spill] sm:$0xff]  ;;  %v3474_v32 = vrot.slane %v12422_v44, 7  ;;  %v12425_v44 = vld [vmem:[#allocation53_spill] sm:$0xff] }
 0x624   :  { %v3745_v11 = vsel %vm613_vm7, %v3744_v27, %v3743_v34  ;;  %v3757_v33 = vsel %vm610_vm6, %v3756_v50, %v3755_v52  ;;  %v3473_v55 = vrot.slane %v12421_v54, 7  ;;  %v3475_v27 = vrot.slane %v12423_v30, 7  ;;  %v12424_v34 = vld [vmem:[#allocation49_spill] sm:$0xff] }
 0x625   :  { %v3747_v9 = vsel %vm616_vm8, %v3746_v5, %v3745_v11  ;;  %v3759_v22 = vsel %vm613_vm7, %v3758_v53, %v3757_v33  ;;  %v3476_v3 = vrot.slane %v12424_v34, 7  ;;  %v10146_v5 = vsel %vm616_vm8, %v4023_v18, %v9873_v14  ;;  %v12436_v34 = vld [vmem:[#allocation60_spill] sm:$0xff] }
 0x626   :  { %v3761_v59 = vsel %vm616_vm8, %v3760_v17, %v3759_v22  ;;  %v3444_v50 = vrot.slane %v9807_v62, 1  ;;  %v3445_v52 = vrot.slane %v9807_v62, 2  ;;  %v3446_v54 = vrot.slane %v9807_v62, 3  ;;  %v12435_v22 = vld [vmem:[#allocation58_spill] sm:$0xff] }
 0x627   :  { %v6562_v11 = vpack.c.bf16 %v3761_v59, %v3747_v9  ;;  %v10153_v30 = vsel %vm63_vm1, %v3440_v41, %v3470_v29  ;;  %v3633_v53 = vrot.slane %v12425_v44, 1  ;;  %v10158_v33 = vsel %vm63_vm1, %v3441_v38, %v3471_v47  ;;  %v12432_v41 = vld [vmem:[#allocation54_spill] sm:$0xff] }
 0x628   :  { %12426 = vst [vmem:[#allocation52_spill] sm:$0xff] %v10158_v33  ;;  %v10162_v14 = vsel %vm63_vm1, %v3442_v42, %v3472_v31  ;;  %v10166_v59 = vsel %vm63_vm1, %v3443_v58, %v3473_v55  ;;  %v10170_v18 = vsel %vm63_vm1, %v3444_v50, %v3474_v32  ;;  %v10174_v29 = vsel %vm63_vm1, %v3445_v52, %v3475_v27  ;;  %v12433_v42 = vld [vmem:[#allocation55_spill] sm:$0xff]  ;;  %v12437_v52 = vld [vmem:[#allocation61_spill] sm:$0xff] }
 0x629   :  { %12427 = vst [vmem:[#allocation35_spill] sm:$0xff] %v10162_v14  ;;  %12428 = vst [vmem:[#allocation36_spill] sm:$0xff] %v10166_v59  ;;  %6563 = vmatprep.subr.bf16.mxu1 %v6562_v11  ;;  %v10178_v47 = vsel %vm63_vm1, %v3446_v54, %v3476_v3  ;;  %v3997_v31 = vrot.slane %v10153_v30, 4  ;;  %v3634_v38 = vrot.slane %v12432_v41, 1  ;;  %v3635_v9 = vrot.slane %v12433_v42, 1  ;;  %v12434_v58 = vld [vmem:[#allocation59_spill] sm:$0xff] }
 0x62a   :  { %12429 = vst [vmem:[#allocation34_spill] sm:$0xff] %v10170_v18  ;;  %12430 = vst [vmem:[#allocation38_spill] sm:$0xff] %v10174_v29  ;;  %6565 = vmatpush3.bf16.msra.mxu1 %v6562_v11  ;;  %v3998_v17 = vrot.slane %v10158_v33, 3  ;;  %v4000_v32 = vrot.slane %v10162_v14, 2  ;;  %v3636_v55 = vrot.slane %v12434_v58, 1  ;;  %v3637_v27 = vrot.slane %v12435_v22, 1 }
 0x62b   :  { %12431 = vst [vmem:[#allocation28_spill] sm:$0xff] %v10178_v47  ;;  %v3638_v50 = vrot.slane %v12436_v34, 1  ;;  %v3639_v3 = vrot.slane %v12437_v52, 1  ;;  %v12438_v54 = vld [vmem:[#allocation31_spill] sm:$0xff]  ;;  %v4002_v42 = vrot.slane %v10166_v59, 1  ;;  %v12441_v58 = vld [vmem:[#allocation37_spill] sm:$0xff] }
 0x62c   :  { %v12439_v44 = vrot.slane %v12438_v54, 7  ;;  %v3999_v11 = vsel %vm598_vm2, %v3998_v17, %v3997_v31  ;;  %v4007_v34 = vrot.slane %v10174_v29, 6  ;;  %v4009_v52 = vrot.slane %v10178_v47, 5  ;;  %v12442_v33 = vld [vmem:[#allocation51_spill] sm:$0xff]  ;;  %v12447_v29 = vld [vmem:[#allocation45_spill] sm:$0xff]  ;;  %v12448_v59 = vld [vmem:[#allocation56_spill] sm:$0xff] }
 0x62d   :  { %6439 = vmatmul.mubr.msk.f32.vlgmr.msra.gmra.mrb[32].mxu1 %vm64_vm0, %v12441_v58  ;;  %v4001_v22 = vsel %vm601_vm3, %v4000_v32, %v3999_v11  ;;  %v3603_v54 = vrot.slane %v9880_v25, 5  ;;  %v3604_v31 = vrot.slane %v9880_v25, 6  ;;  %v3605_v17 = vrot.slane %v9880_v25, 7 }
 0x62e   :  { %v10194_v41 = vsel %vm63_vm1, %v9807_v62, %v12439_v44  ;;  %6441 = vmatprep.mubr.msk.f32.mxu1 %vm64_vm0, %v12442_v33  ;;  %v4003_v62 = vsel %vm604_vm4, %v4002_v42, %v4001_v22  ;;  %v3606_v44 = vrot.slane %v9880_v25, 1  ;;  %v3607_v11 = vrot.slane %v9880_v25, 2 }
 0x62f   :  { %12440 = vst [vmem:[#allocation17_spill] sm:$0xff] %v10194_v41  ;;  %v4004_v32 = vsel %vm607_vm5, %v10194_v41, %v4003_v62  ;;  %v3608_v58 = vrot.slane %v9880_v25, 3  ;;  %v3609_v14 = vrot.slane %v9880_v25, 4  ;;  %v12443_v47 = vrot.slane %v10170_v18, 7 }
 0x630   :  { %v10221_v42 = vsel %vm63_vm1, %v3603_v54, %v3633_v53  ;;  %v10225_v22 = vsel %vm63_vm1, %v3604_v31, %v3634_v38  ;;  %v10229_v62 = vsel %vm63_vm1, %v3605_v17, %v3635_v9  ;;  %v3626_v41 = vrot.slane %v12447_v29, 1  ;;  %v12451_v38 = vld [vmem:[#allocation41_spill] sm:$0xff] }
 0x631   :  { %v4006_v33 = vsel %vm610_vm6, %v12443_v47, %v4004_v32  ;;  %12444 = vst [vmem:[#allocation30_spill] sm:$0xff] %v10221_v42  ;;  %12445 = vst [vmem:[#allocation50_spill] sm:$0xff] %v10225_v22  ;;  %6442 = vmatmul.mubr.msk.f32.gmra.mrb[34].mxu1 %vm64_vm0, %v12448_v59  ;;  %v10237_v47 = vsel %vm63_vm1, %v3606_v44, %v3636_v55  ;;  %v10241_v53 = vsel %vm63_vm1, %v3607_v11, %v3637_v27  ;;  %v12455_v27 = vld [vmem:[#allocation11_spill] sm:$0xff]  ;;  %v12457_v32 = vld [vmem:[#allocation42_spill] sm:$0xff] }
 0x632   :  { %12446 = vst [vmem:[#allocation24_spill] sm:$0xff] %v10229_v62  ;;  %v4008_v18 = vsel %vm613_vm7, %v4007_v34, %v4006_v33  ;;  %12449 = vst [vmem:[#allocation48_spill] sm:$0xff] %v10237_v47  ;;  %6444 = vmatprep.mubr.msk.f32.mxu1 %vm64_vm0, %v12451_v38  ;;  %v10250_v29 = vsel %vm63_vm1, %v3608_v58, %v3638_v50  ;;  %v10254_v59 = vsel %vm63_vm1, %v3609_v14, %v3639_v3  ;;  %v12454_v34 = vld [vmem:[#allocation39_spill] sm:$0xff]  ;;  %v12458_v50 = vld [vmem:[#allocation12_spill] sm:$0xff] }
 0x633   :  { %12450 = vst [vmem:[#allocation49_spill] sm:$0xff] %v10241_v53  ;;  %v10246_v9 = vsel %vm616_vm8, %v4009_v52, %v4008_v18  ;;  %12452 = vst [vmem:[#allocation53_spill] sm:$0xff] %v10250_v29  ;;  %v4105_v55 = vrot.slane %v10221_v42, 3  ;;  %v3627_v54 = vrot.slane %v12454_v34, 1  ;;  %v3628_v31 = vrot.slane %v12455_v27, 1  ;;  %v12456_v18 = vld [vmem:[#allocation25_spill] sm:$0xff] }
 0x634   :  { %12453 = vst [vmem:[#allocation54_spill] sm:$0xff] %v10254_v59  ;;  %v4106_v17 = vrot.slane %v10225_v22, 2  ;;  %v3629_v52 = vrot.slane %v12456_v18, 1  ;;  %v3630_v11 = vrot.slane %v12457_v32, 1  ;;  %v3631_v58 = vrot.slane %v12458_v50, 1  ;;  %v12459_v33 = vld [vmem:[#allocation22_spill] sm:$0xff] }
 0x635   :  { %v3632_v38 = vrot.slane %v12459_v33, 1  ;;  %v12460_v14 = vld [vmem:[#allocation62_spill] sm:$0xff]  ;;  %v12461_v3 = vld [vmem:[#allocation57_spill] sm:$0xff]  ;;  %v4111_v18 = vrot.slane %v10237_v47, 7  ;;  %v4113_v32 = vrot.slane %v10241_v53, 6  ;;  %v12464_v44 = vld [vmem:[#allocation43_spill] sm:$0xff] }
 0x636   :  { %6445 = vmatmul.mubr.msk.f32.gmra.mrb[36].mxu1 %vm64_vm0, %v12460_v14  ;;  %v12462_v42 = vrot.slane %v12461_v3, 1  ;;  %v4107_v27 = vsel %vm598_vm2, %v4106_v17, %v4105_v55  ;;  %v12465_v50 = vrot.slane %v10229_v62, 1  ;;  %v4115_v14 = vrot.slane %v10250_v29, 5 }
 0x637   :  { %6447 = vmatprep.mubr.msk.f32.mxu1 %vm64_vm0, %v12464_v44  ;;  %v4117_v3 = vrot.slane %v10254_v59, 4  ;;  %v3597_v55 = vrot.slane %v9884_v60, 6  ;;  %v3598_v17 = vrot.slane %v9884_v60, 7  ;;  %v3599_v53 = vrot.slane %v9884_v60, 1  ;;  %v12466_v59 = vld [vmem:[#allocation44_spill] sm:$0xff] }
 0x638   :  { %v10272_v34 = vsel %vm63_vm1, %v9880_v25, %v12462_v42  ;;  %v4109_v33 = vsel %vm601_vm3, %v12465_v50, %v4107_v27  ;;  %v3596_v25 = vrot.slane %v9884_v60, 5  ;;  %v3600_v62 = vrot.slane %v9884_v60, 2 }
 0x639   :  { %12463 = vst [vmem:[#allocation55_spill] sm:$0xff] %v10272_v34  ;;  %v4110_v42 = vsel %vm604_vm4, %v10272_v34, %v4109_v33  ;;  %v3601_v27 = vrot.slane %v9884_v60, 3  ;;  %v3602_v50 = vrot.slane %v9884_v60, 4  ;;  %v10303_v47 = vsel %vm63_vm1, %v3597_v55, %v3627_v54 }
 0x63a   :  { %v4112_v44 = vsel %vm607_vm5, %v4111_v18, %v4110_v42  ;;  %6448 = vmatmul.mubr.msk.f32.gmra.mrb[38].mxu1 %vm64_vm0, %v12466_v59  ;;  %v10299_v33 = vsel %vm63_vm1, %v3596_v25, %v3626_v41  ;;  %12468 = vst [vmem:[#allocation58_spill] sm:$0xff] %v10303_v47  ;;  %v10307_v18 = vsel %vm63_vm1, %v3598_v17, %v3628_v31  ;;  %v12470_v42 = vld [vmem:[#allocation47_spill] sm:$0xff] }
 0x63b   :  { %v4114_v29 = vsel %vm610_vm6, %v4113_v32, %v4112_v44  ;;  %12467 = vst [vmem:[#allocation59_spill] sm:$0xff] %v10299_v33  ;;  %12469 = vst [vmem:[#allocation60_spill] sm:$0xff] %v10307_v18  ;;  %6450 = vmatprep.mubr.msk.f32.mxu1 %vm64_vm0, %v12470_v42  ;;  %v10314_v59 = vsel %vm63_vm1, %v3599_v53, %v3629_v52  ;;  %v10318_v41 = vsel %vm63_vm1, %v3600_v62, %v3630_v11  ;;  %v12476_v62 = vld [vmem:[#allocation14_spill] sm:$0xff] }
 0x63c   :  { %v4116_v34 = vsel %vm613_vm7, %v4115_v14, %v4114_v29  ;;  %12471 = vst [vmem:[#allocation61_spill] sm:$0xff] %v10314_v59  ;;  %12472 = vst [vmem:[#allocation31_spill] sm:$0xff] %v10318_v41  ;;  %v10325_v31 = vsel %vm63_vm1, %v3601_v27, %v3631_v58  ;;  %v10329_v32 = vsel %vm63_vm1, %v3602_v50, %v3632_v38  ;;  %v4091_v29 = vrot.slane %v10299_v33, 3  ;;  %v12475_v14 = vld [vmem:[#allocation13_spill] sm:$0xff]  ;;  %v12477_v58 = vld [vmem:[#allocation40_spill] sm:$0xff] }
 0x63d   :  { %v10321_v54 = vsel %vm616_vm8, %v4117_v3, %v4116_v34  ;;  %12473 = vst [vmem:[#allocation37_spill] sm:$0xff] %v10325_v31  ;;  %12474 = vst [vmem:[#allocation51_spill] sm:$0xff] %v10329_v32  ;;  %v4092_v53 = vrot.slane %v10303_v47, 2  ;;  %v11986_v52 = vrot.slane %v10307_v18, 1  ;;  %v12478_v34 = vrot.slane %v12477_v58, 1  ;;  %v12480_v44 = vld [vmem:[#allocation18_spill] sm:$0xff] }
 0x63e   :  { %6451 = vmatmul.mubr.msk.f32.gmra.mrb[40].mxu1 %vm64_vm0, %v12475_v14  ;;  %v4097_v25 = vrot.slane %v10314_v59, 7  ;;  %v4099_v17 = vrot.slane %v10318_v41, 6  ;;  %v4101_v50 = vrot.slane %v10325_v31, 5  ;;  %v12484_v58 = vld [vmem:[#allocation21_spill] sm:$0xff]  ;;  %v3914_v41 = vld [vmem:[#allocation2 + $0x160] sm:$0xff]  ;;  %v4248_v33 = vrot.slane %v9812_v57, 7 }
 0x63f   :  { %6453 = vmatprep.mubr.msk.f32.mxu1 %vm64_vm0, %v12476_v62  ;;  %v4093_v11 = vsel %vm598_vm2, %v4092_v53, %v4091_v29  ;;  %v10344_v38 = vsel %vm63_vm1, %v9884_v60, %v12478_v34  ;;  %v12481_v60 = vld [vmem:[#allocation26_spill] sm:$0xff]  ;;  %v4103_v29 = vrot.slane %v10329_v32, 4  ;;  %v12485_v34 = vld [vmem:[#allocation15_spill] sm:$0xff]  ;;  %v4252_v57 = vrot.slane %v9857_v2, 7 }
 0x640   :  { %12479 = vst [vmem:[#allocation45_spill] sm:$0xff] %v10344_v38  ;;  %v4095_v3 = vsel %vm601_vm3, %v11986_v52, %v4093_v11  ;;  %v12482_v62 = vld [vmem:[#allocation46_spill] sm:$0xff]  ;;  %v12483_v11 = vld [vmem:[#allocation29_spill] sm:$0xff] }
 0x641   :  { %v4096_v55 = vsel %vm604_vm4, %v10344_v38, %v4095_v3  ;;  %v3911_v3 = vld [vmem:[#allocation2 + $0x148] sm:$0xff] }
 0x642   :  { %6454 = vmatmul.mubr.msk.f32.gmra.mrb[42].mxu1 %vm64_vm0, %v12480_v44  ;;  %v4098_v27 = vsel %vm607_vm5, %v4097_v25, %v4096_v55  ;;  %v3910_v25 = vld [vmem:[#allocation2 + $0x140] sm:$0xff] }
 0x643   :  { %6456 = vmatprep.mubr.msk.f32.mxu1 %vm64_vm0, %v12481_v60  ;;  %v4100_v42 = vsel %vm610_vm6, %v4099_v17, %v4098_v27 }
 0x644   :  { %v4102_v53 = vsel %vm613_vm7, %v4101_v50, %v4100_v42  ;;  %v3913_v50 = vld [vmem:[#allocation2 + $0x158] sm:$0xff]  ;;  %v3912_v42 = vld [vmem:[#allocation2 + $0x150] sm:$0xff] }
 0x645   :  { %v10363_v14 = vsel %vm616_vm8, %v4103_v29, %v4102_v53 }
 0x646   :  { %6457 = vmatmul.mubr.msk.f32.gmra.mrb[44].mxu1 %vm64_vm0, %v12482_v62 }
 0x647   :  { %6459 = vmatprep.mubr.msk.f32.mxu1 %vm64_vm0, %v12483_v11 }
 0x64a   :  { %6460 = vmatmul.mubr.msk.f32.gmra.mrb[46].mxu1 %vm64_vm0, %v12484_v58 }
 0x64b   :  { %6502 = vmatprep.mubr.msk.f32.mxu1 %vm64_vm0, %v12485_v34  ;;  %v3915_v34 = vld [vmem:[#allocation2 + $0x168] sm:$0xff] }
 0x700   :  { %v6440_v55 = vpop.f32.mrb[32].mxu1 }
 0x701   :  { %v3919_v17 = vadd.f32 %v6440_v55, %v3911_v3  ;;  %v3830_v44 = vpop.f32.mrb[33].mxu1  ;;  %v3917_v3 = vld [vmem:[#allocation2 + $0x178] sm:$0xff]  ;;  %v3916_v55 = vld [vmem:[#allocation2 + $0x170] sm:$0xff] }
 0x702   :  { %v3918_v27 = vadd.f32 %v3910_v25, %v3830_v44 }
 0x703   :  { %v6056_v60 = vmul.f32 -1.442695, %v3919_v17 }
 0x704   :  { %v6055_v29 = vmul.f32 -1.442695, %v3918_v27  ;;  %v6443_v53 = vpop.f32.mrb[34].mxu1 }
 0x705   :  { %6908 = vpow2.f32 %v6056_v60  ;;  %v3921_v62 = vadd.f32 %v6443_v53, %v3913_v50  ;;  %v3840_v11 = vpop.f32.mrb[35].mxu1  ;;  %v3928_v50 = vld [vmem:[#allocation5 + $0x88] sm:$0xff] }
 0x706   :  { %6910 = vpow2.f32 %v6055_v29  ;;  %v3920_v52 = vadd.f32 %v3912_v42, %v3840_v11  ;;  %v3927_v29 = vld [vmem:[#allocation5 + $0x80] sm:$0xff] }
 0x707   :  { %v6058_v58 = vmul.f32 -1.442695, %v3921_v62 }
 0x708   :  { %v6057_v18 = vmul.f32 -1.442695, %v3920_v52 }
 0x709   :  { %v6446_v32 = vpop.f32.mrb[36].mxu1  ;;  %6912 = vpow2.f32 %v6058_v58 }
 0x70a   :  { %v3850_v31 = vpop.f32.mrb[37].mxu1  ;;  %6914 = vpow2.f32 %v6057_v18  ;;  %v3923_v25 = vadd.f32 %v6446_v32, %v3915_v34 }
 0x70b   :  { %v3922_v17 = vadd.f32 %v3914_v41, %v3850_v31  ;;  %v3930_v31 = vld [vmem:[#allocation5 + $0x98] sm:$0xff] }
 0x70c   :  { %6916 = vtanh.f32 %v3923_v25 }
 0x70d   :  { %v6449_v44 = vpop.f32.mrb[38].mxu1  ;;  %6918 = vtanh.f32 %v3922_v17 }
 0x70e   :  { %v3925_v27 = vadd.f32 %v6449_v44, %v3917_v3  ;;  %v3860_v59 = vpop.f32.mrb[39].mxu1  ;;  %v3929_v3 = vld [vmem:[#allocation5 + $0x90] sm:$0xff] }
 0x70f   :  { %v3924_v60 = vadd.f32 %v3916_v55, %v3860_v59  ;;  %v6909_v53 = vpop.eup %6908 }
 0x710   :  { %v6060_v42 = vmul.f32 -1.442695, %v3925_v27  ;;  %v6911_v52 = vpop.eup %6910  ;;  %v3950_v62 = vadd.f32 1.0, %v6909_v53 }
 0x711   :  { %v6059_v11 = vmul.f32 -1.442695, %v3924_v60  ;;  %v6452_v58 = vpop.f32.mrb[40].mxu1  ;;  %v3949_v38 = vadd.f32 1.0, %v6911_v52  ;;  %v3932_v52 = vld [vmem:[#allocation5 + $0xa8] sm:$0xff] }
 0x712   :  { %6920 = vpow2.f32 %v6060_v42  ;;  %v3936_v18 = vadd.f32 %v6452_v58, %v3928_v50  ;;  %v3870_v32 = vpop.f32.mrb[41].mxu1 }
 0x713   :  { %6922 = vrcp.f32 %v3950_v62  ;;  %v3935_v41 = vadd.f32 %v3927_v29, %v3870_v32  ;;  %v6913_v34 = vpop.eup %6912 }
 0x714   :  { %6924 = vrcp.f32 %v3949_v38  ;;  %v6062_v59 = vmul.f32 -1.442695, %v3936_v18  ;;  %v6915_v55 = vpop.eup %6914  ;;  %v3962_v25 = vadd.f32 1.0, %v6913_v34  ;;  %v3931_v38 = vld [vmem:[#allocation5 + $0xa0] sm:$0xff] }
 0x715   :  { %6926 = vpow2.f32 %v6059_v11  ;;  %v6061_v44 = vmul.f32 -1.442695, %v3935_v41  ;;  %v6455_v27 = vpop.f32.mrb[42].mxu1  ;;  %v3961_v53 = vadd.f32 1.0, %v6915_v55  ;;  %v3934_v41 = vld [vmem:[#allocation5 + $0xb8] sm:$0xff] }
 0x716   :  { %6928 = vpow2.f32 %v6062_v59  ;;  %v3938_v17 = vadd.f32 %v6455_v27, %v3930_v31  ;;  %v3880_v60 = vpop.f32.mrb[43].mxu1  ;;  %v6917_v58 = vpop.eup %6916  ;;  %v3933_v31 = vld [vmem:[#allocation5 + $0xb0] sm:$0xff] }
 0x717   :  { %6930 = vrcp.f32 %v3962_v25  ;;  %v3937_v42 = vadd.f32 %v3929_v3, %v3880_v60  ;;  %v6919_v32 = vpop.eup %6918 }
 0x718   :  { %6932 = vrcp.f32 %v3961_v53  ;;  %v6064_v50 = vmul.f32 -1.442695, %v3938_v17 }
 0x719   :  { %6934 = vpow2.f32 %v6061_v44  ;;  %v6063_v29 = vmul.f32 -1.442695, %v3937_v42  ;;  %v6458_v62 = vpop.f32.mrb[44].mxu1 }
 0x71a   :  { %6936 = vpow2.f32 %v6064_v50  ;;  %v3890_v18 = vpop.f32.mrb[45].mxu1  ;;  %v3940_v11 = vadd.f32 %v6458_v62, %v3932_v52 }
 0x71b   :  { %6938 = vpow2.f32 %v6063_v29  ;;  %v3939_v59 = vadd.f32 %v3931_v38, %v3890_v18  ;;  %v4249_v38 = vrot.slane %v9816_v63, 7 }
 0x71c   :  { %v6921_v34 = vpop.eup %6920  ;;  %6940 = vtanh.f32 %v3940_v11 }
 0x71d   :  { %v6923_v55 = vpop.eup %6922  ;;  %v3976_v25 = vadd.f32 1.0, %v6921_v34  ;;  %v6461_v3 = vpop.f32.mrb[46].mxu1  ;;  %6942 = vtanh.f32 %v3939_v59 }
 0x71e   :  { %v6925_v27 = vpop.eup %6924  ;;  %v4030_v53 = vmul.f32 %v6923_v55, %v6917_v58  ;;  %v3942_v17 = vadd.f32 %v6461_v3, %v3934_v41  ;;  %v3900_v44 = vpop.f32.mrb[47].mxu1  ;;  %v4250_v41 = vrot.slane %v9820_v1, 7  ;;  %v12487_v55 = vld [vmem:[#allocation32_spill] sm:$0xff] }
 0x71f   :  { %v6927_v60 = vpop.eup %6926  ;;  %v4029_v42 = vmul.f32 %v6925_v27, %v6919_v32  ;;  %v3941_v47 = vadd.f32 %v3933_v31, %v3900_v44  ;;  %6944 = vrcp.f32 %v3976_v25  ;;  %v12486_v32 = vld [vmem:[#allocation19_spill] sm:$0xff]  ;;  %v4253_v59 = vrot.slane %v12487_v55, 7 }
 0x720   :  { %v6929_v50 = vpop.eup %6928  ;;  %v3975_v29 = vadd.f32 1.0, %v6927_v60  ;;  %v6066_v52 = vmul.f32 -1.442695, %v3942_v17  ;;  %v4251_v11 = vrot.slane %v12486_v32, 7  ;;  %v4254_v25 = vrot.slane %v9837_v45, 7  ;;  %v12490_v32 = vld [vmem:[#allocation27_spill] sm:$0xff] }
 0x721   :  { %v6931_v62 = vpop.eup %6930  ;;  %v4044_v18 = vadd.f32 1.0, %v6929_v50  ;;  %v6065_v34 = vmul.f32 -1.442695, %v3941_v47  ;;  %v12491_v1 = vrot.slane %v12490_v32, 7 }
 0x722   :  { %v6933_v22 = vpop.eup %6932  ;;  %v4028_v58 = vmul.f32 %v6931_v62, %v10146_v5  ;;  %6946 = vrcp.f32 %v3975_v29 }
 0x723   :  { %v6935_v31 = vpop.eup %6934  ;;  %v4027_v3 = vmul.f32 %v6933_v22, %v10246_v9  ;;  %6948 = vrcp.f32 %v4044_v18 }
 0x724   :  { %v6937_v63 = vpop.eup %6936  ;;  %v4032_v47 = vadd.f32 %v4030_v53, %v4028_v58  ;;  %v4043_v27 = vadd.f32 1.0, %v6935_v31  ;;  %6950 = vpow2.f32 %v6066_v52 }
 0x725   :  { %v6939_v5 = vpop.eup %6938  ;;  %v10383_v17 = vadd.f32 %v4029_v42, %v4027_v3  ;;  %v4056_v44 = vadd.f32 1.0, %v6937_v63  ;;  %6952 = vpow2.f32 %v6065_v34 }
 0x726   :  { %6954 = vtanh.f32 %v4032_v47  ;;  %v4055_v2 = vadd.f32 1.0, %v6939_v5  ;;  %v4218_v60 = vrot.slane %v4032_v47, 3  ;;  %v4219_v50 = vrot.slane %v4032_v47, 4  ;;  %v6941_v42 = vpop.eup %6940 }
 0x727   :  { %6956 = vtanh.f32 %v10383_v17  ;;  %v4220_v22 = vrot.slane %v4032_v47, 5  ;;  %v4221_v9 = vrot.slane %v4032_v47, 6  ;;  %v4222_v29 = vrot.slane %v4032_v47, 7  ;;  %v6943_v58 = vpop.eup %6942 }
 0x728   :  { %6958 = vrcp.f32 %v4043_v27  ;;  %v4223_v45 = vrot.slane %v4032_v47, 1  ;;  %v4224_v53 = vrot.slane %v4032_v47, 2  ;;  %v10388_v52 = vsel %vm63_vm1, %v4218_v60, %v4248_v33 }
 0x729   :  { %12488 = vst [vmem:[#allocation56_spill] sm:$0xff] %v10388_v52  ;;  %6960 = vrcp.f32 %v4056_v44  ;;  %v10392_v62 = vsel %vm63_vm1, %v4219_v50, %v4249_v38  ;;  %v10396_v18 = vsel %vm63_vm1, %v4220_v22, %v4250_v41  ;;  %v10400_v34 = vsel %vm63_vm1, %v4221_v9, %v4251_v11  ;;  %v6945_v31 = vpop.eup %6944 }
 0x72a   :  { %6962 = vrcp.f32 %v4055_v2  ;;  %v10405_v33 = vsel %vm63_vm1, %v4222_v29, %v4252_v57  ;;  %v10409_v38 = vsel %vm63_vm1, %v4223_v45, %v4253_v59  ;;  %v10413_v41 = vsel %vm63_vm1, %v4224_v53, %v4254_v25 }
 0x72b   :  { %12489 = vst [vmem:[#allocation41_spill] sm:$0xff] %v10409_v38  ;;  %v4782_v11 = vrot.slane %v10388_v52, 5  ;;  %v4783_v55 = vrot.slane %v10392_v62, 4  ;;  %v4785_v3 = vrot.slane %v10396_v18, 3  ;;  %v4165_v27 = vrot.slane %v9903_v8, 7 }
 0x72c   :  { %v6947_v63 = vpop.eup %6946  ;;  %v4166_v57 = vrot.slane %v9907_v21, 7  ;;  %v4167_v5 = vrot.slane %v9969_v16, 7  ;;  %v4168_v59 = vrot.slane %v9917_v28, 7  ;;  %v4169_v2 = vrot.slane %v9921_v36, 7 }
 0x72d   :  { %v6949_v44 = vpop.eup %6948  ;;  %v4170_v25 = vrot.slane %v9925_v49, 7  ;;  %v4784_v60 = vsel %vm598_vm2, %v4783_v55, %v4782_v11  ;;  %v4787_v50 = vrot.slane %v10400_v34, 2  ;;  %v4171_v9 = vrot.slane %v9929_v6, 7 }
 0x72e   :  { %v6951_v22 = vpop.eup %6950  ;;  %v4124_v29 = vmul.f32 %v6949_v44, %v6941_v42  ;;  %v4786_v8 = vsel %vm601_vm3, %v4785_v3, %v4784_v60  ;;  %v4789_v21 = vrot.slane %v10405_v33, 1  ;;  %v4172_v28 = vrot.slane %v9933_v15, 7 }
 0x72f   :  { %v6953_v16 = vpop.eup %6952  ;;  %v4173_v45 = vrot.slane %v9938_v51, 7  ;;  %v4070_v36 = vadd.f32 1.0, %v6951_v22  ;;  %v4788_v49 = vsel %vm604_vm4, %v4787_v50, %v4786_v8  ;;  %v4174_v11 = vrot.slane %v9981_v40, 7 }
 0x730   :  { %v6955_v53 = vpop.eup %6954  ;;  %v4069_v55 = vadd.f32 1.0, %v6953_v16  ;;  %v10437_v6 = vsel %vm63_vm1, %v4032_v47, %v12491_v1  ;;  %v4790_v42 = vsel %vm607_vm5, %v4789_v21, %v4788_v49  ;;  %v4175_v15 = vrot.slane %v9946_v7, 7 }
 0x731   :  { %v6957_v3 = vpop.eup %6956  ;;  %v10441_v44 = vmul.f32 %v6955_v53, %v6945_v31  ;;  %6964 = vrcp.f32 %v4070_v36  ;;  %v10445_v51 = vsel %vm610_vm6, %v10437_v6, %v4790_v42  ;;  %v4176_v60 = vrot.slane %v9950_v43, 7 }
 0x732   :  { %v6959_v40 = vpop.eup %6958  ;;  %v4035_v50 = vmul.f32 %v6957_v3, %v6947_v63  ;;  %6966 = vrcp.f32 %v4069_v55 }
 0x733   :  { %v6961_v47 = vpop.eup %6960  ;;  %v4123_v1 = vmul.f32 %v6959_v40, %v6943_v58  ;;  %v4140_v22 = vrot.slane %v10441_v44, 3  ;;  %v4141_v7 = vrot.slane %v10441_v44, 4  ;;  %v4142_v31 = vrot.slane %v10441_v44, 5 }
 0x734   :  { %v6963_v8 = vpop.eup %6962  ;;  %v4122_v21 = vmul.f32 %v6961_v47, %v10321_v54  ;;  %v4133_v16 = vrot.slane %v4035_v50, 3  ;;  %v4134_v36 = vrot.slane %v4035_v50, 4  ;;  %v4135_v49 = vrot.slane %v4035_v50, 5 }
 0x735   :  { %v4121_v43 = vmul.f32 %v6963_v8, %v10363_v14  ;;  %v4136_v53 = vrot.slane %v4035_v50, 6  ;;  %v4137_v42 = vrot.slane %v4035_v50, 7  ;;  %v4138_v63 = vrot.slane %v4035_v50, 1 }
 0x736   :  { %v10454_v55 = vadd.f32 %v4124_v29, %v4122_v21  ;;  %v4139_v58 = vrot.slane %v4035_v50, 2  ;;  %v4143_v3 = vrot.slane %v10441_v44, 6  ;;  %v4144_v40 = vrot.slane %v10441_v44, 7 }
 0x737   :  { %v10458_v32 = vadd.f32 %v4123_v1, %v4121_v43  ;;  %v4145_v52 = vrot.slane %v10441_v44, 1  ;;  %v4146_v54 = vrot.slane %v10441_v44, 2  ;;  %v12492_v47 = vrot.slane %v9892_v19, 7 }
 0x738   :  { %6968 = vtanh.f32 %v10454_v55  ;;  %v12493_v29 = vrot.slane %v9899_v20, 7  ;;  %v10477_v1 = vsel %vm63_vm1, %v4135_v49, %v4165_v27  ;;  %v10481_v21 = vsel %vm63_vm1, %v4136_v53, %v4166_v57 }
 0x739   :  { %v10466_v14 = vsel %vm63_vm1, %v4133_v16, %v12492_v47  ;;  %6970 = vtanh.f32 %v10458_v32  ;;  %v10487_v16 = vsel %vm63_vm1, %v4137_v42, %v4167_v5  ;;  %v10491_v20 = vsel %vm63_vm1, %v4138_v63, %v4168_v59  ;;  %v12497_v47 = vld [vmem:[#allocation23_spill] sm:$0xff] }
 0x73a   :  { %v10473_v8 = vsel %vm63_vm1, %v4134_v36, %v12493_v29  ;;  %12494 = vst [vmem:[#allocation39_spill] sm:$0xff] %v10491_v20  ;;  %v10495_v27 = vsel %vm63_vm1, %v4139_v58, %v4169_v2  ;;  %v10499_v57 = vsel %vm63_vm1, %v4140_v22, %v4170_v25  ;;  %v10503_v36 = vsel %vm63_vm1, %v4141_v7, %v4171_v9 }
 0x73b   :  { %v10507_v5 = vsel %vm63_vm1, %v4142_v31, %v4172_v28  ;;  %v6965_v49 = vpop.eup %6964  ;;  %v10512_v43 = vsel %vm63_vm1, %v4143_v3, %v4173_v45  ;;  %v10516_v2 = vsel %vm63_vm1, %v4144_v40, %v4174_v11  ;;  %v10520_v25 = vsel %vm63_vm1, %v4145_v52, %v4175_v15 }
 0x73c   :  { %12495 = vst [vmem:[#allocation11_spill] sm:$0xff] %v10520_v25  ;;  %v6967_v9 = vpop.eup %6966  ;;  %v10524_v28 = vsel %vm63_vm1, %v4146_v54, %v4176_v60  ;;  %v4459_v22 = vrot.slane %v10466_v14, 5  ;;  %v4460_v7 = vrot.slane %v10473_v8, 4  ;;  %v4462_v45 = vrot.slane %v10477_v1, 3 }
 0x73d   :  { %12496 = vst [vmem:[#allocation25_spill] sm:$0xff] %v10524_v28  ;;  %v4464_v52 = vrot.slane %v10481_v21, 2  ;;  %v4473_v42 = vrot.slane %v10499_v57, 5  ;;  %v4474_v60 = vrot.slane %v10503_v36, 4  ;;  %v4476_v63 = vrot.slane %v10507_v5, 3 }
 0x73e   :  { %v4461_v15 = vsel %vm598_vm2, %v4460_v7, %v4459_v22  ;;  %v4325_v58 = vrot.slane %v10055_v23, 1  ;;  %v4326_v3 = vrot.slane %v10059_v10, 1  ;;  %v4466_v54 = vrot.slane %v10487_v16, 1 }
 0x73f   :  { %v4463_v40 = vsel %vm601_vm3, %v4462_v45, %v4461_v15  ;;  %v12498_v29 = vrot.slane %v12497_v47, 7  ;;  %v4475_v7 = vsel %vm598_vm2, %v4474_v60, %v4473_v42  ;;  %v4478_v11 = vrot.slane %v10512_v43, 2  ;;  %v12499_v47 = vld [vmem:[#allocation16_spill] sm:$0xff] }
 0x740   :  { %v4465_v22 = vsel %vm604_vm4, %v4464_v52, %v4463_v40  ;;  %v11997_v10 = vrot.slane %v10491_v20, 7  ;;  %v4477_v45 = vsel %vm601_vm3, %v4476_v63, %v4475_v7  ;;  %v4480_v15 = vrot.slane %v10516_v2, 1 }
 0x741   :  { %v10545_v53 = vsel %vm63_vm1, %v4035_v50, %v12498_v29  ;;  %v4467_v23 = vsel %vm607_vm5, %v4466_v54, %v4465_v22  ;;  %v12500_v59 = vrot.slane %v12499_v47, 7  ;;  %v4471_v42 = vrot.slane %v10495_v27, 6 }
 0x742   :  { %v6969_v31 = vpop.eup %6968  ;;  %v4468_v52 = vsel %vm610_vm6, %v10545_v53, %v4467_v23  ;;  %v4479_v60 = vsel %vm604_vm4, %v4478_v11, %v4477_v45  ;;  %v11998_v22 = vrot.slane %v10520_v25, 7  ;;  %v4485_v23 = vrot.slane %v10524_v28, 6 }
 0x743   :  { %v10559_v50 = vsel %vm63_vm1, %v10441_v44, %v12500_v59  ;;  %v6971_v40 = vpop.eup %6970  ;;  %v10565_v54 = vmul.f32 %v6969_v31, %v6965_v49  ;;  %v4470_v63 = vsel %vm613_vm7, %v11997_v10, %v4468_v52  ;;  %v4481_v29 = vsel %vm607_vm5, %v4480_v15, %v4479_v60 }
 0x744   :  { %v4129_v44 = vmul.f32 %v6971_v40, %v6967_v9  ;;  %v4472_v59 = vsel %vm616_vm8, %v4471_v42, %v4470_v63  ;;  %v4482_v7 = vsel %vm610_vm6, %v10559_v50, %v4481_v29  ;;  %v4327_v11 = vrot.slane %v10063_v61, 1 }
 0x745   :  { %v4328_v49 = vrot.slane %v10113_v4, 1  ;;  %v4329_v31 = vrot.slane %v10071_v26, 1  ;;  %v4484_v45 = vsel %vm613_vm7, %v11998_v22, %v4482_v7  ;;  %v4330_v15 = vrot.slane %v10075_v37, 1 }
 0x746   :  { %v4331_v9 = vrot.slane %v10079_v12, 1  ;;  %v4332_v47 = vrot.slane %v10083_v46, 1  ;;  %v4486_v52 = vsel %vm616_vm8, %v4485_v23, %v4484_v45  ;;  %v4289_v61 = vrot.slane %v4129_v44, 6 }
 0x747   :  { %v6566_v60 = vpack.c.bf16 %v4486_v52, %v4472_v59  ;;  %v4290_v40 = vrot.slane %v4129_v44, 7  ;;  %v4291_v4 = vrot.slane %v4129_v44, 1  ;;  %v4292_v63 = vrot.slane %v4129_v44, 2  ;;  %v12501_v52 = vld [vmem:[#allocation52_spill] sm:$0xff] }
 0x748   :  { %v4293_v26 = vrot.slane %v4129_v44, 3  ;;  %v4294_v29 = vrot.slane %v4129_v44, 4  ;;  %v4295_v10 = vrot.slane %v4129_v44, 5  ;;  %v4296_v7 = vrot.slane %v10565_v54, 6 }
 0x749   :  { %6567 = vmatprep.subr.bf16.mxu0 %v6566_v60  ;;  %v4297_v37 = vrot.slane %v10565_v54, 7  ;;  %v4298_v12 = vrot.slane %v10565_v54, 1  ;;  %v4299_v46 = vrot.slane %v10565_v54, 2  ;;  %v4300_v23 = vrot.slane %v10565_v54, 3 }
 0x74a   :  { %6569 = vmatpush3.bf16.msra.mxu0 %v6566_v60  ;;  %v4301_v59 = vrot.slane %v10565_v54, 4  ;;  %v4302_v45 = vrot.slane %v10565_v54, 5  ;;  %v12502_v42 = vrot.slane %v10025_v48, 1  ;;  %v12503_v25 = vrot.slane %v10031_v56, 1 }
 0x74b   :  { %v12505_v20 = vrot.slane %v10101_v0, 1  ;;  %v12506_v22 = vrot.slane %v10043_v35, 1  ;;  %v12510_v35 = vld [vmem:[#allocation35_spill] sm:$0xff] }
 0x74c   :  { %v10599_v19 = vsel %vm63_vm1, %v4289_v61, %v12502_v42  ;;  %v10605_v60 = vsel %vm63_vm1, %v4290_v40, %v12503_v25  ;;  %v12507_v42 = vrot.slane %v10047_v39, 1  ;;  %v12508_v25 = vrot.slane %v10051_v13, 1 }
 0x74d   :  { %12504 = vst [vmem:[#allocation42_spill] sm:$0xff] %v10605_v60  ;;  %v10611_v28 = vsel %vm63_vm1, %v4291_v4, %v12505_v20  ;;  %v10617_v48 = vsel %vm63_vm1, %v4292_v63, %v12506_v22  ;;  %v10633_v20 = vsel %vm63_vm1, %v4295_v10, %v4325_v58  ;;  %v4243_v61 = vrot.slane %v12510_v35, 7 }
 0x74e   :  { %v10623_v56 = vsel %vm63_vm1, %v4293_v26, %v12507_v42  ;;  %v10629_v0 = vsel %vm63_vm1, %v4294_v29, %v12508_v25  ;;  %v10638_v22 = vsel %vm63_vm1, %v4296_v7, %v4326_v3  ;;  %v10642_v39 = vsel %vm63_vm1, %v4297_v37, %v4327_v11  ;;  %v12517_v29 = vld [vmem:[#allocation20_spill] sm:$0xff] }
 0x74f   :  { %12509 = vst [vmem:[#allocation12_spill] sm:$0xff] %v10629_v0  ;;  %12511 = vst [vmem:[#allocation22_spill] sm:$0xff] %v10638_v22  ;;  %v10646_v13 = vsel %vm63_vm1, %v4298_v12, %v4328_v49  ;;  %v10650_v40 = vsel %vm63_vm1, %v4299_v46, %v4329_v31  ;;  %v10654_v58 = vsel %vm63_vm1, %v4300_v23, %v4330_v15  ;;  %v4505_v11 = vrot.slane %v10599_v19, 2  ;;  %v12519_v23 = vld [vmem:[#allocation33_spill] sm:$0xff] }
 0x750   :  { %12512 = vst [vmem:[#allocation62_spill] sm:$0xff] %v10642_v39  ;;  %12513 = vst [vmem:[#allocation57_spill] sm:$0xff] %v10650_v40  ;;  %v10658_v3 = vsel %vm63_vm1, %v4301_v59, %v4331_v9  ;;  %v10662_v10 = vsel %vm63_vm1, %v4302_v45, %v4332_v47  ;;  %v12003_v49 = vrot.slane %v10605_v60, 1  ;;  %v4794_v31 = vrot.slane %v10413_v41, 6 }
 0x751   :  { %12514 = vst [vmem:[#allocation43_spill] sm:$0xff] %v10654_v58  ;;  %12515 = vst [vmem:[#allocation44_spill] sm:$0xff] %v10658_v3  ;;  %v4519_v63 = vrot.slane %v10638_v22, 2  ;;  %v4211_v15 = vrot.slane %v10383_v17, 3  ;;  %v4212_v26 = vrot.slane %v10383_v17, 4  ;;  %v4213_v9 = vrot.slane %v10383_v17, 5 }
 0x752   :  { %12516 = vst [vmem:[#allocation47_spill] sm:$0xff] %v10662_v10  ;;  %v12518_v7 = vrot.slane %v12517_v29, 1  ;;  %v4507_v37 = vsel %vm598_vm2, %v12003_v49, %v4505_v11  ;;  %v4509_v12 = vrot.slane %v10611_v28, 7  ;;  %v12004_v46 = vrot.slane %v10642_v39, 1  ;;  %v4704_v22 = vld [vmem:[#allocation5 + $0x70] sm:$0xff] }
 0x753   :  { %v12520_v59 = vrot.slane %v12519_v23, 1  ;;  %v4214_v25 = vrot.slane %v10383_v17, 6  ;;  %v4513_v11 = vrot.slane %v10623_v56, 5  ;;  %v4515_v23 = vrot.slane %v10629_v0, 4 }
 0x754   :  { %v10676_v47 = vsel %vm63_vm1, %v4129_v44, %v12518_v7  ;;  %v4511_v44 = vrot.slane %v10617_v48, 6  ;;  %v4521_v29 = vsel %vm598_vm2, %v12004_v46, %v4519_v63  ;;  %v4523_v7 = vrot.slane %v10646_v13, 7 }
 0x755   :  { %v10688_v45 = vsel %vm63_vm1, %v10565_v54, %v12520_v59  ;;  %v4508_v42 = vsel %vm601_vm3, %v10676_v47, %v4507_v37  ;;  %v4525_v59 = vrot.slane %v10650_v40, 6  ;;  %v4527_v4 = vrot.slane %v10654_v58, 5  ;;  %v12526_v58 = vld [vmem:[#allocation28_spill] sm:$0xff] }
 0x756   :  { %12521 = vst [vmem:[#allocation13_spill] sm:$0xff] %v10688_v45  ;;  %v4510_v35 = vsel %vm604_vm4, %v4509_v12, %v4508_v42  ;;  %v4522_v37 = vsel %vm601_vm3, %v10688_v45, %v4521_v29  ;;  %v4517_v12 = vrot.slane %v10633_v20, 3 }
 0x757   :  { %v4512_v54 = vsel %vm607_vm5, %v4511_v44, %v4510_v35  ;;  %v4524_v42 = vsel %vm604_vm4, %v4523_v7, %v4522_v37  ;;  %v4529_v44 = vrot.slane %v10658_v3, 4  ;;  %v12522_v35 = vrot.slane %v10409_v38, 7  ;;  %v12523_v37 = vld [vmem:[#allocation36_spill] sm:$0xff] }
 0x758   :  { %v4514_v49 = vsel %vm610_vm6, %v4513_v11, %v4512_v54  ;;  %v4526_v46 = vsel %vm607_vm5, %v4525_v59, %v4524_v42  ;;  %v4531_v54 = vrot.slane %v10662_v10, 3  ;;  %v4215_v7 = vrot.slane %v10383_v17, 7  ;;  %v12525_v59 = vld [vmem:[#allocation38_spill] sm:$0xff] }
 0x759   :  { %v4516_v63 = vsel %vm613_vm7, %v4515_v23, %v4514_v49  ;;  %v4793_v29 = vsel %vm613_vm7, %v12522_v35, %v10445_v51  ;;  %v4528_v11 = vsel %vm610_vm6, %v4527_v4, %v4526_v46  ;;  %v4244_v60 = vrot.slane %v12523_v37, 7  ;;  %v12524_v49 = vld [vmem:[#allocation17_spill] sm:$0xff] }
 0x75a   :  { %v4518_v39 = vsel %vm616_vm8, %v4517_v12, %v4516_v63  ;;  %v4245_v23 = vrot.slane %v12524_v49, 7  ;;  %v4246_v42 = vrot.slane %v12525_v59, 7  ;;  %v4530_v3 = vsel %vm613_vm7, %v4529_v44, %v4528_v11 }
 0x75b   :  { %v4247_v38 = vrot.slane %v12526_v58, 7  ;;  %v4532_v51 = vsel %vm616_vm8, %v4531_v54, %v4530_v3  ;;  %v10727_v12 = vsel %vm616_vm8, %v4794_v31, %v4793_v29  ;;  %v4216_v4 = vrot.slane %v10383_v17, 1  ;;  %v12531_v3 = vld [vmem:[#allocation30_spill] sm:$0xff]  ;;  %v12535_v54 = vld [vmem:[#allocation48_spill] sm:$0xff] }
 0x75c   :  { %12527 = vst [vmem:[#allocation14_spill] sm:$0xff] %v10727_v12  ;;  %v6570_v46 = vpack.c.bf16 %v4532_v51, %v4518_v39  ;;  %v4217_v63 = vrot.slane %v10383_v17, 2  ;;  %v12528_v35 = vrot.slane %v10153_v30, 7  ;;  %v12530_v44 = vrot.slane %v12501_v52, 7  ;;  %v10829_v12 = vld [vmem:[%s11774_s3 + $0x18] sm:$0xff] }
 0x75d   :  { %v4404_v31 = vrot.slane %v12531_v3, 1  ;;  %v10746_v29 = vsel %vm63_vm1, %v4213_v9, %v4243_v61  ;;  %v10750_v39 = vsel %vm63_vm1, %v4214_v25, %v4244_v60  ;;  %v10754_v30 = vsel %vm63_vm1, %v4215_v7, %v4245_v23  ;;  %v12533_v9 = vld [vmem:[#allocation50_spill] sm:$0xff]  ;;  %v12534_v25 = vld [vmem:[#allocation55_spill] sm:$0xff]  ;;  %v12536_v23 = vld [vmem:[#allocation49_spill] sm:$0xff]  ;;  %12547 = vst [vmem:[#allocation19_spill] sm:$0xff] %v10829_v12 }
 0x75e   :  { %v10735_v37 = vsel %vm63_vm1, %v4211_v15, %v12528_v35  ;;  %v10741_v58 = vsel %vm63_vm1, %v4212_v26, %v12530_v44  ;;  %6571 = vmatprep.subr.bf16.mxu0 %v6570_v46  ;;  %v10758_v52 = vsel %vm63_vm1, %v4216_v4, %v4246_v42  ;;  %v10762_v15 = vsel %vm63_vm1, %v4217_v63, %v4247_v38  ;;  %v12537_v42 = vld [vmem:[#allocation53_spill] sm:$0xff]  ;;  %v12538_v63 = vld [vmem:[#allocation34_spill] sm:$0xff] }
 0x75f   :  { %12529 = vst [vmem:[#allocation40_spill] sm:$0xff] %v10735_v37  ;;  %12532 = vst [vmem:[#allocation18_spill] sm:$0xff] %v10758_v52  ;;  %v4768_v61 = vrot.slane %v10735_v37, 5  ;;  %v4769_v26 = vrot.slane %v10741_v58, 4  ;;  %v4405_v60 = vrot.slane %v12533_v9, 1  ;;  %v4406_v11 = vrot.slane %v12534_v25, 1  ;;  %6573 = vmatpush3.bf16.msra.mxu0 %v6570_v46 }
 0x760   :  { %v4407_v7 = vrot.slane %v12535_v54, 1  ;;  %v4771_v49 = vrot.slane %v10746_v29, 3  ;;  %v4408_v59 = vrot.slane %v12536_v23, 1  ;;  %v4409_v51 = vrot.slane %v12537_v42, 1  ;;  %v10787_v25 = vld [vmem:[%s11774_s3 + $0x8] sm:$0xff] }
 0x761   :  { %v4770_v38 = vsel %vm598_vm2, %v4769_v26, %v4768_v61  ;;  %v4773_v4 = vrot.slane %v10750_v39, 2  ;;  %v12539_v35 = vrot.slane %v12538_v63, 7  ;;  %v4775_v46 = vrot.slane %v10754_v30, 1  ;;  %12540 = vst [vmem:[#allocation26_spill] sm:$0xff] %v10787_v25 }
 0x762   :  { %v4772_v3 = vsel %vm601_vm3, %v4771_v49, %v4770_v38  ;;  %6471 = vmatmul.mubr.msk.f32.vlgmr.msra.gmra.mrb[48].mxu0 %vm64_vm0, %v10787_v25  ;;  %v4780_v26 = vrot.slane %v10762_v15, 6  ;;  %v4375_v54 = vrot.slane %v10454_v55, 7  ;;  %v10798_v49 = vld [vmem:[%s11774_s3 + $0x10] sm:$0xff]  ;;  %v4376_v42 = vrot.slane %v10454_v55, 1 }
 0x763   :  { %v10779_v44 = vsel %vm63_vm1, %v10383_v17, %v12539_v35  ;;  %v4774_v61 = vsel %vm604_vm4, %v4773_v4, %v4772_v3  ;;  %v4374_v17 = vrot.slane %v10454_v55, 6  ;;  %12541 = vst [vmem:[#allocation46_spill] sm:$0xff] %v10798_v49  ;;  %6473 = vmatprep.mubr.msk.f32.mxu0 %vm64_vm0, %v10798_v49  ;;  %v4377_v38 = vrot.slane %v10454_v55, 2  ;;  %v12543_v49 = vld [vmem:[#allocation54_spill] sm:$0xff] }
 0x764   :  { %v4776_v23 = vsel %vm607_vm5, %v4775_v46, %v4774_v61  ;;  %v4378_v4 = vrot.slane %v10454_v55, 3  ;;  %v4379_v35 = vrot.slane %v10454_v55, 4  ;;  %v4380_v3 = vrot.slane %v10454_v55, 5 }
 0x765   :  { %v4777_v63 = vsel %vm610_vm6, %v10779_v44, %v4776_v23  ;;  %v10812_v9 = vsel %vm63_vm1, %v4374_v17, %v4404_v31  ;;  %v4410_v25 = vrot.slane %v12543_v49, 1  ;;  %v12544_v46 = vrot.slane %v10758_v52, 7 }
 0x766   :  { %12542 = vst [vmem:[#allocation29_spill] sm:$0xff] %v10812_v9  ;;  %v10820_v37 = vsel %vm63_vm1, %v4375_v54, %v4405_v60  ;;  %v10824_v23 = vsel %vm63_vm1, %v4376_v42, %v4406_v11  ;;  %6474 = vmatmul.mubr.msk.f32.gmra.mrb[50].mxu0 %vm64_vm0, %v10829_v12  ;;  %v10838_v17 = vsel %vm63_vm1, %v4377_v38, %v4407_v7  ;;  %v12552_v54 = vld [vmem:[#allocation59_spill] sm:$0xff]  ;;  %v12559_v12 = vld [vmem:[#allocation37_spill] sm:$0xff] }
 0x767   :  { %v4779_v61 = vsel %vm613_vm7, %v12544_v46, %v4777_v63  ;;  %12545 = vst [vmem:[#allocation21_spill] sm:$0xff] %v10820_v37  ;;  %12546 = vst [vmem:[#allocation15_spill] sm:$0xff] %v10824_v23  ;;  %v10842_v60 = vsel %vm63_vm1, %v4378_v4, %v4408_v59  ;;  %v10846_v11 = vsel %vm63_vm1, %v4379_v35, %v4409_v51  ;;  %v4397_v49 = vrot.slane %v12552_v54, 1  ;;  %v10852_v42 = vld [vmem:[%s11774_s3 + $0x20] sm:$0xff]  ;;  %v12555_v51 = vld [vmem:[#allocation58_spill] sm:$0xff] }
 0x768   :  { %v10834_v31 = vsel %vm616_vm8, %v4780_v26, %v4779_v61  ;;  %12549 = vst [vmem:[#allocation27_spill] sm:$0xff] %v10838_v17  ;;  %12550 = vst [vmem:[#allocation23_spill] sm:$0xff] %v10842_v60  ;;  %6476 = vmatprep.mubr.msk.f32.mxu0 %vm64_vm0, %v10852_v42  ;;  %v10858_v7 = vsel %vm63_vm1, %v4380_v3, %v4410_v25  ;;  %v4876_v59 = vrot.slane %v10812_v9, 2  ;;  %v12018_v26 = vrot.slane %v10820_v37, 1  ;;  %v12556_v4 = vld [vmem:[#allocation45_spill] sm:$0xff]  ;;  %v12558_v61 = vld [vmem:[#allocation31_spill] sm:$0xff] }
 0x769   :  { %12548 = vst [vmem:[#allocation32_spill] sm:$0xff] %v10834_v31  ;;  %12551 = vst [vmem:[#allocation16_spill] sm:$0xff] %v10846_v11  ;;  %v4398_v38 = vrot.slane %v12555_v51, 1  ;;  %v4399_v63 = vrot.slane %v12556_v4, 1  ;;  %v12557_v35 = vld [vmem:[#allocation61_spill] sm:$0xff]  ;;  %v4401_v54 = vrot.slane %v12558_v61, 1 }
 0x76a   :  { %12553 = vst [vmem:[#allocation52_spill] sm:$0xff] %v10852_v42  ;;  %12554 = vst [vmem:[#allocation35_spill] sm:$0xff] %v10858_v7  ;;  %v4400_v46 = vrot.slane %v12557_v35, 1  ;;  %v4402_v52 = vrot.slane %v12559_v12, 1  ;;  %v12560_v31 = vld [vmem:[#allocation24_spill] sm:$0xff]  ;;  %v4878_v3 = vsel %vm598_vm2, %v12018_v26, %v4876_v59  ;;  %v4880_v51 = vrot.slane %v10824_v23, 7 }
 0x76b   :  { %v12561_v42 = vrot.slane %v12560_v31, 1  ;;  %v10881_v4 = vld [vmem:[%s11774_s3 + $0x28] sm:$0xff]  ;;  %v4884_v31 = vrot.slane %v10842_v60, 5  ;;  %v10893_v59 = vld [vmem:[%s11774_s3 + $0x30] sm:$0xff]  ;;  %v4888_v61 = vrot.slane %v10858_v7, 3  ;;  %v4368_v26 = vrot.slane %v10458_v32, 7 }
 0x76c   :  { %12563 = vst [vmem:[#allocation33_spill] sm:$0xff] %v10881_v4  ;;  %6477 = vmatmul.mubr.msk.f32.gmra.mrb[52].mxu0 %vm64_vm0, %v10881_v4  ;;  %12564 = vst [vmem:[#allocation36_spill] sm:$0xff] %v10893_v59  ;;  %v4369_v37 = vrot.slane %v10458_v32, 1  ;;  %v4371_v60 = vrot.slane %v10458_v32, 3  ;;  %v12566_v7 = vld [vmem:[#allocation51_spill] sm:$0xff] }
 0x76d   :  { %v10872_v25 = vsel %vm63_vm1, %v10454_v55, %v12561_v42  ;;  %v4882_v55 = vrot.slane %v10838_v17, 6  ;;  %v4886_v42 = vrot.slane %v10846_v11, 4  ;;  %6479 = vmatprep.mubr.msk.f32.mxu0 %vm64_vm0, %v10893_v59  ;;  %v4370_v11 = vrot.slane %v10458_v32, 2 }
 0x76e   :  { %12562 = vst [vmem:[#allocation20_spill] sm:$0xff] %v10872_v25  ;;  %v4879_v12 = vsel %vm601_vm3, %v10872_v25, %v4878_v3  ;;  %v4367_v3 = vrot.slane %v10458_v32, 6  ;;  %v4372_v59 = vrot.slane %v10458_v32, 4  ;;  %v4403_v23 = vrot.slane %v12566_v7, 1  ;;  %v10932_v7 = vld [vmem:[%s11774_s3 + $0x40] sm:$0xff] }
 0x76f   :  { %v4881_v35 = vsel %vm604_vm4, %v4880_v51, %v4879_v12  ;;  %v4373_v51 = vrot.slane %v10458_v32, 5  ;;  %12570 = vst [vmem:[#allocation50_spill] sm:$0xff] %v10932_v7 }
 0x770   :  { %v4883_v4 = vsel %vm607_vm5, %v4882_v55, %v4881_v35  ;;  %v10910_v12 = vsel %vm63_vm1, %v4367_v3, %v4397_v49  ;;  %v10916_v55 = vld [vmem:[%s11774_s3 + $0x38] sm:$0xff]  ;;  %v10927_v49 = vsel %vm63_vm1, %v4369_v37, %v4399_v63  ;;  %v10949_v37 = vsel %vm63_vm1, %v4372_v59, %v4402_v52  ;;  %v10978_v59 = vld [vmem:[%s11774_s3 + $0x50] sm:$0xff] }
 0x771   :  { %v4885_v17 = vsel %vm610_vm6, %v4884_v31, %v4883_v4  ;;  %12565 = vst [vmem:[#allocation17_spill] sm:$0xff] %v10910_v12  ;;  %12567 = vst [vmem:[#allocation38_spill] sm:$0xff] %v10916_v55  ;;  %6480 = vmatmul.mubr.msk.f32.gmra.mrb[54].mxu0 %vm64_vm0, %v10916_v55  ;;  %v10923_v31 = vsel %vm63_vm1, %v4368_v26, %v4398_v38  ;;  %v10945_v26 = vsel %vm63_vm1, %v4371_v60, %v4401_v54  ;;  %v12576_v60 = vld [vmem:[#allocation60_spill] sm:$0xff] }
 0x772   :  { %v4887_v4 = vsel %vm613_vm7, %v4886_v42, %v4885_v17  ;;  %12568 = vst [vmem:[#allocation28_spill] sm:$0xff] %v10923_v31  ;;  %12569 = vst [vmem:[#allocation30_spill] sm:$0xff] %v10927_v49  ;;  %6482 = vmatprep.mubr.msk.f32.mxu0 %vm64_vm0, %v10932_v7  ;;  %v10941_v17 = vsel %vm63_vm1, %v4370_v11, %v4400_v46  ;;  %v10953_v38 = vsel %vm63_vm1, %v4373_v51, %v4403_v23  ;;  %v10960_v11 = vld [vmem:[%s11774_s3 + $0x48] sm:$0xff] }
 0x773   :  { %v10937_v35 = vsel %vm616_vm8, %v4888_v61, %v4887_v4  ;;  %12571 = vst [vmem:[#allocation55_spill] sm:$0xff] %v10941_v17  ;;  %12572 = vst [vmem:[#allocation48_spill] sm:$0xff] %v10945_v26  ;;  %v4862_v63 = vrot.slane %v10910_v12, 2  ;;  %v12032_v42 = vrot.slane %v10923_v31, 1  ;;  %v12577_v46 = vrot.slane %v12576_v60, 1  ;;  %v10992_v60 = vld [vmem:[%s11774_s3 + $0x58] sm:$0xff] }
 0x774   :  { %12573 = vst [vmem:[#allocation49_spill] sm:$0xff] %v10949_v37  ;;  %12574 = vst [vmem:[#allocation53_spill] sm:$0xff] %v10953_v38  ;;  %v4866_v54 = vrot.slane %v10927_v49, 7  ;;  %v4870_v51 = vrot.slane %v10945_v26, 5  ;;  %v4685_v49 = vld [vmem:[#allocation2 + $0x1a0] sm:$0xff] }
 0x775   :  { %12575 = vst [vmem:[#allocation34_spill] sm:$0xff] %v10960_v11  ;;  %6483 = vmatmul.mubr.msk.f32.gmra.mrb[56].mxu0 %vm64_vm0, %v10960_v11  ;;  %v10969_v52 = vsel %vm63_vm1, %v10458_v32, %v12577_v46  ;;  %v4864_v23 = vsel %vm598_vm2, %v12032_v42, %v4862_v63  ;;  %12579 = vst [vmem:[#allocation59_spill] sm:$0xff] %v10978_v59  ;;  %v4868_v32 = vrot.slane %v10941_v17, 6  ;;  %v4872_v63 = vrot.slane %v10949_v37, 4 }
 0x776   :  { %12578 = vst [vmem:[#allocation54_spill] sm:$0xff] %v10969_v52  ;;  %6485 = vmatprep.mubr.msk.f32.mxu0 %vm64_vm0, %v10978_v59  ;;  %v4865_v61 = vsel %vm601_vm3, %v10969_v52, %v4864_v23  ;;  %12580 = vst [vmem:[#allocation58_spill] sm:$0xff] %v10992_v60  ;;  %v4874_v23 = vrot.slane %v10953_v38, 3  ;;  %v4683_v59 = vld [vmem:[#allocation2 + $0x190] sm:$0xff] }
 0x777   :  { %v4867_v3 = vsel %vm604_vm4, %v4866_v54, %v4865_v61  ;;  %v11001_v54 = vld [vmem:[%s11774_s3 + $0x60] sm:$0xff] }
 0x778   :  { %v4869_v4 = vsel %vm607_vm5, %v4868_v32, %v4867_v3  ;;  %12581 = vst [vmem:[#allocation45_spill] sm:$0xff] %v11001_v54  ;;  %v11012_v3 = vld [vmem:[%s11774_s3 + $0x68] sm:$0xff] }
 0x779   :  { %6486 = vmatmul.mubr.msk.f32.gmra.mrb[58].mxu0 %vm64_vm0, %v10992_v60  ;;  %v4871_v46 = vsel %vm610_vm6, %v4870_v51, %v4869_v4  ;;  %12582 = vst [vmem:[#allocation61_spill] sm:$0xff] %v11012_v3  ;;  %v11019_v51 = vld [vmem:[%s11774_s3 + $0x70] sm:$0xff]  ;;  %v11026_v4 = vld [vmem:[%s11774_s3 + $0x78] sm:$0xff]  ;;  %s7200_s3 = smov [#allocation7]  }
 0x77a   :  { %6488 = vmatprep.mubr.msk.f32.mxu0 %vm64_vm0, %v11001_v54  ;;  %v4873_v61 = vsel %vm613_vm7, %v4872_v63, %v4871_v46  ;;  %12583 = vst [vmem:[#allocation31_spill] sm:$0xff] %v11019_v51  ;;  %12584 = vst [vmem:[#allocation37_spill] sm:$0xff] %v11026_v4  ;;  %v4682_v63 = vld [vmem:[#allocation2 + $0x188] sm:$0xff]  ;;  %v4681_v46 = vld [vmem:[#allocation2 + $0x180] sm:$0xff]  ;;  %s5886_s9 = sshll.u32 %s7200_s3, 4  ;;  %s5887_s9 = int_to_ptr.vmem [resolvable:$true] %s5886_s9 }
 0x77b   :  { %v11007_v32 = vsel %vm616_vm8, %v4874_v23, %v4873_v61  ;;  %v4684_v54 = vld [vmem:[#allocation2 + $0x198] sm:$0xff]  ;;  %s7167_s10 = scalar_lea.vmem %s5887_s9, 512  ;;  %p7172_p3 = scmp.lt.s32.totalorder %s5887_s9, %s5887_s9 }
 0x77c   :  { %p7168_p2 = scmp.ne.s32.totalorder %s5887_s9, %s7167_s10  ;;  %p7173_p4 = scmp.lt.s32.totalorder %s7167_s10, %s7167_s10 }
 0x77d   :  { %6489 = vmatmul.mubr.msk.f32.gmra.mrb[60].mxu0 %vm64_vm0, %v11012_v3 }
 0x77e   :  { %6491 = vmatprep.mubr.msk.f32.mxu0 %vm64_vm0, %v11019_v51  ;;  %p7174_p5 = por %p7173_p4, %p7172_p3 }
 0x780   :  { %p7175_p6 = pnand %p7174_p5, %p7168_p2 }
 0x781   :  { %6492 = vmatmul.mubr.msk.f32.gmra.mrb[62].mxu0 %vm64_vm0, %v11026_v4  ;;  %v4686_v4 = vld [vmem:[#allocation2 + $0x1a8] sm:$0xff] }
 0x835   :  { %v6472_v23 = vpop.f32.mrb[48].mxu0 }
 0x836   :  { %v4690_v61 = vadd.f32 %v6472_v23, %v4682_v63  ;;  %v4601_v42 = vpop.f32.mrb[49].mxu0  ;;  %v4688_v63 = vld [vmem:[#allocation2 + $0x1b8] sm:$0xff]  ;;  %v4687_v23 = vld [vmem:[#allocation2 + $0x1b0] sm:$0xff] }
 0x837   :  { %v4689_v3 = vadd.f32 %v4681_v46, %v4601_v42 }
 0x838   :  { %v6084_v60 = vmul.f32 -1.442695, %v4690_v61 }
 0x839   :  { %v6083_v11 = vmul.f32 -1.442695, %v4689_v3  ;;  %v6475_v7 = vpop.f32.mrb[50].mxu0 }
 0x83a   :  { %6972 = vpow2.f32 %v6084_v60  ;;  %v4692_v51 = vadd.f32 %v6475_v7, %v4684_v54  ;;  %v4611_v55 = vpop.f32.mrb[51].mxu0  ;;  %v4699_v7 = vld [vmem:[#allocation5 + $0x48] sm:$0xff] }
 0x83b   :  { %6974 = vpow2.f32 %v6083_v11  ;;  %v4691_v31 = vadd.f32 %v4683_v59, %v4611_v55 }
 0x83c   :  { %v6086_v38 = vmul.f32 -1.442695, %v4692_v51 }
 0x83d   :  { %v6085_v37 = vmul.f32 -1.442695, %v4691_v31 }
 0x83e   :  { %6976 = vpow2.f32 %v6086_v38  ;;  %v4698_v38 = vld [vmem:[#allocation5 + $0x40] sm:$0xff] }
 0x83f   :  { %v6478_v26 = vpop.f32.mrb[52].mxu0  ;;  %6978 = vpow2.f32 %v6085_v37 }
 0x840   :  { %v4621_v17 = vpop.f32.mrb[53].mxu0  ;;  %v4694_v46 = vadd.f32 %v6478_v26, %v4686_v4 }
 0x841   :  { %v4693_v55 = vadd.f32 %v4685_v49, %v4621_v17  ;;  %v12585_v49 = vld [vmem:[#allocation25_spill] sm:$0xff] }
 0x842   :  { %6980 = vtanh.f32 %v4694_v46 }
 0x843   :  { %6982 = vtanh.f32 %v4693_v55 }
 0x844   :  { %v6481_v59 = vpop.f32.mrb[54].mxu0  ;;  %v6973_v3 = vpop.eup %6972 }
 0x845   :  { %v4696_v37 = vadd.f32 %v6481_v59, %v4688_v63  ;;  %v4631_v54 = vpop.f32.mrb[55].mxu0  ;;  %v6975_v11 = vpop.eup %6974  ;;  %v4721_v59 = vadd.f32 1.0, %v6973_v3 }
 0x846   :  { %v4695_v61 = vadd.f32 %v4687_v23, %v4631_v54  ;;  %v4720_v4 = vadd.f32 1.0, %v6975_v11 }
 0x847   :  { %v6088_v31 = vmul.f32 -1.442695, %v4696_v37  ;;  %v4701_v37 = vld [vmem:[#allocation5 + $0x58] sm:$0xff] }
 0x848   :  { %v6087_v51 = vmul.f32 -1.442695, %v4695_v61  ;;  %v6484_v60 = vpop.f32.mrb[56].mxu0  ;;  %v6977_v42 = vpop.eup %6976  ;;  %v4700_v61 = vld [vmem:[#allocation5 + $0x50] sm:$0xff] }
 0x849   :  { %6984 = vpow2.f32 %v6088_v31  ;;  %v4707_v23 = vadd.f32 %v6484_v60, %v4699_v7  ;;  %v4641_v54 = vpop.f32.mrb[57].mxu0  ;;  %v6979_v26 = vpop.eup %6978  ;;  %v4733_v7 = vadd.f32 1.0, %v6977_v42 }
 0x84a   :  { %6986 = vrcp.f32 %v4721_v59  ;;  %v4706_v46 = vadd.f32 %v4698_v38, %v4641_v54  ;;  %v4732_v59 = vadd.f32 1.0, %v6979_v26 }
 0x84b   :  { %6988 = vrcp.f32 %v4720_v4  ;;  %v6090_v55 = vmul.f32 -1.442695, %v4707_v23 }
 0x84c   :  { %6990 = vpow2.f32 %v6087_v51  ;;  %v6089_v31 = vmul.f32 -1.442695, %v4706_v46  ;;  %v6487_v60 = vpop.f32.mrb[58].mxu0  ;;  %v4703_v51 = vld [vmem:[#allocation5 + $0x68] sm:$0xff]  ;;  %v6981_v63 = vpop.eup %6980 }
 0x84d   :  { %6992 = vpow2.f32 %v6090_v55  ;;  %v4709_v38 = vadd.f32 %v6487_v60, %v4701_v37  ;;  %v4651_v54 = vpop.f32.mrb[59].mxu0  ;;  %v4702_v60 = vld [vmem:[#allocation5 + $0x60] sm:$0xff] }
 0x84e   :  { %6994 = vrcp.f32 %v4733_v7  ;;  %v4708_v4 = vadd.f32 %v4700_v61, %v4651_v54 }
 0x84f   :  { %6996 = vrcp.f32 %v4732_v59  ;;  %v6092_v42 = vmul.f32 -1.442695, %v4709_v38  ;;  %v6983_v59 = vpop.eup %6982  ;;  %v12593_v38 = vld [vmem:[#allocation16_spill] sm:$0xff] }
 0x850   :  { %6998 = vpow2.f32 %v6089_v31  ;;  %v6091_v37 = vmul.f32 -1.442695, %v4708_v4  ;;  %v6490_v55 = vpop.f32.mrb[60].mxu0  ;;  %v4705_v31 = vld [vmem:[#allocation5 + $0x78] sm:$0xff] }
 0x851   :  { %7000 = vpow2.f32 %v6092_v42  ;;  %v4661_v54 = vpop.f32.mrb[61].mxu0  ;;  %v4711_v26 = vadd.f32 %v6490_v55, %v4703_v51 }
 0x852   :  { %7002 = vpow2.f32 %v6091_v37  ;;  %v4710_v61 = vadd.f32 %v4702_v60, %v4661_v54  ;;  %v12589_v60 = vld [vmem:[#allocation15_spill] sm:$0xff] }
 0x853   :  { %v6985_v4 = vpop.eup %6984  ;;  %7004 = vtanh.f32 %v4711_v26  ;;  %v12590_v26 = vld [vmem:[#allocation27_spill] sm:$0xff] }
 0x854   :  { %v6987_v7 = vpop.eup %6986  ;;  %v4747_v46 = vadd.f32 1.0, %v6985_v4  ;;  %v6493_v37 = vpop.f32.mrb[62].mxu0  ;;  %7006 = vtanh.f32 %v4710_v61  ;;  %v12592_v61 = vld [vmem:[#allocation23_spill] sm:$0xff] }
 0x855   :  { %v6989_v51 = vpop.eup %6988  ;;  %v4801_v11 = vmul.f32 %v6987_v7, %v6981_v63  ;;  %v4713_v0 = vadd.f32 %v6493_v37, %v4705_v31  ;;  %v4671_v17 = vpop.f32.mrb[63].mxu0  ;;  %v12588_v31 = vld [vmem:[#allocation14_spill] sm:$0xff] }
 0x856   :  { %v6991_v3 = vpop.eup %6990  ;;  %v4800_v54 = vmul.f32 %v6989_v51, %v6983_v59  ;;  %v4712_v42 = vadd.f32 %v4704_v22, %v4671_v17  ;;  %7008 = vrcp.f32 %v4747_v46  ;;  %v12595_v22 = vld [vmem:[#allocation56_spill] sm:$0xff] }
 0x857   :  { %v6993_v10 = vpop.eup %6992  ;;  %v4746_v45 = vadd.f32 1.0, %v6991_v3  ;;  %v6094_v4 = vmul.f32 -1.442695, %v4713_v0  ;;  %v12591_v3 = vld [vmem:[#allocation32_spill] sm:$0xff]  ;;  %v5019_v59 = vrot.slane %v12595_v22, 7 }
 0x858   :  { %v6995_v40 = vpop.eup %6994  ;;  %v4815_v55 = vadd.f32 1.0, %v6993_v10  ;;  %v6093_v63 = vmul.f32 -1.442695, %v4712_v42  ;;  %v12594_v42 = vld [vmem:[#allocation35_spill] sm:$0xff] }
 0x859   :  { %v6997_v7 = vpop.eup %6996  ;;  %v4799_v37 = vmul.f32 %v6995_v40, %v12588_v31  ;;  %7010 = vrcp.f32 %v4746_v45 }
 0x85a   :  { %v6999_v17 = vpop.eup %6998  ;;  %v4798_v51 = vmul.f32 %v6997_v7, %v12591_v3  ;;  %7012 = vrcp.f32 %v4815_v55 }
 0x85b   :  { %v7001_v10 = vpop.eup %7000  ;;  %v4803_v9 = vadd.f32 %v4801_v11, %v4799_v37  ;;  %v4814_v23 = vadd.f32 1.0, %v6999_v17  ;;  %7014 = vpow2.f32 %v6094_v4 }
 0x85c   :  { %v7003_v40 = vpop.eup %7002  ;;  %v11079_v45 = vadd.f32 %v4800_v54, %v4798_v51  ;;  %v4827_v31 = vadd.f32 1.0, %v7001_v10  ;;  %7016 = vpow2.f32 %v6093_v63  ;;  %v12597_v63 = vrot.slane %v10392_v62, 7 }
 0x85d   :  { %7018 = vtanh.f32 %v4803_v9  ;;  %v4826_v7 = vadd.f32 1.0, %v7003_v40  ;;  %v4989_v55 = vrot.slane %v4803_v9, 2  ;;  %v4990_v3 = vrot.slane %v4803_v9, 3  ;;  %v7005_v4 = vpop.eup %7004 }
 0x85e   :  { %7020 = vtanh.f32 %v11079_v45  ;;  %v4991_v46 = vrot.slane %v4803_v9, 4  ;;  %v4992_v0 = vrot.slane %v4803_v9, 5  ;;  %v4993_v11 = vrot.slane %v4803_v9, 6  ;;  %v7007_v40 = vpop.eup %7006 }
 0x85f   :  { %7022 = vrcp.f32 %v4814_v23  ;;  %v4994_v37 = vrot.slane %v4803_v9, 7  ;;  %v4995_v17 = vrot.slane %v4803_v9, 1  ;;  %v11085_v54 = vsel %vm63_vm1, %v4989_v55, %v5019_v59 }
 0x860   :  { %12596 = vst [vmem:[#allocation24_spill] sm:$0xff] %v11085_v54  ;;  %7024 = vrcp.f32 %v4827_v31  ;;  %v11091_v22 = vsel %vm63_vm1, %v4990_v3, %v12597_v63  ;;  %v12599_v51 = vrot.slane %v10396_v18, 7  ;;  %v12601_v23 = vrot.slane %v10400_v34, 7  ;;  %v7009_v34 = vpop.eup %7008 }
 0x861   :  { %12598 = vst [vmem:[#allocation51_spill] sm:$0xff] %v11091_v22  ;;  %7026 = vrcp.f32 %v4826_v7  ;;  %v12603_v31 = vrot.slane %v10405_v33, 7  ;;  %v12605_v18 = vrot.slane %v10437_v6, 7  ;;  %v5528_v3 = vrot.slane %v11085_v54, 6 }
 0x862   :  { %v11097_v10 = vsel %vm63_vm1, %v4991_v46, %v12599_v51  ;;  %v11103_v59 = vsel %vm63_vm1, %v4992_v0, %v12601_v23  ;;  %v12607_v0 = vrot.slane %v10413_v41, 7  ;;  %v5529_v33 = vrot.slane %v11091_v22, 5  ;;  %v12608_v51 = vld [vmem:[#allocation41_spill] sm:$0xff] }
 0x863   :  { %12600 = vst [vmem:[#allocation60_spill] sm:$0xff] %v11097_v10  ;;  %12602 = vst [vmem:[#allocation25_spill] sm:$0xff] %v11103_v59  ;;  %v11110_v55 = vsel %vm63_vm1, %v4993_v11, %v12603_v31  ;;  %v11116_v46 = vsel %vm63_vm1, %v4994_v37, %v12605_v18  ;;  %v5531_v11 = vrot.slane %v11097_v10, 4  ;;  %v7011_v63 = vpop.eup %7010  ;;  %v12609_v23 = vrot.slane %v12608_v51, 7  ;;  %v12611_v31 = vld [vmem:[#allocation40_spill] sm:$0xff] }
 0x864   :  { %12604 = vst [vmem:[#allocation14_spill] sm:$0xff] %v11110_v55  ;;  %12606 = vst [vmem:[#allocation15_spill] sm:$0xff] %v11116_v46  ;;  %v11122_v7 = vsel %vm63_vm1, %v4995_v17, %v12607_v0  ;;  %v5533_v41 = vrot.slane %v11103_v59, 3  ;;  %v5012_v17 = vrot.slane %v12611_v31, 7  ;;  %v7013_v18 = vpop.eup %7012  ;;  %v5530_v0 = vsel %vm598_vm2, %v5529_v33, %v5528_v3 }
 0x865   :  { %v11132_v37 = vsel %vm63_vm1, %v4803_v9, %v12609_v23  ;;  %v5535_v62 = vrot.slane %v11110_v55, 2  ;;  %v4982_v25 = vrot.slane %v11079_v45, 2  ;;  %v4983_v10 = vrot.slane %v11079_v45, 3  ;;  %v7015_v6 = vpop.eup %7014 }
 0x866   :  { %12610 = vst [vmem:[#allocation27_spill] sm:$0xff] %v11132_v37  ;;  %v4895_v22 = vmul.f32 %v7013_v18, %v7005_v4  ;;  %v5532_v51 = vsel %vm601_vm3, %v5531_v11, %v5530_v0  ;;  %v5537_v9 = vrot.slane %v11116_v46, 1  ;;  %v4984_v23 = vrot.slane %v11079_v45, 4  ;;  %v7017_v59 = vpop.eup %7016 }
 0x867   :  { %v4841_v54 = vadd.f32 1.0, %v7015_v6  ;;  %v5534_v31 = vsel %vm604_vm4, %v5533_v41, %v5532_v51  ;;  %v7019_v55 = vpop.eup %7018  ;;  %v4840_v52 = vadd.f32 1.0, %v7017_v59  ;;  %v11150_v11 = vsel %vm63_vm1, %v4982_v25, %v5012_v17 }
 0x868   :  { %v5536_v12 = vsel %vm607_vm5, %v5535_v62, %v5534_v31  ;;  %v7021_v18 = vpop.eup %7020  ;;  %v4807_v0 = vmul.f32 %v7019_v55, %v7009_v34  ;;  %v12612_v41 = vrot.slane %v10741_v58, 7  ;;  %v12613_v25 = vrot.slane %v10746_v29, 7 }
 0x869   :  { %7028 = vrcp.f32 %v4841_v54  ;;  %v5538_v6 = vsel %vm610_vm6, %v5537_v9, %v5536_v12  ;;  %v7023_v59 = vpop.eup %7022  ;;  %v4806_v33 = vmul.f32 %v7021_v18, %v7011_v63 }
 0x86a   :  { %v11157_v51 = vsel %vm63_vm1, %v4983_v10, %v12612_v41  ;;  %7030 = vrcp.f32 %v4840_v52  ;;  %v5539_v62 = vsel %vm613_vm7, %v11132_v37, %v5538_v6  ;;  %v11165_v55 = vsel %vm63_vm1, %v4984_v23, %v12613_v25  ;;  %v7025_v54 = vpop.eup %7024 }
 0x86b   :  { %v4894_v12 = vmul.f32 %v7023_v59, %v7007_v40  ;;  %v4911_v34 = vrot.slane %v4807_v0, 2  ;;  %v4912_v58 = vrot.slane %v4807_v0, 3  ;;  %v4913_v17 = vrot.slane %v4807_v0, 4  ;;  %v7027_v9 = vpop.eup %7026 }
 0x86c   :  { %v4893_v10 = vmul.f32 %v7025_v54, %v10937_v35  ;;  %v4904_v31 = vrot.slane %v4806_v33, 2  ;;  %v4905_v63 = vrot.slane %v4806_v33, 3  ;;  %v4906_v52 = vrot.slane %v4806_v33, 4 }
 0x86d   :  { %v4892_v18 = vmul.f32 %v7027_v9, %v11007_v32  ;;  %v4907_v6 = vrot.slane %v4806_v33, 5  ;;  %v4908_v41 = vrot.slane %v4806_v33, 6  ;;  %v4909_v29 = vrot.slane %v4806_v33, 7 }
 0x86e   :  { %v11169_v4 = vadd.f32 %v4895_v22, %v4893_v10  ;;  %v4910_v23 = vrot.slane %v4806_v33, 1  ;;  %v4914_v25 = vrot.slane %v4807_v0, 5  ;;  %v4915_v3 = vrot.slane %v4807_v0, 6 }
 0x86f   :  { %v11171_v40 = vadd.f32 %v4894_v12, %v4892_v18  ;;  %v4916_v59 = vrot.slane %v4807_v0, 7  ;;  %v4917_v46 = vrot.slane %v4807_v0, 1  ;;  %v12614_v37 = vrot.slane %v10466_v14, 7 }
 0x870   :  { %7032 = vtanh.f32 %v11169_v4  ;;  %v12615_v32 = vrot.slane %v10473_v8, 7  ;;  %v12616_v54 = vrot.slane %v10477_v1, 7  ;;  %v12617_v9 = vrot.slane %v10481_v21, 7 }
 0x871   :  { %v4964_v35 = vsel %vm63_vm1, %v4904_v31, %v12614_v37  ;;  %7034 = vtanh.f32 %v11171_v40  ;;  %v12618_v37 = vrot.slane %v10487_v16, 7  ;;  %v12619_v10 = vrot.slane %v10545_v53, 7 }
 0x872   :  { %v4965_v22 = vsel %vm63_vm1, %v4905_v63, %v12615_v32  ;;  %v4966_v12 = vsel %vm63_vm1, %v4906_v52, %v12616_v54  ;;  %v4967_v14 = vsel %vm63_vm1, %v4907_v6, %v12617_v9  ;;  %v4987_v31 = vrot.slane %v11079_v45, 7 }
 0x873   :  { %v4968_v8 = vsel %vm63_vm1, %v4908_v41, %v12618_v37  ;;  %v4969_v1 = vsel %vm63_vm1, %v4909_v29, %v12619_v10  ;;  %v12620_v63 = vrot.slane %v10495_v27, 7  ;;  %v12621_v52 = vrot.slane %v10499_v57, 7  ;;  %v7029_v29 = vpop.eup %7028 }
 0x874   :  { %v12622_v18 = vrot.slane %v10503_v36, 7  ;;  %v12623_v6 = vrot.slane %v10507_v5, 7  ;;  %v12624_v27 = vrot.slane %v10512_v43, 7  ;;  %v12625_v57 = vrot.slane %v10516_v2, 7  ;;  %v7031_v32 = vpop.eup %7030  ;;  %v12628_v2 = vld [vmem:[#allocation39_spill] sm:$0xff] }
 0x875   :  { %v4971_v21 = vsel %vm63_vm1, %v4910_v23, %v12620_v63  ;;  %v4972_v16 = vsel %vm63_vm1, %v4911_v34, %v12621_v52  ;;  %v12626_v36 = vrot.slane %v10559_v50, 7  ;;  %v4988_v5 = vrot.slane %v11079_v45, 1  ;;  %v12630_v50 = vld [vmem:[#allocation11_spill] sm:$0xff] }
 0x876   :  { %v4973_v53 = vsel %vm63_vm1, %v4912_v58, %v12622_v18  ;;  %v4974_v41 = vsel %vm63_vm1, %v4913_v17, %v12623_v6  ;;  %v4975_v23 = vsel %vm63_vm1, %v4914_v25, %v12624_v27  ;;  %v4976_v34 = vsel %vm63_vm1, %v4915_v3, %v12625_v57 }
 0x877   :  { %v4977_v58 = vsel %vm63_vm1, %v4916_v59, %v12626_v36  ;;  %v12627_v17 = vrot.slane %v12585_v49, 7  ;;  %v5230_v54 = vrot.slane %v4964_v35, 6  ;;  %v5231_v25 = vrot.slane %v4965_v22, 5 }
 0x878   :  { %v5233_v9 = vrot.slane %v4966_v12, 4  ;;  %v12629_v37 = vrot.slane %v12628_v2, 7  ;;  %v12631_v10 = vrot.slane %v12630_v50, 7  ;;  %v5235_v63 = vrot.slane %v4967_v14, 3 }
 0x879   :  { %v4979_v43 = vsel %vm63_vm1, %v4917_v46, %v12627_v17  ;;  %v5237_v52 = vrot.slane %v4968_v8, 2  ;;  %v5232_v49 = vsel %vm598_vm2, %v5231_v25, %v5230_v54  ;;  %v5244_v18 = vrot.slane %v4972_v16, 6 }
 0x87a   :  { %v4970_v3 = vsel %vm63_vm1, %v4806_v33, %v12629_v37  ;;  %v4978_v59 = vsel %vm63_vm1, %v4807_v0, %v12631_v10  ;;  %v5245_v6 = vrot.slane %v4973_v53, 5  ;;  %v5247_v46 = vrot.slane %v4974_v41, 4 }
 0x87b   :  { %v5234_v35 = vsel %vm601_vm3, %v5233_v9, %v5232_v49  ;;  %v5239_v22 = vrot.slane %v4969_v1, 1  ;;  %v5242_v12 = vrot.slane %v4971_v21, 7  ;;  %v5249_v27 = vrot.slane %v4975_v23, 3  ;;  %v7033_v23 = vpop.eup %7032 }
 0x87c   :  { %v5236_v57 = vsel %vm604_vm4, %v5235_v63, %v5234_v35  ;;  %v5246_v33 = vsel %vm598_vm2, %v5245_v6, %v5244_v18  ;;  %v5251_v36 = vrot.slane %v4976_v34, 2  ;;  %v12632_v17 = vrot.slane %v11122_v7, 7  ;;  %v7035_v2 = vpop.eup %7034 }
 0x87d   :  { %v5238_v14 = vsel %vm607_vm5, %v5237_v52, %v5236_v57  ;;  %v5248_v8 = vsel %vm601_vm3, %v5247_v46, %v5246_v33  ;;  %v12633_v16 = vrot.slane %v10750_v39, 7  ;;  %v12634_v1 = vrot.slane %v11079_v45, 5 }
 0x87e   :  { %v11248_v0 = vsel %vm616_vm8, %v12632_v17, %v5539_v62  ;;  %v12635_v53 = vrot.slane %v10754_v30, 7  ;;  %v12636_v41 = vrot.slane %v11079_v45, 6  ;;  %v5240_v34 = vsel %vm610_vm6, %v5239_v22, %v5238_v14 }
 0x87f   :  { %v11258_v21 = vsel %vm63_vm1, %v12634_v1, %v12633_v16  ;;  %v5250_v54 = vsel %vm604_vm4, %v5249_v27, %v5248_v8  ;;  %v5253_v39 = vrot.slane %v4977_v58, 1  ;;  %v12637_v25 = vrot.slane %v10779_v44, 7 }
 0x880   :  { %v11266_v62 = vsel %vm63_vm1, %v12636_v41, %v12635_v53  ;;  %v4901_v30 = vmul.f32 %v7033_v23, %v7029_v29  ;;  %v5241_v37 = vsel %vm613_vm7, %v4970_v3, %v5240_v34  ;;  %v5252_v50 = vsel %vm607_vm5, %v5251_v36, %v5250_v54  ;;  %v12644_v34 = vld [vmem:[#allocation12_spill] sm:$0xff] }
 0x881   :  { %v11274_v9 = vsel %vm63_vm1, %v4987_v31, %v12637_v25  ;;  %v12638_v10 = vrot.slane %v10762_v15, 7  ;;  %v4900_v52 = vmul.f32 %v7035_v2, %v7031_v32  ;;  %v5243_v58 = vsel %vm616_vm8, %v5242_v12, %v5241_v37  ;;  %v12646_v25 = vld [vmem:[#allocation42_spill] sm:$0xff] }
 0x882   :  { %v5254_v44 = vsel %vm610_vm6, %v5253_v39, %v5252_v50  ;;  %v5256_v49 = vrot.slane %v4979_v43, 7  ;;  %v5067_v18 = vrot.slane %v4901_v30, 7  ;;  %v5068_v29 = vrot.slane %v4901_v30, 1  ;;  %v12649_v50 = vld [vmem:[#allocation22_spill] sm:$0xff] }
 0x883   :  { %v11282_v63 = vsel %vm63_vm1, %v4988_v5, %v12638_v10  ;;  %v5255_v31 = vsel %vm613_vm7, %v4978_v59, %v5254_v44  ;;  %v5069_v6 = vrot.slane %v4901_v30, 2  ;;  %v5060_v46 = vrot.slane %v4900_v52, 7 }
 0x884   :  { %v5257_v3 = vsel %vm616_vm8, %v5256_v49, %v5255_v31  ;;  %v5061_v35 = vrot.slane %v4900_v52, 1  ;;  %v5062_v15 = vrot.slane %v4900_v52, 2  ;;  %v5063_v27 = vrot.slane %v4900_v52, 3 }
 0x885   :  { %v6574_v22 = vpack.c.bf16 %v5257_v3, %v5243_v58  ;;  %v5064_v5 = vrot.slane %v4900_v52, 4  ;;  %v5065_v57 = vrot.slane %v4900_v52, 5  ;;  %v5066_v32 = vrot.slane %v4900_v52, 6  ;;  %v12651_v58 = vld [vmem:[#allocation13_spill] sm:$0xff] }
 0x886   :  { %v5070_v33 = vrot.slane %v4901_v30, 3  ;;  %v5071_v12 = vrot.slane %v4901_v30, 4  ;;  %v5072_v36 = vrot.slane %v4901_v30, 5  ;;  %v5073_v43 = vrot.slane %v4901_v30, 6  ;;  %v12654_v3 = vld [vmem:[#allocation57_spill] sm:$0xff] }
 0x887   :  { %6575 = vmatprep.subr.bf16.mxu1 %v6574_v22  ;;  %v12639_v59 = vrot.slane %v10599_v19, 1  ;;  %v12640_v14 = vrot.slane %v10676_v47, 1  ;;  %v5514_v16 = vrot.slane %v11150_v11, 6  ;;  %v12641_v1 = vrot.slane %v10611_v28, 1 }
 0x888   :  { %6577 = vmatpush3.bf16.msra.mxu1 %v6574_v22  ;;  %v12642_v41 = vrot.slane %v10617_v48, 1  ;;  %v12643_v23 = vrot.slane %v10623_v56, 1  ;;  %v12645_v54 = vrot.slane %v12644_v34, 1  ;;  %v12647_v28 = vrot.slane %v12646_v25, 1  ;;  %v12658_v22 = vld [vmem:[#allocation44_spill] sm:$0xff] }
 0x889   :  { %v5120_v17 = vsel %vm63_vm1, %v5060_v46, %v12639_v59  ;;  %v5122_v8 = vsel %vm63_vm1, %v5061_v35, %v12640_v14  ;;  %v5123_v53 = vsel %vm63_vm1, %v5062_v15, %v12641_v1  ;;  %v12648_v48 = vrot.slane %v10633_v20, 1  ;;  %v12656_v35 = vld [vmem:[#allocation43_spill] sm:$0xff] }
 0x88a   :  { %v5124_v19 = vsel %vm63_vm1, %v5063_v27, %v12642_v41  ;;  %v5125_v47 = vsel %vm63_vm1, %v5064_v5, %v12643_v23  ;;  %v5126_v39 = vsel %vm63_vm1, %v5065_v57, %v12645_v54  ;;  %v5121_v2 = vsel %vm63_vm1, %v4900_v52, %v12647_v28  ;;  %v12660_v5 = vld [vmem:[#allocation62_spill] sm:$0xff]  ;;  %v12662_v57 = vld [vmem:[#allocation47_spill] sm:$0xff] }
 0x88b   :  { %v5127_v37 = vsel %vm63_vm1, %v5066_v32, %v12648_v48  ;;  %v12650_v56 = vrot.slane %v12649_v50, 1  ;;  %v12652_v44 = vrot.slane %v12651_v58, 1  ;;  %v12653_v31 = vrot.slane %v10646_v13, 1 }
 0x88c   :  { %v12655_v20 = vrot.slane %v12654_v3, 1  ;;  %v12657_v15 = vrot.slane %v12656_v35, 1  ;;  %v12659_v27 = vrot.slane %v12658_v22, 1  ;;  %v12661_v13 = vrot.slane %v12660_v5, 1 }
 0x88d   :  { %v5128_v10 = vsel %vm63_vm1, %v5067_v18, %v12650_v56  ;;  %v5130_v49 = vsel %vm63_vm1, %v5068_v29, %v12652_v44  ;;  %v5131_v52 = vsel %vm63_vm1, %v5069_v6, %v12653_v31  ;;  %v12663_v32 = vrot.slane %v12662_v57, 1 }
 0x88e   :  { %v5132_v46 = vsel %vm63_vm1, %v5070_v33, %v12655_v20  ;;  %v5133_v18 = vsel %vm63_vm1, %v5071_v12, %v12657_v15  ;;  %v5134_v29 = vsel %vm63_vm1, %v5072_v36, %v12659_v27  ;;  %v5129_v6 = vsel %vm63_vm1, %v4901_v30, %v12661_v13  ;;  %v12664_v15 = vld [vmem:[#allocation30_spill] sm:$0xff] }
 0x88f   :  { %v5135_v33 = vsel %vm63_vm1, %v5073_v43, %v12663_v32  ;;  %v5276_v59 = vrot.slane %v5120_v17, 1  ;;  %v5278_v14 = vrot.slane %v5122_v8, 7  ;;  %v5280_v1 = vrot.slane %v5123_v53, 6  ;;  %v12666_v13 = vld [vmem:[#allocation18_spill] sm:$0xff] }
 0x890   :  { %v5282_v41 = vrot.slane %v5124_v19, 5  ;;  %v5284_v12 = vrot.slane %v5125_v47, 4  ;;  %v5286_v23 = vrot.slane %v5126_v39, 3  ;;  %v5288_v54 = vrot.slane %v5127_v37, 2 }
 0x891   :  { %v5277_v34 = vsel %vm598_vm2, %v5121_v2, %v5276_v59  ;;  %v5290_v36 = vrot.slane %v5128_v10, 1  ;;  %v5292_v25 = vrot.slane %v5130_v49, 7  ;;  %v5294_v48 = vrot.slane %v5131_v52, 6  ;;  %v12668_v59 = vld [vmem:[#allocation48_spill] sm:$0xff] }
 0x892   :  { %v5279_v28 = vsel %vm601_vm3, %v5278_v14, %v5277_v34  ;;  %v5296_v30 = vrot.slane %v5132_v46, 5  ;;  %v5298_v50 = vrot.slane %v5133_v18, 4  ;;  %v5300_v17 = vrot.slane %v5134_v29, 3  ;;  %v12665_v18 = vld [vmem:[#allocation55_spill] sm:$0xff] }
 0x893   :  { %v5281_v56 = vsel %vm604_vm4, %v5280_v1, %v5279_v28  ;;  %v5291_v43 = vsel %vm598_vm2, %v5129_v6, %v5290_v36  ;;  %v5515_v8 = vrot.slane %v11157_v51, 5  ;;  %v5302_v47 = vrot.slane %v5135_v33, 2 }
 0x894   :  { %v5283_v53 = vsel %vm607_vm5, %v5282_v41, %v5281_v56  ;;  %v5293_v19 = vsel %vm601_vm3, %v5292_v25, %v5291_v43  ;;  %v5517_v39 = vrot.slane %v11165_v55, 4  ;;  %v5519_v58 = vrot.slane %v11258_v21, 3  ;;  %v12671_v56 = vld [vmem:[#allocation49_spill] sm:$0xff] }
 0x895   :  { %v5285_v2 = vsel %vm610_vm6, %v5284_v12, %v5283_v53  ;;  %v5295_v37 = vsel %vm604_vm4, %v5294_v48, %v5293_v19  ;;  %v5516_v10 = vsel %vm598_vm2, %v5515_v8, %v5514_v16  ;;  %v5521_v52 = vrot.slane %v11266_v62, 2  ;;  %v12669_v48 = vld [vmem:[#allocation29_spill] sm:$0xff] }
 0x896   :  { %v5287_v44 = vsel %vm613_vm7, %v5286_v23, %v5285_v2  ;;  %v5297_v49 = vsel %vm607_vm5, %v5296_v30, %v5295_v37  ;;  %v5518_v31 = vsel %vm601_vm3, %v5517_v39, %v5516_v10  ;;  %v5523_v35 = vrot.slane %v11274_v9, 1 }
 0x897   :  { %v5289_v3 = vsel %vm616_vm8, %v5288_v54, %v5287_v44  ;;  %v5299_v20 = vsel %vm610_vm6, %v5298_v50, %v5297_v49  ;;  %v5520_v46 = vsel %vm604_vm4, %v5519_v58, %v5518_v31  ;;  %v5170_v16 = vrot.slane %v12664_v15, 1  ;;  %v12679_v31 = vld [vmem:[#allocation53_spill] sm:$0xff] }
 0x898   :  { %v5171_v22 = vrot.slane %v12665_v18, 1  ;;  %v5301_v27 = vsel %vm613_vm7, %v5300_v17, %v5299_v20  ;;  %v5522_v29 = vsel %vm607_vm5, %v5521_v52, %v5520_v46  ;;  %v12667_v6 = vrot.slane %v12666_v13, 7  ;;  %v12672_v17 = vld [vmem:[#allocation20_spill] sm:$0xff]  ;;  %v12680_v52 = vld [vmem:[#allocation21_spill] sm:$0xff] }
 0x899   :  { %v5303_v5 = vsel %vm616_vm8, %v5302_v47, %v5301_v27  ;;  %v5524_v32 = vsel %vm610_vm6, %v5523_v35, %v5522_v29  ;;  %v5526_v33 = vrot.slane %v11282_v63, 7  ;;  %v5172_v14 = vrot.slane %v12668_v59, 1 }
 0x89a   :  { %v11383_v57 = vsel %vm63_vm1, %v11079_v45, %v12667_v6  ;;  %v6578_v1 = vpack.c.bf16 %v5303_v5, %v5289_v3  ;;  %v5145_v12 = vrot.slane %v11169_v4, 7  ;;  %v5146_v45 = vrot.slane %v11169_v4, 1 }
 0x89b   :  { %v5525_v41 = vsel %vm613_vm7, %v11383_v57, %v5524_v32  ;;  %v5147_v34 = vrot.slane %v11169_v4, 2  ;;  %v5148_v54 = vrot.slane %v11169_v4, 3  ;;  %v5149_v36 = vrot.slane %v11169_v4, 4 }
 0x89c   :  { %v11394_v23 = vsel %vm616_vm8, %v5526_v33, %v5525_v41  ;;  %6579 = vmatprep.subr.bf16.mxu1 %v6578_v1  ;;  %v5150_v25 = vrot.slane %v11169_v4, 5  ;;  %v5151_v28 = vrot.slane %v11169_v4, 6  ;;  %v12670_v30 = vrot.slane %v12669_v48, 1 }
 0x89d   :  { %v5173_v43 = vrot.slane %v12671_v56, 1  ;;  %6581 = vmatpush3.bf16.msra.mxu1 %v6578_v1  ;;  %v12673_v8 = vrot.slane %v12672_v17, 1  ;;  %v12674_v19 = vrot.slane %v12589_v60, 1  ;;  %v12675_v39 = vrot.slane %v12590_v26, 1 }
 0x89e   :  { %v11406_v50 = vsel %vm63_vm1, %v5145_v12, %v12670_v30  ;;  %v12676_v37 = vrot.slane %v12592_v61, 1  ;;  %v12677_v58 = vrot.slane %v12593_v38, 1  ;;  %v12678_v44 = vrot.slane %v12594_v42, 1  ;;  %v12682_v42 = vld [vmem:[#allocation26_spill] sm:$0xff] }
 0x89f   :  { %v11413_v53 = vsel %vm63_vm1, %v5146_v45, %v12673_v8  ;;  %v11419_v47 = vsel %vm63_vm1, %v5147_v34, %v12674_v19  ;;  %v11425_v2 = vsel %vm63_vm1, %v5148_v54, %v12675_v39  ;;  %v12069_v49 = vrot.slane %v11406_v50, 1  ;;  %v12684_v54 = vld [vmem:[#allocation17_spill] sm:$0xff]  ;;  %v12687_v30 = vld [vmem:[#allocation54_spill] sm:$0xff]  ;;  %v12689_v39 = vld [vmem:[#allocation52_spill] sm:$0xff] }
 0x8a0   :  { %v11431_v10 = vsel %vm63_vm1, %v5149_v36, %v12676_v37  ;;  %v11437_v60 = vsel %vm63_vm1, %v5150_v25, %v12677_v58  ;;  %v11443_v26 = vsel %vm63_vm1, %v5151_v28, %v12678_v44  ;;  %v5174_v61 = vrot.slane %v12679_v31, 1  ;;  %6503 = vmatmul.mubr.msk.f32.vlgmr.msra.gmra.mrb[48].mxu1 %vm64_vm0, %v12682_v42  ;;  %v12686_v28 = vld [vmem:[#allocation19_spill] sm:$0xff]  ;;  %v12693_v42 = vld [vmem:[#allocation36_spill] sm:$0xff] }
 0x8a1   :  { %v12681_v3 = vrot.slane %v12680_v52, 1  ;;  %v5608_v20 = vrot.slane %v11413_v53, 7  ;;  %v5610_v46 = vrot.slane %v11419_v47, 6  ;;  %v5612_v15 = vrot.slane %v11425_v2, 5 }
 0x8a2   :  { %v5614_v18 = vrot.slane %v11431_v10, 4  ;;  %v5616_v27 = vrot.slane %v11437_v60, 3  ;;  %v5138_v5 = vrot.slane %v11171_v40, 7  ;;  %v5139_v13 = vrot.slane %v11171_v40, 1 }
 0x8a3   :  { %v11452_v38 = vsel %vm63_vm1, %v11169_v4, %v12681_v3  ;;  %v12683_v4 = vld [vmem:[#allocation46_spill] sm:$0xff]  ;;  %v5140_v6 = vrot.slane %v11171_v40, 2  ;;  %v5141_v59 = vrot.slane %v11171_v40, 3  ;;  %v5142_v1 = vrot.slane %v11171_v40, 4  ;;  %v12690_v3 = vld [vmem:[#allocation28_spill] sm:$0xff] }
 0x8a4   :  { %v5607_v35 = vsel %vm598_vm2, %v11452_v38, %v12069_v49  ;;  %6505 = vmatprep.mubr.msk.f32.mxu1 %vm64_vm0, %v12683_v4  ;;  %v5143_v41 = vrot.slane %v11171_v40, 5  ;;  %v5618_v45 = vrot.slane %v11443_v26, 2  ;;  %v5144_v34 = vrot.slane %v11171_v40, 6 }
 0x8a5   :  { %v5609_v29 = vsel %vm601_vm3, %v5608_v20, %v5607_v35  ;;  %v12685_v36 = vrot.slane %v12684_v54, 1  ;;  %6506 = vmatmul.mubr.msk.f32.gmra.mrb[50].mxu1 %vm64_vm0, %v12686_v28  ;;  %v12688_v56 = vrot.slane %v12687_v30, 1  ;;  %v11495_v8 = vsel %vm63_vm1, %v5140_v6, %v5170_v16  ;;  %v12695_v6 = vld [vmem:[#allocation50_spill] sm:$0xff]  ;;  %v12701_v54 = vld [vmem:[#allocation31_spill] sm:$0xff]  ;;  %v5449_v28 = vld [vmem:[#allocation2 + $0x1c8] sm:$0xff] }
 0x8a6   :  { %v5611_v32 = vsel %vm604_vm4, %v5610_v46, %v5609_v29  ;;  %v11499_v19 = vsel %vm63_vm1, %v5141_v59, %v5171_v22  ;;  %6508 = vmatprep.mubr.msk.f32.mxu1 %vm64_vm0, %v12689_v39  ;;  %v11506_v58 = vsel %vm63_vm1, %v5142_v1, %v5172_v14  ;;  %v11510_v44 = vsel %vm63_vm1, %v5143_v41, %v5173_v43  ;;  %v12692_v43 = vld [vmem:[#allocation33_spill] sm:$0xff]  ;;  %v12694_v29 = vld [vmem:[#allocation38_spill] sm:$0xff]  ;;  %v12697_v41 = vld [vmem:[#allocation59_spill] sm:$0xff] }
 0x8a7   :  { %v5613_v12 = vsel %vm607_vm5, %v5612_v15, %v5611_v32  ;;  %v11482_v25 = vsel %vm63_vm1, %v5138_v5, %v12685_v36  ;;  %v11491_v17 = vsel %vm63_vm1, %v5139_v13, %v12688_v56  ;;  %v11514_v16 = vsel %vm63_vm1, %v5144_v34, %v5174_v61  ;;  %v12696_v1 = vld [vmem:[#allocation34_spill] sm:$0xff]  ;;  %v12700_v34 = vld [vmem:[#allocation61_spill] sm:$0xff] }
 0x8a8   :  { %v5615_v48 = vsel %vm610_vm6, %v5614_v18, %v5613_v12  ;;  %v12070_v31 = vrot.slane %v11482_v25, 1  ;;  %v5594_v52 = vrot.slane %v11491_v17, 7  ;;  %v12691_v20 = vrot.slane %v12690_v3, 1  ;;  %v12698_v12 = vld [vmem:[#allocation58_spill] sm:$0xff]  ;;  %v12702_v36 = vld [vmem:[#allocation37_spill] sm:$0xff] }
 0x8a9   :  { %v5617_v37 = vsel %vm613_vm7, %v5616_v27, %v5615_v48  ;;  %6509 = vmatmul.mubr.msk.f32.gmra.mrb[52].mxu1 %vm64_vm0, %v12692_v43  ;;  %v5596_v46 = vrot.slane %v11495_v8, 6  ;;  %v5598_v15 = vrot.slane %v11499_v19, 5  ;;  %v5600_v18 = vrot.slane %v11506_v58, 4  ;;  %v5448_v48 = vld [vmem:[#allocation2 + $0x1c0] sm:$0xff] }
 0x8aa   :  { %v11517_v22 = vsel %vm616_vm8, %v5618_v45, %v5617_v37  ;;  %v11526_v14 = vsel %vm63_vm1, %v11171_v40, %v12691_v20  ;;  %6511 = vmatprep.mubr.msk.f32.mxu1 %vm64_vm0, %v12693_v42  ;;  %v5602_v4 = vrot.slane %v11510_v44, 3  ;;  %v5604_v13 = vrot.slane %v11514_v16, 2  ;;  %v12699_v45 = vld [vmem:[#allocation45_spill] sm:$0xff] }
 0x8ab   :  { %v5593_v61 = vsel %vm598_vm2, %v11526_v14, %v12070_v31  ;;  %v5450_v20 = vld [vmem:[#allocation2 + $0x1d0] sm:$0xff] }
 0x8ac   :  { %v5595_v35 = vsel %vm601_vm3, %v5594_v52, %v5593_v61  ;;  %v5451_v52 = vld [vmem:[#allocation2 + $0x1d8] sm:$0xff] }
 0x8ad   :  { %v5597_v40 = vsel %vm604_vm4, %v5596_v46, %v5595_v35  ;;  %6512 = vmatmul.mubr.msk.f32.gmra.mrb[54].mxu1 %vm64_vm0, %v12694_v29  ;;  %v5452_v29 = vld [vmem:[#allocation2 + $0x1e0] sm:$0xff] }
 0x8ae   :  { %v5599_v27 = vsel %vm607_vm5, %v5598_v15, %v5597_v40  ;;  %6514 = vmatprep.mubr.msk.f32.mxu1 %vm64_vm0, %v12695_v6 }
 0x8af   :  { %v5601_v5 = vsel %vm610_vm6, %v5600_v18, %v5599_v27  ;;  %v5453_v27 = vld [vmem:[#allocation2 + $0x1e8] sm:$0xff] }
 0x8b0   :  { %v5603_v32 = vsel %vm613_vm7, %v5602_v4, %v5601_v5 }
 0x8b1   :  { %v11551_v59 = vsel %vm616_vm8, %v5604_v13, %v5603_v32  ;;  %6515 = vmatmul.mubr.msk.f32.gmra.mrb[56].mxu1 %vm64_vm0, %v12696_v1  ;;  %v5461_v1 = vld [vmem:[#allocation5 + $0x8] sm:$0xff] }
 0x8b2   :  { %6517 = vmatprep.mubr.msk.f32.mxu1 %vm64_vm0, %v12697_v41 }
 0x8b5   :  { %6518 = vmatmul.mubr.msk.f32.gmra.mrb[58].mxu1 %vm64_vm0, %v12698_v12  ;;  %v5460_v12 = vld [vmem:[#allocation5] sm:$0xff] }
 0x8b6   :  { %6520 = vmatprep.mubr.msk.f32.mxu1 %vm64_vm0, %v12699_v45 }
 0x8b9   :  { %6521 = vmatmul.mubr.msk.f32.gmra.mrb[60].mxu1 %vm64_vm0, %v12700_v34 }
 0x8ba   :  { %6523 = vmatprep.mubr.msk.f32.mxu1 %vm64_vm0, %v12701_v54 }
 0x8bd   :  { %6524 = vmatmul.mubr.msk.f32.gmra.mrb[62].mxu1 %vm64_vm0, %v12702_v36 }
 0x973   :  { %v6504_v30 = vpop.f32.mrb[48].mxu1 }
 0x974   :  { %v5455_v56 = vadd.f32 %v6504_v30, %v5449_v28  ;;  %v5372_v39 = vpop.f32.mrb[49].mxu1 }
 0x975   :  { %v5454_v37 = vadd.f32 %v5448_v48, %v5372_v39 }
 0x976   :  { %v6112_v3 = vmul.f32 -1.442695, %v5455_v56  ;;  %v5463_v56 = vld [vmem:[#allocation5 + $0x18] sm:$0xff] }
 0x977   :  { %v6111_v43 = vmul.f32 -1.442695, %v5454_v37 }
 0x978   :  { %v6507_v61 = vpop.f32.mrb[50].mxu1  ;;  %7036 = vpow2.f32 %v6112_v3 }
 0x979   :  { %v5457_v46 = vadd.f32 %v6507_v61, %v5451_v52  ;;  %v5382_v42 = vpop.f32.mrb[51].mxu1  ;;  %7038 = vpow2.f32 %v6111_v43  ;;  %v5462_v52 = vld [vmem:[#allocation5 + $0x10] sm:$0xff] }
 0x97a   :  { %v5456_v35 = vadd.f32 %v5450_v20, %v5382_v42 }
 0x97b   :  { %v6114_v15 = vmul.f32 -1.442695, %v5457_v46 }
 0x97c   :  { %v6113_v40 = vmul.f32 -1.442695, %v5456_v35  ;;  %v6510_v18 = vpop.f32.mrb[52].mxu1 }
 0x97d   :  { %7040 = vpow2.f32 %v6114_v15  ;;  %v5392_v4 = vpop.f32.mrb[53].mxu1  ;;  %v5459_v5 = vadd.f32 %v6510_v18, %v5453_v27 }
 0x97e   :  { %7042 = vpow2.f32 %v6113_v40  ;;  %v5458_v6 = vadd.f32 %v5452_v29, %v5392_v4  ;;  %v5465_v4 = vld [vmem:[#allocation5 + $0x28] sm:$0xff] }
 0x97f   :  { %7044 = vtanh.f32 %v5459_v5 }
 0x980   :  { %v6513_v13 = vpop.f32.mrb[54].mxu1  ;;  %7046 = vtanh.f32 %v5458_v6 }
 0x981   :  { %v5402_v32 = vpop.f32.mrb[55].mxu1  ;;  %v12703_v13 = vld [vmem:[#allocation27_spill] sm:$0xff] }
 0x982   :  { %v7037_v41 = vpop.eup %7036 }
 0x983   :  { %v7039_v45 = vpop.eup %7038  ;;  %v5479_v34 = vadd.f32 1.0, %v7037_v41  ;;  %v5663_v41 = vrot.slane %v11258_v21, 7 }
 0x984   :  { %v6516_v54 = vpop.f32.mrb[56].mxu1  ;;  %v5478_v36 = vadd.f32 1.0, %v7039_v45  ;;  %v5665_v45 = vrot.slane %v11274_v9, 7 }
 0x985   :  { %v5467_v28 = vadd.f32 %v6516_v54, %v5461_v1  ;;  %v5410_v48 = vpop.f32.mrb[57].mxu1  ;;  %7048 = vrcp.f32 %v5479_v34  ;;  %v5662_v1 = vrot.slane %v11165_v55, 7  ;;  %v5666_v54 = vrot.slane %v11383_v57, 7 }
 0x986   :  { %v5466_v30 = vadd.f32 %v5460_v12, %v5410_v48  ;;  %7050 = vrcp.f32 %v5478_v36  ;;  %v5664_v12 = vrot.slane %v11266_v62, 7 }
 0x987   :  { %v7041_v39 = vpop.eup %7040  ;;  %v6116_v37 = vmul.f32 -1.442695, %v5467_v28  ;;  %v12709_v28 = vld [vmem:[#allocation15_spill] sm:$0xff] }
 0x988   :  { %v7043_v3 = vpop.eup %7042  ;;  %v5491_v20 = vadd.f32 1.0, %v7041_v39  ;;  %v6115_v43 = vmul.f32 -1.442695, %v5466_v30  ;;  %v6519_v61 = vpop.f32.mrb[58].mxu1  ;;  %v5464_v30 = vld [vmem:[#allocation5 + $0x20] sm:$0xff] }
 0x989   :  { %v5490_v46 = vadd.f32 1.0, %v7043_v3  ;;  %7052 = vpow2.f32 %v6116_v37  ;;  %v5469_v42 = vadd.f32 %v6519_v61, %v5463_v56  ;;  %v5420_v35 = vpop.f32.mrb[59].mxu1  ;;  %v7045_v5 = vpop.eup %7044  ;;  %v5660_v3 = vrot.slane %v11150_v11, 7 }
 0x98a   :  { %7054 = vrcp.f32 %v5491_v20  ;;  %v5468_v15 = vadd.f32 %v5462_v52, %v5420_v35  ;;  %v7047_v32 = vpop.eup %7046  ;;  %v5661_v20 = vrot.slane %v11157_v51, 7 }
 0x98b   :  { %7056 = vrcp.f32 %v5490_v46  ;;  %v6118_v40 = vmul.f32 -1.442695, %v5469_v42  ;;  %v12705_v42 = vld [vmem:[#allocation51_spill] sm:$0xff] }
 0x98c   :  { %7058 = vpow2.f32 %v6115_v43  ;;  %v6117_v18 = vmul.f32 -1.442695, %v5468_v15  ;;  %v6522_v27 = vpop.f32.mrb[60].mxu1  ;;  %v12704_v43 = vld [vmem:[#allocation24_spill] sm:$0xff]  ;;  %v12710_v9 = vrot.slane %v12705_v42, 7  ;;  %v12714_v42 = vrot.slane %v11122_v7, 7 }
 0x98d   :  { %7060 = vpow2.f32 %v6118_v40  ;;  %v5430_v29 = vpop.f32.mrb[61].mxu1  ;;  %v5471_v48 = vadd.f32 %v6522_v27, %v5465_v4  ;;  %v5667_v61 = vrot.slane %v12704_v43, 7  ;;  %v12706_v15 = vld [vmem:[#allocation60_spill] sm:$0xff]  ;;  %v12708_v4 = vld [vmem:[#allocation14_spill] sm:$0xff]  ;;  %v12713_v43 = vrot.slane %v12703_v13, 7 }
 0x98e   :  { %7062 = vpow2.f32 %v6117_v18  ;;  %v12707_v18 = vld [vmem:[#allocation25_spill] sm:$0xff]  ;;  %v5470_v27 = vadd.f32 %v5464_v30, %v5430_v29 }
 0x98f   :  { %v7049_v34 = vpop.eup %7048  ;;  %7064 = vtanh.f32 %v5471_v48 }
 0x990   :  { %v6525_v56 = vpop.f32.mrb[62].mxu1  ;;  %v7051_v39 = vpop.eup %7050  ;;  %v5547_v37 = vmul.f32 %v7049_v34, %v7045_v5  ;;  %v5672_v5 = vrot.slane %v12709_v28, 7 }
 0x991   :  { %v5440_v52 = vpop.f32.mrb[63].mxu1  ;;  %v5546_v46 = vmul.f32 %v7051_v39, %v7047_v32  ;;  %v5671_v56 = vrot.slane %v12708_v4, 7 }
 0x993   :  { %v7053_v49 = vpop.eup %7052 }
 0x994   :  { %v7055_v11 = vpop.eup %7054  ;;  %v5557_v52 = vadd.f32 1.0, %v7053_v49 }
 0x995   :  { %v7057_v39 = vpop.eup %7056  ;;  %v5545_v31 = vmul.f32 %v7055_v11, %v11248_v0 }
 0x996   :  { %v7059_v4 = vpop.eup %7058  ;;  %v5544_v28 = vmul.f32 %v7057_v39, %v11394_v23  ;;  %7066 = vrcp.f32 %v5557_v52 }
 0x997   :  { %v7061_v51 = vpop.eup %7060  ;;  %v5549_v34 = vadd.f32 %v5547_v37, %v5545_v31  ;;  %v5556_v32 = vadd.f32 1.0, %v7059_v4  ;;  %7068 = vtanh.f32 %v5470_v27 }
 0x998   :  { %v7063_v11 = vpop.eup %7062  ;;  %v5548_v6 = vadd.f32 %v5546_v46, %v5544_v28  ;;  %v5569_v36 = vadd.f32 1.0, %v7061_v51 }
 0x999   :  { %7070 = vrcp.f32 %v5556_v32  ;;  %v5568_v23 = vadd.f32 1.0, %v7063_v11  ;;  %v5637_v52 = vrot.slane %v5549_v34, 1  ;;  %v5638_v39 = vrot.slane %v5549_v34, 2 }
 0x99a   :  { %7072 = vrcp.f32 %v5569_v36  ;;  %v5630_v49 = vrot.slane %v5548_v6, 1  ;;  %v5631_v48 = vrot.slane %v5548_v6, 2  ;;  %v5632_v40 = vrot.slane %v5548_v6, 3  ;;  %v7065_v36 = vpop.eup %7064 }
 0x99b   :  { %7074 = vrcp.f32 %v5568_v23  ;;  %v5633_v31 = vrot.slane %v5548_v6, 4  ;;  %v5634_v37 = vrot.slane %v5548_v6, 5  ;;  %v5635_v27 = vrot.slane %v5548_v6, 6 }
 0x99c   :  { %v5636_v4 = vrot.slane %v5548_v6, 7  ;;  %v5639_v0 = vrot.slane %v5549_v34, 3  ;;  %v5640_v46 = vrot.slane %v5549_v34, 4  ;;  %v5641_v51 = vrot.slane %v5549_v34, 5 }
 0x99d   :  { %v5642_v28 = vrot.slane %v5549_v34, 6  ;;  %v5643_v29 = vrot.slane %v5549_v34, 7  ;;  %v5690_v32 = vsel %vm63_vm1, %v5630_v49, %v5660_v3  ;;  %v5691_v11 = vsel %vm63_vm1, %v5631_v48, %v5661_v20 }
 0x99e   :  { %v5692_v23 = vsel %vm63_vm1, %v5632_v40, %v5662_v1  ;;  %v5693_v30 = vsel %vm63_vm1, %v5633_v31, %v5663_v41  ;;  %v5694_v35 = vsel %vm63_vm1, %v5634_v37, %v5664_v12  ;;  %v5695_v3 = vsel %vm63_vm1, %v5635_v27, %v5665_v45  ;;  %5830 = vst [vmem:[#allocation7 - $0x7] sm:$0x80] %v5690_v32 }
 0x99f   :  { %v5696_v55 = vsel %vm63_vm1, %v5636_v4, %v5666_v54  ;;  %v11624_v21 = vsel %vm63_vm1, %v5548_v6, %v5526_v33  ;;  %v11630_v62 = vsel %vm63_vm1, %v5637_v52, %v5667_v61  ;;  %v5699_v57 = vsel %vm63_vm1, %v5638_v39, %v12710_v9 }
 0x9a0   :  { %v7067_v1 = vpop.eup %7066  ;;  %v12711_v41 = vrot.slane %v12706_v15, 7  ;;  %v12712_v33 = vrot.slane %v12707_v18, 7  ;;  %v5702_v12 = vsel %vm63_vm1, %v5641_v51, %v5671_v56  ;;  %v5703_v45 = vsel %vm63_vm1, %v5642_v28, %v5672_v5 }
 0x9a1   :  { %v7069_v54 = vpop.eup %7068  ;;  %v5625_v20 = vmul.f32 %v7067_v1, %v7065_v36  ;;  %v11652_v61 = vsel %vm63_vm1, %v5643_v29, %v12713_v43  ;;  %v11658_v15 = vsel %vm63_vm1, %v5549_v34, %v12714_v42  ;;  %v5800_v40 = vrot.slane %v5691_v11, 7 }
 0x9a2   :  { %v5700_v63 = vsel %vm63_vm1, %v5639_v0, %v12711_v41  ;;  %v5701_v6 = vsel %vm63_vm1, %v5640_v46, %v12712_v33  ;;  %v5751_v18 = vrot.slane %v11443_v26, 1  ;;  %v5801_v56 = vrot.slane %v5692_v23, 6 }
 0x9a3   :  { %v5803_v49 = vrot.slane %v5693_v30, 5  ;;  %v5805_v5 = vrot.slane %v5694_v35, 4  ;;  %v7071_v48 = vpop.eup %7070  ;;  %v5807_v0 = vrot.slane %v5695_v3, 3  ;;  %v5809_v52 = vrot.slane %v5696_v55, 2 }
 0x9a4   :  { %v5814_v13 = vrot.slane %v5699_v57, 7  ;;  %v5815_v39 = vrot.slane %v5700_v63, 6  ;;  %v7073_v31 = vpop.eup %7072  ;;  %v5624_v29 = vmul.f32 %v7071_v48, %v7069_v54  ;;  %v5802_v37 = vsel %vm598_vm2, %v5801_v56, %v5800_v40 }
 0x9a5   :  { %v5811_v7 = vrot.slane %v11624_v21, 1  ;;  %v5817_v27 = vrot.slane %v5701_v6, 5  ;;  %v7075_v34 = vpop.eup %7074  ;;  %v5623_v4 = vmul.f32 %v7073_v31, %v11517_v22  ;;  %v5804_v26 = vsel %vm601_vm3, %v5803_v49, %v5802_v37 }
 0x9a6   :  { %v5816_v30 = vsel %vm598_vm2, %v5815_v39, %v5814_v13  ;;  %v5819_v35 = vrot.slane %v5702_v12, 4  ;;  %v5622_v46 = vmul.f32 %v7075_v34, %v11551_v59  ;;  %v5806_v51 = vsel %vm604_vm4, %v5805_v5, %v5804_v26 }
 0x9a7   :  { %v5818_v28 = vsel %vm601_vm3, %v5817_v27, %v5816_v30  ;;  %v5821_v32 = vrot.slane %v5703_v45, 3  ;;  %v5627_v11 = vadd.f32 %v5625_v20, %v5623_v4  ;;  %v5808_v36 = vsel %vm607_vm5, %v5807_v0, %v5806_v51 }
 0x9a8   :  { %v5820_v23 = vsel %vm604_vm4, %v5819_v35, %v5818_v28  ;;  %v5823_v3 = vrot.slane %v11652_v61, 2  ;;  %v5626_v22 = vadd.f32 %v5624_v29, %v5622_v46  ;;  %v5810_v55 = vsel %vm610_vm6, %v5809_v52, %v5808_v36 }
 0x9a9   :  { %v5822_v21 = vsel %vm607_vm5, %v5821_v32, %v5820_v23  ;;  %v5825_v9 = vrot.slane %v11658_v15, 1  ;;  %v5715_v59 = vrot.slane %v5627_v11, 1  ;;  %v5716_v57 = vrot.slane %v5627_v11, 2 }
 0x9aa   :  { %v5717_v1 = vrot.slane %v5627_v11, 3  ;;  %v5718_v41 = vrot.slane %v5627_v11, 4  ;;  %v5708_v63 = vrot.slane %v5626_v22, 1  ;;  %v5709_v33 = vrot.slane %v5626_v22, 2 }
 0x9ab   :  { %v5710_v6 = vrot.slane %v5626_v22, 3  ;;  %v5711_v12 = vrot.slane %v5626_v22, 4  ;;  %v5712_v45 = vrot.slane %v5626_v22, 5  ;;  %v5713_v54 = vrot.slane %v5626_v22, 6 }
 0x9ac   :  { %v5714_v20 = vrot.slane %v5626_v22, 7  ;;  %v5719_v43 = vrot.slane %v5627_v11, 5  ;;  %v5720_v61 = vrot.slane %v5627_v11, 6  ;;  %v5721_v42 = vrot.slane %v5627_v11, 7 }
 0x9ad   :  { %v12715_v40 = vrot.slane %v11482_v25, 1  ;;  %v12716_v15 = vrot.slane %v11526_v14, 1  ;;  %v12717_v5 = vrot.slane %v11491_v17, 1  ;;  %v12718_v0 = vrot.slane %v11495_v8, 1 }
 0x9ae   :  { %v12719_v25 = vrot.slane %v11499_v19, 1  ;;  %v12720_v14 = vrot.slane %v11506_v58, 1  ;;  %v12721_v17 = vrot.slane %v11510_v44, 1  ;;  %v12722_v8 = vrot.slane %v11514_v16, 1 }
 0x9af   :  { %v5768_v56 = vsel %vm63_vm1, %v5626_v22, %v12715_v40  ;;  %v5769_v49 = vsel %vm63_vm1, %v5708_v63, %v12716_v15  ;;  %v5770_v48 = vsel %vm63_vm1, %v5709_v33, %v12717_v5  ;;  %v5771_v52 = vsel %vm63_vm1, %v5710_v6, %v12718_v0 }
 0x9b0   :  { %v5772_v13 = vsel %vm63_vm1, %v5711_v12, %v12719_v25  ;;  %v5773_v39 = vsel %vm63_vm1, %v5712_v45, %v12720_v14  ;;  %v5774_v31 = vsel %vm63_vm1, %v5713_v54, %v12721_v17  ;;  %v5775_v29 = vsel %vm63_vm1, %v5714_v20, %v12722_v8 }
 0x9b1   :  { %v12723_v19 = vrot.slane %v11406_v50, 1  ;;  %v12724_v58 = vrot.slane %v11452_v38, 1  ;;  %v12725_v44 = vrot.slane %v11413_v53, 1  ;;  %v12726_v16 = vrot.slane %v11419_v47, 1 }
 0x9b2   :  { %v12727_v50 = vrot.slane %v11425_v2, 1  ;;  %v12728_v38 = vrot.slane %v11431_v10, 1  ;;  %v12729_v53 = vrot.slane %v11437_v60, 1  ;;  %v5783_v47 = vsel %vm63_vm1, %v5721_v42, %v5751_v18 }
 0x9b3   :  { %v5776_v37 = vsel %vm63_vm1, %v5627_v11, %v12723_v19  ;;  %v5777_v27 = vsel %vm63_vm1, %v5715_v59, %v12724_v58  ;;  %v5778_v34 = vsel %vm63_vm1, %v5716_v57, %v12725_v44  ;;  %v5779_v4 = vsel %vm63_vm1, %v5717_v1, %v12726_v16 }
 0x9b4   :  { %v5780_v26 = vsel %vm63_vm1, %v5718_v41, %v12727_v50  ;;  %v5781_v30 = vsel %vm63_vm1, %v5719_v43, %v12728_v38  ;;  %v5782_v35 = vsel %vm63_vm1, %v5720_v61, %v12729_v53  ;;  %v5812_v46 = vsel %vm613_vm7, %v5811_v7, %v5810_v55 }
 0x9b5   :  { %v5824_v2 = vsel %vm610_vm6, %v5823_v3, %v5822_v21  ;;  %v5813_v51 = vsel %vm616_vm8, %v11630_v62, %v5812_v46  ;;  %v5849_v28 = vrot.slane %v5769_v49, 7  ;;  %v5851_v32 = vrot.slane %v5770_v48, 6 }
 0x9b6   :  { %v5826_v10 = vsel %vm613_vm7, %v5825_v9, %v5824_v2  ;;  %5831 = vst [vmem:[#allocation7 + $0x1] sm:$0xff] %v5813_v51  ;;  %v5853_v11 = vrot.slane %v5771_v52, 5  ;;  %v5863_v36 = vrot.slane %v5777_v27, 7  ;;  %v5865_v23 = vrot.slane %v5778_v34, 6 }
 0x9b7   :  { %5832 = vst [vmem:[#allocation7 + $0x9] sm:$0x7f] %v5826_v10  ;;  %v5850_v60 = vsel %vm598_vm2, %v5849_v28, %v5768_v56  ;;  %v5855_v18 = vrot.slane %v5772_v13, 4  ;;  %v5857_v3 = vrot.slane %v5773_v39, 3  ;;  %v5867_v62 = vrot.slane %v5779_v4, 5 }
 0x9b8   :  { %v5852_v24 = vsel %vm601_vm3, %v5851_v32, %v5850_v60  ;;  %v5864_v22 = vsel %vm598_vm2, %v5863_v36, %v5776_v37  ;;  %v5859_v21 = vrot.slane %v5774_v31, 2  ;;  %v5869_v59 = vrot.slane %v5780_v26, 4 }
 0x9b9   :  { %v5854_v7 = vsel %vm604_vm4, %v5853_v11, %v5852_v24  ;;  %v5866_v9 = vsel %vm601_vm3, %v5865_v23, %v5864_v22  ;;  %v5861_v1 = vrot.slane %v5775_v29, 1  ;;  %v5871_v63 = vrot.slane %v5781_v30, 3 }
 0x9ba   :  { %v5856_v55 = vsel %vm607_vm5, %v5855_v18, %v5854_v7  ;;  %v5868_v41 = vsel %vm604_vm4, %v5867_v62, %v5866_v9  ;;  %v5873_v12 = vrot.slane %v5782_v35, 2  ;;  %v5875_v20 = vrot.slane %v5783_v47, 1 }
 0x9bb   :  { %v5858_v57 = vsel %vm610_vm6, %v5857_v3, %v5856_v55  ;;  %v5870_v6 = vsel %vm607_vm5, %v5869_v59, %v5868_v41 }
 0x9bc   :  { %v5860_v33 = vsel %vm613_vm7, %v5859_v21, %v5858_v57  ;;  %v5872_v54 = vsel %vm610_vm6, %v5871_v63, %v5870_v6 }
 0x9bd   :  { %v5862_v45 = vsel %vm616_vm8, %v5861_v1, %v5860_v33  ;;  %v5874_v43 = vsel %vm613_vm7, %v5873_v12, %v5872_v54 }
 0x9be   :  { %5879 = vst [vmem:[#allocation7 + $0x10] sm:$0xff] %v5862_v45  ;;  %v5876_v61 = vsel %vm616_vm8, %v5875_v20, %v5874_v43 }
 0x9bf   :  { %5880 = vst [vmem:[#allocation7 + $0x18] sm:$0xff] %v5876_v61 }
 0x9c0   :  { %7178 = shalt.err (!%p7175_p6)
}
 0x9c1   :  { %s7179_s0 = scalar_lea.hbm %s11775_s4, 512 }
 0x9c2   :  { %p7180_p7 = scmp.ne.s32.totalorder %s11775_s4, %s7179_s0  ;;  %p7183_p8 = scmp.lt.u32.totalorder %s7179_s0, %s11775_s4 }
 0x9c4   :  { %p7185_p9 = pnand %p7183_p8, %p7180_p7 }
 0x9c6   :  { %7188 = shalt.err (!%p7185_p9)
}
 0x9c7   :  { %5892 = dma.vmem_to_hbm [thread:$0]  %s5887_s9, 512, %s11775_s4, [#allocation4], %s7196_s25, %s7196_s25, %s7197_s26  }
 0x9c8   :  { %7193 = dma.done.wait [#allocation4], 512  }
 0x9c9   :  { %7194 = vsyncadd [#allocation4], 4294966784 }
 0x9ca   :  { %5896 = vsyncpa [#allocation3], 1 }
 0x9cb   :  { %5897 = vsyncpa [#allocation6], 1 }
 0x9cc   :  { %5898 = vsyncpa [#allocation4], 1 }

</bundles_post_ra>
